<compile_context>
chip_gen: v7x
topology: tpu7x:2x2x1
jax: 0.10.0
libtpu: 0.0.40
codegen_flags: <defaults>
</compile_context>

<pallas_src>
import math

import jax
import jax.numpy as jnp
from jax import lax
from jax.experimental import pallas as pl
from jax.experimental.pallas import tpu as pltpu

BN_EPS = 1e-5


# ---------------------------------------------------------------------------
# align_corners=True interpolation tables (trace-time Python constants)
# ---------------------------------------------------------------------------
def interp_cols(n_in, n_out):
    """Source indices + lerp weight per output position (python constants)."""
    cols = []
    for o in range(n_out):
        pos = o * (n_in - 1) / (n_out - 1) if n_out > 1 else 0.0
        lo = min(int(math.floor(pos)), n_in - 1)
        hi = min(lo + 1, n_in - 1)
        cols.append((lo, hi, float(pos - lo)))
    return cols


def interp_matrix(n_in, n_out):
    m = [[0.0] * n_in for _ in range(n_out)]
    for o, (lo, hi, f) in enumerate(interp_cols(n_in, n_out)):
        m[o][lo] += 1.0 - f
        m[o][hi] += f
    return jnp.array(m, dtype=jnp.float32)


# ---------------------------------------------------------------------------
# Fused DecoderBlock kernel
# ---------------------------------------------------------------------------
def _make_decoder_block_kernel(Cin, Csk, Cout, TR, Wo):
    NR1 = TR + 4            # conv1-input rows per tile (+-2 halo)
    NR2 = TR + 2            # conv1-output rows per tile (+-1 halo)
    N1 = NR2 * Wo
    N2 = TR * Wo
    C1 = Cin + Csk
    has_skip = Csk > 0
    cdt = jnp.bfloat16

    def kernel(*refs):
        if has_skip:
            (xw_ref, uh_ref, w1_ref, s1_ref, b1_ref,
             w2_ref, s2_ref, b2_ref, skip_ref, o_ref,
             in1_pad, y1_pad) = refs
        else:
            (xw_ref, uh_ref, w1_ref, s1_ref, b1_ref,
             w2_ref, s2_ref, b2_ref, o_ref,
             in1_pad, y1_pad) = refs
            skip_ref = None

        rt = pl.program_id(1)

        # Zero the 1-pixel width-padding columns every step (the kernel keeps
        # no state across grid steps, so "parallel" sharding is safe).
        in1_pad[:, 0, :] = jnp.zeros((NR1, C1), cdt)
        in1_pad[:, Wo + 1, :] = jnp.zeros((NR1, C1), cdt)
        y1_pad[:, 0, :] = jnp.zeros((NR2, Cout), cdt)
        y1_pad[:, Wo + 1, :] = jnp.zeros((NR2, Cout), cdt)

        # ---- 2x bilinear upsample, height direction: one lane-dense MXU
        # matmul.  uh_ref holds this tile's interpolation rows incl. +-2 halo
        # rows (zero rows outside the image == conv1 zero padding).  The width
        # direction was already interpolated in the wrapper, so xw_ref is
        # (H, Wo*Cin). ----
        up = jnp.dot(uh_ref[0], xw_ref[0],
                     preferred_element_type=jnp.float32)      # (NR1, Wo*Cin)
        up = up.astype(cdt)

        # Scatter the lane-dense upsample result into the channels-last padded
        # conv1 input (static per-column stores; no gathers, no reshuffles).
        for xo in range(Wo):
            in1_pad[:, 1 + xo, 0:Cin] = up[:, xo * Cin:(xo + 1) * Cin]

        # ---- skip connection: channel-concat directly in VMEM (no HBM concat,
        # conv1 runs as a single K = Cin+Csk matmul per tap). ----
        if has_skip:
            in1_pad[:, 1:1 + Wo, Cin:C1] = skip_ref[0]

        # ---- conv1 (3x3, pad=1) + folded BN + ReLU: 9 shifted MXU matmuls,
        # f32 accumulation kept in vregs (compiler-managed). ----
        acc1 = None
        for dy in range(3):
            for dx in range(3):
                slab = in1_pad[dy:dy + NR2, dx:dx + Wo, :].reshape(N1, C1)
                p = jnp.dot(slab, w1_ref[dy, dx],
                            preferred_element_type=jnp.float32)
                acc1 = p if acc1 is None else acc1 + p
        y1 = jnp.maximum(acc1 * s1_ref[...] + b1_ref[...], 0.0)
        y1_pad[:, 1:1 + Wo, :] = y1.reshape(NR2, Wo, Cout).astype(cdt)

        # conv2's zero padding at the image top/bottom: the +-1 halo rows of
        # y1 that fall outside the image must be exact zeros.
        @pl.when(rt == 0)
        def _():
            y1_pad[0, :, :] = jnp.zeros((Wo + 2, Cout), cdt)

        @pl.when(rt == pl.num_programs(1) - 1)
        def _():
            y1_pad[NR2 - 1, :, :] = jnp.zeros((Wo + 2, Cout), cdt)

        # ---- conv2 (3x3, pad=1) + folded BN + ReLU ----
        acc2 = None
        for dy in range(3):
            for dx in range(3):
                slab = y1_pad[dy:dy + TR, dx:dx + Wo, :].reshape(N2, Cout)
                p = jnp.dot(slab, w2_ref[dy, dx],
                            preferred_element_type=jnp.float32)
                acc2 = p if acc2 is None else acc2 + p
        y2 = jnp.maximum(acc2 * s2_ref[...] + b2_ref[...], 0.0)
        o_ref[0] = y2.reshape(TR, Wo, Cout).astype(o_ref.dtype)

    return kernel


# ---------------------------------------------------------------------------
# Parameters / BN folding
# ---------------------------------------------------------------------------
def fold_bn(bn):
    scale = bn["gamma"] / jnp.sqrt(bn["var"] + BN_EPS)
    return scale, bn["beta"] - bn["mean"] * scale


def _init_bn(key, c):
    kg, kb, km, kv = jax.random.split(key, 4)
    return dict(gamma=1.0 + 0.1 * jax.random.normal(kg, (c,), jnp.float32),
                beta=0.1 * jax.random.normal(kb, (c,), jnp.float32),
                mean=0.1 * jax.random.normal(km, (c,), jnp.float32),
                var=jnp.abs(jax.random.normal(kv, (c,), jnp.float32)) + 1.0)


def init_decoder_block(key, in_channels, out_channels, skip_channels=0):
    c1 = in_channels + skip_channels
    k1, k2, k3, k4 = jax.random.split(key, 4)
    return dict(
        w1=jax.random.normal(k1, (3, 3, c1, out_channels), jnp.float32)
        * (1.0 / math.sqrt(9 * c1)),
        bn1=_init_bn(k3, out_channels),
        w2=jax.random.normal(k2, (3, 3, out_channels, out_channels), jnp.float32)
        * (1.0 / math.sqrt(9 * out_channels)),
        bn2=_init_bn(k4, out_channels),
    )


# ---------------------------------------------------------------------------
# Wrapper (NCHW in / NCHW out, like the PyTorch module)
# ---------------------------------------------------------------------------
def decoder_block_forward(params, x_nchw, skip_nchw=None, *, row_tile=None):
    B, Cin, H, W = x_nchw.shape
    Ho, Wo = 2 * H, 2 * W
    Cout = params["w2"].shape[-1]
    Csk = 0 if skip_nchw is None else skip_nchw.shape[1]
    C1 = Cin + Csk
    assert params["w1"].shape[2] == C1
    if Csk > 0:
        assert skip_nchw.shape[2] == Ho and skip_nchw.shape[3] == Wo

    if row_tile is None:
        row_tile = Ho                  # single tile; pick ~64-128 rows at scale
    TR = row_tile
    assert Ho % TR == 0, "row_tile must divide the upsampled height"
    assert TR % 8 == 0 or TR == Ho, "row_tile should be sublane (8) aligned"
    n_rt = Ho // TR
    NR1, NR2 = TR + 4, TR + 2
    cdt = jnp.bfloat16

    # Height-interp matrix with +-2 zero halo rows, pre-tiled per row tile so
    # the kernel never needs overlapping block reads for the conv halos.
    uh_ext = jnp.pad(interp_matrix(H, Ho), ((2, 2), (0, 0)))       # (Ho+4, H)
    uh_tiled = jnp.stack([uh_ext[r * TR: r * TR + NR1]
                          for r in range(n_rt)]).astype(cdt)       # (n_rt, NR1, H)

    # Width-direction lerp hoisted onto the (small) pre-upsample grid: done once
    # per call instead of once per row tile, and keeps all in-kernel upsample
    # work on the MXU.  The full-resolution upsample result never touches HBM.
    uw = interp_matrix(W, Wo)                                       # (Wo, W)
    x_nhwc = jnp.transpose(x_nchw, (0, 2, 3, 1))
    xw = jnp.einsum("qw,bhwc->bhqc", uw, x_nhwc,
                    precision=lax.Precision.HIGHEST)                # (B,H,Wo,Cin)
    xw_flat = xw.astype(cdt).reshape(B, H, Wo * Cin)

    s1, b1 = fold_bn(params["bn1"])
    s2, b2 = fold_bn(params["bn2"])
    s1 = s1.reshape(1, Cout).astype(jnp.float32)
    b1 = b1.reshape(1, Cout).astype(jnp.float32)
    s2 = s2.reshape(1, Cout).astype(jnp.float32)
    b2 = b2.reshape(1, Cout).astype(jnp.float32)

    w1 = params["w1"].astype(cdt)                  # (3, 3, Cin+Csk, Cout) HWIO
    w2 = params["w2"].astype(cdt)

    inputs = [xw_flat, uh_tiled, w1, s1, b1, w2, s2, b2]
    in_specs = [
        pl.BlockSpec((1, H, Wo * Cin), lambda b, r: (b, 0, 0)),
        pl.BlockSpec((1, NR1, H), lambda b, r: (r, 0, 0)),
        pl.BlockSpec((3, 3, C1, Cout), lambda b, r: (0, 0, 0, 0)),
        pl.BlockSpec((1, Cout), lambda b, r: (0, 0)),
        pl.BlockSpec((1, Cout), lambda b, r: (0, 0)),
        pl.BlockSpec((3, 3, Cout, Cout), lambda b, r: (0, 0, 0, 0)),
        pl.BlockSpec((1, Cout), lambda b, r: (0, 0)),
        pl.BlockSpec((1, Cout), lambda b, r: (0, 0)),
    ]
    if Csk > 0:
        # Pre-tile the skip (halo rows duplicated, 2 zero rows top/bottom) so
        # each grid step DMAs only its own (NR1, Wo, Csk) tile.
        skip_nhwc = jnp.transpose(skip_nchw, (0, 2, 3, 1)).astype(cdt)
        skip_padded = jnp.pad(skip_nhwc, ((0, 0), (2, 2), (0, 0), (0, 0)))
        skip_tiled = jnp.stack([skip_padded[:, r * TR: r * TR + NR1]
                                for r in range(n_rt)], axis=1)
        skip_tiled = skip_tiled.reshape(B * n_rt, NR1, Wo, Csk)
        inputs.append(skip_tiled)
        in_specs.append(pl.BlockSpec((1, NR1, Wo, Csk),
                                     lambda b, r: (b * n_rt + r, 0, 0, 0)))

    scratch = [
        pltpu.VMEM((NR1, Wo + 2, C1), cdt),       # conv1 input (upsampled x ++ skip)
        pltpu.VMEM((NR2, Wo + 2, Cout), cdt),     # conv1 output (padded)
    ]

    kernel = _make_decoder_block_kernel(Cin, Csk, Cout, TR, Wo)
    out_nhwc = pl.pallas_call(
        kernel,
        out_shape=jax.ShapeDtypeStruct((B, Ho, Wo, Cout), jnp.float32),
        grid_spec=pltpu.PrefetchScalarGridSpec(
            num_scalar_prefetch=0,
            grid=(B, n_rt),
            in_specs=in_specs,
            out_specs=pl.BlockSpec((1, TR, Wo, Cout), lambda b, r: (b, r, 0, 0)),
            scratch_shapes=scratch,
        ),
        compiler_params=pltpu.CompilerParams(
            dimension_semantics=("parallel", "parallel"),
            vmem_limit_bytes=32 * 1024 * 1024),
    )(*inputs)
    return jnp.transpose(out_nhwc, (0, 3, 1, 2))      # NCHW, like PyTorch


# ---------------------------------------------------------------------------
# Pure-JAX references for verification
# ---------------------------------------------------------------------------
def _bf(a):
    return a.astype(jnp.bfloat16).astype(jnp.float32)


def _conv3x3_ref(x, w):
    return lax.conv_general_dilated(
        x, w, window_strides=(1, 1), padding="SAME",
        dimension_numbers=("NHWC", "HWIO", "NHWC"),
        preferred_element_type=jnp.float32,
        precision=lax.Precision.HIGHEST)


def ref_upsample2x_matmul(x_nhwc):
    B, H, W, C = x_nhwc.shape
    uh = interp_matrix(H, 2 * H)
    uw = interp_matrix(W, 2 * W)
    t = jnp.einsum("ph,bhwc->bpwc", uh, x_nhwc, precision=lax.Precision.HIGHEST)
    return jnp.einsum("qw,bpwc->bpqc", uw, t, precision=lax.Precision.HIGHEST)


def ref_upsample2x_gather(x):
    """Independent align_corners=True implementation (gather + lerp)."""
    B, H, W, C = x.shape
    Ho, Wo = 2 * H, 2 * W

    def coords(n_in, n_out):
        pos = jnp.arange(n_out, dtype=jnp.float32) * (n_in - 1) / (n_out - 1)
        lo = jnp.floor(pos).astype(jnp.int32)
        hi = jnp.minimum(lo + 1, n_in - 1)
        return lo, hi, pos - lo.astype(jnp.float32)

    ylo, yhi, yf = coords(H, Ho)
    xlo, xhi, xf = coords(W, Wo)
    row = (x[:, :, xlo, :] * (1.0 - xf)[None, None, :, None]
           + x[:, :, xhi, :] * xf[None, None, :, None])
    return (row[:, ylo] * (1.0 - yf)[None, :, None, None]
            + row[:, yhi] * yf[None, :, None, None])


def ref_decoder_block(params, x_nchw, skip_nchw=None):
    """Mirrors the kernel's compute order/dtypes (width lerp f32 -> bf16,
    height interp with bf16 matrix, bf16 convs with f32 accumulation)."""
    B, Cin, H, W = x_nchw.shape
    Ho, Wo = 2 * H, 2 * W
    x = jnp.transpose(x_nchw, (0, 2, 3, 1))
    uw = interp_matrix(W, Wo)
    uh = _bf(interp_matrix(H, Ho))
    xw = _bf(jnp.einsum("qw,bhwc->bhqc", uw, x, precision=lax.Precision.HIGHEST))
    up = _bf(jnp.einsum("ph,bhqc->bpqc", uh, xw, precision=lax.Precision.HIGHEST))
    z = up
    if skip_nchw is not None:
        z = jnp.concatenate([z, _bf(jnp.transpose(skip_nchw, (0, 2, 3, 1)))],
                            axis=-1)
    s1, b1 = fold_bn(params["bn1"])
    s2, b2 = fold_bn(params["bn2"])
    y1 = jnp.maximum(_conv3x3_ref(z, _bf(params["w1"])) * s1 + b1, 0.0)
    y2 = jnp.maximum(_conv3x3_ref(_bf(y1), _bf(params["w2"])) * s2 + b2, 0.0)
    return jnp.transpose(y2, (0, 3, 1, 2))


# ---------------------------------------------------------------------------
if __name__ == "__main__":
    key = jax.random.PRNGKey(0)
    k0, k1, k2, k3, k4, k5 = jax.random.split(key, 6)

    # Sanity: matmul-based upsample == independent align_corners gather upsample.
    xs = jax.random.normal(k0, (1, 5, 4, 3), jnp.float32)
    du = ref_upsample2x_matmul(xs) - ref_upsample2x_gather(xs)
    assert float(jnp.max(jnp.abs(du))) < 1e-5

    # Case 1: no skip.  x (2, 64, 8, 8) -> (2, 32, 16, 16); two row tiles so the
    # halo / tile-seam logic is exercised.
    params1 = init_decoder_block(k1, 64, 32)
    x1 = jax.random.normal(k2, (2, 64, 8, 8), jnp.float32)
    out1 = jax.block_until_ready(decoder_block_forward(params1, x1, row_tile=8))
    assert out1.shape == (2, 32, 16, 16), out1.shape
    ref1 = jax.block_until_ready(ref_decoder_block(params1, x1))
    err1 = float(jnp.max(jnp.abs(out1 - ref1)))
    assert jnp.allclose(out1, ref1, rtol=2e-2, atol=2e-2), err1

    # Case 2: with a skip connection (in-VMEM channel concat).  x (2, 32, 8, 8)
    # + skip (2, 16, 16, 16) -> (2, 16, 16, 16); two sublane-aligned row tiles.
    params2 = init_decoder_block(k3, 32, 16, skip_channels=16)
    x2 = jax.random.normal(k4, (2, 32, 8, 8), jnp.float32)
    skip2 = jax.random.normal(k5, (2, 16, 16, 16), jnp.float32)
    out2 = jax.block_until_ready(
        decoder_block_forward(params2, x2, skip2, row_tile=8))
    assert out2.shape == (2, 16, 16, 16), out2.shape
    ref2 = jax.block_until_ready(ref_decoder_block(params2, x2, skip2))
    err2 = float(jnp.max(jnp.abs(out2 - ref2)))
    assert jnp.allclose(out2, ref2, rtol=2e-2, atol=2e-2), err2

    print("KERNEL_OK")
</pallas_src>

<mosaic_0001>
module attributes {stable_mosaic.version = 11 : i64} {
  func.func @kernel(%arg0: i32, %arg1: i32, %arg2: memref<1x8x1024xbf16, #tpu.memory_space<vmem>>, %arg3: memref<1x12x8xbf16, #tpu.memory_space<vmem>>, %arg4: memref<3x3x64x32xbf16, #tpu.memory_space<vmem>>, %arg5: memref<1x32xf32, #tpu.memory_space<vmem>>, %arg6: memref<1x32xf32, #tpu.memory_space<vmem>>, %arg7: memref<3x3x32x32xbf16, #tpu.memory_space<vmem>>, %arg8: memref<1x32xf32, #tpu.memory_space<vmem>>, %arg9: memref<1x32xf32, #tpu.memory_space<vmem>>, %arg10: memref<1x8x16x32xf32, #tpu.memory_space<vmem>>, %arg11: memref<12x18x64xbf16, #tpu.memory_space<vmem>>, %arg12: memref<10x18x32xbf16, #tpu.memory_space<vmem>>) attributes {dimension_semantics = [#tpu.dimension_semantics<parallel>, #tpu.dimension_semantics<parallel>], iteration_bounds = array<i64: 2, 2>, scalar_prefetch = 0 : i64, scratch_operands = 2 : i64, tpu.core_type = #tpu.core_type<tc>, window_params = [{transform_indices = @transform_0, window_bounds = array<i64: 1, 8, 1024>}, {transform_indices = @transform_1, window_bounds = array<i64: 1, 12, 8>}, {pipeline_mode = #tpu.pipeline_mode<synchronous>, transform_indices = @transform_2, window_bounds = array<i64: 3, 3, 64, 32>}, {pipeline_mode = #tpu.pipeline_mode<synchronous>, transform_indices = @transform_3, window_bounds = array<i64: 1, 32>}, {pipeline_mode = #tpu.pipeline_mode<synchronous>, transform_indices = @transform_4, window_bounds = array<i64: 1, 32>}, {pipeline_mode = #tpu.pipeline_mode<synchronous>, transform_indices = @transform_5, window_bounds = array<i64: 3, 3, 32, 32>}, {pipeline_mode = #tpu.pipeline_mode<synchronous>, transform_indices = @transform_6, window_bounds = array<i64: 1, 32>}, {pipeline_mode = #tpu.pipeline_mode<synchronous>, transform_indices = @transform_7, window_bounds = array<i64: 1, 32>}, {transform_indices = @transform_8, window_bounds = array<i64: 1, 8, 16, 32>}]} {
    %cst = arith.constant 0.000000e+00 : bf16
    %0 = vector.broadcast %cst : bf16 to vector<12x64xbf16>
    %c0 = arith.constant 0 : index
    %c0_0 = arith.constant 0 : index
    %c0_1 = arith.constant 0 : index
    %1 = vector.load %arg11[%c0, %c0_0, %c0_1] : memref<12x18x64xbf16, #tpu.memory_space<vmem>>, vector<12x1x64xbf16>
    %2 = vector.shape_cast %1 : vector<12x1x64xbf16> to vector<12x64xbf16>
    %3 = vector.shape_cast %0 : vector<12x64xbf16> to vector<12x1x64xbf16>
    tpu.vector_store %arg11[%c0, %c0_0, %c0_1], %3 {strides = array<i32>} : memref<12x18x64xbf16, #tpu.memory_space<vmem>>, vector<12x1x64xbf16>,
    %cst_2 = arith.constant 0.000000e+00 : bf16
    %4 = vector.broadcast %cst_2 : bf16 to vector<12x64xbf16>
    %c0_3 = arith.constant 0 : index
    %c17 = arith.constant 17 : index
    %c0_4 = arith.constant 0 : index
    %5 = vector.load %arg11[%c0_3, %c17, %c0_4] : memref<12x18x64xbf16, #tpu.memory_space<vmem>>, vector<12x1x64xbf16>
    %6 = vector.shape_cast %5 : vector<12x1x64xbf16> to vector<12x64xbf16>
    %7 = vector.shape_cast %4 : vector<12x64xbf16> to vector<12x1x64xbf16>
    tpu.vector_store %arg11[%c0_3, %c17, %c0_4], %7 {strides = array<i32>} : memref<12x18x64xbf16, #tpu.memory_space<vmem>>, vector<12x1x64xbf16>,
    %cst_5 = arith.constant 0.000000e+00 : bf16
    %8 = vector.broadcast %cst_5 : bf16 to vector<10x32xbf16>
    %c0_6 = arith.constant 0 : index
    %c0_7 = arith.constant 0 : index
    %c0_8 = arith.constant 0 : index
    %9 = vector.load %arg12[%c0_6, %c0_7, %c0_8] : memref<10x18x32xbf16, #tpu.memory_space<vmem>>, vector<10x1x32xbf16>
    %10 = vector.shape_cast %9 : vector<10x1x32xbf16> to vector<10x32xbf16>
    %11 = vector.shape_cast %8 : vector<10x32xbf16> to vector<10x1x32xbf16>
    tpu.vector_store %arg12[%c0_6, %c0_7, %c0_8], %11 {strides = array<i32>} : memref<10x18x32xbf16, #tpu.memory_space<vmem>>, vector<10x1x32xbf16>,
    %cst_9 = arith.constant 0.000000e+00 : bf16
    %12 = vector.broadcast %cst_9 : bf16 to vector<10x32xbf16>
    %c0_10 = arith.constant 0 : index
    %c17_11 = arith.constant 17 : index
    %c0_12 = arith.constant 0 : index
    %13 = vector.load %arg12[%c0_10, %c17_11, %c0_12] : memref<10x18x32xbf16, #tpu.memory_space<vmem>>, vector<10x1x32xbf16>
    %14 = vector.shape_cast %13 : vector<10x1x32xbf16> to vector<10x32xbf16>
    %15 = vector.shape_cast %12 : vector<10x32xbf16> to vector<10x1x32xbf16>
    tpu.vector_store %arg12[%c0_10, %c17_11, %c0_12], %15 {strides = array<i32>} : memref<10x18x32xbf16, #tpu.memory_space<vmem>>, vector<10x1x32xbf16>,
    %c0_13 = arith.constant 0 : index
    %c0_14 = arith.constant 0 : index
    %c0_15 = arith.constant 0 : index
    %16 = vector.load %arg3[%c0_13, %c0_14, %c0_15] : memref<1x12x8xbf16, #tpu.memory_space<vmem>>, vector<1x12x8xbf16>
    %17 = vector.shape_cast %16 : vector<1x12x8xbf16> to vector<12x8xbf16>
    %c0_16 = arith.constant 0 : index
    %c0_17 = arith.constant 0 : index
    %c0_18 = arith.constant 0 : index
    %18 = vector.load %arg2[%c0_16, %c0_17, %c0_18] : memref<1x8x1024xbf16, #tpu.memory_space<vmem>>, vector<1x8x1024xbf16>
    %19 = vector.shape_cast %18 : vector<1x8x1024xbf16> to vector<8x1024xbf16>
    %cst_19 = arith.constant dense<0.000000e+00> : vector<12x1024xf32>
    %20 = tpu.matmul %17, %19, %cst_19 {dimension_numbers = #tpu.dot_dimension_numbers<[1], [0], [0], [1], [0, 0, 1, 1], [], []>} : vector<12x8xbf16>, vector<8x1024xbf16>, vector<12x1024xf32> -> vector<12x1024xf32>
    %21 = arith.truncf %20 : vector<12x1024xf32> to vector<12x1024xbf16>
    %22 = vector.extract_strided_slice %21 {offsets = [0, 0], sizes = [12, 64], strides = [1, 1]} : vector<12x1024xbf16> to vector<12x64xbf16>
    %c0_20 = arith.constant 0 : index
    %c1 = arith.constant 1 : index
    %c0_21 = arith.constant 0 : index
    %23 = vector.load %arg11[%c0_20, %c1, %c0_21] : memref<12x18x64xbf16, #tpu.memory_space<vmem>>, vector<12x1x64xbf16>
    %24 = vector.shape_cast %23 : vector<12x1x64xbf16> to vector<12x64xbf16>
    %25 = vector.shape_cast %22 : vector<12x64xbf16> to vector<12x1x64xbf16>
    tpu.vector_store %arg11[%c0_20, %c1, %c0_21], %25 {strides = array<i32>} : memref<12x18x64xbf16, #tpu.memory_space<vmem>>, vector<12x1x64xbf16>,
    %26 = vector.extract_strided_slice %21 {offsets = [0, 64], sizes = [12, 64], strides = [1, 1]} : vector<12x1024xbf16> to vector<12x64xbf16>
    %c0_22 = arith.constant 0 : index
    %c2 = arith.constant 2 : index
    %c0_23 = arith.constant 0 : index
    %27 = vector.load %arg11[%c0_22, %c2, %c0_23] : memref<12x18x64xbf16, #tpu.memory_space<vmem>>, vector<12x1x64xbf16>
    %28 = vector.shape_cast %27 : vector<12x1x64xbf16> to vector<12x64xbf16>
    %29 = vector.shape_cast %26 : vector<12x64xbf16> to vector<12x1x64xbf16>
    tpu.vector_store %arg11[%c0_22, %c2, %c0_23], %29 {strides = array<i32>} : memref<12x18x64xbf16, #tpu.memory_space<vmem>>, vector<12x1x64xbf16>,
    %30 = vector.extract_strided_slice %21 {offsets = [0, 128], sizes = [12, 64], strides = [1, 1]} : vector<12x1024xbf16> to vector<12x64xbf16>
    %c0_24 = arith.constant 0 : index
    %c3 = arith.constant 3 : index
    %c0_25 = arith.constant 0 : index
    %31 = vector.load %arg11[%c0_24, %c3, %c0_25] : memref<12x18x64xbf16, #tpu.memory_space<vmem>>, vector<12x1x64xbf16>
    %32 = vector.shape_cast %31 : vector<12x1x64xbf16> to vector<12x64xbf16>
    %33 = vector.shape_cast %30 : vector<12x64xbf16> to vector<12x1x64xbf16>
    tpu.vector_store %arg11[%c0_24, %c3, %c0_25], %33 {strides = array<i32>} : memref<12x18x64xbf16, #tpu.memory_space<vmem>>, vector<12x1x64xbf16>,
    %34 = vector.extract_strided_slice %21 {offsets = [0, 192], sizes = [12, 64], strides = [1, 1]} : vector<12x1024xbf16> to vector<12x64xbf16>
    %c0_26 = arith.constant 0 : index
    %c4 = arith.constant 4 : index
    %c0_27 = arith.constant 0 : index
    %35 = vector.load %arg11[%c0_26, %c4, %c0_27] : memref<12x18x64xbf16, #tpu.memory_space<vmem>>, vector<12x1x64xbf16>
    %36 = vector.shape_cast %35 : vector<12x1x64xbf16> to vector<12x64xbf16>
    %37 = vector.shape_cast %34 : vector<12x64xbf16> to vector<12x1x64xbf16>
    tpu.vector_store %arg11[%c0_26, %c4, %c0_27], %37 {strides = array<i32>} : memref<12x18x64xbf16, #tpu.memory_space<vmem>>, vector<12x1x64xbf16>,
    %38 = vector.extract_strided_slice %21 {offsets = [0, 256], sizes = [12, 64], strides = [1, 1]} : vector<12x1024xbf16> to vector<12x64xbf16>
    %c0_28 = arith.constant 0 : index
    %c5 = arith.constant 5 : index
    %c0_29 = arith.constant 0 : index
    %39 = vector.load %arg11[%c0_28, %c5, %c0_29] : memref<12x18x64xbf16, #tpu.memory_space<vmem>>, vector<12x1x64xbf16>
    %40 = vector.shape_cast %39 : vector<12x1x64xbf16> to vector<12x64xbf16>
    %41 = vector.shape_cast %38 : vector<12x64xbf16> to vector<12x1x64xbf16>
    tpu.vector_store %arg11[%c0_28, %c5, %c0_29], %41 {strides = array<i32>} : memref<12x18x64xbf16, #tpu.memory_space<vmem>>, vector<12x1x64xbf16>,
    %42 = vector.extract_strided_slice %21 {offsets = [0, 320], sizes = [12, 64], strides = [1, 1]} : vector<12x1024xbf16> to vector<12x64xbf16>
    %c0_30 = arith.constant 0 : index
    %c6 = arith.constant 6 : index
    %c0_31 = arith.constant 0 : index
    %43 = vector.load %arg11[%c0_30, %c6, %c0_31] : memref<12x18x64xbf16, #tpu.memory_space<vmem>>, vector<12x1x64xbf16>
    %44 = vector.shape_cast %43 : vector<12x1x64xbf16> to vector<12x64xbf16>
    %45 = vector.shape_cast %42 : vector<12x64xbf16> to vector<12x1x64xbf16>
    tpu.vector_store %arg11[%c0_30, %c6, %c0_31], %45 {strides = array<i32>} : memref<12x18x64xbf16, #tpu.memory_space<vmem>>, vector<12x1x64xbf16>,
    %46 = vector.extract_strided_slice %21 {offsets = [0, 384], sizes = [12, 64], strides = [1, 1]} : vector<12x1024xbf16> to vector<12x64xbf16>
    %c0_32 = arith.constant 0 : index
    %c7 = arith.constant 7 : index
    %c0_33 = arith.constant 0 : index
    %47 = vector.load %arg11[%c0_32, %c7, %c0_33] : memref<12x18x64xbf16, #tpu.memory_space<vmem>>, vector<12x1x64xbf16>
    %48 = vector.shape_cast %47 : vector<12x1x64xbf16> to vector<12x64xbf16>
    %49 = vector.shape_cast %46 : vector<12x64xbf16> to vector<12x1x64xbf16>
    tpu.vector_store %arg11[%c0_32, %c7, %c0_33], %49 {strides = array<i32>} : memref<12x18x64xbf16, #tpu.memory_space<vmem>>, vector<12x1x64xbf16>,
    %50 = vector.extract_strided_slice %21 {offsets = [0, 448], sizes = [12, 64], strides = [1, 1]} : vector<12x1024xbf16> to vector<12x64xbf16>
    %c0_34 = arith.constant 0 : index
    %c8 = arith.constant 8 : index
    %c0_35 = arith.constant 0 : index
    %51 = vector.load %arg11[%c0_34, %c8, %c0_35] : memref<12x18x64xbf16, #tpu.memory_space<vmem>>, vector<12x1x64xbf16>
    %52 = vector.shape_cast %51 : vector<12x1x64xbf16> to vector<12x64xbf16>
    %53 = vector.shape_cast %50 : vector<12x64xbf16> to vector<12x1x64xbf16>
    tpu.vector_store %arg11[%c0_34, %c8, %c0_35], %53 {strides = array<i32>} : memref<12x18x64xbf16, #tpu.memory_space<vmem>>, vector<12x1x64xbf16>,
    %54 = vector.extract_strided_slice %21 {offsets = [0, 512], sizes = [12, 64], strides = [1, 1]} : vector<12x1024xbf16> to vector<12x64xbf16>
    %c0_36 = arith.constant 0 : index
    %c9 = arith.constant 9 : index
    %c0_37 = arith.constant 0 : index
    %55 = vector.load %arg11[%c0_36, %c9, %c0_37] : memref<12x18x64xbf16, #tpu.memory_space<vmem>>, vector<12x1x64xbf16>
    %56 = vector.shape_cast %55 : vector<12x1x64xbf16> to vector<12x64xbf16>
    %57 = vector.shape_cast %54 : vector<12x64xbf16> to vector<12x1x64xbf16>
    tpu.vector_store %arg11[%c0_36, %c9, %c0_37], %57 {strides = array<i32>} : memref<12x18x64xbf16, #tpu.memory_space<vmem>>, vector<12x1x64xbf16>,
    %58 = vector.extract_strided_slice %21 {offsets = [0, 576], sizes = [12, 64], strides = [1, 1]} : vector<12x1024xbf16> to vector<12x64xbf16>
    %c0_38 = arith.constant 0 : index
    %c10 = arith.constant 10 : index
    %c0_39 = arith.constant 0 : index
    %59 = vector.load %arg11[%c0_38, %c10, %c0_39] : memref<12x18x64xbf16, #tpu.memory_space<vmem>>, vector<12x1x64xbf16>
    %60 = vector.shape_cast %59 : vector<12x1x64xbf16> to vector<12x64xbf16>
    %61 = vector.shape_cast %58 : vector<12x64xbf16> to vector<12x1x64xbf16>
    tpu.vector_store %arg11[%c0_38, %c10, %c0_39], %61 {strides = array<i32>} : memref<12x18x64xbf16, #tpu.memory_space<vmem>>, vector<12x1x64xbf16>,
    %62 = vector.extract_strided_slice %21 {offsets = [0, 640], sizes = [12, 64], strides = [1, 1]} : vector<12x1024xbf16> to vector<12x64xbf16>
    %c0_40 = arith.constant 0 : index
    %c11 = arith.constant 11 : index
    %c0_41 = arith.constant 0 : index
    %63 = vector.load %arg11[%c0_40, %c11, %c0_41] : memref<12x18x64xbf16, #tpu.memory_space<vmem>>, vector<12x1x64xbf16>
    %64 = vector.shape_cast %63 : vector<12x1x64xbf16> to vector<12x64xbf16>
    %65 = vector.shape_cast %62 : vector<12x64xbf16> to vector<12x1x64xbf16>
    tpu.vector_store %arg11[%c0_40, %c11, %c0_41], %65 {strides = array<i32>} : memref<12x18x64xbf16, #tpu.memory_space<vmem>>, vector<12x1x64xbf16>,
    %66 = vector.extract_strided_slice %21 {offsets = [0, 704], sizes = [12, 64], strides = [1, 1]} : vector<12x1024xbf16> to vector<12x64xbf16>
    %c0_42 = arith.constant 0 : index
    %c12 = arith.constant 12 : index
    %c0_43 = arith.constant 0 : index
    %67 = vector.load %arg11[%c0_42, %c12, %c0_43] : memref<12x18x64xbf16, #tpu.memory_space<vmem>>, vector<12x1x64xbf16>
    %68 = vector.shape_cast %67 : vector<12x1x64xbf16> to vector<12x64xbf16>
    %69 = vector.shape_cast %66 : vector<12x64xbf16> to vector<12x1x64xbf16>
    tpu.vector_store %arg11[%c0_42, %c12, %c0_43], %69 {strides = array<i32>} : memref<12x18x64xbf16, #tpu.memory_space<vmem>>, vector<12x1x64xbf16>,
    %70 = vector.extract_strided_slice %21 {offsets = [0, 768], sizes = [12, 64], strides = [1, 1]} : vector<12x1024xbf16> to vector<12x64xbf16>
    %c0_44 = arith.constant 0 : index
    %c13 = arith.constant 13 : index
    %c0_45 = arith.constant 0 : index
    %71 = vector.load %arg11[%c0_44, %c13, %c0_45] : memref<12x18x64xbf16, #tpu.memory_space<vmem>>, vector<12x1x64xbf16>
    %72 = vector.shape_cast %71 : vector<12x1x64xbf16> to vector<12x64xbf16>
    %73 = vector.shape_cast %70 : vector<12x64xbf16> to vector<12x1x64xbf16>
    tpu.vector_store %arg11[%c0_44, %c13, %c0_45], %73 {strides = array<i32>} : memref<12x18x64xbf16, #tpu.memory_space<vmem>>, vector<12x1x64xbf16>,
    %74 = vector.extract_strided_slice %21 {offsets = [0, 832], sizes = [12, 64], strides = [1, 1]} : vector<12x1024xbf16> to vector<12x64xbf16>
    %c0_46 = arith.constant 0 : index
    %c14 = arith.constant 14 : index
    %c0_47 = arith.constant 0 : index
    %75 = vector.load %arg11[%c0_46, %c14, %c0_47] : memref<12x18x64xbf16, #tpu.memory_space<vmem>>, vector<12x1x64xbf16>
    %76 = vector.shape_cast %75 : vector<12x1x64xbf16> to vector<12x64xbf16>
    %77 = vector.shape_cast %74 : vector<12x64xbf16> to vector<12x1x64xbf16>
    tpu.vector_store %arg11[%c0_46, %c14, %c0_47], %77 {strides = array<i32>} : memref<12x18x64xbf16, #tpu.memory_space<vmem>>, vector<12x1x64xbf16>,
    %78 = vector.extract_strided_slice %21 {offsets = [0, 896], sizes = [12, 64], strides = [1, 1]} : vector<12x1024xbf16> to vector<12x64xbf16>
    %c0_48 = arith.constant 0 : index
    %c15 = arith.constant 15 : index
    %c0_49 = arith.constant 0 : index
    %79 = vector.load %arg11[%c0_48, %c15, %c0_49] : memref<12x18x64xbf16, #tpu.memory_space<vmem>>, vector<12x1x64xbf16>
    %80 = vector.shape_cast %79 : vector<12x1x64xbf16> to vector<12x64xbf16>
    %81 = vector.shape_cast %78 : vector<12x64xbf16> to vector<12x1x64xbf16>
    tpu.vector_store %arg11[%c0_48, %c15, %c0_49], %81 {strides = array<i32>} : memref<12x18x64xbf16, #tpu.memory_space<vmem>>, vector<12x1x64xbf16>,
    %82 = vector.extract_strided_slice %21 {offsets = [0, 960], sizes = [12, 64], strides = [1, 1]} : vector<12x1024xbf16> to vector<12x64xbf16>
    %c0_50 = arith.constant 0 : index
    %c16 = arith.constant 16 : index
    %c0_51 = arith.constant 0 : index
    %83 = vector.load %arg11[%c0_50, %c16, %c0_51] : memref<12x18x64xbf16, #tpu.memory_space<vmem>>, vector<12x1x64xbf16>
    %84 = vector.shape_cast %83 : vector<12x1x64xbf16> to vector<12x64xbf16>
    %85 = vector.shape_cast %82 : vector<12x64xbf16> to vector<12x1x64xbf16>
    tpu.vector_store %arg11[%c0_50, %c16, %c0_51], %85 {strides = array<i32>} : memref<12x18x64xbf16, #tpu.memory_space<vmem>>, vector<12x1x64xbf16>,
    %c0_52 = arith.constant 0 : index
    %c0_53 = arith.constant 0 : index
    %c0_54 = arith.constant 0 : index
    %86 = vector.load %arg11[%c0_52, %c0_53, %c0_54] : memref<12x18x64xbf16, #tpu.memory_space<vmem>>, vector<10x16x64xbf16>
    %87 = vector.shape_cast %86 : vector<10x16x64xbf16> to vector<160x64xbf16>
    %c0_55 = arith.constant 0 : index
    %c0_56 = arith.constant 0 : index
    %c0_57 = arith.constant 0 : index
    %c0_58 = arith.constant 0 : index
    %88 = vector.load %arg4[%c0_55, %c0_56, %c0_57, %c0_58] : memref<3x3x64x32xbf16, #tpu.memory_space<vmem>>, vector<1x1x64x32xbf16>
    %89 = vector.shape_cast %88 : vector<1x1x64x32xbf16> to vector<64x32xbf16>
    %cst_59 = arith.constant dense<0.000000e+00> : vector<160x32xf32>
    %90 = tpu.matmul %87, %89, %cst_59 {dimension_numbers = #tpu.dot_dimension_numbers<[1], [0], [0], [1], [0, 0, 1, 1], [], []>} : vector<160x64xbf16>, vector<64x32xbf16>, vector<160x32xf32> -> vector<160x32xf32>
    %c0_60 = arith.constant 0 : index
    %c1_61 = arith.constant 1 : index
    %c0_62 = arith.constant 0 : index
    %91 = vector.load %arg11[%c0_60, %c1_61, %c0_62] : memref<12x18x64xbf16, #tpu.memory_space<vmem>>, vector<10x16x64xbf16>
    %92 = vector.shape_cast %91 : vector<10x16x64xbf16> to vector<160x64xbf16>
    %c0_63 = arith.constant 0 : index
    %c1_64 = arith.constant 1 : index
    %c0_65 = arith.constant 0 : index
    %c0_66 = arith.constant 0 : index
    %93 = vector.load %arg4[%c0_63, %c1_64, %c0_65, %c0_66] : memref<3x3x64x32xbf16, #tpu.memory_space<vmem>>, vector<1x1x64x32xbf16>
    %94 = vector.shape_cast %93 : vector<1x1x64x32xbf16> to vector<64x32xbf16>
    %cst_67 = arith.constant dense<0.000000e+00> : vector<160x32xf32>
    %95 = tpu.matmul %92, %94, %cst_67 {dimension_numbers = #tpu.dot_dimension_numbers<[1], [0], [0], [1], [0, 0, 1, 1], [], []>} : vector<160x64xbf16>, vector<64x32xbf16>, vector<160x32xf32> -> vector<160x32xf32>
    %96 = arith.addf %90, %95 : vector<160x32xf32>
    %c0_68 = arith.constant 0 : index
    %c2_69 = arith.constant 2 : index
    %c0_70 = arith.constant 0 : index
    %97 = vector.load %arg11[%c0_68, %c2_69, %c0_70] : memref<12x18x64xbf16, #tpu.memory_space<vmem>>, vector<10x16x64xbf16>
    %98 = vector.shape_cast %97 : vector<10x16x64xbf16> to vector<160x64xbf16>
    %c0_71 = arith.constant 0 : index
    %c2_72 = arith.constant 2 : index
    %c0_73 = arith.constant 0 : index
    %c0_74 = arith.constant 0 : index
    %99 = vector.load %arg4[%c0_71, %c2_72, %c0_73, %c0_74] : memref<3x3x64x32xbf16, #tpu.memory_space<vmem>>, vector<1x1x64x32xbf16>
    %100 = vector.shape_cast %99 : vector<1x1x64x32xbf16> to vector<64x32xbf16>
    %cst_75 = arith.constant dense<0.000000e+00> : vector<160x32xf32>
    %101 = tpu.matmul %98, %100, %cst_75 {dimension_numbers = #tpu.dot_dimension_numbers<[1], [0], [0], [1], [0, 0, 1, 1], [], []>} : vector<160x64xbf16>, vector<64x32xbf16>, vector<160x32xf32> -> vector<160x32xf32>
    %102 = arith.addf %96, %101 : vector<160x32xf32>
    %c1_76 = arith.constant 1 : index
    %c0_77 = arith.constant 0 : index
    %c0_78 = arith.constant 0 : index
    %103 = vector.load %arg11[%c1_76, %c0_77, %c0_78] : memref<12x18x64xbf16, #tpu.memory_space<vmem>>, vector<10x16x64xbf16>
    %104 = vector.shape_cast %103 : vector<10x16x64xbf16> to vector<160x64xbf16>
    %c1_79 = arith.constant 1 : index
    %c0_80 = arith.constant 0 : index
    %c0_81 = arith.constant 0 : index
    %c0_82 = arith.constant 0 : index
    %105 = vector.load %arg4[%c1_79, %c0_80, %c0_81, %c0_82] : memref<3x3x64x32xbf16, #tpu.memory_space<vmem>>, vector<1x1x64x32xbf16>
    %106 = vector.shape_cast %105 : vector<1x1x64x32xbf16> to vector<64x32xbf16>
    %cst_83 = arith.constant dense<0.000000e+00> : vector<160x32xf32>
    %107 = tpu.matmul %104, %106, %cst_83 {dimension_numbers = #tpu.dot_dimension_numbers<[1], [0], [0], [1], [0, 0, 1, 1], [], []>} : vector<160x64xbf16>, vector<64x32xbf16>, vector<160x32xf32> -> vector<160x32xf32>
    %108 = arith.addf %102, %107 : vector<160x32xf32>
    %c1_84 = arith.constant 1 : index
    %c1_85 = arith.constant 1 : index
    %c0_86 = arith.constant 0 : index
    %109 = vector.load %arg11[%c1_84, %c1_85, %c0_86] : memref<12x18x64xbf16, #tpu.memory_space<vmem>>, vector<10x16x64xbf16>
    %110 = vector.shape_cast %109 : vector<10x16x64xbf16> to vector<160x64xbf16>
    %c1_87 = arith.constant 1 : index
    %c1_88 = arith.constant 1 : index
    %c0_89 = arith.constant 0 : index
    %c0_90 = arith.constant 0 : index
    %111 = vector.load %arg4[%c1_87, %c1_88, %c0_89, %c0_90] : memref<3x3x64x32xbf16, #tpu.memory_space<vmem>>, vector<1x1x64x32xbf16>
    %112 = vector.shape_cast %111 : vector<1x1x64x32xbf16> to vector<64x32xbf16>
    %cst_91 = arith.constant dense<0.000000e+00> : vector<160x32xf32>
    %113 = tpu.matmul %110, %112, %cst_91 {dimension_numbers = #tpu.dot_dimension_numbers<[1], [0], [0], [1], [0, 0, 1, 1], [], []>} : vector<160x64xbf16>, vector<64x32xbf16>, vector<160x32xf32> -> vector<160x32xf32>
    %114 = arith.addf %108, %113 : vector<160x32xf32>
    %c1_92 = arith.constant 1 : index
    %c2_93 = arith.constant 2 : index
    %c0_94 = arith.constant 0 : index
    %115 = vector.load %arg11[%c1_92, %c2_93, %c0_94] : memref<12x18x64xbf16, #tpu.memory_space<vmem>>, vector<10x16x64xbf16>
    %116 = vector.shape_cast %115 : vector<10x16x64xbf16> to vector<160x64xbf16>
    %c1_95 = arith.constant 1 : index
    %c2_96 = arith.constant 2 : index
    %c0_97 = arith.constant 0 : index
    %c0_98 = arith.constant 0 : index
    %117 = vector.load %arg4[%c1_95, %c2_96, %c0_97, %c0_98] : memref<3x3x64x32xbf16, #tpu.memory_space<vmem>>, vector<1x1x64x32xbf16>
    %118 = vector.shape_cast %117 : vector<1x1x64x32xbf16> to vector<64x32xbf16>
    %cst_99 = arith.constant dense<0.000000e+00> : vector<160x32xf32>
    %119 = tpu.matmul %116, %118, %cst_99 {dimension_numbers = #tpu.dot_dimension_numbers<[1], [0], [0], [1], [0, 0, 1, 1], [], []>} : vector<160x64xbf16>, vector<64x32xbf16>, vector<160x32xf32> -> vector<160x32xf32>
    %120 = arith.addf %114, %119 : vector<160x32xf32>
    %c2_100 = arith.constant 2 : index
    %c0_101 = arith.constant 0 : index
    %c0_102 = arith.constant 0 : index
    %121 = vector.load %arg11[%c2_100, %c0_101, %c0_102] : memref<12x18x64xbf16, #tpu.memory_space<vmem>>, vector<10x16x64xbf16>
    %122 = vector.shape_cast %121 : vector<10x16x64xbf16> to vector<160x64xbf16>
    %c2_103 = arith.constant 2 : index
    %c0_104 = arith.constant 0 : index
    %c0_105 = arith.constant 0 : index
    %c0_106 = arith.constant 0 : index
    %123 = vector.load %arg4[%c2_103, %c0_104, %c0_105, %c0_106] : memref<3x3x64x32xbf16, #tpu.memory_space<vmem>>, vector<1x1x64x32xbf16>
    %124 = vector.shape_cast %123 : vector<1x1x64x32xbf16> to vector<64x32xbf16>
    %cst_107 = arith.constant dense<0.000000e+00> : vector<160x32xf32>
    %125 = tpu.matmul %122, %124, %cst_107 {dimension_numbers = #tpu.dot_dimension_numbers<[1], [0], [0], [1], [0, 0, 1, 1], [], []>} : vector<160x64xbf16>, vector<64x32xbf16>, vector<160x32xf32> -> vector<160x32xf32>
    %126 = arith.addf %120, %125 : vector<160x32xf32>
    %c2_108 = arith.constant 2 : index
    %c1_109 = arith.constant 1 : index
    %c0_110 = arith.constant 0 : index
    %127 = vector.load %arg11[%c2_108, %c1_109, %c0_110] : memref<12x18x64xbf16, #tpu.memory_space<vmem>>, vector<10x16x64xbf16>
    %128 = vector.shape_cast %127 : vector<10x16x64xbf16> to vector<160x64xbf16>
    %c2_111 = arith.constant 2 : index
    %c1_112 = arith.constant 1 : index
    %c0_113 = arith.constant 0 : index
    %c0_114 = arith.constant 0 : index
    %129 = vector.load %arg4[%c2_111, %c1_112, %c0_113, %c0_114] : memref<3x3x64x32xbf16, #tpu.memory_space<vmem>>, vector<1x1x64x32xbf16>
    %130 = vector.shape_cast %129 : vector<1x1x64x32xbf16> to vector<64x32xbf16>
    %cst_115 = arith.constant dense<0.000000e+00> : vector<160x32xf32>
    %131 = tpu.matmul %128, %130, %cst_115 {dimension_numbers = #tpu.dot_dimension_numbers<[1], [0], [0], [1], [0, 0, 1, 1], [], []>} : vector<160x64xbf16>, vector<64x32xbf16>, vector<160x32xf32> -> vector<160x32xf32>
    %132 = arith.addf %126, %131 : vector<160x32xf32>
    %c2_116 = arith.constant 2 : index
    %c2_117 = arith.constant 2 : index
    %c0_118 = arith.constant 0 : index
    %133 = vector.load %arg11[%c2_116, %c2_117, %c0_118] : memref<12x18x64xbf16, #tpu.memory_space<vmem>>, vector<10x16x64xbf16>
    %134 = vector.shape_cast %133 : vector<10x16x64xbf16> to vector<160x64xbf16>
    %c2_119 = arith.constant 2 : index
    %c2_120 = arith.constant 2 : index
    %c0_121 = arith.constant 0 : index
    %c0_122 = arith.constant 0 : index
    %135 = vector.load %arg4[%c2_119, %c2_120, %c0_121, %c0_122] : memref<3x3x64x32xbf16, #tpu.memory_space<vmem>>, vector<1x1x64x32xbf16>
    %136 = vector.shape_cast %135 : vector<1x1x64x32xbf16> to vector<64x32xbf16>
    %cst_123 = arith.constant dense<0.000000e+00> : vector<160x32xf32>
    %137 = tpu.matmul %134, %136, %cst_123 {dimension_numbers = #tpu.dot_dimension_numbers<[1], [0], [0], [1], [0, 0, 1, 1], [], []>} : vector<160x64xbf16>, vector<64x32xbf16>, vector<160x32xf32> -> vector<160x32xf32>
    %138 = arith.addf %132, %137 : vector<160x32xf32>
    %c0_124 = arith.constant 0 : index
    %c0_125 = arith.constant 0 : index
    %139 = vector.load %arg5[%c0_124, %c0_125] : memref<1x32xf32, #tpu.memory_space<vmem>>, vector<1x32xf32>
    %140 = vector.broadcast %139 : vector<1x32xf32> to vector<160x32xf32>
    %141 = arith.mulf %138, %140 : vector<160x32xf32>
    %c0_126 = arith.constant 0 : index
    %c0_127 = arith.constant 0 : index
    %142 = vector.load %arg6[%c0_126, %c0_127] : memref<1x32xf32, #tpu.memory_space<vmem>>, vector<1x32xf32>
    %143 = vector.broadcast %142 : vector<1x32xf32> to vector<160x32xf32>
    %144 = arith.addf %141, %143 : vector<160x32xf32>
    %cst_128 = arith.constant 0.000000e+00 : f32
    %145 = vector.broadcast %cst_128 : f32 to vector<160x32xf32>
    %146 = arith.maximumf %144, %145 : vector<160x32xf32>
    %147 = vector.shape_cast %146 : vector<160x32xf32> to vector<10x16x32xf32>
    %148 = arith.truncf %147 : vector<10x16x32xf32> to vector<10x16x32xbf16>
    %c0_129 = arith.constant 0 : index
    %c1_130 = arith.constant 1 : index
    %c0_131 = arith.constant 0 : index
    %149 = vector.load %arg12[%c0_129, %c1_130, %c0_131] : memref<10x18x32xbf16, #tpu.memory_space<vmem>>, vector<10x16x32xbf16>
    tpu.vector_store %arg12[%c0_129, %c1_130, %c0_131], %148 {strides = array<i32>} : memref<10x18x32xbf16, #tpu.memory_space<vmem>>, vector<10x16x32xbf16>,
    %c0_i32 = arith.constant 0 : i32
    %150 = arith.cmpi eq, %arg1, %c0_i32 : i32
    %151 = arith.extui %150 : i1 to i32
    %c0_i32_132 = arith.constant 0 : i32
    %152 = arith.cmpi ne, %151, %c0_i32_132 : i32
    scf.if %152 {
      %cst_215 = arith.constant 0.000000e+00 : bf16
      %221 = vector.broadcast %cst_215 : bf16 to vector<18x32xbf16>
      %c0_216 = arith.constant 0 : index
      %c0_217 = arith.constant 0 : index
      %c0_218 = arith.constant 0 : index
      %222 = vector.load %arg12[%c0_216, %c0_217, %c0_218] : memref<10x18x32xbf16, #tpu.memory_space<vmem>>, vector<1x18x32xbf16>
      %223 = vector.shape_cast %222 : vector<1x18x32xbf16> to vector<18x32xbf16>
      %224 = vector.shape_cast %221 : vector<18x32xbf16> to vector<1x18x32xbf16>
      tpu.vector_store %arg12[%c0_216, %c0_217, %c0_218], %224 {strides = array<i32>} : memref<10x18x32xbf16, #tpu.memory_space<vmem>>, vector<1x18x32xbf16>,
    } else {
    }
    %c1_i32 = arith.constant 1 : i32
    %153 = arith.cmpi eq, %arg1, %c1_i32 : i32
    %154 = arith.extui %153 : i1 to i32
    %c0_i32_133 = arith.constant 0 : i32
    %155 = arith.cmpi ne, %154, %c0_i32_133 : i32
    scf.if %155 {
      %cst_215 = arith.constant 0.000000e+00 : bf16
      %221 = vector.broadcast %cst_215 : bf16 to vector<18x32xbf16>
      %c9_216 = arith.constant 9 : index
      %c0_217 = arith.constant 0 : index
      %c0_218 = arith.constant 0 : index
      %222 = vector.load %arg12[%c9_216, %c0_217, %c0_218] : memref<10x18x32xbf16, #tpu.memory_space<vmem>>, vector<1x18x32xbf16>
      %223 = vector.shape_cast %222 : vector<1x18x32xbf16> to vector<18x32xbf16>
      %224 = vector.shape_cast %221 : vector<18x32xbf16> to vector<1x18x32xbf16>
      tpu.vector_store %arg12[%c9_216, %c0_217, %c0_218], %224 {strides = array<i32>} : memref<10x18x32xbf16, #tpu.memory_space<vmem>>, vector<1x18x32xbf16>,
    } else {
    }
    %c0_134 = arith.constant 0 : index
    %c0_135 = arith.constant 0 : index
    %c0_136 = arith.constant 0 : index
    %156 = vector.load %arg12[%c0_134, %c0_135, %c0_136] : memref<10x18x32xbf16, #tpu.memory_space<vmem>>, vector<8x16x32xbf16>
    %157 = vector.shape_cast %156 : vector<8x16x32xbf16> to vector<128x32xbf16>
    %c0_137 = arith.constant 0 : index
    %c0_138 = arith.constant 0 : index
    %c0_139 = arith.constant 0 : index
    %c0_140 = arith.constant 0 : index
    %158 = vector.load %arg7[%c0_137, %c0_138, %c0_139, %c0_140] : memref<3x3x32x32xbf16, #tpu.memory_space<vmem>>, vector<1x1x32x32xbf16>
    %159 = vector.shape_cast %158 : vector<1x1x32x32xbf16> to vector<32x32xbf16>
    %cst_141 = arith.constant dense<0.000000e+00> : vector<128x32xf32>
    %160 = tpu.matmul %157, %159, %cst_141 {dimension_numbers = #tpu.dot_dimension_numbers<[1], [0], [0], [1], [0, 0, 1, 1], [], []>} : vector<128x32xbf16>, vector<32x32xbf16>, vector<128x32xf32> -> vector<128x32xf32>
    %c0_142 = arith.constant 0 : index
    %c1_143 = arith.constant 1 : index
    %c0_144 = arith.constant 0 : index
    %161 = vector.load %arg12[%c0_142, %c1_143, %c0_144] : memref<10x18x32xbf16, #tpu.memory_space<vmem>>, vector<8x16x32xbf16>
    %162 = vector.shape_cast %161 : vector<8x16x32xbf16> to vector<128x32xbf16>
    %c0_145 = arith.constant 0 : index
    %c1_146 = arith.constant 1 : index
    %c0_147 = arith.constant 0 : index
    %c0_148 = arith.constant 0 : index
    %163 = vector.load %arg7[%c0_145, %c1_146, %c0_147, %c0_148] : memref<3x3x32x32xbf16, #tpu.memory_space<vmem>>, vector<1x1x32x32xbf16>
    %164 = vector.shape_cast %163 : vector<1x1x32x32xbf16> to vector<32x32xbf16>
    %cst_149 = arith.constant dense<0.000000e+00> : vector<128x32xf32>
    %165 = tpu.matmul %162, %164, %cst_149 {dimension_numbers = #tpu.dot_dimension_numbers<[1], [0], [0], [1], [0, 0, 1, 1], [], []>} : vector<128x32xbf16>, vector<32x32xbf16>, vector<128x32xf32> -> vector<128x32xf32>
    %166 = arith.addf %160, %165 : vector<128x32xf32>
    %c0_150 = arith.constant 0 : index
    %c2_151 = arith.constant 2 : index
    %c0_152 = arith.constant 0 : index
    %167 = vector.load %arg12[%c0_150, %c2_151, %c0_152] : memref<10x18x32xbf16, #tpu.memory_space<vmem>>, vector<8x16x32xbf16>
    %168 = vector.shape_cast %167 : vector<8x16x32xbf16> to vector<128x32xbf16>
    %c0_153 = arith.constant 0 : index
    %c2_154 = arith.constant 2 : index
    %c0_155 = arith.constant 0 : index
    %c0_156 = arith.constant 0 : index
    %169 = vector.load %arg7[%c0_153, %c2_154, %c0_155, %c0_156] : memref<3x3x32x32xbf16, #tpu.memory_space<vmem>>, vector<1x1x32x32xbf16>
    %170 = vector.shape_cast %169 : vector<1x1x32x32xbf16> to vector<32x32xbf16>
    %cst_157 = arith.constant dense<0.000000e+00> : vector<128x32xf32>
    %171 = tpu.matmul %168, %170, %cst_157 {dimension_numbers = #tpu.dot_dimension_numbers<[1], [0], [0], [1], [0, 0, 1, 1], [], []>} : vector<128x32xbf16>, vector<32x32xbf16>, vector<128x32xf32> -> vector<128x32xf32>
    %172 = arith.addf %166, %171 : vector<128x32xf32>
    %c1_158 = arith.constant 1 : index
    %c0_159 = arith.constant 0 : index
    %c0_160 = arith.constant 0 : index
    %173 = vector.load %arg12[%c1_158, %c0_159, %c0_160] : memref<10x18x32xbf16, #tpu.memory_space<vmem>>, vector<8x16x32xbf16>
    %174 = vector.shape_cast %173 : vector<8x16x32xbf16> to vector<128x32xbf16>
    %c1_161 = arith.constant 1 : index
    %c0_162 = arith.constant 0 : index
    %c0_163 = arith.constant 0 : index
    %c0_164 = arith.constant 0 : index
    %175 = vector.load %arg7[%c1_161, %c0_162, %c0_163, %c0_164] : memref<3x3x32x32xbf16, #tpu.memory_space<vmem>>, vector<1x1x32x32xbf16>
    %176 = vector.shape_cast %175 : vector<1x1x32x32xbf16> to vector<32x32xbf16>
    %cst_165 = arith.constant dense<0.000000e+00> : vector<128x32xf32>
    %177 = tpu.matmul %174, %176, %cst_165 {dimension_numbers = #tpu.dot_dimension_numbers<[1], [0], [0], [1], [0, 0, 1, 1], [], []>} : vector<128x32xbf16>, vector<32x32xbf16>, vector<128x32xf32> -> vector<128x32xf32>
    %178 = arith.addf %172, %177 : vector<128x32xf32>
    %c1_166 = arith.constant 1 : index
    %c1_167 = arith.constant 1 : index
    %c0_168 = arith.constant 0 : index
    %179 = vector.load %arg12[%c1_166, %c1_167, %c0_168] : memref<10x18x32xbf16, #tpu.memory_space<vmem>>, vector<8x16x32xbf16>
    %180 = vector.shape_cast %179 : vector<8x16x32xbf16> to vector<128x32xbf16>
    %c1_169 = arith.constant 1 : index
    %c1_170 = arith.constant 1 : index
    %c0_171 = arith.constant 0 : index
    %c0_172 = arith.constant 0 : index
    %181 = vector.load %arg7[%c1_169, %c1_170, %c0_171, %c0_172] : memref<3x3x32x32xbf16, #tpu.memory_space<vmem>>, vector<1x1x32x32xbf16>
    %182 = vector.shape_cast %181 : vector<1x1x32x32xbf16> to vector<32x32xbf16>
    %cst_173 = arith.constant dense<0.000000e+00> : vector<128x32xf32>
    %183 = tpu.matmul %180, %182, %cst_173 {dimension_numbers = #tpu.dot_dimension_numbers<[1], [0], [0], [1], [0, 0, 1, 1], [], []>} : vector<128x32xbf16>, vector<32x32xbf16>, vector<128x32xf32> -> vector<128x32xf32>
    %184 = arith.addf %178, %183 : vector<128x32xf32>
    %c1_174 = arith.constant 1 : index
    %c2_175 = arith.constant 2 : index
    %c0_176 = arith.constant 0 : index
    %185 = vector.load %arg12[%c1_174, %c2_175, %c0_176] : memref<10x18x32xbf16, #tpu.memory_space<vmem>>, vector<8x16x32xbf16>
    %186 = vector.shape_cast %185 : vector<8x16x32xbf16> to vector<128x32xbf16>
    %c1_177 = arith.constant 1 : index
    %c2_178 = arith.constant 2 : index
    %c0_179 = arith.constant 0 : index
    %c0_180 = arith.constant 0 : index
    %187 = vector.load %arg7[%c1_177, %c2_178, %c0_179, %c0_180] : memref<3x3x32x32xbf16, #tpu.memory_space<vmem>>, vector<1x1x32x32xbf16>
    %188 = vector.shape_cast %187 : vector<1x1x32x32xbf16> to vector<32x32xbf16>
    %cst_181 = arith.constant dense<0.000000e+00> : vector<128x32xf32>
    %189 = tpu.matmul %186, %188, %cst_181 {dimension_numbers = #tpu.dot_dimension_numbers<[1], [0], [0], [1], [0, 0, 1, 1], [], []>} : vector<128x32xbf16>, vector<32x32xbf16>, vector<128x32xf32> -> vector<128x32xf32>
    %190 = arith.addf %184, %189 : vector<128x32xf32>
    %c2_182 = arith.constant 2 : index
    %c0_183 = arith.constant 0 : index
    %c0_184 = arith.constant 0 : index
    %191 = vector.load %arg12[%c2_182, %c0_183, %c0_184] : memref<10x18x32xbf16, #tpu.memory_space<vmem>>, vector<8x16x32xbf16>
    %192 = vector.shape_cast %191 : vector<8x16x32xbf16> to vector<128x32xbf16>
    %c2_185 = arith.constant 2 : index
    %c0_186 = arith.constant 0 : index
    %c0_187 = arith.constant 0 : index
    %c0_188 = arith.constant 0 : index
    %193 = vector.load %arg7[%c2_185, %c0_186, %c0_187, %c0_188] : memref<3x3x32x32xbf16, #tpu.memory_space<vmem>>, vector<1x1x32x32xbf16>
    %194 = vector.shape_cast %193 : vector<1x1x32x32xbf16> to vector<32x32xbf16>
    %cst_189 = arith.constant dense<0.000000e+00> : vector<128x32xf32>
    %195 = tpu.matmul %192, %194, %cst_189 {dimension_numbers = #tpu.dot_dimension_numbers<[1], [0], [0], [1], [0, 0, 1, 1], [], []>} : vector<128x32xbf16>, vector<32x32xbf16>, vector<128x32xf32> -> vector<128x32xf32>
    %196 = arith.addf %190, %195 : vector<128x32xf32>
    %c2_190 = arith.constant 2 : index
    %c1_191 = arith.constant 1 : index
    %c0_192 = arith.constant 0 : index
    %197 = vector.load %arg12[%c2_190, %c1_191, %c0_192] : memref<10x18x32xbf16, #tpu.memory_space<vmem>>, vector<8x16x32xbf16>
    %198 = vector.shape_cast %197 : vector<8x16x32xbf16> to vector<128x32xbf16>
    %c2_193 = arith.constant 2 : index
    %c1_194 = arith.constant 1 : index
    %c0_195 = arith.constant 0 : index
    %c0_196 = arith.constant 0 : index
    %199 = vector.load %arg7[%c2_193, %c1_194, %c0_195, %c0_196] : memref<3x3x32x32xbf16, #tpu.memory_space<vmem>>, vector<1x1x32x32xbf16>
    %200 = vector.shape_cast %199 : vector<1x1x32x32xbf16> to vector<32x32xbf16>
    %cst_197 = arith.constant dense<0.000000e+00> : vector<128x32xf32>
    %201 = tpu.matmul %198, %200, %cst_197 {dimension_numbers = #tpu.dot_dimension_numbers<[1], [0], [0], [1], [0, 0, 1, 1], [], []>} : vector<128x32xbf16>, vector<32x32xbf16>, vector<128x32xf32> -> vector<128x32xf32>
    %202 = arith.addf %196, %201 : vector<128x32xf32>
    %c2_198 = arith.constant 2 : index
    %c2_199 = arith.constant 2 : index
    %c0_200 = arith.constant 0 : index
    %203 = vector.load %arg12[%c2_198, %c2_199, %c0_200] : memref<10x18x32xbf16, #tpu.memory_space<vmem>>, vector<8x16x32xbf16>
    %204 = vector.shape_cast %203 : vector<8x16x32xbf16> to vector<128x32xbf16>
    %c2_201 = arith.constant 2 : index
    %c2_202 = arith.constant 2 : index
    %c0_203 = arith.constant 0 : index
    %c0_204 = arith.constant 0 : index
    %205 = vector.load %arg7[%c2_201, %c2_202, %c0_203, %c0_204] : memref<3x3x32x32xbf16, #tpu.memory_space<vmem>>, vector<1x1x32x32xbf16>
    %206 = vector.shape_cast %205 : vector<1x1x32x32xbf16> to vector<32x32xbf16>
    %cst_205 = arith.constant dense<0.000000e+00> : vector<128x32xf32>
    %207 = tpu.matmul %204, %206, %cst_205 {dimension_numbers = #tpu.dot_dimension_numbers<[1], [0], [0], [1], [0, 0, 1, 1], [], []>} : vector<128x32xbf16>, vector<32x32xbf16>, vector<128x32xf32> -> vector<128x32xf32>
    %208 = arith.addf %202, %207 : vector<128x32xf32>
    %c0_206 = arith.constant 0 : index
    %c0_207 = arith.constant 0 : index
    %209 = vector.load %arg8[%c0_206, %c0_207] : memref<1x32xf32, #tpu.memory_space<vmem>>, vector<1x32xf32>
    %210 = vector.broadcast %209 : vector<1x32xf32> to vector<128x32xf32>
    %211 = arith.mulf %208, %210 : vector<128x32xf32>
    %c0_208 = arith.constant 0 : index
    %c0_209 = arith.constant 0 : index
    %212 = vector.load %arg9[%c0_208, %c0_209] : memref<1x32xf32, #tpu.memory_space<vmem>>, vector<1x32xf32>
    %213 = vector.broadcast %212 : vector<1x32xf32> to vector<128x32xf32>
    %214 = arith.addf %211, %213 : vector<128x32xf32>
    %cst_210 = arith.constant 0.000000e+00 : f32
    %215 = vector.broadcast %cst_210 : f32 to vector<128x32xf32>
    %216 = arith.maximumf %214, %215 : vector<128x32xf32>
    %217 = vector.shape_cast %216 : vector<128x32xf32> to vector<8x16x32xf32>
    %c0_211 = arith.constant 0 : index
    %c0_212 = arith.constant 0 : index
    %c0_213 = arith.constant 0 : index
    %c0_214 = arith.constant 0 : index
    %218 = vector.load %arg10[%c0_211, %c0_212, %c0_213, %c0_214] : memref<1x8x16x32xf32, #tpu.memory_space<vmem>>, vector<1x8x16x32xf32>
    %219 = vector.shape_cast %218 : vector<1x8x16x32xf32> to vector<8x16x32xf32>
    %220 = vector.shape_cast %217 : vector<8x16x32xf32> to vector<1x8x16x32xf32>
    tpu.vector_store %arg10[%c0_211, %c0_212, %c0_213, %c0_214], %220 {strides = array<i32>} : memref<1x8x16x32xf32, #tpu.memory_space<vmem>>, vector<1x8x16x32xf32>,
    return
  }
  func.func @transform_0(%arg0: i32, %arg1: i32) -> (i32, i32, i32) {
    %c0_i32 = arith.constant 0 : i32
    %c0_i32_0 = arith.constant 0 : i32
    %c0_i32_1 = arith.constant 0 : i32
    return %arg0, %c0_i32, %c0_i32_0 : i32, i32, i32
  }
  func.func @transform_1(%arg0: i32, %arg1: i32) -> (i32, i32, i32) {
    %c0_i32 = arith.constant 0 : i32
    %c0_i32_0 = arith.constant 0 : i32
    %c0_i32_1 = arith.constant 0 : i32
    return %arg1, %c0_i32, %c0_i32_0 : i32, i32, i32
  }
  func.func @transform_2(%arg0: i32, %arg1: i32) -> (i32, i32, i32, i32) {
    %c0_i32 = arith.constant 0 : i32
    %c0_i32_0 = arith.constant 0 : i32
    %c0_i32_1 = arith.constant 0 : i32
    %c0_i32_2 = arith.constant 0 : i32
    %c0_i32_3 = arith.constant 0 : i32
    return %c0_i32, %c0_i32_0, %c0_i32_1, %c0_i32_2 : i32, i32, i32, i32
  }
  func.func @transform_3(%arg0: i32, %arg1: i32) -> (i32, i32) {
    %c0_i32 = arith.constant 0 : i32
    %c0_i32_0 = arith.constant 0 : i32
    %c0_i32_1 = arith.constant 0 : i32
    return %c0_i32, %c0_i32_0 : i32, i32
  }
  func.func @transform_4(%arg0: i32, %arg1: i32) -> (i32, i32) {
    %c0_i32 = arith.constant 0 : i32
    %c0_i32_0 = arith.constant 0 : i32
    %c0_i32_1 = arith.constant 0 : i32
    return %c0_i32, %c0_i32_0 : i32, i32
  }
  func.func @transform_5(%arg0: i32, %arg1: i32) -> (i32, i32, i32, i32) {
    %c0_i32 = arith.constant 0 : i32
    %c0_i32_0 = arith.constant 0 : i32
    %c0_i32_1 = arith.constant 0 : i32
    %c0_i32_2 = arith.constant 0 : i32
    %c0_i32_3 = arith.constant 0 : i32
    return %c0_i32, %c0_i32_0, %c0_i32_1, %c0_i32_2 : i32, i32, i32, i32
  }
  func.func @transform_6(%arg0: i32, %arg1: i32) -> (i32, i32) {
    %c0_i32 = arith.constant 0 : i32
    %c0_i32_0 = arith.constant 0 : i32
    %c0_i32_1 = arith.constant 0 : i32
    return %c0_i32, %c0_i32_0 : i32, i32
  }
  func.func @transform_7(%arg0: i32, %arg1: i32) -> (i32, i32) {
    %c0_i32 = arith.constant 0 : i32
    %c0_i32_0 = arith.constant 0 : i32
    %c0_i32_1 = arith.constant 0 : i32
    return %c0_i32, %c0_i32_0 : i32, i32
  }
  func.func @transform_8(%arg0: i32, %arg1: i32) -> (i32, i32, i32, i32) {
    %c0_i32 = arith.constant 0 : i32
    %c0_i32_0 = arith.constant 0 : i32
    %c0_i32_1 = arith.constant 0 : i32
    return %arg0, %arg1, %c0_i32, %c0_i32_0 : i32, i32, i32, i32
  }
}

</mosaic_0001>

<bundles_post_ra>
// kernel: tpu_custom_call.1
= control target key start
LH: loop header
LB: loop body
LE: loop exit
PB: predicated region body
PF: predicated region fallthrough
CT: control target
= control target key end

     0   :  { %13 = vsyncpa [#allocation5], 0  ;;  %s14920_s0 = inlined_call_operand.vmem [shape: bf16[2,8,1024], index: 0, kind: input, shape index: {}]   ;;  %s14921_s1 = inlined_call_operand.vmem [shape: bf16[2,12,8], index: 1, kind: input, shape index: {}]   ;;  %s14922_s2 = inlined_call_operand.vmem [shape: bf16[3,3,64,32], index: 2, kind: input, shape index: {}]   ;;  %s14923_s3 = inlined_call_operand.vmem [shape: f32[1,32], index: 3, kind: input, shape index: {}]   ;;  %s14924_s4 = inlined_call_operand.vmem [shape: f32[1,32], index: 4, kind: input, shape index: {}]   ;;  %s14925_s5 = inlined_call_operand.vmem [shape: bf16[3,3,32,32], index: 5, kind: input, shape index: {}]   ;;  %s14926_s6 = inlined_call_operand.vmem [shape: f32[1,32], index: 6, kind: input, shape index: {}]   ;;  %s14927_s7 = inlined_call_operand.vmem [shape: f32[1,32], index: 7, kind: input, shape index: {}]   ;;  %s14928_s8 = inlined_call_operand.hbm [shape: f32[2,16,16,32], index: 8, kind: output, shape index: {}]  }
   0x1   :  { %15 = vsyncpa [#allocation5 + $0x1], 0  ;;  %s11289_s27 = smov 0   ;;  %s11291_s28 = smov 0  }
   0x2   :  { %s11293_s29 = smov 0   ;;  %s11295_s30 = smov 0  }
   0x3   :  { %s11297_s9 = smov 0   ;;  %s11299_s10 = smov 0  }
   0x4   :  { %s11301_s11 = smov 0   ;;  %s11303_s12 = smov 0  }
   0x5 LB: > { %s9339_s13 = sadd.s32 4294967295, %s11233_s12   ;;  %s9340_s14 = sadd.s32 4294967294, %s11233_s12   ;;  %s11233_s12 = sphi %s11303_s12, %s21_s12   ;;  %s11229_s11 = sphi %s11301_s11, %s15154_s11   ;;  %s11225_s10 = sphi %s11299_s10, %s15153_s10   ;;  %s11221_s9 = sphi %s11297_s9, %s15152_s9   ;;  %s11217_s30 = sphi %s11295_s30, %s15151_s30   ;;  %s11213_s29 = sphi %s11293_s29, %s15150_s29   ;;  %s11209_s28 = sphi %s11291_s28, %s15149_s28   ;;  %s11205_s27 = sphi %s11289_s27, %s15148_s27  }
   0x6   : > { %s30_s15 = sadd.s32 1, %s11225_s10  ;;  %s33_s16 = sadd.s32 1, %s11229_s11 }
   0x7   : > { %p31_p0 = scmp.ge.s32.totalorder %s30_s15, 2  ;;  %p230_p1 = scmp.ne.s32.totalorder %s11213_s29, %s11209_s28 }
   0x8   : > { %p231_p2 = scmp.eq.s32.totalorder %s9339_s13, 3  ;;  %p236_p5 = scmp.ne.s32.totalorder %s11209_s28, %s11205_s27 }
   0x9   : > { %s15156_s15 = smov (%p31_p0, %s30_s15), 0  ;;  %s15158_s16 = smov (!%p31_p0, %s33_s16), %s11229_s11 }
   0xa   : > { %14988 = sst [smem:[#allocation7_spill]] %s15156_s15  ;;  %s216_s17 = ssub.s32 %s11225_s10, %s15156_s15 }
   0xb   : > { %p11340_p3 = por %p231_p2, %p230_p1  ;;  %p35_p4 = scmp.ge.s32.totalorder %s15158_s16, 2 }
   0xc   : > { %p237_p6 = scmp.eq.s32.totalorder %s9340_s14, 3  ;;  %p9343_p7 = scmp.ge.s32.totalorder %s11233_s12, 1 }
   0xd   : > { %s15160_s16 = smov (%p35_p4, %s15158_s16), 0  ;;  %p289_p9 = scmp.lt.s32.totalorder %s11233_s12, 5 }
   0xe   : > { %14990 = sst [smem:[#allocation8_spill]] %s15160_s16  ;;  %p11349_p8 = por %p237_p6, %p236_p5 }
   0xf   : > { %s215_s20 = ssub.s32 %s11229_s11, %s15160_s16  ;;  %s220_s21 = sadd.s32 1, %s11213_s29 }
  0x10   : > { %s217_s22 = sor.u32 %s216_s17, %s215_s20  ;;  %p290_p10 = pnand %p9343_p7, %p289_p9 }
  0x11   : > { %p218_p11 = scmp.eq.s32.totalorder %s217_s22, 0 }
  0x12   : > { %293 = sbr.rel (%p290_p10) target bundleno = 1617 (0x651), region = 52 }
  0x13   : > { %s11358_s23 = scalar_select %p218_p11, %s11213_s29, %s220_s21  }
  0x19   : > { %s14931_s24 = sand.u32 1, %s11209_s28   ;;  %p328_p12 = scmp.lt.s32.totalorder %s11221_s9, 1  ;;  %v11235_v0 = vmov 0   ;;  %vm515_vm0 = vcmask 1043456   ;;  %vm511_vm1 = vcmask 64512   ;;  %vm340_vm2 = vcmask 516096  }
  0x1a   : > { %s11364_s25 = sshll.u32 %s14931_s24, 7  ;;  %572 = vmatprep.mubr.bf16.mxu0 %v11235_v0  ;;  %615 = vmatprep.mubr.bf16.mxu1 %v11235_v0  ;;  %p333_p13 = scmp.lt.s32.totalorder %s11217_s30, 1  ;;  %vm341_vm3 = vsmask.f32 256  ;;  %v343_v19 = vld [vmem:[#allocation2] sm:$0x1]  ;;  %v725_v45 = vlaneseq }
  0x1b   : > { %s329_s26 = scalar_select %p328_p12, %s11221_s9, 1  ;;  %vm11385_vm4 = vmand %vm340_vm2, %vm341_vm3  ;;  %v367_v20 = vld [vmem:[#allocation2 + $0x60] sm:$0x1]  ;;  %v346_v23 = vld [vmem:[#allocation2 + $0xc] sm:$0x1]  ;;  %v11237_v55 = vmov 286326784  }
  0x1c   : > { %s334_s13 = scalar_select %p333_p13, %s11217_s30, 1  ;;  %v344_v21 = vsel %vm11385_vm4, 0, %v343_v19  ;;  %v368_v22 = vsel %vm11385_vm4, 0, %v367_v20  ;;  %v347_v24 = vsel %vm11385_vm4, 0, %v346_v23  ;;  %v349_v25 = vld [vmem:[#allocation2 + $0x18] sm:$0x1]  ;;  %v793_v56 = vunpack.c.l.s4 %v11237_v55 }
  0x1d   : > { %s9983_s14 = sshll.u32 %s329_s26, 5  ;;  %345 = vst [vmem:[#allocation2] sm:$0x1] %v344_v21  ;;  %369 = vst [vmem:[#allocation2 + $0x60] sm:$0x1] %v368_v22  ;;  %v350_v26 = vsel %vm11385_vm4, 0, %v349_v25 }
  0x1e   : > { %s332_s21 = scalar_lea.vmem %s14920_s0, %s9983_s14  ;;  %s9984_s22 = sshll.u32 %s334_s13, 3  ;;  %348 = vst [vmem:[#allocation2 + $0xc] sm:$0x1] %v347_v24  ;;  %351 = vst [vmem:[#allocation2 + $0x18] sm:$0x1] %v350_v26  ;;  %v726_v47 = vshrl.u32 %v725_v45, 7 }
  0x1f   : > { %v482_v1 = vld [vmem:[%s332_s21] sm:$0xff]  ;;  %v483_v2 = vld [vmem:[%s332_s21 + $0x8] sm:$0xff]  ;;  %s337_s24 = scalar_lea.vmem %s14921_s1, %s9984_s22  ;;  %v484_v3 = vld [vmem:[%s332_s21 + $0x10] sm:$0xff]  ;;  %v11236_v43 = vmov 1966171168   ;;  %s11238_s15 = smov 64  }
  0x20   : > { %v9351_v4 = vcombine.high %v482_v1, %v482_v1  ;;  %v9353_v5 = vcombine.high %v483_v2, %v483_v2  ;;  %v9350_v6 = vcombine.low %v482_v1, %v482_v1  ;;  %v9352_v7 = vcombine.low %v483_v2, %v483_v2  ;;  %v11025_v8 = vld [vmem:[%s337_s24] sm:$0x3f]   ;;  %v485_v11 = vld [vmem:[%s332_s21 + $0x18] sm:$0xff]  ;;  %v355_v27 = vld [vmem:[#allocation2 + $0x30] sm:$0x1]  ;;  %p9754_p0 = scmp.ne.s32.totalorder %s11217_s30, 0 }
  0x21   : > { %v9355_v9 = vcombine.high %v484_v3, %v484_v3  ;;  %v9354_v10 = vcombine.low %v484_v3, %v484_v3  ;;  %v9357_v14 = vcombine.high %v485_v11, %v485_v11  ;;  %v9356_v15 = vcombine.low %v485_v11, %v485_v11  ;;  %v361_v29 = vld [vmem:[#allocation2 + $0x48] sm:$0x1]  ;;  %v352_v31 = vld [vmem:[#allocation2 + $0x24] sm:$0x1]  ;;  %v358_v33 = vld [vmem:[#allocation2 + $0x3c] sm:$0x1] }
  0x22   : > { %9358 = vmatprep.subr.msk.bf16.mxu0 %vm515_vm0, %v9351_v4  ;;  %9360 = vmatprep.subr.msk.bf16.mxu1 %vm515_vm0, %v9353_v5  ;;  %v517_v12 = vsel %vm515_vm0, %v9350_v6, 0  ;;  %v523_v13 = vsel %vm515_vm0, %v9352_v7, 0  ;;  %v356_v28 = vsel %vm11385_vm4, 0, %v355_v27  ;;  %v362_v30 = vsel %vm11385_vm4, 0, %v361_v29  ;;  %v364_v35 = vld [vmem:[#allocation2 + $0x54] sm:$0x1] }
  0x23   : > { %541 = vmatpush1.bf16.msra.mxu0 %v517_v12  ;;  %584 = vmatpush1.bf16.msra.mxu1 %v523_v13  ;;  %v529_v16 = vsel %vm515_vm0, %v9354_v10, 0  ;;  %v535_v17 = vsel %vm515_vm0, %v9356_v15, 0  ;;  %357 = vst [vmem:[#allocation2 + $0x30] sm:$0x1] %v356_v28  ;;  %363 = vst [vmem:[#allocation2 + $0x48] sm:$0x1] %v362_v30  ;;  %v723_v44 = vunpack.c.l.s4 %v11236_v43 }
  0x24   : > { %9362 = vmatprep.subr.msk.bf16.mxu0 %vm515_vm0, %v9355_v9  ;;  %9364 = vmatprep.subr.msk.bf16.mxu1 %vm515_vm0, %v9357_v14  ;;  %v353_v32 = vsel %vm11385_vm4, 0, %v352_v31  ;;  %v359_v34 = vsel %vm11385_vm4, 0, %v358_v33  ;;  %v365_v36 = vsel %vm11385_vm4, 0, %v364_v35  ;;  %v370_v37 = vld [vmem:[#allocation2 + $0x6c] sm:$0x1]  ;;  %vm1522_vm7 = vcmask 519171  }
  0x25   : > { %354 = vst [vmem:[#allocation2 + $0x24] sm:$0x1] %v353_v32  ;;  %360 = vst [vmem:[#allocation2 + $0x3c] sm:$0x1] %v359_v34  ;;  %v371_v38 = vsel %vm11385_vm4, 0, %v370_v37  ;;  %v724_v46 = vunpack.c.0.s8 %v723_v44  ;;  %vm960_vm9 = vcmask 517121  }
  0x26   : > { %9359 = vmatmul.mubr.msk.bf16.vlgmr.msra.gmra.mrb[0].mxu0 %vm511_vm1, %v11025_v8  ;;  %9361 = vmatmul.mubr.msk.bf16.vlgmr.msra.gmra.mrb[0].mxu1 %vm511_vm1, %v11025_v8  ;;  %366 = vst [vmem:[#allocation2 + $0x54] sm:$0x1] %v365_v36  ;;  %372 = vst [vmem:[#allocation2 + $0x6c] sm:$0x1] %v371_v38  ;;  %v373_v39 = vld [vmem:[#allocation2 + $0x78] sm:$0x1] }
  0x27   : > { %627 = vmatpush1.bf16.msra.mxu0 %v529_v16  ;;  %658 = vmatprep.mubr.bf16.mxu0 %v11235_v0  ;;  %v374_v40 = vsel %vm11385_vm4, 0, %v373_v39  ;;  %v376_v41 = vld [vmem:[#allocation2 + $0x84] sm:$0x1]  ;;  %v11413_v52 = vsub.s32 %v724_v46, %v726_v47  ;;  %vm379_vm5 = vsmask.f32 7938  ;;  %v14994_v39 = vmov 0 }
  0x28   : > { %670 = vmatpush1.bf16.msra.mxu1 %v535_v17  ;;  %701 = vmatprep.mubr.bf16.mxu1 %v11235_v0  ;;  %375 = vst [vmem:[#allocation2 + $0x78] sm:$0x1] %v374_v40  ;;  %v377_v42 = vsel %vm11385_vm4, 0, %v376_v41  ;;  %vm11477_vm6 = vmand %vm340_vm2, %vm379_vm5  ;;  %v888_v40 = vld [vmem:[#allocation2] sm:$0x1]  ;;  %vm1241_vm15 = vcmask 518146  }
  0x29   : > { %378 = vst [vmem:[#allocation2 + $0x84] sm:$0x1] %v377_v42  ;;  %v14995_v39 = vsel %vm11477_vm6, 4294967295, %v14994_v39  ;;  %v912_v46 = vld [vmem:[#allocation2 + $0x60] sm:$0x1] }
  0x2a   : > { %14996 = vst [vmem:[#allocation9_spill] sm:$0xff] %v14995_v39  ;;  %vm1523_vm8 = vsmask.f32 3328  ;;  %vm961_vm10 = vsmask.f32 1280 }
  0x2b   : > { %vm12008_vm11 = vmand %vm1522_vm7, %vm1523_vm8  ;;  %vm1729_vm13 = vsmask.f32 7950  ;;  %vm1167_vm14 = vsmask.f32 7942  ;;  %vm1242_vm0 = vsmask.f32 2304 }
  0x2c   : > { %vm12017_vm12 = vmand %vm960_vm9, %vm961_vm10 }
  0x2d   : > { %vm12066_vm2 = vmand %vm1241_vm15, %vm1242_vm0  ;;  %vm2981_vm0 = vsmask.f32 7440 }
  0x2e   : > { %9363 = vmatmul.mubr.msk.bf16.vlgmr.msra.gmra.mrb[4].mxu0 %vm511_vm1, %v11025_v8  ;;  %9365 = vmatmul.mubr.msk.bf16.vlgmr.msra.gmra.mrb[4].mxu1 %vm511_vm1, %v11025_v8  ;;  %v794_v8 = vunpack.c.0.s8 %v793_v56  ;;  %vm12052_vm1 = vmand %vm1522_vm7, %vm1729_vm13  ;;  %vm3286_vm13 = vcmask 523264  }
  0x2f   : > { %vm12072_vm7 = vmand %vm960_vm9, %vm1167_vm14  ;;  %vm1448_vm9 = vsmask.f32 7946  ;;  %vm3677_vm14 = vcmask 1042432  }
  0x30   : > { %v11448_v25 = vsub.s32 %v794_v8, %v726_v47  ;;  %vm12122_vm10 = vmand %vm1241_vm15, %vm1448_vm9  ;;  %vm3678_vm15 = vcmask 1046532  }
  0x31   : > { %vm12805_vm9 = vmor %vm3677_vm14, %vm3678_vm15 }
  0x32   : > { %vm12848_vm14 = vmor %vm1523_vm8, %vm2981_vm0 }
  0xf9   : > { %v574_v48 = vpop.f32.mrb[0].mxu0  ;;  %v617_v49 = vpop.f32.mrb[0].mxu1 }
  0xfa   : > { %v576_v50 = vpop.f32.mrb[1].mxu0  ;;  %v619_v51 = vpop.f32.mrb[1].mxu1 }
  0xfb   : > { %v578_v53 = vpop.f32.mrb[2].mxu0  ;;  %v621_v54 = vpop.f32.mrb[2].mxu1 }
  0xfc   : > { %v712_v57 = vpack.c.bf16 %v578_v53, %v574_v48  ;;  %v9366_v58 = vpack.c.bf16 %v578_v53, %v578_v53  ;;  %v714_v59 = vpack.c.bf16 %v621_v54, %v617_v49  ;;  %v9380_v60 = vpack.c.bf16 %v621_v54, %v621_v54  ;;  %v580_v61 = vpop.f32.mrb[3].mxu0  ;;  %v623_v62 = vpop.f32.mrb[3].mxu1 }
  0xfd   : > { %v713_v63 = vpack.c.bf16 %v580_v61, %v576_v50  ;;  %v9373_v0 = vpack.c.bf16 %v580_v61, %v580_v61  ;;  %v715_v1 = vpack.c.bf16 %v623_v62, %v619_v51  ;;  %v9387_v2 = vpack.c.bf16 %v623_v62, %v623_v62  ;;  %v891_v61 = vld [vmem:[#allocation2 + $0xc] sm:$0x1] }
  0xfe   : > { %v728_v3 = vrot.slane %v712_v57, %v11413_v52  ;;  %v735_v4 = vrot.slane %v9366_v58, %v11413_v52  ;;  %v11418_v5 = vrot.slane %v714_v59, %v11413_v52  ;;  %v1295_v6 = vrot.slane %v9380_v60, %v11413_v52  ;;  %v894_v59 = vld [vmem:[#allocation2 + $0x18] sm:$0x1] }
  0xff   : > { %v1014_v7 = vrot.slane %v9373_v0, %v11413_v52  ;;  %v1576_v10 = vrot.slane %v9387_v2, %v11413_v52  ;;  %v11429_v14 = vrot.slane %v715_v1, %v11413_v52  ;;  %v1007_v32 = vrot.slane %v713_v63, %v11413_v52 }
 0x100   : > { %v737_v9 = vcombine.high %v735_v4, %v735_v4  ;;  %v744_v11 = vrot.slane %v728_v3, %v11413_v52  ;;  %v1297_v12 = vcombine.high %v1295_v6, %v1295_v6  ;;  %v11426_v13 = vrot.slane %v11418_v5, %v11413_v52 }
 0x101   : > { %v11431_v15 = vpop.f32.mrb[4].mxu0  ;;  %v11433_v16 = vpop.f32.mrb[4].mxu1  ;;  %v736_v17 = vcombine.high %v728_v3, %v728_v3  ;;  %v11436_v19 = vrot.slane %v735_v4, %v11413_v52  ;;  %v1016_v21 = vcombine.high %v1014_v7, %v1014_v7  ;;  %v1578_v29 = vcombine.high %v1576_v10, %v1576_v10 }
 0x102   : > { %v11439_v20 = vrot.slane %v737_v9, %v11413_v52  ;;  %v11441_v22 = vpop.f32.mrb[5].mxu0  ;;  %v11443_v23 = vpop.f32.mrb[5].mxu1  ;;  %v11446_v24 = vrot.slane %v1297_v12, %v11413_v52  ;;  %v11464_v33 = vrot.slane %v11429_v14, %v11413_v52  ;;  %v9381_v34 = vpack.i.b16 %v11426_v13, %v11426_v13 }
 0x103   : > { %v11450_v26 = vpop.f32.mrb[6].mxu0  ;;  %v11452_v27 = vpop.f32.mrb[6].mxu1  ;;  %v11455_v28 = vrot.slane %v1016_v21, %v11413_v52  ;;  %v9367_v35 = vpack.i.b16 %v744_v11, %v744_v11  ;;  %v758_v36 = vrot.slane %v736_v17, %v11413_v52  ;;  %v11470_v37 = vrot.slane %v1295_v6, %v11413_v52 }
 0x104   : > { %v11457_v30 = vpop.f32.mrb[7].mxu0  ;;  %v11459_v31 = vpop.f32.mrb[7].mxu1  ;;  %v11473_v38 = vrot.slane %v1578_v29, %v11413_v52  ;;  %v9371_v41 = vpack.i.b16 %v11436_v19, %v11436_v19  ;;  %v11484_v42 = vrot.slane %v1014_v7, %v11413_v52  ;;  %v11487_v43 = vrot.slane %v9381_v34, %v11448_v25 }
 0x105   : > { %v798_v44 = vrot.slane %v9367_v35, %v11448_v25  ;;  %v9388_v45 = vpack.i.b16 %v11464_v33, %v11464_v33  ;;  %v11494_v48 = vrot.slane %v1007_v32, %v11413_v52  ;;  %v769_v50 = vunpack.i.h.s16 %v744_v11 }
 0x106   : > { %v854_v47 = vrot.slane %v9371_v41, %v11448_v25  ;;  %1486 = vrot.lane.b32.xlu1 %v11487_v43, %s11238_s15  ;;  %v11502_v51 = vrot.slane %v1576_v10, %v11413_v52  ;;  %v9385_v54 = vpack.i.b16 %v11470_v37, %v11470_v37  ;;  %v9368_v55 = vpack.i.b16 %v758_v36, %v758_v36  ;;  %v900_v10 = vld [vmem:[#allocation2 + $0x30] sm:$0x1] }
 0x107   : > { %924 = vrot.lane.b32.xlu0 %v798_v44, %s11238_s15  ;;  %v889_v49 = vsel %vm11477_vm6, %v798_v44, %v888_v40  ;;  %v11509_v56 = vrot.slane %v9388_v45, %v11448_v25  ;;  %v9378_v57 = vpack.i.b16 %v11484_v42, %v11484_v42  ;;  %v781_v58 = vpack.i.b16 %v769_v50, %v769_v50  ;;  %v906_v45 = vld [vmem:[#allocation2 + $0x48] sm:$0x1] }
 0x108   : > { %890 = vst [vmem:[#allocation2] sm:$0x1] %v889_v49  ;;  %v913_v53 = vsel %vm11477_vm6, %v854_v47, %v912_v46  ;;  %v766_v60 = vcombine.high %v744_v11, %v744_v11  ;;  %v812_v62 = vrot.slane %v9368_v55, %v11448_v25  ;;  %v1296_v63 = vcombine.high %v11418_v5, %v11418_v5  ;;  %v897_v46 = vld [vmem:[#allocation2 + $0x24] sm:$0x1] }
 0x109   : > { %914 = vst [vmem:[#allocation2 + $0x60] sm:$0x1] %v913_v53  ;;  %v1015_v0 = vcombine.high %v1007_v32, %v1007_v32  ;;  %v805_v1 = vrot.slane %v781_v58, %v11448_v25  ;;  %v1577_v2 = vcombine.high %v11429_v14, %v11429_v14  ;;  %v11523_v3 = vrot.slane %v9385_v54, %v11448_v25 }
 0x10a   : > { %1767 = vrot.lane.b32.xlu1 %v11509_v56, %s11238_s15  ;;  %v895_v4 = vsel %vm11477_vm6, %v812_v62, %v894_v59  ;;  %v9369_v6 = vpack.i.b16 %v766_v60, %v766_v60  ;;  %v11528_v5 = vrot.slane %v9378_v57, %v11448_v25  ;;  %v9392_v7 = vpack.i.b16 %v11502_v51, %v11502_v51 }
 0x10b   : > { %940 = vrot.lane.b32.xlu0 %v854_v47, %s11238_s15  ;;  %v9374_v8 = vpack.i.b16 %v11494_v48, %v11494_v48  ;;  %v892_v9 = vsel %vm11477_vm6, %v805_v1, %v891_v61  ;;  %896 = vst [vmem:[#allocation2 + $0x18] sm:$0x1] %v895_v4  ;;  %v11540_v12 = vrot.slane %v1296_v63, %v11413_v52  ;;  %v771_v17 = vunpack.i.h.s16 %v758_v36  ;;  %v903_v61 = vld [vmem:[#allocation2 + $0x3c] sm:$0x1] }
 0x10c   : > { %893 = vst [vmem:[#allocation2 + $0xc] sm:$0x1] %v892_v9  ;;  %v11537_v11 = vrot.slane %v9369_v6, %v11448_v25  ;;  %v11546_v14 = vcombine.high %v758_v36, %v758_v36  ;;  %v11549_v21 = vrot.slane %v1015_v0, %v11413_v52  ;;  %v11552_v29 = vrot.slane %v1577_v2, %v11413_v52 }
 0x10d   : > { %v1329_v32 = vunpack.i.h.s16 %v11426_v13  ;;  %v11559_v35 = vrot.slane %v9392_v7, %v11448_v25  ;;  %v11562_v40 = vrot.slane %v9374_v8, %v11448_v25  ;;  %v783_v41 = vpack.i.b16 %v771_v17, %v771_v17 }
 0x10e   : > { %1221 = vrot.lane.b32.xlu1 %v11528_v5, %s11238_s15  ;;  %v901_v34 = vsel %vm11477_vm6, %v11537_v11, %v900_v10  ;;  %v9370_v36 = vpack.i.b16 %v11546_v14, %v11546_v14  ;;  %v11568_v44 = vcombine.high %v11426_v13, %v11426_v13  ;;  %v773_v47 = vunpack.i.h.s16 %v766_v60 }
 0x10f   : > { %1502 = vrot.lane.b32.xlu0 %v11523_v3, %s11238_s15  ;;  %902 = vst [vmem:[#allocation2 + $0x30] sm:$0x1] %v901_v34  ;;  %v9382_v49 = vpack.i.b16 %v11540_v12, %v11540_v12  ;;  %v11580_v53 = vrot.slane %v783_v41, %v11448_v25  ;;  %v1341_v13 = vpack.i.b16 %v1329_v32, %v1329_v32  ;;  %v1048_v58 = vunpack.i.h.s16 %v11494_v48 }
 0x110   : > { %v11577_v50 = vrot.slane %v9370_v36, %v11448_v25  ;;  %v9375_v54 = vpack.i.b16 %v11549_v21, %v11549_v21  ;;  %v785_v55 = vpack.i.b16 %v773_v47, %v773_v47  ;;  %v9389_v57 = vpack.i.b16 %v11552_v29, %v11552_v29 }
 0x111   : > { %v898_v60 = vsel %vm11477_vm6, %v11580_v53, %v897_v46  ;;  %v9383_v63 = vpack.i.b16 %v11568_v44, %v11568_v44  ;;  %v11601_v2 = vrot.slane %v9382_v49, %v11448_v25  ;;  %v11604_v4 = vrot.slane %v1341_v13, %v11448_v25 }
 0x112   : > { %1783 = vrot.lane.b32.xlu1 %v11559_v35, %s11238_s15  ;;  %v907_v59 = vsel %vm11477_vm6, %v11577_v50, %v906_v45  ;;  %899 = vst [vmem:[#allocation2 + $0x24] sm:$0x1] %v898_v60  ;;  %v11596_v0 = vrot.slane %v785_v55, %v11448_v25  ;;  %v11607_v6 = vrot.slane %v9375_v54, %v11448_v25  ;;  %v775_v46 = vunpack.i.h.s16 %v11546_v14 }
 0x113   : > { %1205 = vrot.lane.b32.xlu0 %v11562_v40, %s11238_s15  ;;  %908 = vst [vmem:[#allocation2 + $0x48] sm:$0x1] %v907_v59  ;;  %v716_v8 = vpack.c.bf16 %v11450_v26, %v11431_v15  ;;  %v9394_v9 = vpack.c.bf16 %v11450_v26, %v11450_v26  ;;  %v717_v10 = vpack.c.bf16 %v11457_v30, %v11441_v22  ;;  %v1610_v22 = vunpack.i.h.s16 %v11464_v33 }
 0x114   : > { %v904_v7 = vsel %vm11477_vm6, %v11596_v0, %v903_v61  ;;  %v11622_v17 = vrot.slane %v9383_v63, %v11448_v25  ;;  %v11626_v32 = vcombine.high %v11494_v48, %v11494_v48  ;;  %v9401_v34 = vpack.c.bf16 %v11457_v30, %v11457_v30 }
 0x115   : > { %905 = vst [vmem:[#allocation2 + $0x3c] sm:$0x1] %v904_v7  ;;  %v1847_v15 = vrot.slane %v716_v8, %v11413_v52  ;;  %v11638_v26 = vcombine.high %v11464_v33, %v11464_v33  ;;  %v1854_v48 = vrot.slane %v9394_v9, %v11413_v52  ;;  %v2123_v36 = vrot.slane %v717_v10, %v11413_v52 }
 0x116   : > { %926 = vrot.lane.b32.xlu1 %v805_v1, %s11238_s15  ;;  %v11615_v1 = vrot.slane %v9389_v57, %v11448_v25  ;;  %v2130_v30 = vrot.slane %v9401_v34, %v11413_v52  ;;  %v9376_v54 = vpack.i.b16 %v11626_v32, %v11626_v32  ;;  %v718_v60 = vpack.c.bf16 %v11452_v27, %v11433_v16 }
 0x117   : > { %928 = vrot.lane.b32.xlu0 %v812_v62, %s11238_s15  ;;  %v1060_v62 = vpack.i.b16 %v1048_v58, %v1048_v58  ;;  %v1855_v41 = vcombine.high %v1847_v15, %v1847_v15  ;;  %v11643_v45 = vrot.slane %v1847_v15, %v11413_v52  ;;  %v1856_v47 = vcombine.high %v1854_v48, %v1854_v48 }
 0x118   : > { %v11648_v49 = vrot.slane %v1854_v48, %v11413_v52  ;;  %v2131_v13 = vcombine.high %v2123_v36, %v2123_v36  ;;  %v11651_v33 = vrot.slane %v2123_v36, %v11413_v52  ;;  %v2132_v57 = vcombine.high %v2130_v30, %v2130_v30 }
 0x119   : > { %v11656_v55 = vrot.slane %v1855_v41, %v11413_v52  ;;  %v11659_v58 = vrot.slane %v2130_v30, %v11413_v52  ;;  %v11666_v14 = vrot.slane %v1856_v47, %v11413_v52  ;;  %v11674_v61 = vrot.slane %v1060_v62, %v11448_v25 }
 0x11a   : > { %1488 = vrot.lane.b32.xlu1 %v11604_v4, %s11238_s15  ;;  %v11669_v59 = vrot.slane %v2131_v13, %v11413_v52  ;;  %v11677_v63 = vrot.slane %v2132_v57, %v11413_v52  ;;  %v719_v7 = vpack.c.bf16 %v11459_v31, %v11443_v23  ;;  %v1622_v8 = vpack.i.b16 %v1610_v22, %v1610_v22 }
 0x11b   : > { %1490 = vrot.lane.b32.xlu0 %v11601_v2, %s11238_s15  ;;  %v2399_v9 = vrot.slane %v718_v60, %v11413_v52  ;;  %v9415_v10 = vpack.c.bf16 %v11459_v31, %v11459_v31  ;;  %v787_v15 = vpack.i.b16 %v775_v46, %v775_v46  ;;  %v11687_v16 = vrot.slane %v9376_v54, %v11448_v25  ;;  %v909_v46 = vld [vmem:[#allocation2 + $0x54] sm:$0x1] }
 0x11c   : > { %v9390_v62 = vpack.i.b16 %v11638_v26, %v11638_v26 }
 0x11d   : > { %v2407_v23 = vcombine.high %v2399_v9, %v2399_v9  ;;  %v11698_v31 = vrot.slane %v2399_v9, %v11413_v52  ;;  %v2682_v22 = vrot.slane %v9415_v10, %v11413_v52  ;;  %v11714_v57 = vrot.slane %v787_v15, %v11448_v25 }
 0x11e   : > { %1209 = vrot.lane.b32.xlu1 %v11607_v6, %s11238_s15  ;;  %v11733_v10 = vrot.slane %v1622_v8, %v11448_v25  ;;  %v11736_v15 = vrot.slane %v9390_v62, %v11448_v25  ;;  %v1333_v8 = vunpack.i.h.s16 %v11568_v44  ;;  %v1052_v44 = vunpack.i.h.s16 %v11626_v32 }
 0x11f   : > { %932 = vrot.lane.b32.xlu0 %v11537_v11, %s11238_s15  ;;  %v9408_v11 = vpack.c.bf16 %v11452_v27, %v11452_v27  ;;  %v2675_v27 = vrot.slane %v719_v7, %v11413_v52  ;;  %v11708_v47 = vrot.slane %v2407_v23, %v11413_v52  ;;  %v2684_v13 = vcombine.high %v2682_v22, %v2682_v22 }
 0x120   : > { %v11711_v54 = vrot.slane %v2682_v22, %v11413_v52  ;;  %v910_v9 = vsel %vm11477_vm6, %v11714_v57, %v909_v46  ;;  %v1050_v22 = vunpack.i.h.s16 %v11549_v21 }
 0x121   : > { %v2406_v34 = vrot.slane %v9408_v11, %v11413_v52  ;;  %v2683_v41 = vcombine.high %v2675_v27, %v2675_v27  ;;  %v11705_v30 = vrot.slane %v2675_v27, %v11413_v52  ;;  %v11727_v7 = vrot.slane %v2684_v13, %v11413_v52  ;;  %911 = vst [vmem:[#allocation2 + $0x54] sm:$0x1] %v910_v9 }
 0x122   : > { %1771 = vrot.lane.b32.xlu1 %v11615_v1, %s11238_s15  ;;  %v1331_v27 = vunpack.i.h.s16 %v11540_v12  ;;  %v1046_v9 = vcombine.high %v11549_v21, %v11549_v21 }
 0x123   : > { %1494 = vrot.lane.b32.xlu0 %v11622_v17, %s11238_s15  ;;  %v2408_v48 = vcombine.high %v2406_v34, %v2406_v34  ;;  %v11702_v36 = vrot.slane %v2406_v34, %v11413_v52  ;;  %v11720_v11 = vrot.slane %v2683_v41, %v11413_v52  ;;  %v1327_v34 = vcombine.high %v11540_v12, %v11540_v12 }
 0x124   : > { %v1343_v23 = vpack.i.b16 %v1331_v27, %v1331_v27  ;;  %v1612_v41 = vunpack.i.h.s16 %v11552_v29  ;;  %v9377_v21 = vpack.i.b16 %v1046_v9, %v1046_v9 }
 0x125   : > { %v11717_v60 = vrot.slane %v2408_v48, %v11413_v52  ;;  %v9384_v52 = vpack.i.b16 %v1327_v34, %v1327_v34  ;;  %v1062_v48 = vpack.i.b16 %v1050_v22, %v1050_v22  ;;  %v1614_v22 = vunpack.i.h.s16 %v11638_v26 }
 0x126   : > { %1213 = vrot.lane.b32.xlu1 %v11687_v16, %s11238_s15  ;;  %v11755_v62 = vrot.slane %v1343_v23, %v11448_v25  ;;  %v1624_v13 = vpack.i.b16 %v1612_v41, %v1612_v41  ;;  %v1064_v23 = vpack.i.b16 %v1052_v44, %v1052_v44 }
 0x127   : > { %1207 = vrot.lane.b32.xlu0 %v11674_v61, %s11238_s15  ;;  %v11752_v12 = vrot.slane %v9384_v52, %v11448_v25  ;;  %v11765_v46 = vrot.slane %v1062_v48, %v11448_v25  ;;  %v915_v52 = vld [vmem:[#allocation2 + $0x6c] sm:$0x1]  ;;  %v1608_v48 = vcombine.high %v11552_v29, %v11552_v29  ;;  %v1626_v41 = vpack.i.b16 %v1614_v22, %v1614_v22 }
 0x128   : > { %14998 = vst [vmem:[#allocation11_spill] sm:$0xff] %v11755_v62  ;;  %v11793_v26 = vrot.slane %v1064_v23, %v11448_v25  ;;  %v1054_v29 = vunpack.i.h.s16 %v1046_v9 }
 0x129   : > { %14997 = vst [vmem:[#allocation10_spill] sm:$0xff] %v11752_v12  ;;  %v11803_v44 = vrot.slane %v1626_v41, %v11448_v25  ;;  %v1616_v23 = vunpack.i.h.s16 %v1608_v48  ;;  %v9395_v41 = vpack.i.b16 %v11643_v45, %v11643_v45 }
 0x12a   : > { %1775 = vrot.lane.b32.xlu1 %v11736_v15, %s11238_s15  ;;  %15000 = vst [vmem:[#allocation13_spill] sm:$0xff] %v11793_v26 }
 0x12b   : > { %1769 = vrot.lane.b32.xlu0 %v11733_v10, %s11238_s15  ;;  %15001 = vst [vmem:[#allocation14_spill] sm:$0xff] %v11803_v44 }
 0x12e   : > { %930 = vrot.lane.b32.xlu1 %v11580_v53, %s11238_s15  ;;  %v1345_v53 = vpack.i.b16 %v1333_v8, %v1333_v8  ;;  %v11781_v8 = vrot.slane %v1624_v13, %v11448_v25 }
 0x12f   : > { %936 = vrot.lane.b32.xlu0 %v11577_v50, %s11238_s15  ;;  %v777_v50 = vunpack.i.h.s16 %v11436_v19 }
 0x130   : > { %v11777_v32 = vrot.slane %v1345_v53, %v11448_v25  ;;  %v9391_v53 = vpack.i.b16 %v1608_v48, %v1608_v48 }
 0x131   : > { %v789_v27 = vpack.i.b16 %v777_v50, %v777_v50  ;;  %v11796_v50 = vrot.slane %v9377_v21, %v11448_v25  ;;  %v1628_v21 = vpack.i.b16 %v1616_v23, %v1616_v23  ;;  %v1888_v23 = vunpack.i.h.s16 %v11643_v45 }
 0x132   : > { %1492 = vrot.lane.b32.xlu1 %v11755_v62, %s11238_s15  ;;  %14999 = vst [vmem:[#allocation12_spill] sm:$0xff] %v11777_v32  ;;  %v11806_v13 = vrot.slane %v9391_v53, %v11448_v25  ;;  %v9402_v53 = vpack.i.b16 %v11651_v33, %v11651_v33 }
 0x133   : > { %1498 = vrot.lane.b32.xlu0 %v11752_v12, %s11238_s15  ;;  %v11774_v19 = vrot.slane %v789_v27, %v11448_v25  ;;  %v1066_v27 = vpack.i.b16 %v1054_v29, %v1054_v29  ;;  %v918_v29 = vld [vmem:[#allocation2 + $0x78] sm:$0x1] }
 0x135   : > { %v11813_v9 = vrot.slane %v1066_v27, %v11448_v25  ;;  %v779_v27 = vunpack.i.h.s16 %v11439_v20 }
 0x136   : > { %934 = vrot.lane.b32.xlu1 %v11596_v0, %s11238_s15  ;;  %v916_v0 = vsel %vm11477_vm6, %v11774_v19, %v915_v52  ;;  %v1335_v52 = vunpack.i.h.s16 %v1327_v34  ;;  %v9372_v34 = vpack.i.b16 %v11439_v20, %v11439_v20 }
 0x137   : > { %1211 = vrot.lane.b32.xlu0 %v11765_v46, %s11238_s15  ;;  %917 = vst [vmem:[#allocation2 + $0x6c] sm:$0x1] %v916_v0  ;;  %15002 = vst [vmem:[#allocation15_spill] sm:$0xff] %v11813_v9  ;;  %v11825_v0 = vrot.slane %v1628_v21, %v11448_v25  ;;  %v11846_v21 = vrot.slane %v9395_v41, %v11448_v25  ;;  %v791_v20 = vpack.i.b16 %v779_v27, %v779_v27 }
 0x138   : > { %v1347_v22 = vpack.i.b16 %v1335_v52, %v1335_v52  ;;  %v9409_v52 = vpack.i.b16 %v11698_v31, %v11698_v31  ;;  %v9399_v41 = vpack.i.b16 %v11648_v49, %v11648_v49  ;;  %v2440_v27 = vunpack.i.h.s16 %v11698_v31 }
 0x139   : > { %15004 = vst [vmem:[#allocation17_spill] sm:$0xff] %v11825_v0 }
 0x13a   : > { %1496 = vrot.lane.b32.xlu1 %v11777_v32, %s11238_s15  ;;  %v11822_v48 = vrot.slane %v1347_v22, %v11448_v25 }
 0x13b   : > { %1773 = vrot.lane.b32.xlu0 %v11781_v8, %s11238_s15 }
 0x13c   : > { %15003 = vst [vmem:[#allocation16_spill] sm:$0xff] %v11822_v48 }
 0x13e   : > { %1217 = vrot.lane.b32.xlu1 %v11796_v50, %s11238_s15 }
 0x13f   : > { %1215 = vrot.lane.b32.xlu0 %v11793_v26, %s11238_s15 }
 0x142   : > { %1779 = vrot.lane.b32.xlu1 %v11806_v13, %s11238_s15 }
 0x143   : > { %1777 = vrot.lane.b32.xlu0 %v11803_v44, %s11238_s15  ;;  %v2442_v44 = vunpack.i.h.s16 %v11708_v47 }
 0x146   : > { %938 = vrot.lane.b32.xlu1 %v11714_v57, %s11238_s15  ;;  %v11832_v57 = vrot.slane %v9372_v34, %v11448_v25  ;;  %v11849_v34 = vrot.slane %v9402_v53, %v11448_v25  ;;  %v1900_v53 = vpack.i.b16 %v1888_v23, %v1888_v23  ;;  %v11879_v23 = vrot.slane %v9399_v41, %v11448_v25 }
 0x147   : > { %1219 = vrot.lane.b32.xlu0 %v11813_v9, %s11238_s15  ;;  %v11863_v9 = vrot.slane %v9409_v52, %v11448_v25  ;;  %v9396_v52 = vpack.i.b16 %v11656_v55, %v11656_v55  ;;  %v9403_v41 = vpack.i.b16 %v11669_v59, %v11669_v59 }
 0x148   : > { %v919_v22 = vsel %vm11477_vm6, %v11832_v57, %v918_v29  ;;  %15005 = vst [vmem:[#allocation18_spill] sm:$0xff] %v11849_v34  ;;  %v11858_v29 = vrot.slane %v791_v20, %v11448_v25  ;;  %v2452_v20 = vpack.i.b16 %v2440_v27, %v2440_v27  ;;  %v11902_v27 = vcombine.high %v11651_v33, %v11651_v33 }
 0x149   : > { %920 = vst [vmem:[#allocation2 + $0x78] sm:$0x1] %v919_v22  ;;  %15007 = vst [vmem:[#allocation20_spill] sm:$0xff] %v11863_v9 }
 0x14a   : > { %1500 = vrot.lane.b32.xlu1 %v11822_v48, %s11238_s15  ;;  %v921_v48 = vld [vmem:[#allocation2 + $0x84] sm:$0x1]  ;;  %15006 = vst [vmem:[#allocation19_spill] sm:$0xff] %v11858_v29  ;;  %v9404_v32 = vpack.i.b16 %v11902_v27, %v11902_v27 }
 0x14b   : > { %1781 = vrot.lane.b32.xlu0 %v11825_v0, %s11238_s15  ;;  %v9406_v0 = vpack.i.b16 %v11659_v58, %v11659_v58  ;;  %v922_v12 = vsel %vm11477_vm6, %v11858_v29, %v921_v48  ;;  %v9410_v48 = vpack.i.b16 %v11708_v47, %v11708_v47 }
 0x14c   : > { %923 = vst [vmem:[#allocation2 + $0x84] sm:$0x1] %v922_v12  ;;  %v11889_v12 = vrot.slane %v9396_v52, %v11448_v25  ;;  %v2437_v52 = vcombine.high %v11698_v31, %v11698_v31  ;;  %v2164_v31 = vunpack.i.h.s16 %v11651_v33 }
 0x14d   : > { %v11866_v22 = vrot.slane %v9406_v0, %v11448_v25  ;;  %v11882_v0 = vrot.slane %v1900_v53, %v11448_v25  ;;  %v1885_v53 = vcombine.high %v11643_v45, %v11643_v45  ;;  %v11915_v45 = vrot.slane %v9403_v41, %v11448_v25 }
 0x14e   : > { %2319 = vrot.lane.b32.xlu1 %v11849_v34, %s11238_s15 }
 0x14f   : > { %2043 = vrot.lane.b32.xlu0 %v11846_v21, %s11238_s15  ;;  %15008 = vst [vmem:[#allocation21_spill] sm:$0xff] %v11866_v22  ;;  %15011 = vst [vmem:[#allocation24_spill] sm:$0xff] %v11915_v45  ;;  %v9397_v34 = vpack.i.b16 %v1885_v53, %v1885_v53 }
 0x151   : > { %v11925_v29 = vrot.slane %v9397_v34, %v11448_v25  ;;  %v2454_v34 = vpack.i.b16 %v2442_v44, %v2442_v44  ;;  %v11959_v44 = vcombine.high %v11708_v47, %v11708_v47 }
 0x152   : > { %2335 = vrot.lane.b32.xlu1 %v11866_v22, %s11238_s15  ;;  %v11894_v22 = vrot.slane %v2452_v20, %v11448_v25  ;;  %v1890_v20 = vunpack.i.h.s16 %v11656_v55 }
 0x153   : > { %2595 = vrot.lane.b32.xlu0 %v11863_v9, %s11238_s15  ;;  %v11912_v9 = vrot.slane %v9410_v48, %v11448_v25  ;;  %v11928_v48 = vrot.slane %v9404_v32, %v11448_v25  ;;  %v9412_v47 = vpack.i.b16 %v11959_v44, %v11959_v44 }
 0x154   : > { %15009 = vst [vmem:[#allocation22_spill] sm:$0xff] %v11894_v22  ;;  %v1902_v41 = vpack.i.b16 %v1890_v20, %v1890_v20  ;;  %v1892_v20 = vunpack.i.h.s16 %v1885_v53  ;;  %v2444_v53 = vunpack.i.h.s16 %v2437_v52 }
 0x155   : > { %15010 = vst [vmem:[#allocation23_spill] sm:$0xff] %v11912_v9  ;;  %15012 = vst [vmem:[#allocation25_spill] sm:$0xff] %v11928_v48 }
 0x156   : > { %2045 = vrot.lane.b32.xlu1 %v11882_v0, %s11238_s15  ;;  %v11943_v32 = vrot.slane %v1902_v41, %v11448_v25  ;;  %v11031_v41 = vld [vmem:[%s14922_s2] sm:$0xff]  }
 0x157   : > { %2059 = vrot.lane.b32.xlu0 %v11879_v23, %s11238_s15  ;;  %10250 = vmatprep.subr.bf16.mxu0 %v11031_v41 }
 0x158   : > { %15014 = vst [vmem:[#allocation27_spill] sm:$0xff] %v11943_v32  ;;  %10251 = vmatpush3.bf16.msra.mxu0 %v11031_v41  ;;  %v9413_v41 = vpack.i.b16 %v11702_v36, %v11702_v36 }
 0x15a   : > { %2597 = vrot.lane.b32.xlu1 %v11894_v22, %s11238_s15  ;;  %v9411_v22 = vpack.i.b16 %v2437_v52, %v2437_v52  ;;  %v2456_v52 = vpack.i.b16 %v2444_v53, %v2444_v53 }
 0x15b   : > { %2047 = vrot.lane.b32.xlu0 %v11889_v12, %s11238_s15 }
 0x15c   : > { %v11940_v33 = vrot.slane %v9411_v22, %v11448_v25  ;;  %v11955_v22 = vrot.slane %v2454_v34, %v11448_v25 }
 0x15e   : > { %2323 = vrot.lane.b32.xlu1 %v11915_v45, %s11238_s15  ;;  %v11937_v45 = vcombine.high %v11656_v55, %v11656_v55  ;;  %15013 = vst [vmem:[#allocation26_spill] sm:$0xff] %v11940_v33  ;;  %15016 = vst [vmem:[#allocation29_spill] sm:$0xff] %v11955_v22 }
 0x15f   : > { %2599 = vrot.lane.b32.xlu0 %v11912_v9, %s11238_s15  ;;  %v2176_v9 = vpack.i.b16 %v2164_v31, %v2164_v31 }
 0x160   : > { %v9398_v55 = vpack.i.b16 %v11937_v45, %v11937_v45  ;;  %v1894_v62 = vunpack.i.h.s16 %v11937_v45 }
 0x161   : > { %v11950_v31 = vrot.slane %v2176_v9, %v11448_v25 }
 0x162   : > { %2327 = vrot.lane.b32.xlu1 %v11928_v48, %s11238_s15  ;;  %v1904_v48 = vpack.i.b16 %v1892_v20, %v1892_v20  ;;  %v11966_v9 = vrot.slane %v9398_v55, %v11448_v25  ;;  %v2166_v20 = vunpack.i.h.s16 %v11669_v59  ;;  %v11032_v55 = vld [vmem:[%s14922_s2 + $0x8] sm:$0xff]  }
 0x163   : > { %2051 = vrot.lane.b32.xlu0 %v11925_v29, %s11238_s15  ;;  %15015 = vst [vmem:[#allocation28_spill] sm:$0xff] %v11950_v31  ;;  %10252 = vmatprep.subr.bf16.mxu0 %v11032_v55 }
 0x164   : > { %15017 = vst [vmem:[#allocation30_spill] sm:$0xff] %v11966_v9  ;;  %v11972_v34 = vrot.slane %v1904_v48, %v11448_v25  ;;  %v11985_v48 = vrot.slane %v9412_v47, %v11448_v25  ;;  %v2178_v53 = vpack.i.b16 %v2166_v20, %v2166_v20  ;;  %v2168_v47 = vunpack.i.h.s16 %v11902_v27  ;;  %10253 = vmatpush3.bf16.msra.mxu0 %v11032_v55  ;;  %v1525_v27 = vld [vmem:[#allocation2] sm:$0x8] }
 0x165   : > { %v12022_v55 = vrot.slane %v9413_v41, %v11448_v25 }
 0x166   : > { %2049 = vrot.lane.b32.xlu1 %v11943_v32, %s11238_s15  ;;  %15018 = vst [vmem:[#allocation31_spill] sm:$0xff] %v11972_v34  ;;  %15019 = vst [vmem:[#allocation32_spill] sm:$0xff] %v11985_v48  ;;  %v1056_v32 = vunpack.i.h.s16 %v11484_v42  ;;  %v1803_v42 = vld [vmem:[#allocation2 + $0x4] sm:$0x1] }
 0x167   : > { %2603 = vrot.lane.b32.xlu0 %v11940_v33, %s11238_s15  ;;  %v1337_v33 = vunpack.i.h.s16 %v11470_v37  ;;  %v11033_v37 = vld [vmem:[%s14922_s2 + $0x10] sm:$0xff]   ;;  %15026 = vst [vmem:[#allocation35_spill] sm:$0xff] %v12022_v55 }
 0x168   : > { %10254 = vmatprep.subr.bf16.mxu0 %v11033_v37 }
 0x169   : > { %v1349_v20 = vpack.i.b16 %v1337_v33, %v1337_v33  ;;  %10255 = vmatpush3.bf16.msra.mxu0 %v11033_v37  ;;  %v987_v37 = vld [vmem:[#allocation2 + $0x60] sm:$0x2] }
 0x16a   : > { %2601 = vrot.lane.b32.xlu1 %v11955_v22, %s11238_s15  ;;  %v11988_v22 = vrot.slane %v2456_v52, %v11448_v25  ;;  %v12002_v52 = vrot.slane %v2178_v53, %v11448_v25  ;;  %v2180_v53 = vpack.i.b16 %v2168_v47, %v2168_v47 }
 0x16b   : > { %2321 = vrot.lane.b32.xlu0 %v11950_v31, %s11238_s15  ;;  %v11034_v31 = vld [vmem:[%s14922_s2 + $0x18] sm:$0xff]  }
 0x16c   : > { %15020 = vst [vmem:[#allocation33_spill] sm:$0xff] %v11988_v22  ;;  %15021 = vst [vmem:[#allocation34_spill] sm:$0xff] %v12002_v52  ;;  %10256 = vmatprep.subr.bf16.mxu0 %v11034_v31  ;;  %v12041_v45 = vrot.slane %v2180_v53, %v11448_v25  ;;  %v15030_v53 = vmov 0 }
 0x16d   : > { %10257 = vmatpush3.bf16.msra.mxu0 %v11034_v31  ;;  %v15031_v53 = vsel %vm12052_vm1, 4294967295, %v15030_v53 }
 0x16e   : > { %2053 = vrot.lane.b32.xlu1 %v11972_v34, %s11238_s15  ;;  %15028 = vst [vmem:[#allocation37_spill] sm:$0xff] %v12041_v45  ;;  %15032 = vst [vmem:[#allocation39_spill] sm:$0xff] %v15031_v53 }
 0x16f   : > { %2055 = vrot.lane.b32.xlu0 %v11966_v9, %s11238_s15 }
 0x172   : > { %2605 = vrot.lane.b32.xlu1 %v11988_v22, %s11238_s15 }
 0x173   : > { %2607 = vrot.lane.b32.xlu0 %v11985_v48, %s11238_s15  ;;  %v2162_v48 = vcombine.high %v11669_v59, %v11669_v59  ;;  %v963_v59 = vld [vmem:[#allocation2] sm:$0x2] }
 0x175   : > { %v9405_v34 = vpack.i.b16 %v2162_v48, %v2162_v48 }
 0x176   : > { %942 = vrot.lane.b32.xlu1 %v11774_v19, %s11238_s15 }
 0x177   : > { %2325 = vrot.lane.b32.xlu0 %v12002_v52, %s11238_s15  ;;  %v12028_v52 = vrot.slane %v1349_v20, %v11448_v25  ;;  %v2446_v20 = vunpack.i.h.s16 %v11959_v44 }
 0x178   : > { %v1487_v19 = vpop.permute.xlu1 %1486 }
 0x179   : > { %v925_v9 = vpop.permute.xlu0 %924  ;;  %15027 = vst [vmem:[#allocation36_spill] sm:$0xff] %v12028_v52  ;;  %v1526_v41 = vsel %vm12008_vm11, %v1487_v19, %v1525_v27  ;;  %v12048_v19 = vrot.slane %v9405_v34, %v11448_v25  ;;  %v1268_v34 = vld [vmem:[#allocation2 + $0x60] sm:$0x4] }
 0x17a   : > { %v964_v47 = vsel %vm12017_vm12, %v925_v9, %v963_v59  ;;  %1527 = vst [vmem:[#allocation2] sm:$0x8] %v1526_v41  ;;  %1504 = vrot.lane.b32.xlu1 %v12028_v52, %s11238_s15  ;;  %v11037_v9 = vld [vmem:[%s14922_s2 + $0x40] sm:$0xff]   ;;  %v1068_v41 = vpack.i.b16 %v1056_v32, %v1056_v32  ;;  %v2170_v52 = vunpack.i.h.s16 %v2162_v48  ;;  %v15035_v48 = vmov 0 }
 0x17b   : > { %965 = vst [vmem:[#allocation2] sm:$0x2] %v964_v47  ;;  %2611 = vrot.lane.b32.xlu0 %v12022_v55, %s11238_s15  ;;  %15029 = vst [vmem:[#allocation38_spill] sm:$0xff] %v12048_v19  ;;  %v1906_v47 = vpack.i.b16 %v1894_v62, %v1894_v62  ;;  %10278 = vmatprep.subr.bf16.mxu0 %v11037_v9  ;;  %v1549_v62 = vld [vmem:[#allocation2 + $0x60] sm:$0x8]  ;;  %v15036_v48 = vsel %vm12072_vm7, 4294967295, %v15035_v48 }
 0x17c   : > { %v1768_v27 = vpop.permute.xlu1 %1767  ;;  %15037 = vst [vmem:[#allocation40_spill] sm:$0xff] %v15036_v48 }
 0x17d   : > { %v941_v59 = vpop.permute.xlu0 %940  ;;  %v1804_v31 = vsel %vm11385_vm4, %v1768_v27, %v1803_v42  ;;  %v1896_v42 = vunpack.i.h.s16 %v11648_v49 }
 0x17e   : > { %v988_v44 = vsel %vm12017_vm12, %v941_v59, %v987_v37  ;;  %1805 = vst [vmem:[#allocation2 + $0x4] sm:$0x1] %v1804_v31  ;;  %2331 = vrot.lane.b32.xlu1 %v12048_v19, %s11238_s15  ;;  %v1618_v37 = vunpack.i.h.s16 %v11502_v51  ;;  %v12079_v59 = vrot.slane %v1068_v41, %v11448_v25  ;;  %v12082_v31 = vrot.slane %v1906_v47, %v11448_v25 }
 0x17f   : > { %989 = vst [vmem:[#allocation2 + $0x60] sm:$0x2] %v988_v44  ;;  %2329 = vrot.lane.b32.xlu0 %v12041_v45, %s11238_s15  ;;  %v2458_v44 = vpack.i.b16 %v2446_v20, %v2446_v20  ;;  %v2182_v45 = vpack.i.b16 %v2170_v52, %v2170_v52  ;;  %v1827_v52 = vld [vmem:[#allocation2 + $0x64] sm:$0x1]  ;;  %v1244_v20 = vld [vmem:[#allocation2] sm:$0x4]  ;;  %v1908_v47 = vpack.i.b16 %v1896_v42, %v1896_v42 }
 0x180   : > { %v1222_v27 = vpop.permute.xlu1 %1221 }
 0x181   : > { %v1503_v9 = vpop.permute.xlu0 %1502  ;;  %v1731_v19 = vld [vmem:[#allocation2] sm:$0x8]  ;;  %v1269_v49 = vsel %vm12066_vm2, %v1222_v27, %v1268_v34  ;;  %v2172_v34 = vunpack.i.h.s16 %v11659_v58  ;;  %v966_v58 = vld [vmem:[#allocation2 + $0xc] sm:$0x2] }
 0x182   : > { %v1169_v55 = vld [vmem:[#allocation2] sm:$0x2]  ;;  %v1550_v26 = vsel %vm12008_vm11, %v1503_v9, %v1549_v62  ;;  %v1732_v51 = vsel %vm12052_vm1, %v11509_v56, %v1731_v19  ;;  %1270 = vst [vmem:[#allocation2 + $0x60] sm:$0x4] %v1269_v49  ;;  %2057 = vrot.lane.b32.xlu1 %v12082_v31, %s11238_s15  ;;  %v2448_v56 = vunpack.i.h.s16 %v11702_v36 }
 0x183   : > { %v1170_v41 = vsel %vm12072_vm7, %v11562_v40, %v1169_v55  ;;  %1551 = vst [vmem:[#allocation2 + $0x60] sm:$0x8] %v1550_v26  ;;  %1223 = vrot.lane.b32.xlu0 %v12079_v59, %s11238_s15  ;;  %1733 = vst [vmem:[#allocation2] sm:$0x8] %v1732_v51  ;;  %v12100_v40 = vrot.slane %v2458_v44, %v11448_v25  ;;  %v12103_v26 = vrot.slane %v2182_v45, %v11448_v25 }
 0x184   : > { %1171 = vst [vmem:[#allocation2] sm:$0x2] %v1170_v41  ;;  %v1784_v19 = vpop.permute.xlu1 %1783  ;;  %v1630_v55 = vpack.i.b16 %v1618_v37, %v1618_v37  ;;  %v969_v37 = vld [vmem:[#allocation2 + $0x18] sm:$0x2]  ;;  %v2460_v44 = vpack.i.b16 %v2448_v56, %v2448_v56 }
 0x185   : > { %v1206_v62 = vpop.permute.xlu0 %1205  ;;  %15038 = vst [vmem:[#allocation41_spill] sm:$0xff] %v12100_v40  ;;  %15039 = vst [vmem:[#allocation42_spill] sm:$0xff] %v12103_v26  ;;  %v2007_v9 = vld [vmem:[#allocation2 + $0x4] sm:$0x1]  ;;  %v1828_v49 = vsel %vm11385_vm4, %v1784_v19, %v1827_v52  ;;  %v12128_v52 = vrot.slane %v1908_v47, %v11448_v25  ;;  %v2184_v19 = vpack.i.b16 %v2172_v34, %v2172_v34  ;;  %v1531_v34 = vld [vmem:[#allocation2 + $0x18] sm:$0x8] }
 0x186   : > { %v1193_v27 = vld [vmem:[#allocation2 + $0x60] sm:$0x2]  ;;  %v1245_v42 = vsel %vm12066_vm2, %v1206_v62, %v1244_v20  ;;  %v2008_v36 = vsel %vm11477_vm6, %v11846_v21, %v2007_v9  ;;  %1829 = vst [vmem:[#allocation2 + $0x64] sm:$0x1] %v1828_v49  ;;  %2609 = vrot.lane.b32.xlu1 %v12100_v40, %s11238_s15  ;;  %v15040_v21 = vmov 0  ;;  %v12131_v20 = vrot.slane %v1630_v55, %v11448_v25 }
 0x187   : > { %v1194_v45 = vsel %vm12072_vm7, %v11528_v5, %v1193_v27  ;;  %1246 = vst [vmem:[#allocation2] sm:$0x4] %v1245_v42  ;;  %2333 = vrot.lane.b32.xlu0 %v12103_v26, %s11238_s15  ;;  %2009 = vst [vmem:[#allocation2 + $0x4] sm:$0x1] %v2008_v36  ;;  %v15041_v21 = vsel %vm12122_vm10, 4294967295, %v15040_v21  ;;  %v2716_v5 = vunpack.i.h.s16 %v11705_v30  ;;  %v12148_v42 = vrot.slane %v2460_v44, %v11448_v25 }
 0x188   : > { %1195 = vst [vmem:[#allocation2 + $0x60] sm:$0x2] %v1194_v45  ;;  %15042 = vst [vmem:[#allocation43_spill] sm:$0xff] %v15041_v21  ;;  %v927_v51 = vpop.permute.xlu1 %926  ;;  %v1528_v55 = vld [vmem:[#allocation2 + $0xc] sm:$0x8]  ;;  %v9416_v36 = vpack.i.b16 %v11705_v30, %v11705_v30  ;;  %v9417_v40 = vpack.i.b16 %v11720_v11, %v11720_v11 }
 0x189   : > { %v929_v41 = vpop.permute.xlu0 %928  ;;  %15043 = vst [vmem:[#allocation44_spill] sm:$0xff] %v12128_v52  ;;  %v1474_v9 = vld [vmem:[#allocation2 + $0x60] sm:$0x4]  ;;  %v967_v27 = vsel %vm12017_vm12, %v927_v51, %v966_v58  ;;  %v384_v45 = vld [vmem:[#allocation2 + $0x14] sm:$0x1] }
 0x18a   : > { %v1755_v62 = vld [vmem:[#allocation2 + $0x60] sm:$0x8]  ;;  %v970_v49 = vsel %vm12017_vm12, %v929_v41, %v969_v37  ;;  %v1475_v47 = vsel %vm12122_vm10, %v11523_v3, %v1474_v9  ;;  %968 = vst [vmem:[#allocation2 + $0xc] sm:$0x2] %v967_v27  ;;  %2061 = vrot.lane.b32.xlu1 %v12128_v52, %s11238_s15  ;;  %v2718_v3 = vunpack.i.h.s16 %v11720_v11  ;;  %v381_v58 = vld [vmem:[#allocation2 + $0x8] sm:$0x1]  ;;  %v12154_v41 = vrot.slane %v2184_v19, %v11448_v25 }
 0x18b   : > { %v1756_v56 = vsel %vm12052_vm1, %v11559_v35, %v1755_v62  ;;  %971 = vst [vmem:[#allocation2 + $0x18] sm:$0x2] %v970_v49  ;;  %1785 = vrot.lane.b32.xlu0 %v12131_v20, %s11238_s15  ;;  %1476 = vst [vmem:[#allocation2 + $0x60] sm:$0x4] %v1475_v47  ;;  %v2728_v35 = vpack.i.b16 %v2716_v5, %v2716_v5  ;;  %v975_v62 = vld [vmem:[#allocation2 + $0x30] sm:$0x2]  ;;  %v12158_v27 = vcombine.high %v11705_v30, %v11705_v30 }
 0x18c   : > { %1757 = vst [vmem:[#allocation2 + $0x60] sm:$0x8] %v1756_v56  ;;  %v1489_v37 = vpop.permute.xlu1 %1488  ;;  %v1250_v9 = vld [vmem:[#allocation2 + $0x18] sm:$0x4]  ;;  %v385_v44 = vsel %vm11477_vm6, 0, %v384_v45  ;;  %v382_v5 = vsel %vm11477_vm6, 0, %v381_v58 }
 0x18d   : > { %v1491_v51 = vpop.permute.xlu0 %1490  ;;  %v11042_v49 = vld [vmem:[%s14922_s2 + $0x20] sm:$0xff]   ;;  %v390_v56 = vld [vmem:[#allocation2 + $0x2c] sm:$0x1]  ;;  %v1529_v52 = vsel %vm12008_vm11, %v1489_v37, %v1528_v55  ;;  %386 = vst [vmem:[#allocation2 + $0x14] sm:$0x1] %v385_v44 }
 0x18e   : > { %v2031_v47 = vld [vmem:[#allocation2 + $0x64] sm:$0x1]  ;;  %v1450_v19 = vld [vmem:[#allocation2] sm:$0x4]  ;;  %v1532_v30 = vsel %vm12008_vm11, %v1491_v51, %v1531_v34  ;;  %383 = vst [vmem:[#allocation2 + $0x8] sm:$0x1] %v382_v5  ;;  %2613 = vrot.lane.b32.xlu1 %v12148_v42, %s11238_s15  ;;  %v12190_v34 = vcombine.high %v11720_v11, %v11720_v11  ;;  %10222 = vmatprep.subr.bf16.mxu1 %v11042_v49 }
 0x18f   : > { %v391_v45 = vsel %vm11477_vm6, 0, %v390_v56  ;;  %v11045_v58 = vld [vmem:[%s14922_s2 + $0x28] sm:$0xff]   ;;  %v2032_v26 = vsel %vm11477_vm6, %v11879_v23, %v2031_v47  ;;  %v1451_v55 = vsel %vm12122_vm10, %v11487_v43, %v1450_v19  ;;  %1530 = vst [vmem:[#allocation2 + $0xc] sm:$0x8] %v1529_v52  ;;  %1533 = vst [vmem:[#allocation2 + $0x18] sm:$0x8] %v1532_v30  ;;  %2337 = vrot.lane.b32.xlu0 %v12154_v41, %s11238_s15  ;;  %10223 = vmatpush3.bf16.msra.mxu1 %v11042_v49 }
 0x190   : > { %392 = vst [vmem:[#allocation2 + $0x2c] sm:$0x1] %v391_v45  ;;  %v387_v37 = vld [vmem:[#allocation2 + $0x20] sm:$0x1]  ;;  %v396_v51 = vld [vmem:[#allocation2 + $0x44] sm:$0x1]  ;;  %v12193_v43 = vrot.slane %v2728_v35, %v11448_v25  ;;  %v1210_v47 = vpop.permute.xlu1 %1209  ;;  %v12202_v19 = vrot.slane %v9416_v36, %v11448_v25  ;;  %v2720_v35 = vunpack.i.h.s16 %v12158_v27  ;;  %10224 = vmatprep.subr.bf16.mxu1 %v11045_v58 }
 0x191   : > { %v393_v23 = vld [vmem:[#allocation2 + $0x38] sm:$0x1]  ;;  %2033 = vst [vmem:[#allocation2 + $0x64] sm:$0x1] %v2032_v26  ;;  %1452 = vst [vmem:[#allocation2] sm:$0x4] %v1451_v55  ;;  %v933_v56 = vpop.permute.xlu0 %932  ;;  %v2730_v26 = vpack.i.b16 %v2718_v3, %v2718_v3 }
 0x192   : > { %v388_v52 = vsel %vm11477_vm6, 0, %v387_v37  ;;  %v397_v44 = vsel %vm11477_vm6, 0, %v396_v51  ;;  %v394_v11 = vsel %vm11477_vm6, 0, %v393_v23  ;;  %v402_v5 = vld [vmem:[#allocation2 + $0x5c] sm:$0x1]  ;;  %v976_v37 = vsel %vm12017_vm12, %v933_v56, %v975_v62  ;;  %v11047_v36 = vld [vmem:[%s14922_s2 + $0x30] sm:$0xff]   ;;  %2873 = vrot.lane.b32.xlu1 %v12193_v43, %s11238_s15 }
 0x193   : > { %389 = vst [vmem:[#allocation2 + $0x20] sm:$0x1] %v388_v52  ;;  %398 = vst [vmem:[#allocation2 + $0x44] sm:$0x1] %v397_v44  ;;  %v403_v30 = vsel %vm11477_vm6, 0, %v402_v5  ;;  %v1251_v51 = vsel %vm12066_vm2, %v1210_v47, %v1250_v9  ;;  %2871 = vrot.lane.b32.xlu0 %v12202_v19, %s11238_s15  ;;  %v12225_v52 = vrot.slane %v9417_v40, %v11448_v25  ;;  %10225 = vmatpush3.bf16.msra.mxu1 %v11045_v58 }
 0x194   : > { %395 = vst [vmem:[#allocation2 + $0x38] sm:$0x1] %v394_v11  ;;  %v1172_v45 = vld [vmem:[#allocation2 + $0xc] sm:$0x2]  ;;  %v1175_v55 = vld [vmem:[#allocation2 + $0x18] sm:$0x2]  ;;  %v1772_v5 = vpop.permute.xlu1 %1771  ;;  %v12232_v56 = vrot.slane %v2730_v26, %v11448_v25  ;;  %v2732_v47 = vpack.i.b16 %v2720_v35, %v2720_v35  ;;  %10226 = vmatprep.subr.bf16.mxu1 %v11047_v36 }
 0x195   : > { %404 = vst [vmem:[#allocation2 + $0x5c] sm:$0x1] %v403_v30  ;;  %v1173_v3 = vsel %vm12072_vm7, %v11674_v61, %v1172_v45  ;;  %v1176_v49 = vsel %vm12072_vm7, %v11607_v6, %v1175_v55  ;;  %977 = vst [vmem:[#allocation2 + $0x30] sm:$0x2] %v976_v37  ;;  %v1537_v62 = vld [vmem:[#allocation2 + $0x30] sm:$0x8]  ;;  %v9418_v61 = vpack.i.b16 %v12158_v27, %v12158_v27  ;;  %v1495_v11 = vpop.permute.xlu0 %1494  ;;  %v2722_v30 = vunpack.i.h.s16 %v12190_v34 }
 0x196   : > { %1252 = vst [vmem:[#allocation2 + $0x18] sm:$0x4] %v1251_v51  ;;  %v1809_v9 = vld [vmem:[#allocation2 + $0x1c] sm:$0x1]  ;;  %v399_v23 = vld [vmem:[#allocation2 + $0x50] sm:$0x1]  ;;  %v1538_v27 = vsel %vm12008_vm11, %v1495_v11, %v1537_v62  ;;  %2877 = vrot.lane.b32.xlu1 %v12232_v56, %s11238_s15  ;;  %v2724_v62 = vunpack.i.h.s16 %v11711_v54 }
 0x197   : > { %1174 = vst [vmem:[#allocation2 + $0xc] sm:$0x2] %v1173_v3  ;;  %1177 = vst [vmem:[#allocation2 + $0x18] sm:$0x2] %v1176_v49  ;;  %v400_v6 = vsel %vm11477_vm6, 0, %v399_v23  ;;  %v1810_v37 = vsel %vm11385_vm4, %v1772_v5, %v1809_v9  ;;  %v11049_v26 = vld [vmem:[%s14922_s2 + $0x38] sm:$0xff]   ;;  %2875 = vrot.lane.b32.xlu0 %v12225_v52, %s11238_s15  ;;  %v12258_v23 = vrot.slane %v2732_v47, %v11448_v25  ;;  %10227 = vmatpush3.bf16.msra.mxu1 %v11047_v36 }
 0x198   : > { %v408_v44 = vld [vmem:[#allocation2 + $0x74] sm:$0x1]  ;;  %401 = vst [vmem:[#allocation2 + $0x50] sm:$0x1] %v400_v6  ;;  %v1734_v45 = vld [vmem:[#allocation2 + $0xc] sm:$0x8]  ;;  %v12261_v6 = vrot.slane %v9418_v61, %v11448_v25  ;;  %10228 = vmatprep.subr.bf16.mxu1 %v11049_v26 }
 0x199   : > { %v409_v40 = vsel %vm11477_vm6, 0, %v408_v44  ;;  %v1737_v55 = vld [vmem:[#allocation2 + $0x18] sm:$0x8]  ;;  %v1735_v58 = vsel %vm12052_vm1, %v11733_v10, %v1734_v45  ;;  %1539 = vst [vmem:[#allocation2 + $0x30] sm:$0x8] %v1538_v27  ;;  %v9419_v10 = vpack.i.b16 %v12190_v34, %v12190_v34  ;;  %v1208_v9 = vpop.permute.xlu0 %1207  ;;  %v2734_v44 = vpack.i.b16 %v2722_v30, %v2722_v30 }
 0x19a   : > { %410 = vst [vmem:[#allocation2 + $0x74] sm:$0x1] %v409_v40  ;;  %v1738_v35 = vsel %vm12052_vm1, %v11615_v1, %v1737_v55  ;;  %1811 = vst [vmem:[#allocation2 + $0x1c] sm:$0x1] %v1810_v37  ;;  %v1247_v51 = vld [vmem:[#allocation2 + $0xc] sm:$0x4]  ;;  %v1214_v1 = vpop.permute.xlu1 %1213  ;;  %2881 = vrot.lane.b32.xlu1 %v12258_v23, %s11238_s15 }
 0x19b   : > { %v1256_v3 = vld [vmem:[#allocation2 + $0x30] sm:$0x4]  ;;  %v405_v49 = vld [vmem:[#allocation2 + $0x68] sm:$0x1]  ;;  %1736 = vst [vmem:[#allocation2 + $0xc] sm:$0x8] %v1735_v58  ;;  %v1248_v34 = vsel %vm12066_vm2, %v1208_v9, %v1247_v51  ;;  %2879 = vrot.lane.b32.xlu0 %v12261_v6, %s11238_s15  ;;  %v12283_v37 = vrot.slane %v9419_v10, %v11448_v25  ;;  %v9420_v58 = vpack.i.b16 %v11711_v54, %v11711_v54 }
 0x19c   : > { %1739 = vst [vmem:[#allocation2 + $0x18] sm:$0x8] %v1738_v35  ;;  %v406_v11 = vsel %vm11477_vm6, 0, %v405_v49  ;;  %v1181_v5 = vld [vmem:[#allocation2 + $0x30] sm:$0x2]  ;;  %v1257_v45 = vsel %vm12066_vm2, %v1214_v1, %v1256_v3  ;;  %10229 = vmatpush3.bf16.msra.mxu1 %v11049_v26 }
 0x19d   : > { %v1456_v40 = vld [vmem:[#allocation2 + $0x18] sm:$0x4]  ;;  %407 = vst [vmem:[#allocation2 + $0x68] sm:$0x1] %v406_v11  ;;  %v1182_v61 = vsel %vm12072_vm7, %v11687_v16, %v1181_v5  ;;  %1249 = vst [vmem:[#allocation2 + $0xc] sm:$0x4] %v1248_v34  ;;  %v1770_v55 = vpop.permute.xlu0 %1769  ;;  %v12280_v16 = vrot.slane %v2734_v44, %v11448_v25  ;;  %v12305_v44 = vrot.slane %v9420_v58, %v11448_v25 }
 0x19e   : > { %v1457_v36 = vsel %vm12122_vm10, %v11601_v2, %v1456_v40  ;;  %1258 = vst [vmem:[#allocation2 + $0x30] sm:$0x4] %v1257_v45  ;;  %v1806_v47 = vld [vmem:[#allocation2 + $0x10] sm:$0x1]  ;;  %v1815_v30 = vld [vmem:[#allocation2 + $0x34] sm:$0x1]  ;;  %v1776_v27 = vpop.permute.xlu1 %1775  ;;  %v2736_v2 = vpack.i.b16 %v2724_v62, %v2724_v62 }
 0x19f   : > { %1183 = vst [vmem:[#allocation2 + $0x30] sm:$0x2] %v1182_v61  ;;  %1458 = vst [vmem:[#allocation2 + $0x18] sm:$0x4] %v1457_v36  ;;  %v1807_v3 = vsel %vm11385_vm4, %v1770_v55, %v1806_v47  ;;  %v1816_v49 = vsel %vm11385_vm4, %v1776_v27, %v1815_v30  ;;  %2885 = vrot.lane.b32.xlu1 %v12280_v16, %s11238_s15  ;;  %2883 = vrot.lane.b32.xlu0 %v12283_v37, %s11238_s15  ;;  %v981_v54 = vld [vmem:[#allocation2 + $0x48] sm:$0x2] }
 0x1a0   : > { %v1743_v35 = vld [vmem:[#allocation2 + $0x30] sm:$0x8]  ;;  %1808 = vst [vmem:[#allocation2 + $0x10] sm:$0x1] %v1807_v3  ;;  %1817 = vst [vmem:[#allocation2 + $0x34] sm:$0x1] %v1816_v49  ;;  %v9386_v27 = vpack.i.b16 %v11446_v24, %v11446_v24 }
 0x1a1   : > { %v2013_v51 = vld [vmem:[#allocation2 + $0x1c] sm:$0x1]  ;;  %v1744_v9 = vsel %vm12052_vm1, %v11736_v15, %v1743_v35  ;;  %v972_v26 = vld [vmem:[#allocation2 + $0x24] sm:$0x2]  ;;  %v937_v62 = vpop.permute.xlu0 %936  ;;  %v12302_v15 = vrot.slane %v2736_v2, %v11448_v25  ;;  %v1543_v36 = vld [vmem:[#allocation2 + $0x48] sm:$0x8] }
 0x1a2   : > { %v2014_v10 = vsel %vm11477_vm6, %v11889_v12, %v2013_v51  ;;  %1745 = vst [vmem:[#allocation2 + $0x30] sm:$0x8] %v1744_v9  ;;  %v931_v1 = vpop.permute.xlu1 %930  ;;  %v9379_v12 = vpack.i.b16 %v11455_v28, %v11455_v28  ;;  %v982_v40 = vsel %vm12017_vm12, %v937_v62, %v981_v54  ;;  %v1534_v47 = vld [vmem:[#allocation2 + $0x24] sm:$0x8]  ;;  %v978_v9 = vld [vmem:[#allocation2 + $0x3c] sm:$0x2]  ;;  %v12348_v62 = vrot.slane %v9386_v27, %v11448_v25 }
 0x1a3   : > { %2015 = vst [vmem:[#allocation2 + $0x1c] sm:$0x1] %v2014_v10  ;;  %v973_v34 = vsel %vm12017_vm12, %v931_v1, %v972_v26  ;;  %983 = vst [vmem:[#allocation2 + $0x48] sm:$0x2] %v982_v40  ;;  %2889 = vrot.lane.b32.xlu1 %v12302_v15, %s11238_s15  ;;  %2887 = vrot.lane.b32.xlu0 %v12305_v44, %s11238_s15  ;;  %v1253_v10 = vld [vmem:[#allocation2 + $0x24] sm:$0x4]  ;;  %v9400_v1 = vpack.i.b16 %v11666_v14, %v11666_v14 }
 0x1a4   : > { %v1453_v11 = vld [vmem:[#allocation2 + $0xc] sm:$0x4]  ;;  %974 = vst [vmem:[#allocation2 + $0x24] sm:$0x2] %v973_v34  ;;  %v411_v27 = vld [vmem:[#allocation2 + $0x80] sm:$0x1] }
 0x1a5   : > { %v1462_v5 = vld [vmem:[#allocation2 + $0x30] sm:$0x4]  ;;  %v1454_v45 = vsel %vm12122_vm10, %v11604_v4, %v1453_v11  ;;  %v1499_v30 = vpop.permute.xlu0 %1498  ;;  %v12324_v4 = vrot.slane %v9379_v12, %v11448_v25 }
 0x1a6   : > { %v1463_v61 = vsel %vm12122_vm10, %v11622_v17, %v1462_v5  ;;  %1455 = vst [vmem:[#allocation2 + $0xc] sm:$0x4] %v1454_v45  ;;  %v1493_v55 = vpop.permute.xlu1 %1492  ;;  %v9393_v17 = vpack.i.b16 %v11473_v38, %v11473_v38  ;;  %v1544_v35 = vsel %vm12008_vm11, %v1499_v30, %v1543_v36  ;;  %v1540_v45 = vld [vmem:[#allocation2 + $0x3c] sm:$0x8]  ;;  %v1058_v36 = vunpack.i.h.s16 %v11455_v28 }
 0x1a7   : > { %1464 = vst [vmem:[#allocation2 + $0x30] sm:$0x4] %v1463_v61  ;;  %15044 = vst [vmem:[#allocation45_spill] sm:$0xff] %v12324_v4  ;;  %v2010_v2 = vld [vmem:[#allocation2 + $0x10] sm:$0x1]  ;;  %v1535_v51 = vsel %vm12008_vm11, %v1493_v55, %v1534_v47  ;;  %1225 = vrot.lane.b32.xlu1 %v12324_v4, %s11238_s15  ;;  %944 = vrot.lane.b32.xlu0 %v11832_v57, %s11238_s15  ;;  %v9421_v55 = vpack.i.b16 %v11727_v7, %v11727_v7 }
 0x1a8   : > { %v2019_v58 = vld [vmem:[#allocation2 + $0x34] sm:$0x1]  ;;  %v2011_v3 = vsel %vm11477_vm6, %v11882_v0, %v2010_v2  ;;  %1545 = vst [vmem:[#allocation2 + $0x48] sm:$0x8] %v1544_v35  ;;  %1536 = vst [vmem:[#allocation2 + $0x24] sm:$0x8] %v1535_v51  ;;  %v12345_v0 = vrot.slane %v9393_v17, %v11448_v25  ;;  %v9414_v17 = vpack.i.b16 %v11717_v60, %v11717_v60 }
 0x1a9   : > { %v2020_v49 = vsel %vm11477_vm6, %v11925_v29, %v2019_v58  ;;  %2012 = vst [vmem:[#allocation2 + $0x10] sm:$0x1] %v2011_v3  ;;  %v1212_v26 = vpop.permute.xlu0 %1211  ;;  %v9407_v29 = vpack.i.b16 %v11677_v63, %v11677_v63  ;;  %v1812_v61 = vld [vmem:[#allocation2 + $0x28] sm:$0x1] }
 0x1aa   : > { %2021 = vst [vmem:[#allocation2 + $0x34] sm:$0x1] %v2020_v49  ;;  %v935_v54 = vpop.permute.xlu1 %934  ;;  %15045 = vst [vmem:[#allocation46_spill] sm:$0xff] %v12345_v0  ;;  %v1187_v12 = vld [vmem:[#allocation2 + $0x48] sm:$0x2]  ;;  %v1254_v5 = vsel %vm12066_vm2, %v1212_v26, %v1253_v10  ;;  %v1070_v10 = vpack.i.b16 %v1058_v36, %v1058_v36 }
 0x1ab   : > { %v1178_v57 = vld [vmem:[#allocation2 + $0x24] sm:$0x2]  ;;  %v979_v11 = vsel %vm12017_vm12, %v935_v54, %v978_v9  ;;  %v1188_v40 = vsel %vm12072_vm7, %v11796_v50, %v1187_v12  ;;  %1255 = vst [vmem:[#allocation2 + $0x24] sm:$0x4] %v1254_v5  ;;  %1787 = vrot.lane.b32.xlu1 %v12345_v0, %s11238_s15  ;;  %1506 = vrot.lane.b32.xlu0 %v12348_v62, %s11238_s15  ;;  %v1259_v49 = vld [vmem:[#allocation2 + $0x3c] sm:$0x4]  ;;  %v1339_v12 = vunpack.i.h.s16 %v11446_v24 }
 0x1ac   : > { %v1179_v34 = vsel %vm12072_vm7, %v11765_v46, %v1178_v57  ;;  %980 = vst [vmem:[#allocation2 + $0x3c] sm:$0x2] %v979_v11  ;;  %1189 = vst [vmem:[#allocation2 + $0x48] sm:$0x2] %v1188_v40  ;;  %v12370_v30 = vrot.slane %v9407_v29, %v11448_v25  ;;  %v12373_v46 = vrot.slane %v9400_v1, %v11448_v25  ;;  %v1262_v9 = vld [vmem:[#allocation2 + $0x48] sm:$0x4]  ;;  %v1620_v1 = vunpack.i.h.s16 %v11473_v38 }
 0x1ad   : > { %1180 = vst [vmem:[#allocation2 + $0x24] sm:$0x2] %v1179_v34  ;;  %v1774_v50 = vpop.permute.xlu0 %1773  ;;  %v12399_v29 = vrot.slane %v9414_v17, %v11448_v25  ;;  %v15050_v34 = vld [vmem:[#allocation13_spill] sm:$0xff]  ;;  %v1818_v24 = vld [vmem:[#allocation2 + $0x40] sm:$0x1] }
 0x1ae   : > { %v1497_v47 = vpop.permute.xlu1 %1496  ;;  %15046 = vst [vmem:[#allocation47_spill] sm:$0xff] %v12370_v30  ;;  %15047 = vst [vmem:[#allocation48_spill] sm:$0xff] %v12373_v46  ;;  %v1813_v35 = vsel %vm11385_vm4, %v1774_v50, %v1812_v61  ;;  %v15051_v61 = vld [vmem:[#allocation11_spill] sm:$0xff]  ;;  %v1821_v38 = vld [vmem:[#allocation2 + $0x4c] sm:$0x1]  ;;  %v1632_v17 = vpack.i.b16 %v1620_v1, %v1620_v1  ;;  %v2450_v1 = vunpack.i.h.s16 %v11717_v60 }
 0x1af   : > { %v1749_v2 = vld [vmem:[#allocation2 + $0x48] sm:$0x8]  ;;  %v1740_v58 = vld [vmem:[#allocation2 + $0x24] sm:$0x8]  ;;  %v1541_v28 = vsel %vm12008_vm11, %v1497_v47, %v1540_v45  ;;  %1814 = vst [vmem:[#allocation2 + $0x28] sm:$0x1] %v1813_v35  ;;  %2339 = vrot.lane.b32.xlu1 %v12370_v30, %s11238_s15  ;;  %2063 = vrot.lane.b32.xlu0 %v12373_v46, %s11238_s15  ;;  %v12418_v47 = vrot.slane %v1070_v10, %v11448_v25 }
 0x1b0   : > { %v1750_v51 = vsel %vm12052_vm1, %v11806_v13, %v1749_v2  ;;  %v1741_v3 = vsel %vm12052_vm1, %v11781_v8, %v1740_v58  ;;  %1542 = vst [vmem:[#allocation2 + $0x3c] sm:$0x8] %v1541_v28  ;;  %v412_v13 = vsel %vm11477_vm6, 0, %v411_v27  ;;  %v12396_v8 = vrot.slane %v9421_v55, %v11448_v25  ;;  %15049 = vst [vmem:[#allocation50_spill] sm:$0xff] %v12399_v29  ;;  %v15054_v10 = vld [vmem:[#allocation27_spill] sm:$0xff]  ;;  %v15095_v0 = vld [vmem:[#allocation41_spill] sm:$0xff] }
 0x1b1   : > { %1751 = vst [vmem:[#allocation2 + $0x48] sm:$0x8] %v1750_v51  ;;  %1742 = vst [vmem:[#allocation2 + $0x24] sm:$0x8] %v1741_v3  ;;  %v1216_v54 = vpop.permute.xlu0 %1215  ;;  %v1351_v27 = vpack.i.b16 %v1339_v12, %v1339_v12  ;;  %v2174_v2 = vunpack.i.h.s16 %v11677_v63  ;;  %v1898_v58 = vunpack.i.h.s16 %v11666_v14  ;;  %v15055_v14 = vld [vmem:[#allocation19_spill] sm:$0xff] }
 0x1b2   : > { %v1218_v26 = vpop.permute.xlu1 %1217  ;;  %15048 = vst [vmem:[#allocation49_spill] sm:$0xff] %v12396_v8  ;;  %413 = vst [vmem:[#allocation2 + $0x80] sm:$0x1] %v412_v13  ;;  %v1459_v11 = vld [vmem:[#allocation2 + $0x24] sm:$0x4]  ;;  %v1260_v5 = vsel %vm12066_vm2, %v1216_v54, %v1259_v49  ;;  %v15053_v49 = vld [vmem:[#allocation14_spill] sm:$0xff] }
 0x1b3   : > { %v1184_v57 = vld [vmem:[#allocation2 + $0x3c] sm:$0x2]  ;;  %v1263_v40 = vsel %vm12066_vm2, %v1218_v26, %v1262_v9  ;;  %v1460_v36 = vsel %vm12122_vm10, %v15051_v61, %v1459_v11  ;;  %1261 = vst [vmem:[#allocation2 + $0x3c] sm:$0x4] %v1260_v5  ;;  %2891 = vrot.lane.b32.xlu1 %v12396_v8, %s11238_s15  ;;  %2615 = vrot.lane.b32.xlu0 %v12399_v29, %s11238_s15  ;;  %15052 = vst [vmem:[#allocation13_spill] sm:$0xff] %v12418_v47  ;;  %v2726_v26 = vunpack.i.h.s16 %v11727_v7  ;;  %v15086_v8 = vld [vmem:[#allocation32_spill] sm:$0xff] }
 0x1b4   : > { %v1185_v45 = vsel %vm12072_vm7, %v15050_v34, %v1184_v57  ;;  %1264 = vst [vmem:[#allocation2 + $0x48] sm:$0x4] %v1263_v40  ;;  %1461 = vst [vmem:[#allocation2 + $0x24] sm:$0x4] %v1460_v36  ;;  %v984_v63 = vld [vmem:[#allocation2 + $0x54] sm:$0x2]  ;;  %v12439_v11 = vrot.slane %v1632_v17, %v11448_v25  ;;  %v12442_v5 = vrot.slane %v1351_v27, %v11448_v25 }
 0x1b5   : > { %1186 = vst [vmem:[#allocation2 + $0x3c] sm:$0x2] %v1185_v45  ;;  %v1778_v50 = vpop.permute.xlu0 %1777  ;;  %v1265_v54 = vld [vmem:[#allocation2 + $0x54] sm:$0x4]  ;;  %v2186_v40 = vpack.i.b16 %v2174_v2, %v2174_v2  ;;  %v1910_v34 = vpack.i.b16 %v1898_v58, %v1898_v58  ;;  %v1824_v17 = vld [vmem:[#allocation2 + $0x58] sm:$0x1] }
 0x1b6   : > { %v1780_v55 = vpop.permute.xlu1 %1779  ;;  %v2016_v35 = vld [vmem:[#allocation2 + $0x28] sm:$0x1]  ;;  %v1819_v51 = vsel %vm11385_vm4, %v1778_v50, %v1818_v24  ;;  %15056 = vst [vmem:[#allocation11_spill] sm:$0xff] %v12439_v11  ;;  %15057 = vst [vmem:[#allocation14_spill] sm:$0xff] %v12442_v5  ;;  %v15058_v24 = vld [vmem:[#allocation12_spill] sm:$0xff] }
 0x1b7   : > { %v1746_v28 = vld [vmem:[#allocation2 + $0x3c] sm:$0x8]  ;;  %v1822_v3 = vsel %vm11385_vm4, %v1780_v55, %v1821_v38  ;;  %v2017_v13 = vsel %vm11477_vm6, %v15054_v10, %v2016_v35  ;;  %1820 = vst [vmem:[#allocation2 + $0x40] sm:$0x1] %v1819_v51  ;;  %1227 = vrot.lane.b32.xlu1 %v12418_v47, %s11238_s15  ;;  %946 = vrot.lane.b32.xlu0 %v15055_v14, %s11238_s15  ;;  %v15059_v38 = vld [vmem:[#allocation10_spill] sm:$0xff] }
 0x1b8   : > { %v1747_v9 = vsel %vm12052_vm1, %v15053_v49, %v1746_v28  ;;  %1823 = vst [vmem:[#allocation2 + $0x4c] sm:$0x1] %v1822_v3  ;;  %2018 = vst [vmem:[#allocation2 + $0x28] sm:$0x1] %v2017_v13  ;;  %v1546_v55 = vld [vmem:[#allocation2 + $0x54] sm:$0x8]  ;;  %v12459_v58 = vrot.slane %v2186_v40, %v11448_v25  ;;  %v12462_v28 = vrot.slane %v1910_v34, %v11448_v25 }
 0x1b9   : > { %1748 = vst [vmem:[#allocation2 + $0x3c] sm:$0x8] %v1747_v9  ;;  %v1220_v57 = vpop.permute.xlu0 %1219  ;;  %v2738_v35 = vpack.i.b16 %v2726_v26, %v2726_v26  ;;  %v2462_v51 = vpack.i.b16 %v2450_v1, %v2450_v1  ;;  %v414_v3 = vld [vmem:[#allocation2 + $0x8c] sm:$0x1]  ;;  %v2079_v14 = vld [vmem:[#allocation2 + $0x4] sm:$0x2] }
 0x1ba   : > { %v939_v12 = vpop.permute.xlu1 %938  ;;  %v1465_v45 = vld [vmem:[#allocation2 + $0x3c] sm:$0x4]  ;;  %v1266_v7 = vsel %vm12066_vm2, %v1220_v57, %v1265_v54  ;;  %15060 = vst [vmem:[#allocation27_spill] sm:$0xff] %v12459_v58  ;;  %15061 = vst [vmem:[#allocation19_spill] sm:$0xff] %v12462_v28  ;;  %v2355_v26 = vld [vmem:[#allocation2 + $0x4] sm:$0x4] }
 0x1bb   : > { %v1468_v61 = vld [vmem:[#allocation2 + $0x48] sm:$0x4]  ;;  %v985_v36 = vsel %vm12017_vm12, %v939_v12, %v984_v63  ;;  %v1466_v60 = vsel %vm12122_vm10, %v15058_v24, %v1465_v45  ;;  %1267 = vst [vmem:[#allocation2 + $0x54] sm:$0x4] %v1266_v7  ;;  %1789 = vrot.lane.b32.xlu1 %v12439_v11, %s11238_s15  ;;  %1508 = vrot.lane.b32.xlu0 %v12442_v5, %s11238_s15  ;;  %v15062_v63 = vld [vmem:[#allocation31_spill] sm:$0xff]  ;;  %v15063_v12 = vld [vmem:[#allocation30_spill] sm:$0xff] }
 0x1bc   : > { %v1469_v50 = vsel %vm12122_vm10, %v15059_v38, %v1468_v61  ;;  %986 = vst [vmem:[#allocation2 + $0x54] sm:$0x2] %v985_v36  ;;  %1467 = vst [vmem:[#allocation2 + $0x3c] sm:$0x4] %v1466_v60  ;;  %v415_v1 = vsel %vm11477_vm6, 0, %v414_v3  ;;  %v12481_v45 = vrot.slane %v2738_v35, %v11448_v25  ;;  %v12484_v61 = vrot.slane %v2462_v51, %v11448_v25  ;;  %v15066_v38 = vld [vmem:[#allocation15_spill] sm:$0xff] }
 0x1bd   : > { %1470 = vst [vmem:[#allocation2 + $0x48] sm:$0x4] %v1469_v50  ;;  %v1782_v2 = vpop.permute.xlu0 %1781  ;;  %416 = vst [vmem:[#allocation2 + $0x8c] sm:$0x1] %v415_v1  ;;  %v2631_v25 = vld [vmem:[#allocation2 + $0x4] sm:$0x8] }
 0x1be   : > { %v1501_v27 = vpop.permute.xlu1 %1500  ;;  %v2022_v49 = vld [vmem:[#allocation2 + $0x40] sm:$0x1]  ;;  %v1825_v13 = vsel %vm11385_vm4, %v1782_v2, %v1824_v17  ;;  %15064 = vst [vmem:[#allocation12_spill] sm:$0xff] %v12481_v45  ;;  %15065 = vst [vmem:[#allocation10_spill] sm:$0xff] %v12484_v61 }
 0x1bf   : > { %v2025_v9 = vld [vmem:[#allocation2 + $0x4c] sm:$0x1]  ;;  %v1547_v10 = vsel %vm12008_vm11, %v1501_v27, %v1546_v55  ;;  %v2023_v54 = vsel %vm11477_vm6, %v15062_v63, %v2022_v49  ;;  %1826 = vst [vmem:[#allocation2 + $0x58] sm:$0x1] %v1825_v13  ;;  %2341 = vrot.lane.b32.xlu1 %v12459_v58, %s11238_s15  ;;  %2065 = vrot.lane.b32.xlu0 %v12462_v28, %s11238_s15  ;;  %v15067_v55 = vld [vmem:[#allocation16_spill] sm:$0xff] }
 0x1c0   : > { %v2026_v57 = vsel %vm11477_vm6, %v15063_v12, %v2025_v9  ;;  %1548 = vst [vmem:[#allocation2 + $0x54] sm:$0x8] %v1547_v10  ;;  %2024 = vst [vmem:[#allocation2 + $0x40] sm:$0x1] %v2023_v54  ;;  %v2379_v27 = vld [vmem:[#allocation2 + $0x64] sm:$0x4] }
 0x1c1   : > { %2027 = vst [vmem:[#allocation2 + $0x4c] sm:$0x1] %v2026_v57  ;;  %v2044_v40 = vpop.permute.xlu0 %2043  ;;  %v15068_v10 = vld [vmem:[#allocation17_spill] sm:$0xff]  ;;  %v2103_v63 = vld [vmem:[#allocation2 + $0x64] sm:$0x2] }
 0x1c2   : > { %v2320_v34 = vpop.permute.xlu1 %2319  ;;  %v1471_v7 = vld [vmem:[#allocation2 + $0x54] sm:$0x4]  ;;  %v2080_v24 = vsel %vm12017_vm12, %v2044_v40, %v2079_v14  ;;  %v2082_v54 = vld [vmem:[#allocation2 + $0x10] sm:$0x2]  ;;  %v12688_v58 = vld [vmem:[#allocation2 + $0xc] sm:$0xe] }
 0x1c3   : > { %v1190_v36 = vld [vmem:[#allocation2 + $0x54] sm:$0x2]  ;;  %v2356_v60 = vsel %vm12066_vm2, %v2320_v34, %v2355_v26  ;;  %v1472_v17 = vsel %vm12122_vm10, %v15067_v55, %v1471_v7  ;;  %2081 = vst [vmem:[#allocation2 + $0x4] sm:$0x2] %v2080_v24  ;;  %2893 = vrot.lane.b32.xlu1 %v12481_v45, %s11238_s15  ;;  %2617 = vrot.lane.b32.xlu0 %v12484_v61, %s11238_s15  ;;  %v15070_v24 = vld [vmem:[#allocation20_spill] sm:$0xff]  ;;  %s14116_s15 = scalar_lea.vmem [#allocation4], %s11364_s25 }
 0x1c4   : > { %v1191_v50 = vsel %vm12072_vm7, %v15066_v38, %v1190_v36  ;;  %2357 = vst [vmem:[#allocation2 + $0x4] sm:$0x4] %v2356_v60  ;;  %1473 = vst [vmem:[#allocation2 + $0x54] sm:$0x4] %v1472_v17  ;;  %v2085_v36 = vld [vmem:[#allocation2 + $0x1c] sm:$0x2] }
 0x1c5   : > { %1192 = vst [vmem:[#allocation2 + $0x54] sm:$0x2] %v1191_v50  ;;  %v2596_v2 = vpop.permute.xlu0 %2595  ;;  %v15069_v7 = vld [vmem:[#allocation18_spill] sm:$0xff]  ;;  %v2655_v45 = vld [vmem:[#allocation2 + $0x64] sm:$0x8] }
 0x1c6   : > { %v2336_v35 = vpop.permute.xlu1 %2335  ;;  %v2028_v3 = vld [vmem:[#allocation2 + $0x58] sm:$0x1]  ;;  %v2632_v49 = vsel %vm12008_vm11, %v2596_v2, %v2631_v25  ;;  %v2634_v38 = vld [vmem:[#allocation2 + $0x10] sm:$0x8]  ;;  %v12690_v61 = vld [vmem:[#allocation2 + $0x18] sm:$0xe] }
 0x1c7   : > { %v1752_v51 = vld [vmem:[#allocation2 + $0x54] sm:$0x8]  ;;  %v2380_v9 = vsel %vm12066_vm2, %v2336_v35, %v2379_v27  ;;  %v2029_v14 = vsel %vm11477_vm6, %v12082_v31, %v2028_v3  ;;  %2633 = vst [vmem:[#allocation2 + $0x4] sm:$0x8] %v2632_v49  ;;  %v2637_v49 = vld [vmem:[#allocation2 + $0x1c] sm:$0x8] }
 0x1c8   : > { %v1753_v13 = vsel %vm12052_vm1, %v15068_v10, %v1752_v51  ;;  %2381 = vst [vmem:[#allocation2 + $0x64] sm:$0x4] %v2380_v9  ;;  %2030 = vst [vmem:[#allocation2 + $0x58] sm:$0x1] %v2029_v14  ;;  %v15071_v51 = vld [vmem:[#allocation35_spill] sm:$0xff] }
 0x1c9   : > { %1754 = vst [vmem:[#allocation2 + $0x54] sm:$0x8] %v1753_v13  ;;  %v2060_v12 = vpop.permute.xlu0 %2059  ;;  %v2361_v9 = vld [vmem:[#allocation2 + $0x1c] sm:$0x4]  ;;  %v2940_v32 = vld [vmem:[#allocation2 + $0x8c] sm:$0x1] }
 0x1ca   : > { %v2046_v57 = vpop.permute.xlu1 %2045  ;;  %v2283_v26 = vld [vmem:[#allocation2 + $0x4] sm:$0x2]  ;;  %v2104_v40 = vsel %vm12017_vm12, %v2060_v12, %v2103_v63  ;;  %v15072_v12 = vld [vmem:[#allocation21_spill] sm:$0xff] }
 0x1cb   : > { %v2559_v1 = vld [vmem:[#allocation2 + $0x4] sm:$0x4]  ;;  %v2083_v34 = vsel %vm12017_vm12, %v2046_v57, %v2082_v54  ;;  %v2284_v31 = vsel %vm12072_vm7, %v15069_v7, %v2283_v26  ;;  %2105 = vst [vmem:[#allocation2 + $0x64] sm:$0x2] %v2104_v40  ;;  %v2091_v40 = vld [vmem:[#allocation2 + $0x34] sm:$0x2] }
 0x1cc   : > { %v2560_v60 = vsel %vm12122_vm10, %v15070_v24, %v2559_v1  ;;  %2084 = vst [vmem:[#allocation2 + $0x10] sm:$0x2] %v2083_v34  ;;  %2285 = vst [vmem:[#allocation2 + $0x4] sm:$0x2] %v2284_v31  ;;  %v15073_v26 = vld [vmem:[#allocation28_spill] sm:$0xff] }
 0x1cd   : > { %2561 = vst [vmem:[#allocation2 + $0x4] sm:$0x4] %v2560_v60  ;;  %v2048_v50 = vpop.permute.xlu0 %2047  ;;  %v2367_v34 = vld [vmem:[#allocation2 + $0x34] sm:$0x4]  ;;  %v2643_v31 = vld [vmem:[#allocation2 + $0x34] sm:$0x8] }
 0x1ce   : > { %v2598_v55 = vpop.permute.xlu1 %2597  ;;  %v2835_v17 = vld [vmem:[#allocation2 + $0x4] sm:$0x8]  ;;  %v2086_v27 = vsel %vm12017_vm12, %v2048_v50, %v2085_v36 }
 0x1cf   : > { %v2583_v25 = vld [vmem:[#allocation2 + $0x64] sm:$0x4]  ;;  %v2635_v2 = vsel %vm12008_vm11, %v2598_v55, %v2634_v38  ;;  %v2836_v35 = vsel %vm12052_vm1, %v12202_v19, %v2835_v17  ;;  %2087 = vst [vmem:[#allocation2 + $0x1c] sm:$0x2] %v2086_v27  ;;  %v2088_v55 = vld [vmem:[#allocation2 + $0x28] sm:$0x2] }
 0x1d0   : > { %v2584_v3 = vsel %vm12122_vm10, %v15071_v51, %v2583_v25  ;;  %2636 = vst [vmem:[#allocation2 + $0x10] sm:$0x8] %v2635_v2  ;;  %2837 = vst [vmem:[#allocation2 + $0x4] sm:$0x8] %v2836_v35  ;;  %v15074_v17 = vld [vmem:[#allocation24_spill] sm:$0xff] }
 0x1d1   : > { %2585 = vst [vmem:[#allocation2 + $0x64] sm:$0x4] %v2584_v3  ;;  %v2600_v10 = vpop.permute.xlu0 %2599  ;;  %v2943_v2 = vld [vmem:[#allocation2] sm:$0xf] }
 0x1d2   : > { %v2324_v13 = vpop.permute.xlu1 %2323  ;;  %v2307_v14 = vld [vmem:[#allocation2 + $0x64] sm:$0x2]  ;;  %v2638_v54 = vsel %vm12008_vm11, %v2600_v10, %v2637_v49 }
 0x1d3   : > { %v2286_v63 = vld [vmem:[#allocation2 + $0x10] sm:$0x2]  ;;  %v2362_v19 = vsel %vm12066_vm2, %v2324_v13, %v2361_v9  ;;  %v2308_v57 = vsel %vm12072_vm7, %v15072_v12, %v2307_v14  ;;  %2639 = vst [vmem:[#allocation2 + $0x1c] sm:$0x8] %v2638_v54  ;;  %v12558_v14 = vld [vmem:[#allocation2 + $0x60] sm:$0xf] }
 0x1d4   : > { %v2287_v1 = vsel %vm12072_vm7, %v15073_v26, %v2286_v63  ;;  %2363 = vst [vmem:[#allocation2 + $0x1c] sm:$0x4] %v2362_v19  ;;  %2309 = vst [vmem:[#allocation2 + $0x64] sm:$0x2] %v2308_v57  ;;  %v15075_v54 = vld [vmem:[#allocation23_spill] sm:$0xff] }
 0x1d5   : > { %2288 = vst [vmem:[#allocation2 + $0x10] sm:$0x2] %v2287_v1  ;;  %v2052_v36 = vpop.permute.xlu0 %2051  ;;  %v2358_v12 = vld [vmem:[#allocation2 + $0x10] sm:$0x4]  ;;  %v2640_v57 = vld [vmem:[#allocation2 + $0x28] sm:$0x8] }
 0x1d6   : > { %v2328_v7 = vpop.permute.xlu1 %2327  ;;  %v2289_v24 = vld [vmem:[#allocation2 + $0x1c] sm:$0x2]  ;;  %v2092_v38 = vsel %vm12017_vm12, %v2052_v36, %v2091_v40  ;;  %v3176_v40 = vshrl.u32 %v12558_v14, 16 }
 0x1d7   : > { %v2838_v60 = vld [vmem:[#allocation2 + $0x10] sm:$0x8]  ;;  %v2368_v50 = vsel %vm12066_vm2, %v2328_v7, %v2367_v34  ;;  %v2290_v25 = vsel %vm12072_vm7, %v15074_v17, %v2289_v24  ;;  %2093 = vst [vmem:[#allocation2 + $0x34] sm:$0x2] %v2092_v38  ;;  %v12550_v35 = vld [vmem:[#allocation2 + $0x4] sm:$0xf] }
 0x1d8   : > { %v2839_v27 = vsel %vm12052_vm1, %v12193_v43, %v2838_v60  ;;  %2369 = vst [vmem:[#allocation2 + $0x34] sm:$0x4] %v2368_v50  ;;  %2291 = vst [vmem:[#allocation2 + $0x1c] sm:$0x2] %v2290_v25  ;;  %v9454_v51 = vcombine.low %v2943_v2, %v12550_v35  ;;  %v3179_v34 = vshll.u32 %v12558_v14, 16  ;;  %v15076_v24 = vld [vmem:[#allocation25_spill] sm:$0xff] }
 0x1d9   : > { %2840 = vst [vmem:[#allocation2 + $0x10] sm:$0x8] %v2839_v27  ;;  %v2604_v3 = vpop.permute.xlu0 %2603  ;;  %v15077_v38 = vld [vmem:[#allocation26_spill] sm:$0xff]  ;;  %v2094_v17 = vld [vmem:[#allocation2 + $0x40] sm:$0x2]  ;;  %v2984_v25 = vshrl.u32 %v2943_v2, 16 }
 0x1da   : > { %v2050_v49 = vpop.permute.xlu1 %2049  ;;  %v2841_v9 = vld [vmem:[#allocation2 + $0x1c] sm:$0x8]  ;;  %v2644_v13 = vsel %vm12008_vm11, %v2604_v3, %v2643_v31  ;;  %10258 = vmatprep.mubr.msk.bf16.mxu0 %vm3286_vm13, %v9454_v51  ;;  %v2987_v27 = vshll.u32 %v2943_v2, 16 }
 0x1db   : > { %v2565_v10 = vld [vmem:[#allocation2 + $0x1c] sm:$0x4]  ;;  %v2089_v43 = vsel %vm12017_vm12, %v2050_v49, %v2088_v55  ;;  %v2842_v63 = vsel %vm12052_vm1, %v12225_v52, %v2841_v9  ;;  %2645 = vst [vmem:[#allocation2 + $0x34] sm:$0x8] %v2644_v13  ;;  %v2097_v55 = vld [vmem:[#allocation2 + $0x4c] sm:$0x2] }
 0x1dc   : > { %v2566_v19 = vsel %vm12122_vm10, %v15075_v54, %v2565_v10  ;;  %2090 = vst [vmem:[#allocation2 + $0x28] sm:$0x2] %v2089_v43  ;;  %2843 = vst [vmem:[#allocation2 + $0x1c] sm:$0x8] %v2842_v63  ;;  %v3178_v49 = vrot.slane %v3176_v40, 4  ;;  %v3181_v9 = vrot.slane %v3179_v34, 5 }
 0x1dd   : > { %2567 = vst [vmem:[#allocation2 + $0x1c] sm:$0x4] %v2566_v19  ;;  %v2322_v26 = vpop.permute.xlu0 %2321  ;;  %v15078_v19 = vld [vmem:[#allocation34_spill] sm:$0xff]  ;;  %v12592_v40 = vld [vmem:[#allocation2 + $0x18] sm:$0xf] }
 0x1de   : > { %v2602_v1 = vpop.permute.xlu1 %2601  ;;  %v2295_v36 = vld [vmem:[#allocation2 + $0x34] sm:$0x2]  ;;  %v2359_v52 = vsel %vm12066_vm2, %v2322_v26, %v2358_v12  ;;  %v2649_v12 = vld [vmem:[#allocation2 + $0x4c] sm:$0x8]  ;;  %v12588_v26 = vrot.slane %v2984_v25, 4 }
 0x1df   : > { %v2571_v7 = vld [vmem:[#allocation2 + $0x34] sm:$0x4]  ;;  %v2641_v31 = vsel %vm12008_vm11, %v2602_v1, %v2640_v57  ;;  %v2296_v60 = vsel %vm12072_vm7, %v15076_v24, %v2295_v36  ;;  %2360 = vst [vmem:[#allocation2 + $0x10] sm:$0x4] %v2359_v52  ;;  %v2646_v57 = vld [vmem:[#allocation2 + $0x40] sm:$0x8] }
 0x1e0   : > { %v2572_v50 = vsel %vm12122_vm10, %v15077_v38, %v2571_v7  ;;  %2642 = vst [vmem:[#allocation2 + $0x28] sm:$0x8] %v2641_v31  ;;  %2297 = vst [vmem:[#allocation2 + $0x34] sm:$0x2] %v2296_v60  ;;  %v12590_v1 = vrot.slane %v2987_v27, 5  ;;  %v3182_v31 = vor.u32 %v3181_v9, %v3178_v49  ;;  %v3035_v49 = vshll.u32 %v12592_v40, 16 }
 0x1e1   : > { %2573 = vst [vmem:[#allocation2 + $0x34] sm:$0x4] %v2572_v50  ;;  %v2056_v51 = vpop.permute.xlu0 %2055  ;;  %v990_v7 = vld [vmem:[#allocation2 + $0x6c] sm:$0x2]  ;;  %v12596_v52 = vld [vmem:[#allocation2 + $0x30] sm:$0xf] }
 0x1e2   : > { %v2054_v3 = vpop.permute.xlu1 %2053  ;;  %v2847_v10 = vld [vmem:[#allocation2 + $0x34] sm:$0x8]  ;;  %v2098_v43 = vsel %vm12017_vm12, %v2056_v51, %v2097_v55  ;;  %v12602_v55 = vld [vmem:[#allocation2 + $0x24] sm:$0xf]  ;;  %v2364_v51 = vld [vmem:[#allocation2 + $0x28] sm:$0x4] }
 0x1e3   : > { %v2292_v13 = vld [vmem:[#allocation2 + $0x28] sm:$0x2]  ;;  %v2095_v63 = vsel %vm12017_vm12, %v2054_v3, %v2094_v17  ;;  %v2848_v54 = vsel %vm12052_vm1, %v12261_v6, %v2847_v10  ;;  %2099 = vst [vmem:[#allocation2 + $0x4c] sm:$0x2] %v2098_v43  ;;  %v12594_v6 = vld [vmem:[#allocation2 + $0xc] sm:$0xf] }
 0x1e4   : > { %v2293_v2 = vsel %vm12072_vm7, %v15078_v19, %v2292_v13  ;;  %2096 = vst [vmem:[#allocation2 + $0x40] sm:$0x2] %v2095_v63  ;;  %2849 = vst [vmem:[#allocation2 + $0x34] sm:$0x8] %v2848_v54  ;;  %v15079_v17 = vld [vmem:[#allocation22_spill] sm:$0xff]  ;;  %v3032_v3 = vshrl.u32 %v12592_v40, 16 }
 0x1e5   : > { %2294 = vst [vmem:[#allocation2 + $0x28] sm:$0x2] %v2293_v2  ;;  %v2608_v34 = vpop.permute.xlu0 %2607  ;;  %v12612_v9 = vld [vmem:[#allocation2] sm:$0xe]  ;;  %v3008_v10 = vshrl.u32 %v12594_v6, 16  ;;  %v3011_v13 = vshll.u32 %v12594_v6, 16 }
 0x1e6   : > { %v2606_v36 = vpop.permute.xlu1 %2605  ;;  %v2562_v24 = vld [vmem:[#allocation2 + $0x10] sm:$0x4]  ;;  %v2650_v38 = vsel %vm12008_vm11, %v2608_v34, %v2649_v12  ;;  %v3080_v43 = vshrl.u32 %v12596_v52, 16  ;;  %v3083_v63 = vshll.u32 %v12596_v52, 16  ;;  %v1552_v19 = vld [vmem:[#allocation2 + $0x6c] sm:$0x8] }
 0x1e7   : > { %v2844_v60 = vld [vmem:[#allocation2 + $0x28] sm:$0x8]  ;;  %v2647_v50 = vsel %vm12008_vm11, %v2606_v36, %v2646_v57  ;;  %v2563_v25 = vsel %vm12122_vm10, %v15079_v17, %v2562_v24  ;;  %2651 = vst [vmem:[#allocation2 + $0x4c] sm:$0x8] %v2650_v38  ;;  %v3056_v2 = vshrl.u32 %v12602_v55, 16  ;;  %v3059_v12 = vshll.u32 %v12602_v55, 16 }
 0x1e8   : > { %v2845_v27 = vsel %vm12052_vm1, %v12232_v56, %v2844_v60  ;;  %2648 = vst [vmem:[#allocation2 + $0x40] sm:$0x8] %v2647_v50  ;;  %2564 = vst [vmem:[#allocation2 + $0x10] sm:$0x4] %v2563_v25  ;;  %v12620_v57 = vrot.slane %v3182_v31, 4  ;;  %v2990_v38 = vor.u32 %v12590_v1, %v12588_v26  ;;  %v15081_v17 = vld [vmem:[#allocation38_spill] sm:$0xff] }
 0x1e9   : > { %2846 = vst [vmem:[#allocation2 + $0x28] sm:$0x8] %v2845_v27  ;;  %v2326_v54 = vpop.permute.xlu0 %2325  ;;  %v15082_v27 = vld [vmem:[#allocation37_spill] sm:$0xff]  ;;  %v12639_v26 = vrot.slane %v3008_v10, 4  ;;  %v12641_v1 = vrot.slane %v3011_v13, 5 }
 0x1ea   : > { %v943_v56 = vpop.permute.xlu1 %942  ;;  %15080 = vst [vmem:[#allocation31_spill] sm:$0xff] %v12620_v57  ;;  %v2301_v34 = vld [vmem:[#allocation2 + $0x4c] sm:$0x2]  ;;  %v2365_v60 = vsel %vm12066_vm2, %v2326_v54, %v2364_v51  ;;  %v12643_v51 = vrot.slane %v3080_v43, 4  ;;  %v12645_v54 = vrot.slane %v3083_v63, 5 }
 0x1eb   : > { %v2298_v36 = vld [vmem:[#allocation2 + $0x40] sm:$0x2]  ;;  %v991_v24 = vsel %vm12017_vm12, %v943_v56, %v990_v7  ;;  %v2302_v25 = vsel %vm12072_vm7, %v15081_v17, %v2301_v34  ;;  %2366 = vst [vmem:[#allocation2 + $0x28] sm:$0x4] %v2365_v60  ;;  %v12635_v7 = vrot.slane %v3032_v3, 4  ;;  %v12637_v56 = vrot.slane %v3035_v49, 5 }
 0x1ec   : > { %v2299_v31 = vsel %vm12072_vm7, %v15082_v27, %v2298_v36  ;;  %992 = vst [vmem:[#allocation2 + $0x6c] sm:$0x2] %v991_v24  ;;  %2303 = vst [vmem:[#allocation2 + $0x4c] sm:$0x2] %v2302_v25  ;;  %v12647_v34 = vld [vmem:[#allocation2 + $0x3c] sm:$0xf] }
 0x1ed   : > { %2300 = vst [vmem:[#allocation2 + $0x40] sm:$0x2] %v2299_v31  ;;  %v2612_v24 = vpop.permute.xlu0 %2611  ;;  %v2370_v60 = vld [vmem:[#allocation2 + $0x40] sm:$0x4]  ;;  %v2373_v17 = vld [vmem:[#allocation2 + $0x4c] sm:$0x4] }
 0x1ee   : > { %v1505_v36 = vpop.permute.xlu1 %1504  ;;  %v12649_v3 = vrot.slane %v3056_v2, 4  ;;  %v12651_v49 = vrot.slane %v3059_v12, 5  ;;  %v12653_v25 = vld [vmem:[#allocation2 + $0x48] sm:$0xf]  ;;  %v2853_v10 = vld [vmem:[#allocation2 + $0x4c] sm:$0x8]  ;;  %v2656_v43 = vsel %vm12008_vm11, %v2612_v24, %v2655_v45 }
 0x1ef   : > { %v2850_v27 = vld [vmem:[#allocation2 + $0x40] sm:$0x8]  ;;  %v1553_v13 = vsel %vm12008_vm11, %v1505_v36, %v1552_v19  ;;  %v12659_v63 = vld [vmem:[#allocation2 + $0x1c] sm:$0xf]  ;;  %v2854_v31 = vsel %vm12052_vm1, %v12283_v37, %v2853_v10  ;;  %2657 = vst [vmem:[#allocation2 + $0x64] sm:$0x8] %v2656_v43 }
 0x1f0   : > { %v2851_v2 = vsel %vm12052_vm1, %v12258_v23, %v2850_v27  ;;  %1554 = vst [vmem:[#allocation2 + $0x6c] sm:$0x8] %v1553_v13  ;;  %v12667_v12 = vld [vmem:[#allocation2 + $0x10] sm:$0xf]  ;;  %v3104_v50 = vshrl.u32 %v12647_v34, 16  ;;  %v3107_v19 = vshll.u32 %v12647_v34, 16  ;;  %v9456_v13 = vcombine.low %v12592_v40, %v12659_v63 }
 0x1f1   : > { %2855 = vst [vmem:[#allocation2 + $0x4c] sm:$0x8] %v2854_v31  ;;  %2852 = vst [vmem:[#allocation2 + $0x40] sm:$0x8] %v2851_v2  ;;  %v9455_v45 = vcombine.low %v12594_v6, %v12667_v12  ;;  %v11040_v37 = vld [vmem:[%s14922_s2 + $0x48] sm:$0xff]   ;;  %v3128_v36 = vshrl.u32 %v12653_v25, 16  ;;  %v2330_v10 = vpop.permute.xlu0 %2329  ;;  %v3014_v6 = vor.u32 %v12641_v1, %v12639_v26  ;;  %v3038_v2 = vor.u32 %v12637_v56, %v12635_v7 }
 0x1f2   : > { %v3131_v23 = vshll.u32 %v12653_v25, 16  ;;  %v12678_v24 = vrot.slane %v2990_v38, 4  ;;  %v2332_v27 = vpop.permute.xlu1 %2331  ;;  %v1271_v43 = vld [vmem:[#allocation2 + $0x6c] sm:$0x4]  ;;  %v12682_v31 = vld [vmem:[#allocation2 + $0x54] sm:$0xf]  ;;  %v2371_v28 = vsel %vm12066_vm2, %v2330_v10, %v2370_v60  ;;  %v3062_v26 = vor.u32 %v12651_v49, %v12649_v3 }
 0x1f3   : > { %v1196_v38 = vld [vmem:[#allocation2 + $0x6c] sm:$0x2]  ;;  %v2568_v11 = vld [vmem:[#allocation2 + $0x28] sm:$0x4]  ;;  %v2374_v40 = vsel %vm12066_vm2, %v2332_v27, %v2373_v17  ;;  %10259 = vmatmul.mubr.msk.bf16.vlgmr.msra.gmra.mrb[8].mxu0 %vm3286_vm13, %v9455_v45  ;;  %v3086_v7 = vor.u32 %v12645_v54, %v12643_v51  ;;  %v12701_v56 = vld [vmem:[#allocation2 + $0x30] sm:$0xe] }
 0x1f4   : > { %v1197_v1 = vsel %vm12072_vm7, %v12079_v59, %v1196_v38  ;;  %v15083_v60 = vld [vmem:[#allocation29_spill] sm:$0xff]  ;;  %2372 = vst [vmem:[#allocation2 + $0x40] sm:$0x4] %v2371_v28  ;;  %2375 = vst [vmem:[#allocation2 + $0x4c] sm:$0x4] %v2374_v40  ;;  %10262 = vmatprep.mubr.msk.bf16.mxu0 %vm3286_vm13, %v9456_v13  ;;  %v11096_v3 = vld [vmem:[%s14922_s2 + $0x40] sm:$0xff]  }
 0x1f5   : > { %v2569_v17 = vsel %vm12122_vm10, %v15083_v60, %v2568_v11  ;;  %v2100_v45 = vld [vmem:[#allocation2 + $0x58] sm:$0x2]  ;;  %10279 = vmatpush3.bf16.msra.mxu0 %v11096_v3  ;;  %v12713_v51 = vrot.slane %v3104_v50, 4  ;;  %v12715_v54 = vrot.slane %v3107_v19, 5  ;;  %v11044_v59 = vld [vmem:[%s14922_s2 + $0x50] sm:$0xff]   ;;  %v12720_v11 = vrot.slane %v3128_v36, 4  ;;  %v1224_v50 = vpop.permute.xlu0 %1223 }
 0x1f6   : > { %1198 = vst [vmem:[#allocation2 + $0x6c] sm:$0x2] %v1197_v1  ;;  %2570 = vst [vmem:[#allocation2 + $0x28] sm:$0x4] %v2569_v17  ;;  %10280 = vmatprep.subr.bf16.mxu0 %v11040_v37  ;;  %v12722_v28 = vrot.slane %v3131_v23, 5  ;;  %v3152_v49 = vshrl.u32 %v12682_v31, 16  ;;  %v2058_v19 = vpop.permute.xlu1 %2057  ;;  %v1272_v17 = vsel %vm12066_vm2, %v1224_v50, %v1271_v43 }
 0x1f7   : > { %v3155_v10 = vshll.u32 %v12682_v31, 16  ;;  %v12726_v27 = vld [vmem:[#allocation2 + $0x24] sm:$0xe]  ;;  %v2652_v13 = vld [vmem:[#allocation2 + $0x58] sm:$0x8]  ;;  %v12728_v38 = vrot.slane %v3038_v2, 4  ;;  %v2101_v3 = vsel %vm12017_vm12, %v2058_v19, %v2100_v45 }
 0x1f8   : > { %v1758_v60 = vld [vmem:[#allocation2 + $0x6c] sm:$0x8]  ;;  %v2859_v23 = vld [vmem:[#allocation2 + $0x64] sm:$0x8]  ;;  %v12737_v47 = vrot.slane %v3014_v6, 4  ;;  %v12739_v5 = vrot.slane %v3086_v7, 4 }
 0x1f9   : > { %v1759_v2 = vsel %vm12052_vm1, %v12131_v20, %v1758_v60  ;;  %v2860_v40 = vsel %vm12052_vm1, %v12305_v44, %v2859_v23  ;;  %1273 = vst [vmem:[#allocation2 + $0x6c] sm:$0x4] %v1272_v17  ;;  %2102 = vst [vmem:[#allocation2 + $0x58] sm:$0x2] %v2101_v3  ;;  %v2376_v36 = vld [vmem:[#allocation2 + $0x58] sm:$0x4]  ;;  %10281 = vmatpush3.bf16.msra.mxu0 %v11040_v37  ;;  %v3110_v44 = vor.u32 %v12715_v54, %v12713_v51  ;;  %v2334_v23 = vpop.permute.xlu0 %2333 }
 0x1fa   : > { %v11050_v43 = vld [vmem:[%s14922_s2 + $0x58] sm:$0xff]   ;;  %v12750_v6 = vrot.slane %v3062_v26, 4  ;;  %1760 = vst [vmem:[#allocation2 + $0x6c] sm:$0x8] %v1759_v2  ;;  %2861 = vst [vmem:[#allocation2 + $0x64] sm:$0x8] %v2860_v40  ;;  %10282 = vmatprep.subr.bf16.mxu0 %v11044_v59  ;;  %v3134_v37 = vor.u32 %v12722_v28, %v12720_v11  ;;  %v2610_v40 = vpop.permute.xlu1 %2609  ;;  %v2377_v28 = vsel %vm12066_vm2, %v2334_v23, %v2376_v36 }
 0x1fb   : > { %v12753_v20 = vrot.slane %v3152_v49, 4  ;;  %v12755_v45 = vrot.slane %v3155_v10, 5  ;;  %v12761_v50 = vld [vmem:[#allocation2 + $0x3c] sm:$0xe]  ;;  %v12763_v19 = vld [vmem:[#allocation2 + $0x48] sm:$0xe]  ;;  %v2653_v11 = vsel %vm12008_vm11, %v2610_v40, %v2652_v13 }
 0x1fc   : > { %15084 = vst [vmem:[#allocation30_spill] sm:$0xff] %v12763_v19  ;;  %v2997_v26 = vshrl.u32 %v12550_v35, 16  ;;  %v3045_v60 = vshrl.u32 %v12659_v63, 16  ;;  %v2106_v49 = vld [vmem:[#allocation2 + $0x70] sm:$0x2]  ;;  %v2993_v10 = vshll.u32 %v12550_v35, 16 }
 0x1fd   : > { %v1830_v17 = vld [vmem:[#allocation2 + $0x70] sm:$0x1]  ;;  %v3041_v3 = vshll.u32 %v12659_v63, 16  ;;  %v2574_v51 = vld [vmem:[#allocation2 + $0x40] sm:$0x4]  ;;  %v15085_v7 = vld [vmem:[#allocation33_spill] sm:$0xff]  ;;  %10283 = vmatpush3.bf16.msra.mxu0 %v11044_v59  ;;  %v3158_v59 = vor.u32 %v12755_v45, %v12753_v20 }
 0x1fe   : > { %v2577_v54 = vld [vmem:[#allocation2 + $0x4c] sm:$0x4]  ;;  %v12773_v2 = vld [vmem:[#allocation2 + $0x34] sm:$0xf]  ;;  %v2575_v1 = vsel %vm12122_vm10, %v15085_v7, %v2574_v51  ;;  %2654 = vst [vmem:[#allocation2 + $0x58] sm:$0x8] %v2653_v11  ;;  %10284 = vmatprep.subr.bf16.mxu0 %v11050_v43  ;;  %v2062_v51 = vpop.permute.xlu1 %2061 }
 0x1ff   : > { %v2578_v57 = vsel %vm12122_vm10, %v15086_v8, %v2577_v54  ;;  %2378 = vst [vmem:[#allocation2 + $0x58] sm:$0x4] %v2377_v28  ;;  %v12781_v30 = vld [vmem:[#allocation2 + $0x28] sm:$0xf]  ;;  %2576 = vst [vmem:[#allocation2 + $0x40] sm:$0x4] %v2575_v1  ;;  %v1786_v54 = vpop.permute.xlu0 %1785  ;;  %v2107_v45 = vsel %vm12017_vm12, %v2062_v51, %v2106_v49 }
 0x200   : > { %2579 = vst [vmem:[#allocation2 + $0x4c] sm:$0x4] %v2578_v57  ;;  %v9457_v36 = vcombine.low %v12602_v55, %v12781_v30  ;;  %v3682_v7 = vrot.slane %v12550_v35, 5  ;;  %v12791_v8 = vld [vmem:[%s14922_s2 + $0x60] sm:$0xff]   ;;  %v12793_v23 = vrot.slane %v3110_v44, 4  ;;  %v9458_v57 = vcombine.low %v12596_v52, %v12773_v2 }
 0x201   : > { %v2658_v1 = vld [vmem:[#allocation2 + $0x70] sm:$0x8]  ;;  %v12799_v55 = vrot.slane %v2993_v10, 5  ;;  %v12801_v11 = vrot.slane %v2997_v26, 4  ;;  %v12809_v44 = vrot.slane %v3134_v37, 4  ;;  %v1831_v52 = vsel %vm11385_vm4, %v1786_v54, %v1830_v17  ;;  %v15089_v40 = vld [vmem:[#allocation36_spill] sm:$0xff]  ;;  %10285 = vmatpush3.bf16.msra.mxu0 %v11050_v43 }
 0x202   : > { %v1477_v28 = vld [vmem:[#allocation2 + $0x6c] sm:$0x4]  ;;  %v2304_v20 = vld [vmem:[#allocation2 + $0x58] sm:$0x2]  ;;  %10263 = vmatmul.mubr.msk.bf16.gmra.mrb[12].mxu0 %vm3286_vm13, %v9457_v36  ;;  %v12816_v26 = vrot.slane %v3041_v3, 5  ;;  %v12818_v10 = vrot.slane %v3045_v60, 4  ;;  %10306 = vmatprep.subr.bf16.mxu0 %v12791_v8 }
 0x203   : > { %v1478_v13 = vsel %vm12122_vm10, %v15089_v40, %v1477_v28  ;;  %v15090_v37 = vld [vmem:[#allocation42_spill] sm:$0xff]  ;;  %2108 = vst [vmem:[#allocation2 + $0x70] sm:$0x2] %v2107_v45  ;;  %1832 = vst [vmem:[#allocation2 + $0x70] sm:$0x1] %v1831_v52  ;;  %v3093_v49 = vshrl.u32 %v12773_v2, 16  ;;  %10266 = vmatprep.mubr.msk.bf16.mxu0 %vm3286_vm13, %v9458_v57  ;;  %v2614_v57 = vpop.permute.xlu1 %2613  ;;  %v2338_v28 = vpop.permute.xlu0 %2337 }
 0x204   : > { %v2305_v29 = vsel %vm12072_vm7, %v15090_v37, %v2304_v20  ;;  %v2382_v17 = vld [vmem:[#allocation2 + $0x70] sm:$0x4]  ;;  %v3089_v3 = vshll.u32 %v12773_v2, 16  ;;  %v3021_v60 = vshrl.u32 %v12667_v12, 16  ;;  %1479 = vst [vmem:[#allocation2 + $0x6c] sm:$0x4] %v1478_v13 }
 0x205   : > { %2306 = vst [vmem:[#allocation2 + $0x58] sm:$0x2] %v2305_v29  ;;  %v3017_v40 = vshll.u32 %v12667_v12, 16  ;;  %v15091_v36 = vrot.slane %v12612_v9, 9  ;;  %v12838_v54 = vrot.slane %v3158_v59, 4  ;;  %v3069_v43 = vshrl.u32 %v12781_v30, 16 }
 0x206   : > { %v2910_v20 = vld [vmem:[#allocation2 + $0x14] sm:$0x1]  ;;  %v2907_v45 = vld [vmem:[#allocation2 + $0x8] sm:$0x1]  ;;  %v3000_v29 = vor.u32 %v12801_v11, %v12799_v55  ;;  %v12843_v13 = vrot.slane %v3682_v7, 4  ;;  %v3065_v9 = vshll.u32 %v12781_v30, 16 }
 0x207   : > { %v12835_v51 = vsel %vm12805_vm9, %v15091_v36, %v3682_v7  ;;  %15092 = vst [vmem:[#allocation15_spill] sm:$0xff] %v12838_v54  ;;  %v2856_v59 = vld [vmem:[#allocation2 + $0x58] sm:$0x8]  ;;  %v2580_v37 = vld [vmem:[#allocation2 + $0x58] sm:$0x4]  ;;  %v2659_v36 = vsel %vm12008_vm11, %v2614_v57, %v2658_v1  ;;  %v2383_v54 = vsel %vm12066_vm2, %v2338_v28, %v2382_v17  ;;  %v3048_v7 = vor.u32 %v12818_v10, %v12816_v26  ;;  %v2872_v28 = vpop.permute.xlu0 %2871 }
 0x208   : > { %v3696_v11 = vrot.slane %v12659_v63, 5  ;;  %v2857_v19 = vsel %vm12052_vm1, %v12280_v16, %v2856_v59  ;;  %v2581_v46 = vsel %vm12122_vm10, %v15095_v0, %v2580_v37  ;;  %2660 = vst [vmem:[#allocation2 + $0x70] sm:$0x8] %v2659_v36  ;;  %2384 = vst [vmem:[#allocation2 + $0x70] sm:$0x4] %v2383_v54  ;;  %v12869_v17 = vrot.slane %v3089_v3, 5  ;;  %v2874_v54 = vpop.permute.xlu1 %2873 }
 0x209   : > { %v12865_v4 = vld [vmem:[#allocation2 + $0x40] sm:$0xf]  ;;  %v12867_v1 = vld [vmem:[#allocation2 + $0x4c] sm:$0xf]  ;;  %v12871_v57 = vrot.slane %v3093_v49, 4  ;;  %v12877_v10 = vrot.slane %v3017_v40, 5 }
 0x20a   : > { %2858 = vst [vmem:[#allocation2 + $0x58] sm:$0x8] %v2857_v19  ;;  %2582 = vst [vmem:[#allocation2 + $0x58] sm:$0x4] %v2581_v46  ;;  %v9459_v63 = vcombine.low %v12647_v34, %v12865_v4  ;;  %v9460_v16 = vcombine.low %v12653_v25, %v12867_v1  ;;  %v3023_v0 = vrot.slane %v3021_v60, 4  ;;  %v12883_v3 = vrot.slane %v3065_v9, 5 }
 0x20b   : > { %v2916_v59 = vld [vmem:[#allocation2 + $0x2c] sm:$0x1]  ;;  %v3071_v46 = vrot.slane %v3069_v43, 4  ;;  %v3710_v19 = vrot.slane %v12773_v2, 5  ;;  %v2310_v34 = vld [vmem:[#allocation2 + $0x70] sm:$0x2]  ;;  %v2911_v25 = vsel %vm11385_vm4, %v2874_v54, %v2910_v20  ;;  %v2908_v60 = vsel %vm11385_vm4, %v2872_v28, %v2907_v45 }
 0x20c   : > { %v2034_v37 = vld [vmem:[#allocation2 + $0x70] sm:$0x1]  ;;  %10267 = vmatmul.mubr.msk.bf16.gmra.mrb[16].mxu0 %vm3286_vm13, %v9459_v63  ;;  %v12891_v40 = vrot.slane %v3000_v29, 4  ;;  %v15096_v36 = vrot.slane %v12690_v61, 9  ;;  %v3689_v2 = vrot.slane %v12667_v12, 5  ;;  %v2311_v43 = vsel %vm12072_vm7, %v12154_v41, %v2310_v34  ;;  %v15097_v20 = vld [vmem:[#allocation44_spill] sm:$0xff]  ;;  %v2876_v34 = vpop.permute.xlu0 %2875 }
 0x20d   : > { %v2035_v45 = vsel %vm11477_vm6, %v15097_v20, %v2034_v37  ;;  %2912 = vst [vmem:[#allocation2 + $0x14] sm:$0x1] %v2911_v25  ;;  %2909 = vst [vmem:[#allocation2 + $0x8] sm:$0x1] %v2908_v60  ;;  %10270 = vmatprep.mubr.msk.bf16.mxu0 %vm3286_vm13, %v9460_v16  ;;  %v2913_v29 = vld [vmem:[#allocation2 + $0x20] sm:$0x1]  ;;  %v3024_v12 = vor.u32 %v3023_v0, %v12877_v10  ;;  %v3096_v28 = vor.u32 %v12871_v57, %v12869_v17  ;;  %v2878_v16 = vpop.permute.xlu1 %2877 }
 0x20e   : > { %v12897_v9 = vsel %vm12805_vm9, %v15096_v36, %v3696_v11  ;;  %v12907_v61 = vld [vmem:[#allocation2 + $0x64] sm:$0xf]  ;;  %v12909_v63 = vrot.slane %v3696_v11, 4  ;;  %2312 = vst [vmem:[#allocation2 + $0x70] sm:$0x2] %v2311_v43  ;;  %v12916_v54 = vrot.slane %v3048_v7, 4  ;;  %v3072_v11 = vor.u32 %v3071_v46, %v12883_v3 }
 0x20f   : > { %15098 = vst [vmem:[#allocation16_spill] sm:$0xff] %v12907_v61  ;;  %2036 = vst [vmem:[#allocation2 + $0x70] sm:$0x1] %v2035_v45  ;;  %v2922_v37 = vld [vmem:[#allocation2 + $0x44] sm:$0x1]  ;;  %v3703_v60 = vrot.slane %v12781_v30, 5  ;;  %v2917_v57 = vsel %vm11385_vm4, %v2878_v16, %v2916_v59  ;;  %v2914_v45 = vsel %vm11385_vm4, %v2876_v34, %v2913_v29 }
 0x210   : > { %v2919_v25 = vld [vmem:[#allocation2 + $0x38] sm:$0x1]  ;;  %v15099_v0 = vrot.slane %v12701_v56, 9  ;;  %v12928_v43 = vrot.slane %v3710_v19, 4  ;;  %v2862_v7 = vld [vmem:[#allocation2 + $0x70] sm:$0x8] }
 0x211   : > { %v2586_v20 = vld [vmem:[#allocation2 + $0x70] sm:$0x4]  ;;  %v3189_v46 = vshrl.u32 %v12907_v61, 16  ;;  %v3185_v30 = vshll.u32 %v12907_v61, 16  ;;  %v12936_v41 = vrot.slane %v3689_v2, 4  ;;  %v2863_v56 = vsel %vm12052_vm1, %v12302_v15, %v2862_v7  ;;  %v2882_v7 = vpop.permute.xlu1 %2881 }
 0x212   : > { %v12926_v36 = vsel %vm12805_vm9, %v15099_v0, %v3710_v19  ;;  %v2587_v19 = vsel %vm12122_vm10, %v12148_v42, %v2586_v20  ;;  %2918 = vst [vmem:[#allocation2 + $0x2c] sm:$0x1] %v2917_v57  ;;  %2915 = vst [vmem:[#allocation2 + $0x20] sm:$0x1] %v2914_v45  ;;  %v12944_v59 = vld [vmem:[#allocation2 + $0x58] sm:$0xf]  ;;  %v2880_v20 = vpop.permute.xlu0 %2879  ;;  %v9462_v57 = vcombine.low %v12558_v14, %v12907_v61 }
 0x213   : > { %15100 = vst [vmem:[#allocation17_spill] sm:$0xff] %v12926_v36  ;;  %2864 = vst [vmem:[#allocation2 + $0x70] sm:$0x8] %v2863_v56  ;;  %v9461_v16 = vcombine.low %v12682_v31, %v12944_v59  ;;  %v3025_v34 = vrot.slane %v3024_v12, 4  ;;  %v15101_v15 = vrot.slane %v12688_v58, 9  ;;  %v12958_v0 = vrot.slane %v3096_v28, 4 }
 0x214   : > { %2588 = vst [vmem:[#allocation2 + $0x70] sm:$0x4] %v2587_v19  ;;  %v2928_v45 = vld [vmem:[#allocation2 + $0x5c] sm:$0x1]  ;;  %v12962_v56 = vrot.slane %v3072_v11, 4  ;;  %v12964_v19 = vrot.slane %v3703_v60, 4  ;;  %v2923_v58 = vsel %vm11385_vm4, %v2882_v7, %v2922_v37 }
 0x215   : > { %v12956_v42 = vsel %vm12805_vm9, %v15101_v15, %v3689_v2  ;;  %v2920_v2 = vsel %vm11385_vm4, %v2880_v20, %v2919_v25  ;;  %10271 = vmatmul.mubr.msk.bf16.gmra.mrb[20].mxu0 %vm3286_vm13, %v9461_v16  ;;  %v2971_v12 = vld [vmem:[#allocation2 + $0x8] sm:$0x1]  ;;  %v12972_v28 = vld [vmem:[#allocation2 + $0x14] sm:$0x1]  ;;  %v12974_v15 = vrot.slane %v3185_v30, 5  ;;  %v12976_v14 = vrot.slane %v3189_v46, 4 }
 0x216   : > { %v3117_v11 = vshrl.u32 %v12865_v4, 16  ;;  %2924 = vst [vmem:[#allocation2 + $0x44] sm:$0x1] %v2923_v58  ;;  %2921 = vst [vmem:[#allocation2 + $0x38] sm:$0x1] %v2920_v2  ;;  %10274 = vmatprep.mubr.msk.bf16.mxu0 %vm3286_vm13, %v9462_v57  ;;  %v3003_v37 = vshll.u32 %v2971_v12, 16  ;;  %v3020_v30 = vsel %vm12848_vm14, %v12737_v47, %v12877_v10  ;;  %v2886_v58 = vpop.permute.xlu1 %2885  ;;  %v2884_v2 = vpop.permute.xlu0 %2883 }
 0x217   : > { %v2925_v31 = vld [vmem:[#allocation2 + $0x50] sm:$0x1]  ;;  %v3027_v7 = vshll.u32 %v12972_v28, 16  ;;  %v3685_v25 = vrot.slane %v2971_v12, 5  ;;  %v3141_v16 = vshrl.u32 %v12867_v1, 16  ;;  %v15102_v46 = vrot.slane %v12726_v27, 9 }
 0x218   : > { %v3113_v57 = vshll.u32 %v12865_v4, 16  ;;  %v2934_v29 = vld [vmem:[#allocation2 + $0x74] sm:$0x1]  ;;  %v2931_v49 = vld [vmem:[#allocation2 + $0x68] sm:$0x1]  ;;  %v3005_v12 = vrot.slane %v3003_v37, 5  ;;  %v2929_v47 = vsel %vm11385_vm4, %v2886_v58, %v2928_v45  ;;  %v2926_v27 = vsel %vm11385_vm4, %v2884_v2, %v2925_v31 }
 0x219   : > { %v12990_v20 = vsel %vm12805_vm9, %v15102_v46, %v3703_v60  ;;  %v3029_v61 = vrot.slane %v3027_v7, 5  ;;  %v3137_v53 = vshll.u32 %v12867_v1, 16  ;;  %v12999_v10 = vld [vmem:[#allocation2 + $0x6c] sm:$0xf]  ;;  %v3686_v60 = vsel %vm12805_vm9, %v12843_v13, %v3685_v25  ;;  %v2973_v46 = vld [vmem:[#allocation2 + $0x20] sm:$0x1] }
 0x21a   : > { %15103 = vst [vmem:[#allocation18_spill] sm:$0xff] %v12990_v20  ;;  %v13004_v36 = vld [vmem:[#allocation2 + $0x2c] sm:$0x1]  ;;  %2930 = vst [vmem:[#allocation2 + $0x5c] sm:$0x1] %v2929_v47  ;;  %v3006_v45 = vsel %vm12848_vm14, %v12891_v40, %v3005_v12  ;;  %v3051_v13 = vshll.u32 %v2973_v46, 16  ;;  %v15104_v58 = vsel %vm12848_vm14, %v12678_v24, %v12799_v55  ;;  %v2890_v12 = vpop.permute.xlu1 %2889  ;;  %v2888_v37 = vpop.permute.xlu0 %2887 }
 0x21b   : > { %2927 = vst [vmem:[#allocation2 + $0x50] sm:$0x1] %v2926_v27  ;;  %v13013_v31 = vld [vmem:[#allocation2 + $0x70] sm:$0xf]  ;;  %v3030_v7 = vsel %vm12848_vm14, %v3025_v34, %v3029_v61  ;;  %v3075_v25 = vshll.u32 %v13004_v36, 16  ;;  %v9430_v2 = vcombine.low %v15104_v58, %v3006_v45  ;;  %v3724_v40 = vrot.slane %v12867_v1, 5 }
 0x21c   : > { %v9463_v47 = vcombine.low %v12999_v10, %v13013_v31  ;;  %v9431_v27 = vcombine.low %v3020_v30, %v3030_v7  ;;  %v3692_v39 = vrot.slane %v12972_v28, 5  ;;  %v9496_v61 = vcombine.low %v12835_v51, %v3686_v60  ;;  %v1274_v34 = vld [vmem:[#allocation2 + $0x78] sm:$0x4]  ;;  %v993_v55 = vld [vmem:[#allocation2 + $0x78] sm:$0x2] }
 0x21d   : > { %v3053_v20 = vrot.slane %v3051_v13, 5  ;;  %v3077_v48 = vrot.slane %v3075_v25, 5  ;;  %v2935_v21 = vsel %vm11385_vm4, %v2890_v12, %v2934_v29  ;;  %v2932_v24 = vsel %vm11385_vm4, %v2888_v37, %v2931_v49  ;;  %10230 = vmatprep.mubr.msk.bf16.mxu1 %vm3286_vm13, %v9430_v2  ;;  %v13034_v45 = vld [vmem:[#allocation2 + $0x38] sm:$0x1]  ;;  %v13044_v29 = vld [vmem:[#allocation2 + $0x44] sm:$0x1] }
 0x21e   : > { %10275 = vmatmul.mubr.msk.bf16.gmra.mrb[24].mxu0 %vm3286_vm13, %v9463_v47  ;;  %v3699_v30 = vrot.slane %v2973_v46, 5  ;;  %v13036_v28 = vrot.slane %v3117_v11, 4  ;;  %2936 = vst [vmem:[#allocation2 + $0x74] sm:$0x1] %v2935_v21  ;;  %2933 = vst [vmem:[#allocation2 + $0x68] sm:$0x1] %v2932_v24  ;;  %10231 = vmatmul.mubr.msk.bf16.vlgmr.msra.gmra.mrb[8].mxu1 %vm3286_vm13, %v9431_v27  ;;  %v15105_v37 = vsel %vm12848_vm14, %v12728_v38, %v12816_v26 }
 0x21f   : > { %10286 = vmatprep.mubr.msk.bf16.mxu0 %vm3286_vm13, %v9496_v61  ;;  %v3054_v51 = vsel %vm12848_vm14, %v12916_v54, %v3053_v20  ;;  %v3099_v49 = vshll.u32 %v13034_v45, 16  ;;  %v13046_v60 = vrot.slane %v3113_v57, 5  ;;  %v3143_v46 = vrot.slane %v3141_v16, 4  ;;  %v1226_v54 = vpop.permute.xlu1 %1225  ;;  %v945_v20 = vpop.permute.xlu0 %944  ;;  %v1555_v47 = vld [vmem:[#allocation2 + $0x78] sm:$0x8] }
 0x220   : > { %v3200_v11 = vshrl.u32 %v12999_v10, 16  ;;  %v3203_v21 = vshll.u32 %v12999_v10, 16  ;;  %v9432_v7 = vcombine.low %v15105_v37, %v3054_v51  ;;  %v13055_v13 = vrot.slane %v3137_v53, 5 }
 0x221   : > { %v3693_v57 = vsel %vm12805_vm9, %v12936_v41, %v3692_v39  ;;  %v3078_v16 = vsel %vm12848_vm14, %v12962_v56, %v3077_v48  ;;  %v3101_v25 = vrot.slane %v3099_v49, 5  ;;  %v15106_v58 = vrot.slane %v12865_v4, 5  ;;  %v1833_v39 = vld [vmem:[#allocation2 + $0x7c] sm:$0x1]  ;;  %v11053_v4 = vld [vmem:[%s14922_s2 + $0x68] sm:$0xff]  }
 0x222   : > { %v15107_v2 = vrot.slane %v12761_v50, 9  ;;  %v1275_v53 = vsel %vm12066_vm2, %v1226_v54, %v1274_v34  ;;  %v994_v26 = vsel %vm12017_vm12, %v945_v20, %v993_v55  ;;  %10234 = vmatprep.mubr.msk.bf16.mxu1 %vm3286_vm13, %v9432_v7  ;;  %v3700_v48 = vsel %vm12805_vm9, %v12909_v63, %v3699_v30  ;;  %v13080_v50 = vld [vmem:[#allocation2 + $0x50] sm:$0x1] }
 0x223   : > { %v3123_v41 = vshll.u32 %v13044_v29, 16  ;;  %v3165_v56 = vshrl.u32 %v12944_v59, 16  ;;  %1276 = vst [vmem:[#allocation2 + $0x78] sm:$0x4] %v1275_v53  ;;  %995 = vst [vmem:[#allocation2 + $0x78] sm:$0x2] %v994_v26  ;;  %v3102_v27 = vsel %vm12848_vm14, %v12958_v0, %v3101_v25  ;;  %v9497_v34 = vcombine.low %v12956_v42, %v3693_v57  ;;  %v1788_v51 = vpop.permute.xlu1 %1787  ;;  %v1507_v49 = vpop.permute.xlu0 %1506 }
 0x224   : > { %v13069_v38 = vsel %vm12805_vm9, %v15107_v2, %v15106_v58  ;;  %v3147_v12 = vshll.u32 %v13080_v50, 16  ;;  %v3161_v61 = vshll.u32 %v12944_v59, 16  ;;  %v3120_v63 = vor.u32 %v13036_v28, %v13046_v60  ;;  %v2385_v42 = vld [vmem:[#allocation2 + $0x7c] sm:$0x4] }
 0x225   : > { %v3144_v24 = vor.u32 %v3143_v46, %v13055_v13  ;;  %v15108_v55 = vmov %v15106_v58  ;;  %v15109_v0 = vsel %vm12848_vm14, %v12750_v6, %v12883_v3  ;;  %v9498_v7 = vcombine.low %v12897_v9, %v3700_v48  ;;  %v2109_v9 = vld [vmem:[#allocation2 + $0x7c] sm:$0x2] }
 0x226   : > { %v13094_v30 = vrot.slane %v15108_v55, 4  ;;  %v9433_v37 = vcombine.low %v15109_v0, %v3078_v16  ;;  %v3706_v54 = vrot.slane %v13004_v36, 5  ;;  %v3713_v28 = vrot.slane %v13034_v45, 5  ;;  %10287 = vmatmul.mubr.msk.bf16.vlgmr.msra.gmra.mrb[8].mxu0 %vm3286_vm13, %v9497_v34  ;;  %v13117_v45 = vld [vmem:[#allocation2 + $0x5c] sm:$0x1]  ;;  %v15114_v0 = vld [vmem:[#allocation18_spill] sm:$0xff] }
 0x227   : > { %v1834_v46 = vsel %vm11385_vm4, %v1788_v51, %v1833_v39  ;;  %v1556_v20 = vsel %vm12008_vm11, %v1507_v49, %v1555_v47  ;;  %v15110_v6 = vsel %vm12848_vm14, %v12739_v5, %v12869_v17  ;;  %v3125_v36 = vrot.slane %v3123_v41, 5  ;;  %10307 = vmatpush3.bf16.msra.mxu0 %v12791_v8  ;;  %v13127_v17 = vld [vmem:[#allocation2 + $0x68] sm:$0x1]  ;;  %10290 = vmatprep.mubr.msk.bf16.mxu0 %vm3286_vm13, %v9498_v7  ;;  %v2064_v26 = vpop.permute.xlu0 %2063 }
 0x228   : > { %v9434_v3 = vcombine.low %v15110_v6, %v3102_v27  ;;  %1835 = vst [vmem:[#allocation2 + $0x7c] sm:$0x1] %v1834_v46  ;;  %1557 = vst [vmem:[#allocation2 + $0x78] sm:$0x8] %v1556_v20  ;;  %10235 = vmatmul.mubr.msk.bf16.gmra.mrb[12].mxu1 %vm3286_vm13, %v9433_v37  ;;  %v3116_v57 = vsel %vm12848_vm14, %v12793_v23, %v13046_v60  ;;  %v3149_v16 = vrot.slane %v3147_v12, 5  ;;  %v13125_v25 = vrot.slane %v3161_v61, 5  ;;  %v2340_v60 = vpop.permute.xlu1 %2339 }
 0x229   : > { %v3167_v5 = vrot.slane %v3165_v56, 4  ;;  %v13129_v58 = vrot.slane %v3200_v11, 4  ;;  %v3121_v8 = vrot.slane %v3120_v63, 4  ;;  %v3140_v2 = vsel %vm12848_vm14, %v12809_v44, %v13055_v13  ;;  %v11054_v23 = vld [vmem:[%s14922_s2 + $0x70] sm:$0xff]   ;;  %10308 = vmatprep.subr.bf16.mxu0 %v11053_v4  ;;  %v15112_v61 = vld [vmem:[#allocation45_spill] sm:$0xff] }
 0x22a   : > { %10238 = vmatprep.mubr.msk.bf16.mxu1 %vm3286_vm13, %v9434_v3  ;;  %v3145_v53 = vrot.slane %v3144_v24, 4  ;;  %v3707_v11 = vsel %vm12805_vm9, %v12964_v19, %v3706_v54  ;;  %v3714_v39 = vsel %vm12805_vm9, %v12928_v43, %v3713_v28  ;;  %v3171_v48 = vshll.u32 %v13117_v45, 16  ;;  %v1480_v13 = vld [vmem:[#allocation2 + $0x78] sm:$0x4]  ;;  %v1199_v41 = vld [vmem:[#allocation2 + $0x78] sm:$0x2] }
 0x22b   : > { %v3192_v44 = vor.u32 %v12976_v14, %v12974_v15  ;;  %v2386_v56 = vsel %vm12066_vm2, %v2340_v60, %v2385_v42  ;;  %v2110_v47 = vsel %vm12017_vm12, %v2064_v26, %v2109_v9  ;;  %v3126_v19 = vsel %vm12848_vm14, %v3121_v8, %v3125_v36  ;;  %v2937_v63 = vld [vmem:[#allocation2 + $0x80] sm:$0x1]  ;;  %v2661_v24 = vld [vmem:[#allocation2 + $0x7c] sm:$0x8]  ;;  %10309 = vmatpush3.bf16.msra.mxu0 %v11053_v4  ;;  %v2616_v54 = vpop.permute.xlu0 %2615  ;;  %v15115_v46 = vld [vmem:[#allocation17_spill] sm:$0xff] }
 0x22c   : > { %v3195_v27 = vshll.u32 %v13127_v17, 16  ;;  %v1481_v12 = vsel %vm12122_vm10, %v12348_v62, %v1480_v13  ;;  %v1200_v14 = vsel %vm12072_vm7, %v15112_v61, %v1199_v41  ;;  %2387 = vst [vmem:[#allocation2 + $0x7c] sm:$0x4] %v2386_v56  ;;  %2111 = vst [vmem:[#allocation2 + $0x7c] sm:$0x2] %v2110_v47  ;;  %v3150_v55 = vsel %vm12848_vm14, %v3145_v53, %v3149_v16  ;;  %v2892_v42 = vpop.permute.xlu1 %2891  ;;  %v11055_v9 = vld [vmem:[%s14922_s2 + $0x78] sm:$0xff]  }
 0x22d   : > { %v3168_v51 = vor.u32 %v3167_v5, %v13125_v25  ;;  %v3213_v49 = vshrl.u32 %v13013_v31, 16  ;;  %1482 = vst [vmem:[#allocation2 + $0x78] sm:$0x4] %v1481_v12  ;;  %1201 = vst [vmem:[#allocation2 + $0x78] sm:$0x2] %v1200_v14  ;;  %v9499_v62 = vcombine.low %v15114_v0, %v3707_v11  ;;  %v3720_v37 = vrot.slane %v13044_v29, 5  ;;  %10310 = vmatprep.subr.bf16.mxu0 %v11054_v23 }
 0x22e   : > { %v3209_v7 = vshll.u32 %v13013_v31, 16  ;;  %v9435_v28 = vcombine.low %v3116_v57, %v3126_v19  ;;  %v9500_v20 = vcombine.low %v15115_v46, %v3714_v39  ;;  %v1277_v6 = vld [vmem:[#allocation2 + $0x84] sm:$0x4]  ;;  %v3173_v4 = vrot.slane %v3171_v48, 5  ;;  %v15118_v26 = vld [vmem:[#allocation46_spill] sm:$0xff]  ;;  %v11058_v43 = vld [vmem:[#allocation2 + $0x18] sm:$0xff]  }
 0x22f   : > { %v3727_v3 = vrot.slane %v13080_v50, 5  ;;  %v2037_v36 = vld [vmem:[#allocation2 + $0x7c] sm:$0x1]  ;;  %v1761_v16 = vld [vmem:[#allocation2 + $0x78] sm:$0x8]  ;;  %v2938_v29 = vsel %vm11385_vm4, %v2892_v42, %v2937_v63  ;;  %v2662_v5 = vsel %vm12008_vm11, %v2616_v54, %v2661_v24  ;;  %10291 = vmatmul.mubr.msk.bf16.gmra.mrb[12].mxu0 %vm3286_vm13, %v9499_v62  ;;  %v9436_v57 = vcombine.low %v3140_v2, %v3150_v55  ;;  %v15116_v53 = vld [vmem:[#allocation48_spill] sm:$0xff]  ;;  %v947_v61 = vpop.permute.xlu0 %946 }
 0x230   : > { %v3197_v8 = vrot.slane %v3195_v27, 5  ;;  %v2038_v50 = vsel %vm11477_vm6, %v15116_v53, %v2037_v36  ;;  %v1762_v39 = vsel %vm12052_vm1, %v15118_v26, %v1761_v16  ;;  %2939 = vst [vmem:[#allocation2 + $0x80] sm:$0x1] %v2938_v29  ;;  %2663 = vst [vmem:[#allocation2 + $0x7c] sm:$0x8] %v2662_v5  ;;  %10239 = vmatmul.mubr.msk.bf16.gmra.mrb[16].mxu1 %vm3286_vm13, %v9435_v28  ;;  %10294 = vmatprep.mubr.msk.bf16.mxu0 %vm3286_vm13, %v9500_v20  ;;  %v1228_v12 = vpop.permute.xlu1 %1227  ;;  %v13214_v24 = vld [vmem:[%s14922_s2 + $0x80] sm:$0xff]  }
 0x231   : > { %v996_v48 = vld [vmem:[#allocation2 + $0x84] sm:$0x2]  ;;  %v3169_v13 = vrot.slane %v3168_v51, 4  ;;  %v3726_v2 = vrot.slane %v3724_v40, 4  ;;  %v13189_v41 = vld [vmem:[#allocation2 + $0x74] sm:$0x1]  ;;  %10242 = vmatprep.mubr.msk.bf16.mxu1 %vm3286_vm13, %v9436_v57  ;;  %10311 = vmatpush3.bf16.msra.mxu0 %v11054_v23  ;;  %v3721_v14 = vsel %vm12805_vm9, %v13094_v30, %v3720_v37  ;;  %v1278_v51 = vsel %vm12066_vm2, %v1228_v12, %v1277_v6 }
 0x232   : > { %v13193_v56 = vrot.slane %v3203_v21, 5  ;;  %2039 = vst [vmem:[#allocation2 + $0x7c] sm:$0x1] %v2038_v50  ;;  %1763 = vst [vmem:[#allocation2 + $0x78] sm:$0x8] %v1762_v39  ;;  %v3193_v47 = vrot.slane %v3192_v44, 4  ;;  %10312 = vmatprep.subr.bf16.mxu0 %v11055_v9  ;;  %v997_v1 = vsel %vm12017_vm12, %v947_v61, %v996_v48  ;;  %v9501_v6 = vcombine.low %v13069_v38, %v3721_v14 }
 0x233   : > { %v13196_v19 = vrot.slane %v3209_v7, 5  ;;  %v3215_v27 = vrot.slane %v3213_v49, 4  ;;  %v3174_v10 = vsel %vm12848_vm14, %v3169_v13, %v3173_v4  ;;  %v15120_v21 = vld [vmem:[#allocation30_spill] sm:$0xff]  ;;  %v3728_v23 = vsel %vm12805_vm9, %v3726_v2, %v3727_v3  ;;  %v2589_v30 = vld [vmem:[#allocation2 + $0x7c] sm:$0x4]  ;;  %v1509_v5 = vpop.permute.xlu0 %1508  ;;  %v15126_v48 = vld [vmem:[#allocation49_spill] sm:$0xff] }
 0x234   : > { %v15121_v63 = vrot.slane %v15120_v21, 9  ;;  %v2313_v55 = vld [vmem:[#allocation2 + $0x7c] sm:$0x2]  ;;  %v3219_v49 = vshll.u32 %v13189_v41, 16  ;;  %v15122_v0 = vld [vmem:[#allocation50_spill] sm:$0xff]  ;;  %v3731_v20 = vrot.slane %v12944_v59, 5  ;;  %v3206_v36 = vor.u32 %v13193_v56, %v13129_v58  ;;  %v1790_v29 = vpop.permute.xlu1 %1789 }
 0x235   : > { %v2590_v62 = vsel %vm12122_vm10, %v15122_v0, %v2589_v30  ;;  %v15123_v37 = vld [vmem:[#allocation47_spill] sm:$0xff]  ;;  %1279 = vst [vmem:[#allocation2 + $0x84] sm:$0x4] %v1278_v51  ;;  %998 = vst [vmem:[#allocation2 + $0x84] sm:$0x2] %v997_v1  ;;  %v3216_v16 = vor.u32 %v3215_v27, %v13196_v19  ;;  %10313 = vmatpush3.bf16.msra.mxu0 %v11055_v9  ;;  %v3734_v53 = vrot.slane %v13117_v45, 5 }
 0x236   : > { %v3725_v44 = vsel %vm12805_vm9, %v15121_v63, %v3724_v40  ;;  %v3198_v40 = vsel %vm12848_vm14, %v3193_v47, %v3197_v8  ;;  %v2314_v7 = vsel %vm12072_vm7, %v15123_v37, %v2313_v55  ;;  %v1836_v42 = vld [vmem:[#allocation2 + $0x88] sm:$0x1]  ;;  %v1558_v54 = vld [vmem:[#allocation2 + $0x84] sm:$0x8]  ;;  %v15124_v28 = vld [vmem:[#allocation31_spill] sm:$0xff]  ;;  %10334 = vmatprep.subr.bf16.mxu0 %v13214_v24  ;;  %v3221_v26 = vrot.slane %v3219_v49, 5 }
 0x237   : > { %v3188_v46 = vsel %vm12848_vm14, %v15124_v28, %v12974_v15  ;;  %2591 = vst [vmem:[#allocation2 + $0x7c] sm:$0x4] %v2590_v62  ;;  %2315 = vst [vmem:[#allocation2 + $0x7c] sm:$0x2] %v2314_v7  ;;  %v15125_v4 = vld [vmem:[#allocation15_spill] sm:$0xff]  ;;  %v9502_v57 = vcombine.low %v3725_v44, %v3728_v23  ;;  %v1559_v58 = vsel %vm12008_vm11, %v1509_v5, %v1558_v54  ;;  %10295 = vmatmul.mubr.msk.bf16.gmra.mrb[16].mxu0 %vm3286_vm13, %v9501_v6  ;;  %v15127_v47 = vld [vmem:[#allocation16_spill] sm:$0xff]  ;;  %v2066_v61 = vpop.permute.xlu0 %2065 }
 0x238   : > { %v3164_v3 = vsel %vm12848_vm14, %v15125_v4, %v13125_v25  ;;  %v9438_v59 = vcombine.low %v3188_v46, %v3198_v40  ;;  %v2388_v8 = vld [vmem:[#allocation2 + $0x88] sm:$0x4]  ;;  %v3655_v38 = vld [vmem:[#allocation2 + $0x60] sm:$0xe]  ;;  %v2865_v50 = vld [vmem:[#allocation2 + $0x7c] sm:$0x8]  ;;  %v1837_v25 = vsel %vm11385_vm4, %v1790_v29, %v1836_v42 }
 0x239   : > { %v9437_v15 = vcombine.low %v3164_v3, %v3174_v10  ;;  %v3654_v9 = vld [vmem:[#allocation2 + $0x54] sm:$0xe]  ;;  %v3741_v39 = vrot.slane %v13127_v17, 5  ;;  %v2866_v45 = vsel %vm12052_vm1, %v15126_v48, %v2865_v50  ;;  %1838 = vst [vmem:[#allocation2 + $0x88] sm:$0x1] %v1837_v25  ;;  %10298 = vmatprep.mubr.msk.bf16.mxu0 %vm3286_vm13, %v9502_v57  ;;  %v3733_v2 = vrot.slane %v3731_v20, 4  ;;  %v2342_v17 = vpop.permute.xlu1 %2341 }
 0x23a   : > { %1560 = vst [vmem:[#allocation2 + $0x84] sm:$0x8] %v1559_v58  ;;  %v2112_v13 = vld [vmem:[#allocation2 + $0x88] sm:$0x2]  ;;  %2867 = vst [vmem:[#allocation2 + $0x7c] sm:$0x8] %v2866_v45  ;;  %v2389_v30 = vsel %vm12066_vm2, %v2342_v17, %v2388_v8 }
 0x23b   : > { %10243 = vmatmul.mubr.msk.bf16.gmra.mrb[20].mxu1 %vm3286_vm13, %v9437_v15  ;;  %v3217_v56 = vrot.slane %v3216_v16, 4  ;;  %v15128_v27 = vrot.slane %v15127_v47, 5  ;;  %v9485_v14 = vrot.slane %v3654_v9, 9  ;;  %v3735_v10 = vsel %vm12805_vm9, %v3733_v2, %v3734_v53  ;;  %v15129_v40 = vld [vmem:[#allocation14_spill] sm:$0xff]  ;;  %v15130_v0 = vld [vmem:[#allocation13_spill] sm:$0xff]  ;;  %v2618_v4 = vpop.permute.xlu0 %2617  ;;  %v15132_v15 = vld [vmem:[#allocation19_spill] sm:$0xff] }
 0x23c   : > { %10246 = vmatprep.mubr.msk.bf16.mxu1 %vm3286_vm13, %v9438_v59  ;;  %v3207_v21 = vrot.slane %v3206_v36, 4  ;;  %v9486_v63 = vrot.slane %v3655_v38, 9  ;;  %v1483_v44 = vld [vmem:[#allocation2 + $0x84] sm:$0x4]  ;;  %v1202_v23 = vld [vmem:[#allocation2 + $0x84] sm:$0x2]  ;;  %v2113_v55 = vsel %vm12017_vm12, %v2066_v61, %v2112_v13 }
 0x23d   : > { %v3740_v12 = vrot.slane %v15128_v27, 4  ;;  %v3222_v51 = vsel %vm12848_vm14, %v3217_v56, %v3221_v26  ;;  %v1484_v49 = vsel %vm12122_vm10, %v15129_v40, %v1483_v44  ;;  %v1203_v62 = vsel %vm12072_vm7, %v15130_v0, %v1202_v23  ;;  %2390 = vst [vmem:[#allocation2 + $0x88] sm:$0x4] %v2389_v30  ;;  %2114 = vst [vmem:[#allocation2 + $0x88] sm:$0x2] %v2113_v55  ;;  %v2894_v6 = vpop.permute.xlu1 %2893  ;;  %v15133_v59 = vld [vmem:[#allocation11_spill] sm:$0xff] }
 0x23e   : > { %v2664_v37 = vld [vmem:[#allocation2 + $0x88] sm:$0x8]  ;;  %v3732_v33 = vsel %vm12805_vm9, %v9485_v14, %v3731_v20  ;;  %v3745_v7 = vrot.slane %v13013_v31, 5  ;;  %1485 = vst [vmem:[#allocation2 + $0x84] sm:$0x4] %v1484_v49  ;;  %v3212_v54 = vsel %vm12848_vm14, %v3207_v21, %v13196_v19  ;;  %v15131_v28 = vmov %v15128_v27  ;;  %v15134_v38 = vld [vmem:[#allocation10_spill] sm:$0xff] }
 0x23f   : > { %v3742_v1 = vsel %vm12805_vm9, %v3740_v12, %v3741_v39  ;;  %1204 = vst [vmem:[#allocation2 + $0x84] sm:$0x2] %v1203_v62  ;;  %v9503_v42 = vcombine.low %v3732_v33, %v3735_v10  ;;  %v3739_v46 = vsel %vm12805_vm9, %v9486_v63, %v15131_v28  ;;  %v9439_v3 = vcombine.low %v3212_v54, %v3222_v51  ;;  %v3656_v19 = vld [vmem:[#allocation2 + $0x6c] sm:$0xe]  ;;  %v15135_v25 = vld [vmem:[#allocation27_spill] sm:$0xff]  ;;  %v15136_v45 = vld [vmem:[#allocation12_spill] sm:$0xff] }
 0x240   : > { %v9504_v36 = vcombine.low %v3739_v46, %v3742_v1  ;;  %v3748_v20 = vrot.slane %v13189_v41, 5  ;;  %v2040_v16 = vld [vmem:[#allocation2 + $0x88] sm:$0x1]  ;;  %v2941_v29 = vsel %vm11385_vm4, %v2894_v6, %v2940_v32  ;;  %v2665_v5 = vsel %vm12008_vm11, %v2618_v4, %v2664_v37  ;;  %v11056_v39 = vld [vmem:[#allocation2 + $0xc] sm:$0xff]   ;;  %v11068_v47 = vld [vmem:[%s14922_s2 + $0x98] sm:$0xff]  }
 0x241   : > { %v1764_v31 = vld [vmem:[#allocation2 + $0x84] sm:$0x8]  ;;  %10299 = vmatmul.mubr.msk.bf16.gmra.mrb[20].mxu0 %vm3286_vm13, %v9503_v42  ;;  %v2041_v57 = vsel %vm11477_vm6, %v15132_v15, %v2040_v16  ;;  %2942 = vst [vmem:[#allocation2 + $0x8c] sm:$0x1] %v2941_v29  ;;  %2666 = vst [vmem:[#allocation2 + $0x88] sm:$0x8] %v2665_v5 }
 0x242   : > { %v1765_v8 = vsel %vm12052_vm1, %v15133_v59, %v1764_v31  ;;  %10302 = vmatprep.mubr.msk.bf16.mxu0 %vm3286_vm13, %v9504_v36  ;;  %v3747_v18 = vrot.slane %v3745_v7, 4  ;;  %2042 = vst [vmem:[#allocation2 + $0x88] sm:$0x1] %v2041_v57  ;;  %v9487_v22 = vrot.slane %v3656_v19, 9  ;;  %v11062_v34 = vld [vmem:[%s14922_s2 + $0x88] sm:$0xff]   ;;  %v11065_v11 = vld [vmem:[%s14922_s2 + $0x90] sm:$0xff]  }
 0x243   : > { %10247 = vmatmul.mubr.msk.bf16.gmra.mrb[24].mxu1 %vm3286_vm13, %v9439_v3  ;;  %1766 = vst [vmem:[#allocation2 + $0x84] sm:$0x8] %v1765_v8  ;;  %v11059_v2 = vld [vmem:[#allocation2 + $0x24] sm:$0xff]   ;;  %v11060_v56 = vld [vmem:[#allocation2 + $0x30] sm:$0xff]   ;;  %v11061_v27 = vld [vmem:[#allocation2 + $0x3c] sm:$0xff]   ;;  %vm417_vm4 = vcmask 253952  }
 0x244   : > { %v3749_v41 = vsel %vm12805_vm9, %v3747_v18, %v3748_v20  ;;  %v2592_v53 = vld [vmem:[#allocation2 + $0x88] sm:$0x4]  ;;  %v2316_v60 = vld [vmem:[#allocation2 + $0x88] sm:$0x2]  ;;  %v3746_v9 = vsel %vm12805_vm9, %v9487_v22, %v3745_v7  ;;  %v13332_v12 = vld [vmem:[#allocation2 + $0x10] sm:$0xf] }
 0x245   : > { %v2593_v50 = vsel %vm12122_vm10, %v15134_v38, %v2592_v53  ;;  %v2317_v58 = vsel %vm12072_vm7, %v15135_v25, %v2316_v60  ;;  %v9505_v26 = vcombine.low %v3746_v9, %v3749_v41  ;;  %v4243_v17 = vld [vmem:[#allocation2 + $0xc] sm:$0xf]  ;;  %v4283_v14 = vshll.u32 %v13332_v12, 16  ;;  %v11064_v21 = vld [vmem:[#allocation2 + $0x54] sm:$0xff]   ;;  %v13338_v30 = vld [vmem:[#allocation2 + $0x1c] sm:$0xf] }
 0x246   : > { %2594 = vst [vmem:[#allocation2 + $0x88] sm:$0x4] %v2593_v50  ;;  %2318 = vst [vmem:[#allocation2 + $0x88] sm:$0x2] %v2317_v58  ;;  %v11063_v61 = vld [vmem:[#allocation2 + $0x48] sm:$0xff]   ;;  %v4287_v10 = vshrl.u32 %v13332_v12, 16 }
 0x247   : > { %v4274_v63 = vshrl.u32 %v4243_v17, 16  ;;  %v4277_v44 = vshll.u32 %v4243_v17, 16  ;;  %v4246_v23 = vld [vmem:[#allocation2 + $0x18] sm:$0xf]  ;;  %v13341_v55 = vld [vmem:[#allocation2 + $0x14] sm:$0x1]  ;;  %vm13581_vm6 = vmand %vm417_vm4, %vm341_vm3 }
 0x248   : > { %v2868_v48 = vld [vmem:[#allocation2 + $0x88] sm:$0x8]  ;;  %v4249_v51 = vld [vmem:[#allocation2 + $0x24] sm:$0xf]  ;;  %v4285_v1 = vrot.slane %v4283_v14, 5  ;;  %v4289_v40 = vrot.slane %v4287_v10, 4  ;;  %vm13899_vm8 = vmand %vm417_vm4, %vm379_vm5 }
 0x249   : > { %10303 = vmatmul.mubr.msk.bf16.gmra.mrb[24].mxu0 %vm3286_vm13, %v9505_v26  ;;  %v2869_v13 = vsel %vm12052_vm1, %v15136_v45, %v2868_v48  ;;  %v4298_v49 = vshrl.u32 %v4246_v23, 16  ;;  %v4301_v0 = vshll.u32 %v4246_v23, 16  ;;  %v13343_v62 = vld [vmem:[#allocation2 + $0x28] sm:$0xf]  ;;  %v4276_v32 = vrot.slane %v4274_v63, 4  ;;  %v11066_v3 = vld [vmem:[#allocation2 + $0x60] sm:$0xff]  }
 0x24a   : > { %10314 = vmatprep.mubr.msk.bf16.mxu0 %vm3286_vm13, %v11056_v39  ;;  %2870 = vst [vmem:[#allocation2 + $0x88] sm:$0x8] %v2869_v13  ;;  %v4279_v37 = vrot.slane %v4277_v44, 5  ;;  %v4307_v33 = vshll.u32 %v13338_v30, 16  ;;  %v4311_v7 = vshrl.u32 %v13338_v30, 16  ;;  %v4293_v42 = vshll.u32 %v13341_v55, 16 }
 0x24b   : > { %v4322_v54 = vshrl.u32 %v4249_v51, 16  ;;  %v4325_v28 = vshll.u32 %v4249_v51, 16  ;;  %v4252_v46 = vld [vmem:[#allocation2 + $0x30] sm:$0xf]  ;;  %v4331_v6 = vshll.u32 %v13343_v62, 16  ;;  %v4335_v4 = vshrl.u32 %v13343_v62, 16 }
 0x24c   : > { %v4290_v36 = vor.u32 %v4289_v40, %v4285_v1  ;;  %v4300_v20 = vrot.slane %v4298_v49, 4  ;;  %v4303_v16 = vrot.slane %v4301_v0, 5  ;;  %v11067_v31 = vld [vmem:[#allocation2 + $0x6c] sm:$0xff]   ;;  %v4280_v29 = vor.u32 %v4279_v37, %v4276_v32  ;;  %v13350_v5 = vld [vmem:[#allocation2 + $0x20] sm:$0x1]  ;;  %v11069_v17 = vld [vmem:[#allocation2 + $0x78] sm:$0xff]  }
 0x24d   : > { %v13352_v19 = vrot.slane %v4307_v33, 5  ;;  %v4313_v15 = vrot.slane %v4311_v7, 4  ;;  %v4346_v57 = vshrl.u32 %v4252_v46, 16  ;;  %v4295_v59 = vrot.slane %v4293_v42, 5  ;;  %v13356_v41 = vld [vmem:[#allocation2 + $0x2c] sm:$0x1] }
 0x24e   : > { %v4324_v8 = vrot.slane %v4322_v54, 4  ;;  %v4327_v18 = vrot.slane %v4325_v28, 5  ;;  %v4349_v22 = vshll.u32 %v4252_v46, 16  ;;  %v13358_v53 = vrot.slane %v4331_v6, 5  ;;  %v13360_v38 = vld [vmem:[#allocation2 + $0x34] sm:$0xf] }
 0x24f   : > { %v4337_v60 = vrot.slane %v4335_v4, 4  ;;  %v4291_v50 = vrot.slane %v4290_v36, 4  ;;  %v4317_v25 = vshll.u32 %v13350_v5, 16  ;;  %v4281_v58 = vrot.slane %v4280_v29, 4  ;;  %v4255_v39 = vld [vmem:[#allocation2 + $0x3c] sm:$0xf] }
 0x250   : > { %v4304_v9 = vor.u32 %v4303_v16, %v4300_v20  ;;  %v4314_v26 = vor.u32 %v4313_v15, %v13352_v19  ;;  %v13364_v48 = vld [vmem:[#allocation2 + $0x40] sm:$0xf]  ;;  %v4341_v13 = vshll.u32 %v13356_v41, 16  ;;  %v13376_v44 = vld [vmem:[#allocation2 + $0x38] sm:$0x1]  ;;  %v4370_v23 = vshrl.u32 %v4255_v39, 16 }
 0x251   : > { %10315 = vmatmul.mubr.msk.bf16.vlgmr.msra.gmra.mrb[8].mxu0 %vm3286_vm13, %v11058_v43  ;;  %v4296_v45 = vsel %vm12848_vm14, %v4291_v50, %v4295_v59  ;;  %v4355_v43 = vshll.u32 %v13360_v38, 16  ;;  %v4319_v14 = vrot.slane %v4317_v25, 5  ;;  %v4379_v10 = vshll.u32 %v13364_v48, 16  ;;  %v13382_v54 = vld [vmem:[#allocation2 + $0x44] sm:$0x1] }
 0x252   : > { %10335 = vmatpush3.bf16.msra.mxu0 %v13214_v24  ;;  %10318 = vmatprep.mubr.msk.bf16.mxu0 %vm3286_vm13, %v11059_v2  ;;  %v13330_v24 = vld [vmem:[%s14922_s2 + $0xa0] sm:$0xff]   ;;  %v4258_v2 = vld [vmem:[#allocation2 + $0x48] sm:$0xf]  ;;  %v4373_v51 = vshll.u32 %v4255_v39, 16  ;;  %v4315_v49 = vrot.slane %v4314_v26, 4  ;;  %v4343_v0 = vrot.slane %v4341_v13, 5 }
 0x253   : > { %10336 = vmatprep.subr.bf16.mxu0 %v11062_v34  ;;  %v4394_v40 = vshrl.u32 %v4258_v2, 16  ;;  %v13379_v32 = vrot.slane %v4355_v43, 5  ;;  %v4365_v46 = vshll.u32 %v13376_v44, 16  ;;  %v13387_v6 = vrot.slane %v4379_v10, 5  ;;  %v13393_v29 = vld [vmem:[#allocation2 + $0x58] sm:$0xf] }
 0x254   : > { %v4320_v28 = vsel %vm12848_vm14, %v4315_v49, %v4319_v14  ;;  %v4372_v36 = vrot.slane %v4370_v23, 4  ;;  %v4375_v20 = vrot.slane %v4373_v51, 5  ;;  %v11071_v26 = vld [vmem:[%s14922_s2 + $0xa8] sm:$0xff]   ;;  %v4427_v39 = vshll.u32 %v13393_v29, 16  ;;  %v13420_v10 = vld [vmem:[#allocation2 + $0x5c] sm:$0x1] }
 0x255   : > { %v13391_v16 = vrot.slane %v4394_v40, 4  ;;  %v13429_v49 = vld [vmem:[#allocation2 + $0x64] sm:$0xf]  ;;  %vm6510_vm11 = vcmask 257024   ;;  %vm6308_vm12 = vsmask.f32 4368 }
 0x256   : > { %10337 = vmatpush3.bf16.msra.mxu0 %v11062_v34  ;;  %v4359_v34 = vshrl.u32 %v13360_v38, 16  ;;  %v13424_v51 = vrot.slane %v4427_v39, 5  ;;  %v13456_v39 = vld [vmem:[#allocation2 + $0x7c] sm:$0xf]  ;;  %vm13968_vm1 = vmand %vm6510_vm11, %vm379_vm5 }
 0x257   : > { %10338 = vmatprep.subr.bf16.mxu0 %v11065_v11  ;;  %vm13975_vm2 = vmor %vm341_vm3, %vm6308_vm12 }
 0x258   : > { %v4361_v37 = vrot.slane %v4359_v34, 4 }
 0x259   : > { %10319 = vmatmul.mubr.msk.bf16.gmra.mrb[12].mxu0 %vm3286_vm13, %v11060_v56  ;;  %v4338_v56 = vor.u32 %v4337_v60, %v13358_v53 }
 0x25a   : > { %10322 = vmatprep.mubr.msk.bf16.mxu0 %vm3286_vm13, %v11061_v27  ;;  %10339 = vmatpush3.bf16.msra.mxu0 %v11065_v11  ;;  %v4328_v11 = vor.u32 %v4327_v18, %v4324_v8  ;;  %v4351_v27 = vrot.slane %v4349_v22, 5  ;;  %v4362_v59 = vor.u32 %v4361_v37, %v13379_v32  ;;  %v4389_v8 = vshll.u32 %v13382_v54, 16  ;;  %v4261_v18 = vld [vmem:[#allocation2 + $0x54] sm:$0xf] }
 0x25b   : > { %10340 = vmatprep.subr.bf16.mxu0 %v11068_v47  ;;  %v4339_v7 = vrot.slane %v4338_v56, 4  ;;  %v4418_v34 = vshrl.u32 %v4261_v18, 16 }
 0x25c   : > { %v4329_v33 = vrot.slane %v4328_v11, 4  ;;  %v4376_v11 = vor.u32 %v4375_v20, %v4372_v36  ;;  %v4391_v56 = vrot.slane %v4389_v8, 5 }
 0x25e   : > { %10341 = vmatpush3.bf16.msra.mxu0 %v11068_v47  ;;  %v4348_v47 = vrot.slane %v4346_v57, 4  ;;  %v4344_v57 = vsel %vm12848_vm14, %v4339_v7, %v4343_v0  ;;  %v4334_v60 = vsel %vm12848_vm14, %v4329_v33, %v13358_v53  ;;  %v4421_v53 = vshll.u32 %v4261_v18, 16  ;;  %v13433_v7 = vld [vmem:[#allocation2 + $0x70] sm:$0xf]  ;;  %v11073_v18 = vld [vmem:[%s14922_s2 + $0xb8] sm:$0xff]  }
 0x25f   : > { %10362 = vmatprep.subr.bf16.mxu0 %v13330_v24  ;;  %v9562_v13 = vcombine.low %v4334_v60, %v4344_v57  ;;  %v4479_v8 = vshrl.u32 %v13433_v7, 16 }
 0x260   : > { %v4352_v42 = vor.u32 %v4351_v27, %v4348_v47  ;;  %v13414_v47 = vld [vmem:[#allocation2 + $0x50] sm:$0x1]  ;;  %v4423_v33 = vrot.slane %v4421_v53, 5  ;;  %v13459_v53 = vld [vmem:[#allocation2 + $0x74] sm:$0x1] }
 0x261   : > { %10323 = vmatmul.mubr.msk.bf16.gmra.mrb[16].mxu0 %vm3286_vm13, %v11063_v61  ;;  %v4286_v61 = vsel %vm12848_vm14, %v4281_v58, %v4285_v1  ;;  %v4305_v1 = vrot.slane %v4304_v9, 4  ;;  %v4264_v58 = vld [vmem:[#allocation2 + $0x60] sm:$0xf]  ;;  %v4367_v9 = vrot.slane %v4365_v46, 5  ;;  %v4413_v37 = vshll.u32 %v13414_v47, 16 }
 0x262   : > { %10326 = vmatprep.mubr.msk.bf16.mxu0 %vm3286_vm13, %v11064_v21  ;;  %v4383_v21 = vshrl.u32 %v13364_v48, 16  ;;  %v9560_v63 = vcombine.low %v4286_v61, %v4296_v45  ;;  %v4431_v45 = vshrl.u32 %v13393_v29, 16  ;;  %v4442_v27 = vshrl.u32 %v4264_v58, 16 }
 0x263   : > { %v4310_v15 = vsel %vm12848_vm14, %v4305_v1, %v13352_v19  ;;  %v4420_v1 = vrot.slane %v4418_v34, 4  ;;  %v4415_v60 = vrot.slane %v4413_v37, 5 }
 0x264   : > { %v4385_v4 = vrot.slane %v4383_v21, 4  ;;  %v9561_v22 = vcombine.low %v4310_v15, %v4320_v28  ;;  %v4445_v21 = vshll.u32 %v4264_v58, 16  ;;  %v4433_v40 = vrot.slane %v4431_v45, 4  ;;  %v4267_v15 = vld [vmem:[#allocation2 + $0x6c] sm:$0xf] }
 0x265   : > { %v4377_v28 = vrot.slane %v4376_v11, 4  ;;  %v4444_v58 = vrot.slane %v4442_v27, 4  ;;  %v4481_v27 = vrot.slane %v4479_v8, 4 }
 0x266   : > { %v4386_v19 = vor.u32 %v4385_v4, %v13387_v6  ;;  %v4437_v4 = vshll.u32 %v13420_v10, 16 }
 0x267   : > { %v4382_v57 = vsel %vm12848_vm14, %v4377_v28, %v13387_v6 }
 0x268   : > { %v4387_v23 = vrot.slane %v4386_v19, 4  ;;  %v4439_v6 = vrot.slane %v4437_v4, 5  ;;  %v4466_v19 = vshrl.u32 %v4267_v15, 16 }
 0x269   : > { %10327 = vmatmul.mubr.msk.bf16.gmra.mrb[20].mxu0 %vm3286_vm13, %v11066_v3  ;;  %v13389_v3 = vld [vmem:[#allocation2 + $0x4c] sm:$0xf] }
 0x26a   : > { %10330 = vmatprep.mubr.msk.bf16.mxu0 %vm3286_vm13, %v11067_v31  ;;  %v4397_v31 = vshll.u32 %v4258_v2, 16  ;;  %v4403_v50 = vshll.u32 %v13389_v3, 16  ;;  %v4407_v25 = vshrl.u32 %v13389_v3, 16  ;;  %v4363_v2 = vrot.slane %v4362_v59, 4 }
 0x26b   : > { %v4392_v46 = vsel %vm12848_vm14, %v4387_v23, %v4391_v56  ;;  %v4475_v59 = vshll.u32 %v13433_v7, 16  ;;  %v4499_v23 = vshll.u32 %v13456_v39, 16 }
 0x26c   : > { %v4399_v43 = vrot.slane %v4397_v31, 5  ;;  %v13418_v61 = vrot.slane %v4403_v50, 5  ;;  %v4409_v14 = vrot.slane %v4407_v25, 4  ;;  %v4455_v31 = vshrl.u32 %v13429_v49, 16  ;;  %v13453_v25 = vld [vmem:[#allocation2 + $0x68] sm:$0x1] }
 0x26d   : > { %v4424_v50 = vor.u32 %v4423_v33, %v4420_v1  ;;  %v4461_v11 = vshll.u32 %v13453_v25, 16  ;;  %v4477_v56 = vrot.slane %v4475_v59, 5  ;;  %v4485_v1 = vshll.u32 %v13459_v53, 16 }
 0x26e   : > { %v4400_v0 = vor.u32 %v4399_v43, %v13391_v16  ;;  %v4410_v20 = vor.u32 %v4409_v14, %v13418_v61  ;;  %v4451_v16 = vshll.u32 %v13429_v49, 16  ;;  %v4457_v34 = vrot.slane %v4455_v31, 4 }
 0x26f   : > { %v4487_v59 = vrot.slane %v4485_v1, 5 }
 0x270   : > { %v4401_v45 = vrot.slane %v4400_v0, 4  ;;  %v4453_v43 = vrot.slane %v4451_v16, 5  ;;  %v4468_v0 = vrot.slane %v4466_v19, 4 }
 0x271   : > { %10331 = vmatmul.mubr.msk.bf16.gmra.mrb[24].mxu0 %vm3286_vm13, %v11069_v17  ;;  %v4353_v17 = vrot.slane %v4352_v42, 4 }
 0x272   : > { %10342 = vmatprep.mubr.msk.bf16.mxu0 %vm3286_vm13, %v9560_v63  ;;  %v4368_v63 = vsel %vm12848_vm14, %v4363_v2, %v4367_v9  ;;  %v4447_v9 = vrot.slane %v4445_v21, 5  ;;  %v4425_v21 = vrot.slane %v4424_v50, 4  ;;  %v4406_v33 = vsel %vm12848_vm14, %v4401_v45, %v13418_v61 }
 0x273   : > { %v4358_v42 = vsel %vm12848_vm14, %v4353_v17, %v13379_v32  ;;  %v4434_v32 = vor.u32 %v4433_v40, %v13424_v51  ;;  %v13465_v17 = vld [vmem:[%s14922_s2 + $0xc0] sm:$0xff]   ;;  %v4503_v40 = vshrl.u32 %v13456_v39, 16 }
 0x274   : > { %v9563_v36 = vcombine.low %v4358_v42, %v4368_v63  ;;  %v4270_v63 = vld [vmem:[#allocation2 + $0x78] sm:$0xf]  ;;  %v4430_v42 = vsel %vm12848_vm14, %v4425_v21, %v13424_v51  ;;  %v4448_v28 = vor.u32 %v4447_v9, %v4444_v58  ;;  %v4784_v21 = vrot.slane %v13341_v55, 5 }
 0x275   : > { %v4435_v2 = vrot.slane %v4434_v32, 4  ;;  %v4490_v16 = vshrl.u32 %v4270_v63, 16  ;;  %v4505_v32 = vrot.slane %v4503_v40, 4 }
 0x276   : > { %v4449_v8 = vrot.slane %v4448_v28, 4  ;;  %v4791_v28 = vrot.slane %v13350_v5, 5 }
 0x277   : > { %v4492_v50 = vrot.slane %v4490_v16, 4 }
 0x279   : > { %10343 = vmatmul.mubr.msk.bf16.vlgmr.msra.gmra.mrb[8].mxu0 %vm3286_vm13, %v9561_v22  ;;  %v9564_v22 = vcombine.low %v4382_v57, %v4392_v46  ;;  %v4458_v46 = vor.u32 %v4457_v34, %v4453_v43  ;;  %v4501_v57 = vrot.slane %v4499_v23, 5  ;;  %v4739_v23 = vld [vmem:[#allocation2 + $0xc] sm:$0xe] }
 0x27a   : > { %10363 = vmatpush3.bf16.msra.mxu0 %v13330_v24  ;;  %10346 = vmatprep.mubr.msk.bf16.mxu0 %vm3286_vm13, %v9562_v13  ;;  %v11072_v24 = vld [vmem:[%s14922_s2 + $0xb0] sm:$0xff]   ;;  %v4411_v13 = vrot.slane %v4410_v20, 4  ;;  %v4482_v20 = vor.u32 %v4481_v27, %v4477_v56 }
 0x27b   : > { %10364 = vmatprep.subr.bf16.mxu0 %v11071_v26  ;;  %v4459_v51 = vrot.slane %v4458_v46, 4  ;;  %v4740_v46 = vld [vmem:[#allocation2 + $0x18] sm:$0xe] }
 0x27c   : > { %v4416_v14 = vsel %vm12848_vm14, %v4411_v13, %v4415_v60 }
 0x27d   : > { %v9565_v4 = vcombine.low %v4406_v33, %v4416_v14  ;;  %v4795_v33 = vrot.slane %v13343_v62, 5 }
 0x27e   : > { %10365 = vmatpush3.bf16.msra.mxu0 %v11071_v26  ;;  %v4469_v26 = vshll.u32 %v4267_v15, 16  ;;  %v4493_v15 = vshll.u32 %v4270_v63, 16 }
 0x27f   : > { %10366 = vmatprep.subr.bf16.mxu0 %v11072_v24  ;;  %v4797_v16 = vrot.slane %v4795_v33, 4 }
 0x280   : > { %v4471_v37 = vrot.slane %v4469_v26, 5  ;;  %v4495_v58 = vrot.slane %v4493_v15, 5  ;;  %v4454_v26 = vsel %vm12848_vm14, %v4449_v8, %v4453_v43  ;;  %v4805_v8 = vrot.slane %v13376_v44, 5 }
 0x281   : > { %10347 = vmatmul.mubr.msk.bf16.gmra.mrb[12].mxu0 %vm3286_vm13, %v9563_v36  ;;  %v4463_v36 = vrot.slane %v4461_v11, 5 }
 0x282   : > { %10350 = vmatprep.mubr.msk.bf16.mxu0 %vm3286_vm13, %v9564_v22  ;;  %10367 = vmatpush3.bf16.msra.mxu0 %v11072_v24  ;;  %v4440_v24 = vsel %vm12848_vm14, %v4435_v2, %v4439_v6  ;;  %v4472_v61 = vor.u32 %v4471_v37, %v4468_v0  ;;  %v4483_v22 = vrot.slane %v4482_v20, 4  ;;  %v4506_v6 = vor.u32 %v4505_v32, %v4501_v57  ;;  %v4741_v20 = vld [vmem:[#allocation2 + $0x24] sm:$0xe] }
 0x283   : > { %10368 = vmatprep.subr.bf16.mxu0 %v11073_v18  ;;  %v9566_v31 = vcombine.low %v4430_v42, %v4440_v24  ;;  %v4464_v60 = vsel %vm12848_vm14, %v4459_v51, %v4463_v36  ;;  %v4781_v2 = vrot.slane %v13332_v12, 5  ;;  %v4496_v27 = vor.u32 %v4495_v58, %v4492_v50  ;;  %v4743_v50 = vld [vmem:[#allocation2 + $0x3c] sm:$0xe] }
 0x284   : > { %v4473_v9 = vrot.slane %v4472_v61, 4  ;;  %v4488_v19 = vsel %vm12848_vm14, %v4483_v22, %v4487_v59  ;;  %v9567_v13 = vcombine.low %v4454_v26, %v4464_v60  ;;  %v4507_v14 = vrot.slane %v4506_v6, 4  ;;  %v11075_v59 = vld [vmem:[%s14922_s2 + $0xc8] sm:$0xff]   ;;  %v4742_v22 = vld [vmem:[#allocation2 + $0x30] sm:$0xe] }
 0x285   : > { %v4783_v43 = vrot.slane %v4781_v2, 4  ;;  %v4497_v40 = vrot.slane %v4496_v27, 4  ;;  %v9584_v0 = vrot.slane %v4739_v23, 9  ;;  %v4788_v37 = vrot.slane %v13338_v30, 5  ;;  %v4744_v27 = vld [vmem:[#allocation2 + $0x48] sm:$0xe] }
 0x286   : > { %10369 = vmatpush3.bf16.msra.mxu0 %v11073_v18  ;;  %v13483_v18 = vld [vmem:[#allocation2 + $0x80] sm:$0x1]  ;;  %v4478_v34 = vsel %vm12848_vm14, %v4473_v9, %v4477_v56  ;;  %v9585_v30 = vrot.slane %v4740_v46, 9  ;;  %v9586_v15 = vrot.slane %v4741_v20, 9  ;;  %v4809_v61 = vrot.slane %v13364_v48, 5  ;;  %v11076_v48 = vld [vmem:[%s14922_s2 + $0xd0] sm:$0xff]  }
 0x287   : > { %10390 = vmatprep.subr.bf16.mxu0 %v13465_v17  ;;  %v4509_v45 = vshll.u32 %v13483_v18, 16  ;;  %v9568_v11 = vcombine.low %v4478_v34, %v4488_v19  ;;  %v4785_v12 = vsel %vm12805_vm9, %v4783_v43, %v4784_v21  ;;  %v4502_v56 = vsel %vm12848_vm14, %v4497_v40, %v4501_v57  ;;  %v11077_v34 = vld [vmem:[%s14922_s2 + $0xd8] sm:$0xff]   ;;  %v4745_v21 = vld [vmem:[#allocation2 + $0x54] sm:$0xe] }
 0x288   : > { %v4782_v55 = vsel %vm12805_vm9, %v9584_v0, %v4781_v2  ;;  %v4790_v36 = vrot.slane %v4788_v37, 4  ;;  %v4789_v5 = vsel %vm12805_vm9, %v9585_v30, %v4788_v37  ;;  %v4802_v57 = vrot.slane %v13360_v38, 5 }
 0x289   : > { %10351 = vmatmul.mubr.msk.bf16.gmra.mrb[16].mxu0 %vm3286_vm13, %v9565_v4  ;;  %v4511_v63 = vrot.slane %v4509_v45, 5  ;;  %v9602_v42 = vcombine.low %v4782_v55, %v4785_v12  ;;  %v4798_v4 = vrot.slane %v13356_v41, 5  ;;  %v4796_v41 = vsel %vm12805_vm9, %v9586_v15, %v4795_v33  ;;  %v4746_v55 = vld [vmem:[#allocation2 + $0x60] sm:$0xe]  ;;  %v4748_v15 = vld [vmem:[#allocation2 + $0x78] sm:$0xe] }
 0x28a   : > { %10354 = vmatprep.mubr.msk.bf16.mxu0 %vm3286_vm13, %v9566_v31  ;;  %v4792_v31 = vsel %vm12805_vm9, %v4790_v36, %v4791_v28  ;;  %v4812_v60 = vrot.slane %v13382_v54, 5  ;;  %v4804_v38 = vrot.slane %v4802_v57, 4  ;;  %v4811_v58 = vrot.slane %v4809_v61, 4 }
 0x28b   : > { %v4512_v24 = vsel %vm12848_vm14, %v4507_v14, %v4511_v63  ;;  %v4799_v62 = vsel %vm12805_vm9, %v4797_v16, %v4798_v4  ;;  %v9603_v32 = vcombine.low %v4789_v5, %v4792_v31  ;;  %v9587_v6 = vrot.slane %v4742_v22, 9  ;;  %v11081_v22 = vld [vmem:[#allocation2 + $0x30] sm:$0xff]  }
 0x28c   : > { %v9569_v1 = vcombine.low %v4502_v56, %v4512_v24  ;;  %v9604_v51 = vcombine.low %v4796_v41, %v4799_v62  ;;  %v4806_v44 = vsel %vm12805_vm9, %v4804_v38, %v4805_v8  ;;  %v9588_v9 = vrot.slane %v4743_v50, 9  ;;  %v422_v62 = vld [vmem:[#allocation3 + $0xc] sm:$0x1]  ;;  %v11084_v8 = vld [vmem:[%s14922_s2 + $0xe8] sm:$0xff]  }
 0x28d   : > { %v4813_v54 = vsel %vm12805_vm9, %v4811_v58, %v4812_v60  ;;  %v4816_v19 = vrot.slane %v13389_v3, 5  ;;  %v4826_v14 = vrot.slane %v13420_v10, 5  ;;  %v9589_v23 = vrot.slane %v4744_v27, 9  ;;  %v11087_v60 = vld [vmem:[%s14922_s2 + $0xf0] sm:$0xff]   ;;  %v11082_v38 = vld [vmem:[#allocation2 + $0x3c] sm:$0xff]   ;;  %v11083_v58 = vld [vmem:[#allocation2 + $0x48] sm:$0xff]  }
 0x28e   : > { %v4810_v45 = vsel %vm12805_vm9, %v9588_v9, %v4809_v61  ;;  %v9590_v43 = vrot.slane %v4745_v21, 9  ;;  %v4830_v24 = vrot.slane %v13429_v49, 5  ;;  %v4837_v56 = vrot.slane %v13433_v7, 5  ;;  %v4747_v49 = vld [vmem:[#allocation2 + $0x6c] sm:$0xe]  ;;  %v11090_v50 = vld [vmem:[%s14922_s2 + $0xf8] sm:$0xff]  }
 0x28f   : > { %v9606_v2 = vcombine.low %v4810_v45, %v4813_v54  ;;  %v4818_v3 = vrot.slane %v4816_v19, 4  ;;  %v4817_v10 = vsel %vm12805_vm9, %v9589_v23, %v4816_v19  ;;  %v4840_v33 = vrot.slane %v13459_v53, 5  ;;  %v5348_v9 = vld [vmem:[#allocation2 + $0x30] sm:$0xf]  ;;  %v11085_v54 = vld [vmem:[#allocation2 + $0x54] sm:$0xff]  }
 0x290   : > { %v4839_v28 = vrot.slane %v4837_v56, 4  ;;  %v9591_v46 = vrot.slane %v4746_v55, 9  ;;  %v4844_v7 = vrot.slane %v13456_v39, 5  ;;  %v9592_v36 = vrot.slane %v4747_v49, 9  ;;  %v13618_v27 = vld [vmem:[#allocation2 + $0x20] sm:$0x1] }
 0x291   : > { %10355 = vmatmul.mubr.msk.bf16.gmra.mrb[20].mxu0 %vm3286_vm13, %v9567_v13  ;;  %v4823_v13 = vrot.slane %v13393_v29, 5  ;;  %v11079_v29 = vld [vmem:[%s14922_s2 + $0xe0] sm:$0xff]   ;;  %v4847_v39 = vrot.slane %v13483_v18, 5  ;;  %v13620_v23 = vld [vmem:[#allocation2 + $0x28] sm:$0xf]  ;;  %v11088_v55 = vld [vmem:[#allocation2 + $0x6c] sm:$0xff]  }
 0x292   : > { %10358 = vmatprep.mubr.msk.bf16.mxu0 %vm3286_vm13, %v9568_v11  ;;  %v4819_v11 = vrot.slane %v13414_v47, 5  ;;  %v4831_v20 = vsel %vm12805_vm9, %v9591_v46, %v4830_v24  ;;  %v4838_v53 = vsel %vm12805_vm9, %v9592_v36, %v4837_v56  ;;  %v4846_v31 = vrot.slane %v4844_v7, 4  ;;  %v11080_v18 = vld [vmem:[#allocation2 + $0x24] sm:$0xff]   ;;  %v11089_v46 = vld [vmem:[#allocation2 + $0x78] sm:$0xff]  }
 0x293   : > { %v4825_v63 = vrot.slane %v4823_v13, 4  ;;  %v4824_v12 = vsel %vm12805_vm9, %v9590_v43, %v4823_v13  ;;  %v11086_v13 = vld [vmem:[#allocation2 + $0x60] sm:$0xff]   ;;  %v5406_v56 = vshll.u32 %v13620_v23, 16 }
 0x294   : > { %v4820_v47 = vsel %vm12805_vm9, %v4818_v3, %v4819_v11  ;;  %v4848_v41 = vsel %vm12805_vm9, %v4846_v31, %v4847_v39  ;;  %v5345_v11 = vld [vmem:[#allocation2 + $0x24] sm:$0xf]  ;;  %v13635_v39 = vld [vmem:[#allocation2 + $0x38] sm:$0x1] }
 0x295   : > { %v4827_v40 = vsel %vm12805_vm9, %v4825_v63, %v4826_v14  ;;  %v9607_v0 = vcombine.low %v4817_v10, %v4820_v47  ;;  %v5360_v14 = vld [vmem:[#allocation2 + $0x60] sm:$0xf]  ;;  %v5397_v47 = vshrl.u32 %v5345_v11, 16  ;;  %v5400_v43 = vshll.u32 %v5345_v11, 16 }
 0x296   : > { %v9608_v37 = vcombine.low %v4824_v12, %v4827_v40  ;;  %v13622_v40 = vld [vmem:[#allocation2 + $0x34] sm:$0xf]  ;;  %v5517_v12 = vshrl.u32 %v5360_v14, 16 }
 0x297   : > { %v5430_v49 = vshll.u32 %v13622_v40, 16 }
 0x298   : > { %v13632_v31 = vrot.slane %v5517_v12, 4 }
 0x299   : > { %10359 = vmatmul.mubr.msk.bf16.gmra.mrb[24].mxu0 %vm3286_vm13, %v9569_v1  ;;  %v4833_v1 = vrot.slane %v13453_v25, 5  ;;  %v4841_v25 = vsel %vm12805_vm9, %v4839_v28, %v4840_v33  ;;  %v5434_v28 = vshrl.u32 %v13622_v40, 16 }
 0x29a   : > { %10370 = vmatprep.mubr.msk.bf16.mxu0 %vm3286_vm13, %v9602_v42  ;;  %v4832_v42 = vrot.slane %v4830_v24, 4  ;;  %v9610_v30 = vcombine.low %v4838_v53, %v4841_v25  ;;  %v5520_v25 = vshll.u32 %v5360_v14, 16 }
 0x29c   : > { %v4834_v4 = vsel %vm12805_vm9, %v4832_v42, %v4833_v1  ;;  %v5351_v1 = vld [vmem:[#allocation2 + $0x3c] sm:$0xf] }
 0x29d   : > { %v9609_v16 = vcombine.low %v4831_v20, %v4834_v4  ;;  %v5399_v4 = vrot.slane %v5397_v47, 4  ;;  %v5445_v53 = vshrl.u32 %v5351_v1, 16 }
 0x2a1   : > { %10371 = vmatmul.mubr.msk.bf16.vlgmr.msra.gmra.mrb[8].mxu0 %vm3286_vm13, %v9603_v32  ;;  %v9593_v32 = vrot.slane %v4748_v15, 9  ;;  %v5408_v15 = vrot.slane %v5406_v56, 5 }
 0x2a2   : > { %10391 = vmatpush3.bf16.msra.mxu0 %v13465_v17  ;;  %10374 = vmatprep.mubr.msk.bf16.mxu0 %vm3286_vm13, %v9604_v51  ;;  %v4803_v17 = vsel %vm12805_vm9, %v9587_v6, %v4802_v57  ;;  %v423_v57 = vsel %vm13581_vm6, 0, %v422_v62  ;;  %v11078_v51 = vld [vmem:[#allocation2 + $0x18] sm:$0xff]  }
 0x2a3   : > { %10392 = vmatprep.subr.bf16.mxu0 %v11075_v59  ;;  %v9605_v26 = vcombine.low %v4803_v17, %v4806_v44  ;;  %424 = vst [vmem:[#allocation3 + $0xc] sm:$0x1] %v423_v57  ;;  %v4845_v61 = vsel %vm12805_vm9, %v9593_v32, %v4844_v7  ;;  %v5342_v6 = vld [vmem:[#allocation2 + $0x18] sm:$0xf]  ;;  %v13611_v44 = vld [vmem:[#allocation2 + $0x1c] sm:$0xf] }
 0x2a4   : > { %v5373_v17 = vshrl.u32 %v5342_v6, 16  ;;  %v5376_v19 = vshll.u32 %v5342_v6, 16  ;;  %v5386_v45 = vshrl.u32 %v13611_v44, 16  ;;  %v5402_v7 = vrot.slane %v5400_v43, 5  ;;  %v5354_v57 = vld [vmem:[#allocation2 + $0x48] sm:$0xf] }
 0x2a5   : > { %v13647_v6 = vrot.slane %v5445_v53, 4  ;;  %v5472_v47 = vshll.u32 %v5354_v57, 16 }
 0x2a6   : > { %10393 = vmatpush3.bf16.msra.mxu0 %v11075_v59  ;;  %v9611_v59 = vcombine.low %v4845_v61, %v4848_v41  ;;  %v5375_v3 = vrot.slane %v5373_v17, 4  ;;  %v5378_v21 = vrot.slane %v5376_v19, 5  ;;  %v5432_v61 = vrot.slane %v5430_v49, 5 }
 0x2a7   : > { %10394 = vmatprep.subr.bf16.mxu0 %v11076_v48  ;;  %v5474_v53 = vrot.slane %v5472_v47, 5 }
 0x2a8   : > { %v5379_v33 = vor.u32 %v5378_v21, %v5375_v3 }
 0x2a9   : > { %10375 = vmatmul.mubr.msk.bf16.gmra.mrb[12].mxu0 %vm3286_vm13, %v9605_v26  ;;  %v5382_v26 = vshll.u32 %v13611_v44, 16 }
 0x2aa   : > { %10378 = vmatprep.mubr.msk.bf16.mxu0 %vm3286_vm13, %v9606_v2  ;;  %10395 = vmatpush3.bf16.msra.mxu0 %v11076_v48  ;;  %v13609_v48 = vld [vmem:[%s14922_s2 + $0x100] sm:$0xff]   ;;  %v5424_v2 = vshll.u32 %v5348_v9, 16  ;;  %v5380_v32 = vrot.slane %v5379_v33, 4 }
 0x2ab   : > { %10396 = vmatprep.subr.bf16.mxu0 %v11077_v34  ;;  %v5384_v63 = vrot.slane %v5382_v26, 5  ;;  %v5469_v26 = vshrl.u32 %v5354_v57, 16 }
 0x2ac   : > { %v5426_v24 = vrot.slane %v5424_v2, 5 }
 0x2ae   : > { %10397 = vmatpush3.bf16.msra.mxu0 %v11077_v34  ;;  %v5421_v34 = vshrl.u32 %v5348_v9, 16 }
 0x2af   : > { %10418 = vmatprep.subr.bf16.mxu0 %v11079_v29 }
 0x2b0   : > { %v5423_v10 = vrot.slane %v5421_v34, 4  ;;  %v5385_v34 = vsel %vm12848_vm14, %v5380_v32, %v5384_v63 }
 0x2b1   : > { %10379 = vmatmul.mubr.msk.bf16.gmra.mrb[16].mxu0 %vm3286_vm13, %v9607_v0  ;;  %v5392_v0 = vshll.u32 %v13618_v27, 16 }
 0x2b2   : > { %10382 = vmatprep.mubr.msk.bf16.mxu0 %vm3286_vm13, %v9608_v37  ;;  %v5410_v37 = vshrl.u32 %v13620_v23, 16  ;;  %v5427_v36 = vor.u32 %v5426_v24, %v5423_v10  ;;  %v13658_v10 = vld [vmem:[#allocation2 + $0x44] sm:$0x1] }
 0x2b3   : > { %v5394_v20 = vrot.slane %v5392_v0, 5  ;;  %v13662_v0 = vld [vmem:[#allocation2 + $0x58] sm:$0xf] }
 0x2b4   : > { %v5412_v62 = vrot.slane %v5410_v37, 4 }
 0x2b9   : > { %10383 = vmatmul.mubr.msk.bf16.gmra.mrb[20].mxu0 %vm3286_vm13, %v9609_v16  ;;  %v13630_v16 = vld [vmem:[#allocation2 + $0x2c] sm:$0x1] }
 0x2ba   : > { %10386 = vmatprep.mubr.msk.bf16.mxu0 %vm3286_vm13, %v9610_v30  ;;  %v5448_v30 = vshll.u32 %v5351_v1, 16  ;;  %v13667_v1 = vld [vmem:[#allocation2 + $0x50] sm:$0x1] }
 0x2bc   : > { %v13649_v9 = vrot.slane %v5448_v30, 5  ;;  %v5488_v30 = vshll.u32 %v13667_v1, 16 }
 0x2be   : > { %v5451_v24 = vor.u32 %v13649_v9, %v13647_v6 }
 0x2c1   : > { %10387 = vmatmul.mubr.msk.bf16.gmra.mrb[24].mxu0 %vm3286_vm13, %v9611_v59  ;;  %v5436_v59 = vrot.slane %v5434_v28, 4 }
 0x2c2   : > { %10398 = vmatprep.mubr.msk.bf16.mxu0 %vm3286_vm13, %v11078_v51  ;;  %v13637_v51 = vld [vmem:[#allocation2 + $0x40] sm:$0xf] }
 0x2c3   : > { %v5454_v17 = vshll.u32 %v13637_v51, 16  ;;  %v5458_v19 = vshrl.u32 %v13637_v51, 16  ;;  %v5437_v2 = vor.u32 %v5436_v59, %v5432_v61 }
 0x2c5   : > { %v13665_v56 = vrot.slane %v5454_v17, 5  ;;  %v5460_v37 = vrot.slane %v5458_v19, 4  ;;  %v5438_v33 = vrot.slane %v5437_v2, 4  ;;  %v13707_v2 = vld [vmem:[#allocation2 + $0x7c] sm:$0xf] }
 0x2c7   : > { %v5461_v32 = vor.u32 %v5460_v37, %v13665_v56 }
 0x2c9   : > { %10399 = vmatmul.mubr.msk.bf16.vlgmr.msra.gmra.mrb[8].mxu0 %vm3286_vm13, %v11080_v18  ;;  %v5403_v18 = vor.u32 %v5402_v7, %v5399_v4  ;;  %v5464_v7 = vshll.u32 %v13658_v10, 16 }
 0x2ca   : > { %10419 = vmatpush3.bf16.msra.mxu0 %v11079_v29  ;;  %10402 = vmatprep.mubr.msk.bf16.mxu0 %vm3286_vm13, %v11081_v22  ;;  %v5388_v29 = vrot.slane %v5386_v45, 4  ;;  %v5428_v22 = vrot.slane %v5427_v36, 4  ;;  %v5357_v45 = vld [vmem:[#allocation2 + $0x54] sm:$0xf]  ;;  %v5502_v36 = vshll.u32 %v13662_v0, 16 }
 0x2cb   : > { %10420 = vmatprep.subr.bf16.mxu0 %v11084_v8  ;;  %v5404_v21 = vrot.slane %v5403_v18, 4  ;;  %v5496_v28 = vshll.u32 %v5357_v45, 16 }
 0x2cc   : > { %v5389_v42 = vor.u32 %v5388_v29, %v5384_v63  ;;  %v5493_v63 = vshrl.u32 %v5357_v45, 16  ;;  %v13699_v45 = vld [vmem:[#allocation2 + $0x5c] sm:$0x1] }
 0x2cd   : > { %v5409_v57 = vsel %vm12848_vm14, %v5404_v21, %v5408_v15  ;;  %v13694_v6 = vrot.slane %v5496_v28, 5 }
 0x2ce   : > { %10421 = vmatpush3.bf16.msra.mxu0 %v11084_v8  ;;  %v5390_v41 = vrot.slane %v5389_v42, 4  ;;  %v5416_v8 = vshll.u32 %v13630_v16, 16 }
 0x2cf   : > { %10422 = vmatprep.subr.bf16.mxu0 %v11087_v60 }
 0x2d0   : > { %v5418_v29 = vrot.slane %v5416_v8, 5  ;;  %v5433_v8 = vsel %vm12848_vm14, %v5428_v22, %v5432_v61  ;;  %v13701_v61 = vld [vmem:[#allocation2 + $0x68] sm:$0x1]  ;;  %v5462_v22 = vrot.slane %v5461_v32, 4  ;;  %v11095_v32 = vld [vmem:[%s14922_s2 + $0x118] sm:$0xff]  }
 0x2d1   : > { %10403 = vmatmul.mubr.msk.bf16.gmra.mrb[12].mxu0 %vm3286_vm13, %v11082_v38  ;;  %v13642_v38 = vrot.slane %v5520_v25, 5  ;;  %v5506_v25 = vshrl.u32 %v13662_v0, 16 }
 0x2d2   : > { %10406 = vmatprep.mubr.msk.bf16.mxu0 %vm3286_vm13, %v11083_v58  ;;  %10423 = vmatpush3.bf16.msra.mxu0 %v11087_v60  ;;  %v13640_v60 = vld [vmem:[#allocation2 + $0x4c] sm:$0xf]  ;;  %v5440_v58 = vshll.u32 %v13635_v39, 16 }
 0x2d3   : > { %10424 = vmatprep.subr.bf16.mxu0 %v11090_v50  ;;  %v5478_v11 = vshll.u32 %v13640_v60, 16  ;;  %v5482_v14 = vshrl.u32 %v13640_v60, 16  ;;  %v5508_v17 = vrot.slane %v5506_v25, 4  ;;  %v5523_v21 = vor.u32 %v13642_v38, %v13632_v31  ;;  %v5366_v25 = vld [vmem:[#allocation2 + $0x78] sm:$0xf] }
 0x2d4   : > { %v5442_v43 = vrot.slane %v5440_v58, 5  ;;  %v11093_v58 = vld [vmem:[%s14922_s2 + $0x108] sm:$0xff]   ;;  %v5574_v38 = vshll.u32 %v13707_v2, 16 }
 0x2d5   : > { %v13669_v42 = vrot.slane %v5478_v11, 5  ;;  %v5484_v49 = vrot.slane %v5482_v14, 4  ;;  %v5452_v11 = vrot.slane %v5451_v24, 4  ;;  %v5512_v24 = vshll.u32 %v13699_v45, 16 }
 0x2d6   : > { %10425 = vmatpush3.bf16.msra.mxu0 %v11090_v50  ;;  %v5395_v50 = vsel %vm12848_vm14, %v5390_v41, %v5394_v20  ;;  %v5443_v20 = vsel %vm12848_vm14, %v5438_v33, %v5442_v43  ;;  %v5578_v33 = vshrl.u32 %v13707_v2, 16 }
 0x2d7   : > { %10446 = vmatprep.subr.bf16.mxu0 %v13609_v48  ;;  %v9666_v3 = vcombine.low %v5385_v34, %v5395_v50  ;;  %v5485_v50 = vor.u32 %v5484_v49, %v13669_v42  ;;  %v9668_v9 = vcombine.low %v5433_v8, %v5443_v20  ;;  %v5457_v28 = vsel %vm12848_vm14, %v5452_v11, %v13665_v56 }
 0x2d8   : > { %v5514_v8 = vrot.slane %v5512_v24, 5  ;;  %v5524_v11 = vrot.slane %v5523_v21, 4 }
 0x2d9   : > { %10407 = vmatmul.mubr.msk.bf16.gmra.mrb[16].mxu0 %vm3286_vm13, %v11085_v54  ;;  %v5413_v54 = vor.u32 %v5412_v62, %v5408_v15  ;;  %v13681_v62 = vrot.slane %v5493_v63, 4  ;;  %v5466_v15 = vrot.slane %v5464_v7, 5  ;;  %v5486_v14 = vrot.slane %v5485_v50, 4 }
 0x2da   : > { %10410 = vmatprep.mubr.msk.bf16.mxu0 %vm3286_vm13, %v11086_v13  ;;  %v11091_v13 = vld [vmem:[#allocation2 + $0x84] sm:$0xff]   ;;  %v5536_v63 = vshll.u32 %v13701_v61, 16 }
 0x2db   : > { %v5414_v12 = vrot.slane %v5413_v54, 4  ;;  %v13696_v54 = vrot.slane %v5502_v36, 5  ;;  %v5467_v47 = vsel %vm12848_vm14, %v5462_v22, %v5466_v15  ;;  %v13752_v15 = vld [vmem:[#allocation2 + $0x88] sm:$0xf] }
 0x2dc   : > { %v5538_v50 = vrot.slane %v5536_v63, 5  ;;  %v13760_v63 = vld [vmem:[#allocation2 + $0x80] sm:$0x1] }
 0x2dd   : > { %v5419_v4 = vsel %vm12848_vm14, %v5414_v12, %v5418_v29  ;;  %v13716_v29 = vld [vmem:[#allocation2 + $0x70] sm:$0xf]  ;;  %v5509_v43 = vor.u32 %v5508_v17, %v13696_v54  ;;  %v5363_v12 = vld [vmem:[#allocation2 + $0x6c] sm:$0xf] }
 0x2de   : > { %v9667_v18 = vcombine.low %v5409_v57, %v5419_v4  ;;  %v5550_v7 = vshll.u32 %v13716_v29, 16  ;;  %v5554_v36 = vshrl.u32 %v13716_v29, 16  ;;  %v5541_v57 = vshrl.u32 %v5363_v12, 16 }
 0x2df   : > { %v5544_v56 = vshll.u32 %v5363_v12, 16  ;;  %v5598_v12 = vshll.u32 %v13752_v15, 16 }
 0x2e1   : > { %10411 = vmatmul.mubr.msk.bf16.gmra.mrb[20].mxu0 %vm3286_vm13, %v11088_v55  ;;  %v5471_v55 = vrot.slane %v5469_v26, 4  ;;  %v5490_v26 = vrot.slane %v5488_v30, 5 }
 0x2e2   : > { %10414 = vmatprep.mubr.msk.bf16.mxu0 %vm3286_vm13, %v11089_v46  ;;  %v13671_v46 = vld [vmem:[#allocation2 + $0x64] sm:$0xf] }
 0x2e3   : > { %v5526_v41 = vshll.u32 %v13671_v46, 16  ;;  %v5530_v59 = vshrl.u32 %v13671_v46, 16  ;;  %v5475_v19 = vor.u32 %v5474_v53, %v5471_v55  ;;  %v5491_v31 = vsel %vm12848_vm14, %v5486_v14, %v5490_v26 }
 0x2e4   : > { %v9669_v53 = vcombine.low %v5457_v28, %v5467_v47  ;;  %v5556_v26 = vrot.slane %v5554_v36, 4  ;;  %v5543_v14 = vrot.slane %v5541_v57, 4  ;;  %v5546_v47 = vrot.slane %v5544_v56, 5 }
 0x2e5   : > { %v5532_v34 = vrot.slane %v5530_v59, 4  ;;  %v5476_v55 = vrot.slane %v5475_v19, 4  ;;  %v5552_v19 = vrot.slane %v5550_v7, 5  ;;  %v5584_v56 = vshll.u32 %v13760_v63, 16 }
 0x2e6   : > { %v5547_v57 = vor.u32 %v5546_v47, %v5543_v14 }
 0x2e7   : > { %v5481_v30 = vsel %vm12848_vm14, %v5476_v55, %v13669_v42  ;;  %v13750_v42 = vrot.slane %v5574_v38, 5  ;;  %v5369_v38 = vld [vmem:[#allocation2 + $0x84] sm:$0xf]  ;;  %v5557_v7 = vor.u32 %v5556_v26, %v5552_v19 }
 0x2e8   : > { %v9670_v59 = vcombine.low %v5481_v30, %v5491_v31 }
 0x2e9   : > { %10415 = vmatmul.mubr.msk.bf16.gmra.mrb[24].mxu0 %vm3286_vm13, %v11091_v13  ;;  %v13705_v13 = vrot.slane %v5526_v41, 5 }
 0x2ea   : > { %10426 = vmatprep.mubr.msk.bf16.mxu0 %vm3286_vm13, %v9666_v3  ;;  %v5499_v3 = vor.u32 %v13694_v6, %v13681_v62  ;;  %v13742_v62 = vld [vmem:[#allocation2 + $0x74] sm:$0x1]  ;;  %v5568_v6 = vshll.u32 %v5366_v25, 16 }
 0x2eb   : > { %v5533_v4 = vor.u32 %v5532_v34, %v13705_v13  ;;  %v5560_v22 = vshll.u32 %v13742_v62, 16 }
 0x2ec   : > { %v5500_v34 = vrot.slane %v5499_v3, 4  ;;  %v5570_v3 = vrot.slane %v5568_v6, 5  ;;  %v5548_v6 = vrot.slane %v5547_v57, 4 }
 0x2ed   : > { %v5534_v17 = vrot.slane %v5533_v4, 4  ;;  %v5529_v4 = vsel %vm12848_vm14, %v5524_v11, %v13705_v13  ;;  %v5562_v36 = vrot.slane %v5560_v22, 5 }
 0x2ee   : > { %v5505_v28 = vsel %vm12848_vm14, %v5500_v34, %v13696_v54 }
 0x2ef   : > { %v5539_v24 = vsel %vm12848_vm14, %v5534_v17, %v5538_v50  ;;  %v5600_v50 = vrot.slane %v5598_v12, 5  ;;  %v13782_v17 = vld [vmem:[#allocation2 + $0x8c] sm:$0x1]  ;;  %v5553_v12 = vsel %vm12848_vm14, %v5548_v6, %v5552_v19  ;;  %v5883_v19 = vrot.slane %v13618_v27, 5 }
 0x2f0   : > { %v9672_v30 = vcombine.low %v5529_v4, %v5539_v24 }
 0x2f1   : > { %10427 = vmatmul.mubr.msk.bf16.vlgmr.msra.gmra.mrb[8].mxu0 %vm3286_vm13, %v9667_v18  ;;  %v13723_v37 = vpop.f32.mrb[8].mxu1  ;;  %v5510_v18 = vrot.slane %v5509_v43, 4 }
 0x2f2   : > { %10447 = vmatpush3.bf16.msra.mxu0 %v13609_v48  ;;  %10430 = vmatprep.mubr.msk.bf16.mxu0 %vm3286_vm13, %v9668_v9  ;;  %v11094_v48 = vld [vmem:[%s14922_s2 + $0x110] sm:$0xff]   ;;  %v13729_v49 = vpop.f32.mrb[9].mxu1  ;;  %v5580_v9 = vrot.slane %v5578_v33, 4 }
 0x2f3   : > { %10448 = vmatprep.subr.bf16.mxu0 %v11093_v58  ;;  %v13737_v20 = vpop.f32.mrb[10].mxu1  ;;  %v5515_v43 = vsel %vm12848_vm14, %v5510_v18, %v5514_v8  ;;  %v5589_v18 = vshrl.u32 %v5369_v38, 16  ;;  %v5592_v8 = vshll.u32 %v5369_v38, 16  ;;  %v5880_v38 = vrot.slane %v13611_v44, 5 }
 0x2f4   : > { %v13747_v41 = vpop.f32.mrb[11].mxu1  ;;  %v5581_v21 = vor.u32 %v5580_v9, %v13750_v42  ;;  %v5586_v9 = vrot.slane %v5584_v56, 5 }
 0x2f5   : > { %v5591_v22 = vrot.slane %v5589_v18, 4  ;;  %v5594_v34 = vrot.slane %v5592_v8, 5  ;;  %v5882_v57 = vrot.slane %v5880_v38, 4 }
 0x2f6   : > { %10449 = vmatpush3.bf16.msra.mxu0 %v11093_v58  ;;  %v5565_v58 = vshrl.u32 %v5366_v25, 16  ;;  %v5582_v13 = vrot.slane %v5581_v21, 4 }
 0x2f7   : > { %10450 = vmatprep.subr.bf16.mxu0 %v11094_v48  ;;  %v5884_v8 = vsel %vm12805_vm9, %v5882_v57, %v5883_v19  ;;  %v5908_v19 = vrot.slane %v13640_v60, 5  ;;  %v5904_v57 = vrot.slane %v13658_v10, 5 }
 0x2f8   : > { %v5567_v31 = vrot.slane %v5565_v58, 4 }
 0x2f9   : > { %10431 = vmatmul.mubr.msk.bf16.gmra.mrb[12].mxu0 %vm3286_vm13, %v9669_v53  ;;  %v9671_v53 = vcombine.low %v5505_v28, %v5515_v43  ;;  %v5587_v43 = vsel %vm12848_vm14, %v5582_v13, %v5586_v9  ;;  %v5894_v9 = vrot.slane %v13622_v40, 5 }
 0x2fa   : > { %10434 = vmatprep.mubr.msk.bf16.mxu0 %vm3286_vm13, %v9670_v59  ;;  %10451 = vmatpush3.bf16.msra.mxu0 %v11094_v48  ;;  %v5602_v48 = vshrl.u32 %v13752_v15, 16  ;;  %v5571_v58 = vor.u32 %v5570_v3, %v5567_v31 }
 0x2fb   : > { %10452 = vmatprep.subr.bf16.mxu0 %v11095_v32  ;;  %v13764_v55 = vpop.f32.mrb[12].mxu1 }
 0x2fc   : > { %v13767_v33 = vpop.f32.mrb[13].mxu1  ;;  %v5604_v54 = vrot.slane %v5602_v48, 4  ;;  %v5572_v47 = vrot.slane %v5571_v58, 4  ;;  %v5608_v48 = vshll.u32 %v13782_v17, 16  ;;  %v5887_v58 = vrot.slane %v13620_v23, 5 }
 0x2fd   : > { %v13775_v25 = vpop.f32.mrb[14].mxu1 }
 0x2fe   : > { %10453 = vmatpush3.bf16.msra.mxu0 %v11095_v32  ;;  %v13778_v59 = vpop.f32.mrb[15].mxu1  ;;  %v5558_v32 = vrot.slane %v5557_v7, 4  ;;  %v5605_v11 = vor.u32 %v5604_v54, %v5600_v50  ;;  %v5577_v21 = vsel %vm12848_vm14, %v5572_v47, %v13750_v42  ;;  %v5595_v7 = vor.u32 %v5594_v34, %v5591_v22  ;;  %v5840_v47 = vld [vmem:[#allocation2 + $0x30] sm:$0xe] }
 0x2ff   : > { %v9674_v4 = vcombine.low %v5577_v21, %v5587_v43  ;;  %v5890_v34 = vrot.slane %v13630_v16, 5  ;;  %v5889_v23 = vrot.slane %v5887_v58, 4  ;;  %v5896_v43 = vrot.slane %v5894_v9, 4 }
 0x300   : > { %v5563_v26 = vsel %vm12848_vm14, %v5558_v32, %v5562_v36  ;;  %v5606_v36 = vrot.slane %v5605_v11, 4  ;;  %v5596_v56 = vrot.slane %v5595_v7, 4  ;;  %v5839_v11 = vld [vmem:[#allocation2 + $0x24] sm:$0xe] }
 0x301   : > { %10435 = vmatmul.mubr.msk.bf16.gmra.mrb[16].mxu0 %vm3286_vm13, %v9671_v53  ;;  %v9673_v3 = vcombine.low %v5553_v12, %v5563_v26  ;;  %v5610_v53 = vrot.slane %v5608_v48, 5  ;;  %v9691_v12 = vrot.slane %v5839_v11, 9  ;;  %v5891_v48 = vsel %vm12805_vm9, %v5889_v23, %v5890_v34 }
 0x302   : > { %10438 = vmatprep.mubr.msk.bf16.mxu0 %vm3286_vm13, %v9672_v30  ;;  %v5838_v30 = vld [vmem:[#allocation2 + $0x18] sm:$0xe]  ;;  %v5601_v27 = vsel %vm12848_vm14, %v5596_v56, %v5600_v50  ;;  %v5897_v50 = vrot.slane %v13635_v39, 5  ;;  %v5841_v56 = vld [vmem:[#allocation2 + $0x3c] sm:$0xe]  ;;  %v5918_v11 = vrot.slane %v13699_v45, 5 }
 0x303   : > { %v13786_v14 = vpop.f32.mrb[16].mxu1  ;;  %v5611_v42 = vsel %vm12848_vm14, %v5606_v36, %v5610_v53  ;;  %v9690_v44 = vrot.slane %v5838_v30, 9  ;;  %v5888_v39 = vsel %vm12805_vm9, %v9691_v12, %v5887_v58  ;;  %v5925_v23 = vrot.slane %v13701_v61, 5 }
 0x304   : > { %v13790_v24 = vpop.f32.mrb[17].mxu1  ;;  %v9675_v32 = vcombine.low %v5601_v27, %v5611_v42  ;;  %v5898_v16 = vsel %vm12805_vm9, %v5896_v43, %v5897_v50  ;;  %v9709_v7 = vcombine.low %v5888_v39, %v5891_v48  ;;  %v5911_v42 = vrot.slane %v13667_v1, 5  ;;  %v5843_v50 = vld [vmem:[#allocation2 + $0x54] sm:$0xe]  ;;  %v5844_v43 = vld [vmem:[#allocation2 + $0x60] sm:$0xe] }
 0x305   : > { %v13795_v31 = vpop.f32.mrb[18].mxu1  ;;  %v5881_v6 = vsel %vm12805_vm9, %v9690_v44, %v5880_v38  ;;  %v5901_v38 = vrot.slane %v13637_v51, 5  ;;  %v5842_v44 = vld [vmem:[#allocation2 + $0x48] sm:$0xe]  ;;  %v9693_v27 = vrot.slane %v5841_v56, 9  ;;  %v5936_v45 = vrot.slane %v13707_v2, 5 }
 0x306   : > { %v13801_v28 = vpop.f32.mrb[19].mxu1  ;;  %v9708_v22 = vcombine.low %v5881_v6, %v5884_v8  ;;  %v5910_v8 = vrot.slane %v5908_v19, 4  ;;  %v9694_v60 = vrot.slane %v5842_v44, 9  ;;  %v5915_v6 = vrot.slane %v13662_v0, 5  ;;  %v5846_v2 = vld [vmem:[#allocation2 + $0x78] sm:$0xe] }
 0x307   : > { %v5903_v51 = vrot.slane %v5901_v38, 4  ;;  %v5902_v10 = vsel %vm12805_vm9, %v9693_v27, %v5901_v38  ;;  %v9695_v0 = vrot.slane %v5843_v50, 9  ;;  %v5929_v61 = vrot.slane %v13716_v29, 5 }
 0x308   : > { %v5909_v1 = vsel %vm12805_vm9, %v9694_v60, %v5908_v19  ;;  %v5845_v19 = vld [vmem:[#allocation2 + $0x6c] sm:$0xe]  ;;  %v5939_v56 = vrot.slane %v13760_v63, 5  ;;  %v9698_v44 = vrot.slane %v5846_v2, 9  ;;  %v5847_v63 = vld [vmem:[#allocation2 + $0x84] sm:$0xe] }
 0x309   : > { %10439 = vmatmul.mubr.msk.bf16.gmra.mrb[20].mxu0 %vm3286_vm13, %v9673_v3  ;;  %v9692_v3 = vrot.slane %v5840_v47, 9  ;;  %v5905_v58 = vsel %vm12805_vm9, %v5903_v51, %v5904_v57  ;;  %v5917_v47 = vrot.slane %v5915_v6, 4  ;;  %v5931_v57 = vrot.slane %v5929_v61, 4  ;;  %v440_v2 = vld [vmem:[#allocation3 + $0x54] sm:$0x1] }
 0x30a   : > { %10442 = vmatprep.mubr.msk.bf16.mxu0 %vm3286_vm13, %v9674_v4  ;;  %v5943_v51 = vrot.slane %v13752_v15, 5  ;;  %v5946_v15 = vrot.slane %v13782_v17, 5  ;;  %v453_v17 = vld [vmem:[#allocation3 + $0x14] sm:$0x1] }
 0x30b   : > { %v5895_v36 = vsel %vm12805_vm9, %v9692_v3, %v5894_v9  ;;  %v9711_v9 = vcombine.low %v5902_v10, %v5905_v58  ;;  %v5919_v48 = vsel %vm12805_vm9, %v5917_v47, %v5918_v11  ;;  %v9696_v3 = vrot.slane %v5844_v43, 9  ;;  %v428_v43 = vld [vmem:[#allocation3 + $0x24] sm:$0x1] }
 0x30c   : > { %v9710_v30 = vcombine.low %v5895_v36, %v5898_v16  ;;  %v5916_v16 = vsel %vm12805_vm9, %v9695_v0, %v5915_v6  ;;  %v5932_v36 = vrot.slane %v13742_v62, 5  ;;  %v5937_v58 = vsel %vm12805_vm9, %v9698_v44, %v5936_v45  ;;  %v425_v0 = vld [vmem:[#allocation3 + $0x18] sm:$0x1] }
 0x30d   : > { %v9713_v39 = vcombine.low %v5916_v16, %v5919_v48  ;;  %v9699_v10 = vrot.slane %v5847_v63, 9  ;;  %v454_v50 = vsel %vm13899_vm8, 0, %v453_v17  ;;  %v426_v48 = vsel %vm13581_vm6, 0, %v425_v0  ;;  %v434_v16 = vld [vmem:[#allocation3 + $0x3c] sm:$0x1] }
 0x30e   : > { %v13808_v18 = vpop.f32.mrb[20].mxu1  ;;  %v5933_v29 = vsel %vm12805_vm9, %v5931_v57, %v5932_v36  ;;  %455 = vst [vmem:[#allocation3 + $0x14] sm:$0x1] %v454_v50  ;;  %427 = vst [vmem:[#allocation3 + $0x18] sm:$0x1] %v426_v48 }
 0x30f   : > { %v13812_v54 = vpop.f32.mrb[21].mxu1  ;;  %v477_v63 = vld [vmem:[#allocation3 + $0x74] sm:$0x1]  ;;  %v13948_v17 = vld [vmem:[%s14924_s4] ss:$0 sm:$0xff] }
 0x310   : > { %v13817_v13 = vpop.f32.mrb[22].mxu1 }
 0x311   : > { %v13822_v26 = vpop.f32.mrb[23].mxu1  ;;  %10443 = vmatmul.mubr.msk.bf16.gmra.mrb[24].mxu0 %vm3286_vm13, %v9675_v32  ;;  %v5912_v32 = vsel %vm12805_vm9, %v5910_v8, %v5911_v42  ;;  %v9697_v42 = vrot.slane %v5845_v19, 9 }
 0x312   : > { %10454 = vmatprep.mubr.msk.bf16.mxu0 %vm3286_vm13, %v9708_v22  ;;  %v5922_v22 = vrot.slane %v13671_v46, 5  ;;  %v9712_v34 = vcombine.low %v5909_v1, %v5912_v32  ;;  %v5945_v32 = vrot.slane %v5943_v51, 4 }
 0x313   : > { %v5930_v8 = vsel %vm12805_vm9, %v9697_v42, %v5929_v61  ;;  %v437_v42 = vld [vmem:[#allocation3 + $0x48] sm:$0x1] }
 0x314   : > { %v5924_v12 = vrot.slane %v5922_v22, 4  ;;  %v5923_v38 = vsel %vm12805_vm9, %v9696_v3, %v5922_v22  ;;  %v9715_v27 = vcombine.low %v5930_v8, %v5933_v29  ;;  %v5947_v6 = vsel %vm12805_vm9, %v5945_v32, %v5946_v15  ;;  %v419_v22 = vld [vmem:[#allocation3] sm:$0x1]  ;;  %v459_v3 = vld [vmem:[#allocation3 + $0x2c] sm:$0x1] }
 0x315   : > { %v438_v29 = vsel %vm13581_vm6, 0, %v437_v42  ;;  %v478_v15 = vsel %vm13899_vm8, 0, %v477_v63  ;;  %v6520_v63 = vld [vmem:[#allocation3 + $0xc] sm:$0xf] }
 0x316   : > { %v13830_v40 = vpop.f32.mrb[24].mxu1  ;;  %v5926_v46 = vsel %vm12805_vm9, %v5924_v12, %v5925_v23  ;;  %v450_v23 = vld [vmem:[#allocation3 + $0x8] sm:$0x1]  ;;  %v429_v12 = vsel %vm13581_vm6, 0, %v428_v43  ;;  %439 = vst [vmem:[#allocation3 + $0x48] sm:$0x1] %v438_v29 }
 0x317   : > { %v13834_v21 = vpop.f32.mrb[25].mxu1  ;;  %v451_v47 = vsel %vm13899_vm8, 0, %v450_v23  ;;  %430 = vst [vmem:[#allocation3 + $0x24] sm:$0x1] %v429_v12  ;;  %479 = vst [vmem:[#allocation3 + $0x74] sm:$0x1] %v478_v15 }
 0x318   : > { %v13839_v4 = vpop.f32.mrb[26].mxu1  ;;  %452 = vst [vmem:[#allocation3 + $0x8] sm:$0x1] %v451_v47 }
 0x319   : > { %v13844_v53 = vpop.f32.mrb[27].mxu1  ;;  %10455 = vmatmul.mubr.msk.bf16.vlgmr.msra.gmra.mrb[8].mxu0 %vm3286_vm13, %v9709_v7  ;;  %v9714_v7 = vcombine.low %v5923_v38, %v5926_v46  ;;  %v460_v46 = vsel %vm13899_vm8, 0, %v459_v3  ;;  %v431_v38 = vld [vmem:[#allocation3 + $0x30] sm:$0x1] }
 0x31a   : > { %10458 = vmatprep.mubr.msk.bf16.mxu0 %vm3286_vm13, %v9710_v30  ;;  %v5938_v30 = vrot.slane %v5936_v45, 4  ;;  %461 = vst [vmem:[#allocation3 + $0x2c] sm:$0x1] %v460_v46  ;;  %v456_v45 = vld [vmem:[#allocation3 + $0x20] sm:$0x1]  ;;  %v432_v36 = vsel %vm13581_vm6, 0, %v431_v38 }
 0x31b   : > { %v457_v61 = vsel %vm13899_vm8, 0, %v456_v45  ;;  %433 = vst [vmem:[#allocation3 + $0x30] sm:$0x1] %v432_v36 }
 0x31c   : > { %v5940_v62 = vsel %vm12805_vm9, %v5938_v30, %v5939_v56  ;;  %458 = vst [vmem:[#allocation3 + $0x20] sm:$0x1] %v457_v61  ;;  %v462_v30 = vld [vmem:[#allocation3 + $0x38] sm:$0x1]  ;;  %v441_v56 = vsel %vm13581_vm6, 0, %v440_v2 }
 0x31d   : > { %v9716_v60 = vcombine.low %v5937_v58, %v5940_v62  ;;  %v463_v57 = vsel %vm13899_vm8, 0, %v462_v30  ;;  %442 = vst [vmem:[#allocation3 + $0x54] sm:$0x1] %v441_v56  ;;  %v468_v62 = vld [vmem:[#allocation3 + $0x50] sm:$0x1] }
 0x31e   : > { %464 = vst [vmem:[#allocation3 + $0x38] sm:$0x1] %v463_v57  ;;  %v469_v8 = vsel %vm13899_vm8, 0, %v468_v62 }
 0x31f   : > { %470 = vst [vmem:[#allocation3 + $0x50] sm:$0x1] %v469_v8 }
 0x321   : > { %10459 = vmatmul.mubr.msk.bf16.gmra.mrb[12].mxu0 %vm3286_vm13, %v9711_v9  ;;  %v5944_v9 = vsel %vm12805_vm9, %v9699_v10, %v5943_v51  ;;  %v471_v51 = vld [vmem:[#allocation3 + $0x5c] sm:$0x1]  ;;  %v474_v10 = vld [vmem:[#allocation3 + $0x68] sm:$0x1] }
 0x322   : > { %10462 = vmatprep.mubr.msk.bf16.mxu0 %vm3286_vm13, %v9712_v34  ;;  %v9717_v1 = vcombine.low %v5944_v9, %v5947_v6  ;;  %v420_v34 = vsel %vm13581_vm6, 0, %v419_v22  ;;  %v472_v44 = vsel %vm13899_vm8, 0, %v471_v51  ;;  %v475_v6 = vsel %vm13899_vm8, 0, %v474_v10 }
 0x323   : > { %421 = vst [vmem:[#allocation3] sm:$0x1] %v420_v34  ;;  %473 = vst [vmem:[#allocation3 + $0x5c] sm:$0x1] %v472_v44 }
 0x324   : > { %476 = vst [vmem:[#allocation3 + $0x68] sm:$0x1] %v475_v6 }
 0x329   : > { %10463 = vmatmul.mubr.msk.bf16.gmra.mrb[16].mxu0 %vm3286_vm13, %v9713_v39  ;;  %v435_v39 = vsel %vm13581_vm6, 0, %v434_v16 }
 0x32a   : > { %10466 = vmatprep.mubr.msk.bf16.mxu0 %vm3286_vm13, %v9714_v7  ;;  %v465_v7 = vld [vmem:[#allocation3 + $0x44] sm:$0x1]  ;;  %436 = vst [vmem:[#allocation3 + $0x3c] sm:$0x1] %v435_v39 }
 0x32b   : > { %v466_v19 = vsel %vm13899_vm8, 0, %v465_v7 }
 0x32c   : > { %467 = vst [vmem:[#allocation3 + $0x44] sm:$0x1] %v466_v19 }
 0x331   : > { %10467 = vmatmul.mubr.msk.bf16.gmra.mrb[20].mxu0 %vm3286_vm13, %v9715_v27  ;;  %v446_v27 = vld [vmem:[#allocation3 + $0x6c] sm:$0x1] }
 0x332   : > { %10470 = vmatprep.mubr.msk.bf16.mxu0 %vm3286_vm13, %v9716_v60  ;;  %v447_v58 = vsel %vm13581_vm6, 0, %v446_v27  ;;  %v443_v60 = vld [vmem:[#allocation3 + $0x60] sm:$0x1] }
 0x333   : > { %448 = vst [vmem:[#allocation3 + $0x6c] sm:$0x1] %v447_v58  ;;  %v444_v32 = vsel %vm13581_vm6, 0, %v443_v60 }
 0x334   : > { %445 = vst [vmem:[#allocation3 + $0x60] sm:$0x1] %v444_v32 }
 0x339   : > { %10471 = vmatmul.mubr.msk.bf16.gmra.mrb[24].mxu0 %vm3286_vm13, %v9717_v1  ;;  %v13942_v1 = vld [vmem:[%s14923_s3] ss:$0 sm:$0xff] }
 0x3ec   : > { %v10456_v9 = vpop.f32.mrb[8].mxu0 }
 0x3ed   : > { %v10654_v22 = vadd.f32 %v10456_v9, %v13723_v37  ;;  %v6075_v34 = vpop.f32.mrb[9].mxu0 }
 0x3ee   : > { %v10655_v50 = vadd.f32 %v6075_v34, %v13729_v49  ;;  %v10457_v23 = vpop.f32.mrb[10].mxu0 }
 0x3ef   : > { %v6183_v11 = vmul.f32 %v10654_v22, %v13942_v1  ;;  %v10656_v47 = vadd.f32 %v10457_v23, %v13737_v20  ;;  %v6078_v43 = vpop.f32.mrb[11].mxu0 }
 0x3f0   : > { %v6181_v12 = vmul.f32 %v10655_v50, %v13942_v1  ;;  %v10657_v0 = vadd.f32 %v6078_v43, %v13747_v41  ;;  %v6512_v50 = vld [vmem:[#allocation3] sm:$0xf] }
 0x3f1   : > { %v6210_v37 = vadd.f32 %v13948_v17, %v6183_v11  ;;  %v6184_v48 = vmul.f32 %v10656_v47, %v13942_v1 }
 0x3f2   : > { %v6208_v3 = vadd.f32 %v13948_v17, %v6181_v12  ;;  %v6182_v46 = vmul.f32 %v10657_v0, %v13942_v1  ;;  %v6524_v0 = vld [vmem:[#allocation3 + $0x14] sm:$0x1] }
 0x3f3   : > { %v6230_v45 = vmax.f32 %v6210_v37, 0.0  ;;  %v6211_v49 = vadd.f32 %v13948_v17, %v6184_v48 }
 0x3f4   : > { %v6228_v16 = vmax.f32 %v6208_v3, 0.0  ;;  %v6209_v61 = vadd.f32 %v13948_v17, %v6182_v46  ;;  %v10460_v20 = vpop.f32.mrb[12].mxu0 }
 0x3f5   : > { %v9987_v39 = vpack.c.bf16 %v6230_v45, %v6230_v45  ;;  %v6231_v38 = vmax.f32 %v6211_v49, 0.0  ;;  %v10658_v41 = vadd.f32 %v10460_v20, %v13764_v55  ;;  %v6091_v7 = vpop.f32.mrb[13].mxu0 }
 0x3f6   : > { %v9985_v36 = vpack.c.bf16 %v6228_v16, %v6228_v16  ;;  %v6229_v19 = vmax.f32 %v6209_v61, 0.0  ;;  %v10659_v30 = vadd.f32 %v6091_v7, %v13767_v33  ;;  %v10461_v57 = vpop.f32.mrb[14].mxu0  ;;  %v6517_v16 = vld [vmem:[#allocation3 + $0x8] sm:$0x1] }
 0x3f7   : > { %v6328_v2 = vshrl.u32 %v9987_v39, 16  ;;  %v6331_v56 = vshll.u32 %v9987_v39, 16  ;;  %v9988_v42 = vpack.c.bf16 %v6231_v38, %v6231_v38  ;;  %v6187_v29 = vmul.f32 %v10658_v41, %v13942_v1  ;;  %v6094_v51 = vpop.f32.mrb[15].mxu0 }
 0x3f8   : > { %v6311_v44 = vshrl.u32 %v9985_v36, 16  ;;  %v6314_v62 = vshll.u32 %v9985_v36, 16  ;;  %v9986_v8 = vpack.c.bf16 %v6229_v19, %v6229_v19  ;;  %v6185_v27 = vmul.f32 %v10659_v30, %v13942_v1 }
 0x3f9   : > { %v6330_v58 = vrot.slane %v6328_v2, 7  ;;  %v6336_v55 = vshrl.u32 %v9988_v42, 16  ;;  %v6339_v60 = vshll.u32 %v9988_v42, 16  ;;  %v6214_v32 = vadd.f32 %v13948_v17, %v6187_v29 }
 0x3fa   : > { %v6313_v15 = vrot.slane %v6311_v44, 7  ;;  %v6319_v10 = vshrl.u32 %v9986_v8, 16  ;;  %v6322_v6 = vshll.u32 %v9986_v8, 16  ;;  %v6212_v9 = vadd.f32 %v13948_v17, %v6185_v27 }
 0x3fb   : > { %v6333_v22 = vor.u32 %v6331_v56, %v6330_v58  ;;  %v6334_v34 = vrot.slane %v6330_v58, 4  ;;  %v6338_v23 = vrot.slane %v6336_v55, 7  ;;  %v6234_v11 = vmax.f32 %v6214_v32, 0.0  ;;  %v6534_v32 = vld [vmem:[#allocation3 + $0x24] sm:$0xf] }
 0x3fc   : > { %v6316_v47 = vor.u32 %v6314_v62, %v6313_v15  ;;  %v6317_v43 = vrot.slane %v6313_v15, 4  ;;  %v6321_v37 = vrot.slane %v6319_v10, 7  ;;  %v6232_v48 = vmax.f32 %v6212_v9, 0.0  ;;  %v10464_v3 = vpop.f32.mrb[16].mxu0 }
 0x3fd   : > { %v6521_v46 = vsel %vm13968_vm1, %v6333_v22, %v6520_v63  ;;  %v6341_v45 = vor.u32 %v6339_v60, %v6338_v23  ;;  %v6343_v49 = vrot.slane %v6338_v23, 4  ;;  %v9991_v61 = vpack.c.bf16 %v6234_v11, %v6234_v11  ;;  %v6107_v20 = vpop.f32.mrb[17].mxu0 }
 0x3fe   : > { %6522 = vst [vmem:[#allocation3 + $0xc] sm:$0xf] %v6521_v46  ;;  %v6513_v39 = vsel %vm13968_vm1, %v6316_v47, %v6512_v50  ;;  %v6324_v38 = vor.u32 %v6322_v6, %v6321_v37  ;;  %v6326_v41 = vrot.slane %v6321_v37, 4  ;;  %v9989_v7 = vpack.c.bf16 %v6232_v48, %v6232_v48  ;;  %v10465_v36 = vpop.f32.mrb[18].mxu0 }
 0x3ff   : > { %6514 = vst [vmem:[#allocation3] sm:$0xf] %v6513_v39  ;;  %v6342_v19 = vsel %vm13975_vm2, %v6334_v34, %v6341_v45  ;;  %v6525_v30 = vsel %vm13581_vm6, %v6343_v49, %v6524_v0  ;;  %v6362_v2 = vshrl.u32 %v9991_v61, 16  ;;  %v6365_v56 = vshll.u32 %v9991_v61, 16  ;;  %v6110_v42 = vpop.f32.mrb[19].mxu0 }
 0x400   : > { %6523 = vst.msk [vmem:[#allocation3 + $0x10] sm:$0xf] %vm6510_vm11, %v6342_v19  ;;  %6526 = vst [vmem:[#allocation3 + $0x14] sm:$0x1] %v6525_v30  ;;  %v6325_v29 = vsel %vm13975_vm2, %v6317_v43, %v6324_v38  ;;  %v6518_v44 = vsel %vm13581_vm6, %v6326_v41, %v6517_v16  ;;  %v6345_v62 = vshrl.u32 %v9989_v7, 16  ;;  %v6348_v8 = vshll.u32 %v9989_v7, 16 }
 0x401   : > { %6516 = vst.msk [vmem:[#allocation3 + $0x4] sm:$0xf] %vm6510_vm11, %v6325_v29  ;;  %6519 = vst [vmem:[#allocation3 + $0x8] sm:$0x1] %v6518_v44  ;;  %v13993_v27 = vrot.slane %v6362_v2, 7  ;;  %v10660_v58 = vadd.f32 %v10461_v57, %v13775_v25  ;;  %v10661_v55 = vadd.f32 %v6094_v51, %v13778_v59  ;;  %v10662_v60 = vadd.f32 %v10464_v3, %v13786_v14 }
 0x402   : > { %v13998_v63 = vrot.slane %v6345_v62, 7  ;;  %v10663_v15 = vadd.f32 %v6107_v20, %v13790_v24  ;;  %v10664_v10 = vadd.f32 %v10465_v36, %v13795_v31  ;;  %v10665_v6 = vadd.f32 %v6110_v42, %v13801_v28  ;;  %v6527_v34 = vld [vmem:[#allocation3 + $0x18] sm:$0xf] }
 0x403   : > { %v6367_v9 = vor.u32 %v6365_v56, %v13993_v27  ;;  %v6368_v22 = vrot.slane %v13993_v27, 4  ;;  %v6188_v25 = vmul.f32 %v10660_v58, %v13942_v1  ;;  %v6186_v59 = vmul.f32 %v10661_v55, %v13942_v1  ;;  %v6538_v58 = vld [vmem:[#allocation3 + $0x2c] sm:$0x1] }
 0x404   : > { %v6350_v14 = vor.u32 %v6348_v8, %v13998_v63  ;;  %v6351_v57 = vrot.slane %v13998_v63, 4  ;;  %v6191_v51 = vmul.f32 %v10662_v60, %v13942_v1  ;;  %v6189_v24 = vmul.f32 %v10663_v15, %v13942_v1  ;;  %v10468_v31 = vpop.f32.mrb[20].mxu0 }
 0x405   : > { %v6535_v28 = vsel %vm13968_vm1, %v6367_v9, %v6534_v32  ;;  %v6215_v50 = vadd.f32 %v13948_v17, %v6188_v25  ;;  %v6213_v23 = vadd.f32 %v13948_v17, %v6186_v59  ;;  %v6192_v11 = vmul.f32 %v10664_v10, %v13942_v1  ;;  %v6123_v47 = vpop.f32.mrb[21].mxu0  ;;  %v6531_v9 = vld [vmem:[#allocation3 + $0x20] sm:$0x1] }
 0x406   : > { %6536 = vst [vmem:[#allocation3 + $0x24] sm:$0xf] %v6535_v28  ;;  %v6528_v43 = vsel %vm13968_vm1, %v6350_v14, %v6527_v34  ;;  %v6218_v0 = vadd.f32 %v13948_v17, %v6191_v51  ;;  %v6216_v37 = vadd.f32 %v13948_v17, %v6189_v24  ;;  %v6190_v48 = vmul.f32 %v10665_v6, %v13942_v1  ;;  %v14021_v3 = vpop.f32.mrb[22].mxu0  ;;  %v6548_v51 = vld [vmem:[#allocation3 + $0x3c] sm:$0xf] }
 0x407   : > { %6529 = vst [vmem:[#allocation3 + $0x18] sm:$0xf] %v6528_v43  ;;  %v6235_v46 = vmax.f32 %v6215_v50, 0.0  ;;  %v6233_v45 = vmax.f32 %v6213_v23, 0.0  ;;  %v6219_v49 = vadd.f32 %v13948_v17, %v6192_v11  ;;  %v10666_v16 = vadd.f32 %v10468_v31, %v13808_v18  ;;  %v14025_v61 = vpop.f32.mrb[23].mxu0 }
 0x408   : > { %v6238_v20 = vmax.f32 %v6218_v0, 0.0  ;;  %v6236_v39 = vmax.f32 %v6216_v37, 0.0  ;;  %v6217_v38 = vadd.f32 %v13948_v17, %v6190_v48  ;;  %v10667_v41 = vadd.f32 %v6123_v47, %v13812_v54  ;;  %v6541_v0 = vld [vmem:[#allocation3 + $0x30] sm:$0xf] }
 0x409   : > { %v9992_v7 = vpack.c.bf16 %v6235_v46, %v6235_v46  ;;  %v9990_v36 = vpack.c.bf16 %v6233_v45, %v6233_v45  ;;  %v6239_v19 = vmax.f32 %v6219_v49, 0.0  ;;  %v6195_v30 = vmul.f32 %v10666_v16, %v13942_v1 }
 0x40a   : > { %v9995_v2 = vpack.c.bf16 %v6238_v20, %v6238_v20  ;;  %v9993_v56 = vpack.c.bf16 %v6236_v39, %v6236_v39  ;;  %v6237_v42 = vmax.f32 %v6217_v38, 0.0  ;;  %v6193_v29 = vmul.f32 %v10667_v41, %v13942_v1 }
 0x40b   : > { %v6370_v44 = vshrl.u32 %v9992_v7, 16  ;;  %v6373_v18 = vshll.u32 %v9992_v7, 16  ;;  %v6353_v62 = vshrl.u32 %v9990_v36, 16  ;;  %v6356_v8 = vshll.u32 %v9990_v36, 16 }
 0x40c   : > { %v6396_v55 = vshrl.u32 %v9995_v2, 16  ;;  %v6399_v60 = vshll.u32 %v9995_v2, 16  ;;  %v6379_v32 = vshrl.u32 %v9993_v56, 16  ;;  %v6382_v15 = vshll.u32 %v9993_v56, 16  ;;  %v10472_v54 = vpop.f32.mrb[24].mxu0 }
 0x40d   : > { %v6372_v10 = vrot.slane %v6370_v44, 7  ;;  %v6355_v6 = vrot.slane %v6353_v62, 7  ;;  %v9996_v34 = vpack.c.bf16 %v6239_v19, %v6239_v19  ;;  %v9994_v25 = vpack.c.bf16 %v6237_v42, %v6237_v42  ;;  %v6139_v59 = vpop.f32.mrb[25].mxu0 }
 0x40e   : > { %v6398_v14 = vrot.slane %v6396_v55, 7  ;;  %v6381_v24 = vrot.slane %v6379_v32, 7  ;;  %v6222_v31 = vadd.f32 %v13948_v17, %v6195_v30  ;;  %v6220_v28 = vadd.f32 %v13948_v17, %v6193_v29  ;;  %v14033_v50 = vpop.f32.mrb[26].mxu0  ;;  %v6552_v29 = vld [vmem:[#allocation3 + $0x44] sm:$0x1] }
 0x40f   : > { %v6375_v23 = vor.u32 %v6373_v18, %v6372_v10  ;;  %v6377_v11 = vrot.slane %v6372_v10, 4  ;;  %v6358_v47 = vor.u32 %v6356_v8, %v6355_v6  ;;  %v6360_v43 = vrot.slane %v6355_v6, 4  ;;  %v14035_v37 = vpop.f32.mrb[27].mxu0 }
 0x410   : > { %v6401_v48 = vor.u32 %v6399_v60, %v6398_v14  ;;  %v6402_v46 = vrot.slane %v6398_v14, 4  ;;  %v6384_v45 = vor.u32 %v6382_v15, %v6381_v24  ;;  %v6385_v49 = vrot.slane %v6381_v24, 4  ;;  %v6545_v60 = vld [vmem:[#allocation3 + $0x38] sm:$0x1] }
 0x411   : > { %v6376_v16 = vsel %vm13975_vm2, %v6368_v22, %v6375_v23  ;;  %v6539_v20 = vsel %vm13581_vm6, %v6377_v11, %v6538_v58  ;;  %v6359_v39 = vsel %vm13975_vm2, %v6351_v57, %v6358_v47  ;;  %v6532_v38 = vsel %vm13581_vm6, %v6360_v43, %v6531_v9  ;;  %v6555_v23 = vld [vmem:[#allocation3 + $0x48] sm:$0xf] }
 0x412   : > { %6537 = vst.msk [vmem:[#allocation3 + $0x28] sm:$0xf] %vm6510_vm11, %v6376_v16  ;;  %6540 = vst [vmem:[#allocation3 + $0x2c] sm:$0x1] %v6539_v20  ;;  %v6549_v27 = vsel %vm13968_vm1, %v6401_v48, %v6548_v51  ;;  %v6542_v22 = vsel %vm13968_vm1, %v6384_v45, %v6541_v0  ;;  %v6404_v41 = vshrl.u32 %v9996_v34, 16  ;;  %v6407_v63 = vshll.u32 %v9996_v34, 16 }
 0x413   : > { %6530 = vst.msk [vmem:[#allocation3 + $0x1c] sm:$0xf] %vm6510_vm11, %v6359_v39  ;;  %6533 = vst [vmem:[#allocation3 + $0x20] sm:$0x1] %v6532_v38  ;;  %v6387_v57 = vshrl.u32 %v9994_v25, 16  ;;  %v6390_v7 = vshll.u32 %v9994_v25, 16  ;;  %v10668_v2 = vadd.f32 %v14021_v3, %v13817_v13  ;;  %v10669_v56 = vadd.f32 %v14025_v61, %v13822_v26 }
 0x414   : > { %6550 = vst [vmem:[#allocation3 + $0x3c] sm:$0xf] %v6549_v27  ;;  %6543 = vst [vmem:[#allocation3 + $0x30] sm:$0xf] %v6542_v22  ;;  %v6242_v36 = vmax.f32 %v6222_v31, 0.0  ;;  %v6240_v19 = vmax.f32 %v6220_v28, 0.0  ;;  %v10670_v42 = vadd.f32 %v10472_v54, %v13830_v40  ;;  %v10671_v8 = vadd.f32 %v6139_v59, %v13834_v21 }
 0x415   : > { %v6406_v30 = vrot.slane %v6404_v41, 7  ;;  %v6389_v44 = vrot.slane %v6387_v57, 7  ;;  %v6196_v32 = vmul.f32 %v10668_v2, %v13942_v1  ;;  %v6194_v15 = vmul.f32 %v10669_v56, %v13942_v1  ;;  %v6562_v59 = vld [vmem:[#allocation3 + $0x54] sm:$0xf] }
 0x416   : > { %v9999_v18 = vpack.c.bf16 %v6242_v36, %v6242_v36  ;;  %v9997_v62 = vpack.c.bf16 %v6240_v19, %v6240_v19  ;;  %v6199_v24 = vmul.f32 %v10670_v42, %v13942_v1  ;;  %v6197_v31 = vmul.f32 %v10671_v8, %v13942_v1 }
 0x417   : > { %v6409_v58 = vor.u32 %v6407_v63, %v6406_v30  ;;  %v6411_v55 = vrot.slane %v6406_v30, 4  ;;  %v6392_v10 = vor.u32 %v6390_v7, %v6389_v44  ;;  %v6394_v13 = vrot.slane %v6389_v44, 4 }
 0x418   : > { %v6430_v3 = vshrl.u32 %v9999_v18, 16  ;;  %v6433_v6 = vshll.u32 %v9999_v18, 16  ;;  %v6413_v61 = vshrl.u32 %v9997_v62, 16  ;;  %v6416_v54 = vshll.u32 %v9997_v62, 16 }
 0x419   : > { %v6410_v26 = vsel %vm13975_vm2, %v6402_v46, %v6409_v58  ;;  %v6553_v40 = vsel %vm13581_vm6, %v6411_v55, %v6552_v29  ;;  %v6393_v21 = vsel %vm13975_vm2, %v6385_v49, %v6392_v10  ;;  %v6546_v9 = vsel %vm13581_vm6, %v6394_v13, %v6545_v60  ;;  %v6566_v29 = vld [vmem:[#allocation3 + $0x5c] sm:$0x1]  ;;  %v6559_v58 = vld [vmem:[#allocation3 + $0x50] sm:$0x1] }
 0x41a   : > { %6551 = vst.msk [vmem:[#allocation3 + $0x40] sm:$0xf] %vm6510_vm11, %v6410_v26  ;;  %6554 = vst [vmem:[#allocation3 + $0x44] sm:$0x1] %v6553_v40  ;;  %v6432_v34 = vrot.slane %v6430_v3, 7  ;;  %v6223_v25 = vadd.f32 %v13948_v17, %v6196_v32  ;;  %v6415_v14 = vrot.slane %v6413_v61, 7  ;;  %v6221_v51 = vadd.f32 %v13948_v17, %v6194_v15 }
 0x41b   : > { %6544 = vst.msk [vmem:[#allocation3 + $0x34] sm:$0xf] %vm6510_vm11, %v6393_v21  ;;  %6547 = vst [vmem:[#allocation3 + $0x38] sm:$0x1] %v6546_v9  ;;  %v10672_v47 = vadd.f32 %v14033_v50, %v13839_v4  ;;  %v6226_v46 = vadd.f32 %v13948_v17, %v6199_v24  ;;  %v6224_v16 = vadd.f32 %v13948_v17, %v6197_v31  ;;  %v6569_v21 = vld [vmem:[#allocation3 + $0x60] sm:$0xf] }
 0x41c   : > { %v6435_v28 = vor.u32 %v6433_v6, %v6432_v34  ;;  %v6243_v11 = vmax.f32 %v6223_v25, 0.0  ;;  %v6436_v43 = vrot.slane %v6432_v34, 4  ;;  %v6418_v0 = vor.u32 %v6416_v54, %v6415_v14  ;;  %v6576_v6 = vld [vmem:[#allocation3 + $0x6c] sm:$0xf]  ;;  %v6580_v31 = vld [vmem:[#allocation3 + $0x74] sm:$0x1] }
 0x41d   : > { %v6241_v48 = vmax.f32 %v6221_v51, 0.0  ;;  %v6200_v20 = vmul.f32 %v10672_v47, %v13942_v1  ;;  %v6246_v27 = vmax.f32 %v6226_v46, 0.0  ;;  %v10673_v4 = vadd.f32 %v14035_v37, %v13844_v53 }
 0x41e   : > { %v6563_v45 = vsel %vm13968_vm1, %v6435_v28, %v6562_v59  ;;  %v10000_v49 = vpack.c.bf16 %v6243_v11, %v6243_v11  ;;  %v6556_v39 = vsel %vm13968_vm1, %v6418_v0, %v6555_v23  ;;  %v6419_v50 = vrot.slane %v6415_v14, 4 }
 0x41f   : > { %6564 = vst [vmem:[#allocation3 + $0x54] sm:$0xf] %v6563_v45  ;;  %v9998_v38 = vpack.c.bf16 %v6241_v48, %v6241_v48  ;;  %6557 = vst [vmem:[#allocation3 + $0x48] sm:$0xf] %v6556_v39  ;;  %v6244_v41 = vmax.f32 %v6224_v16, 0.0  ;;  %v6227_v63 = vadd.f32 %v13948_v17, %v6200_v20  ;;  %v10003_v36 = vpack.c.bf16 %v6246_v27, %v6246_v27 }
 0x420   : > { %v6438_v22 = vshrl.u32 %v10000_v49, 16  ;;  %v6441_v57 = vshll.u32 %v10000_v49, 16  ;;  %v6198_v19 = vmul.f32 %v10673_v4, %v13942_v1  ;;  %v6573_v45 = vld [vmem:[#allocation3 + $0x68] sm:$0x1] }
 0x421   : > { %v6421_v7 = vshrl.u32 %v9998_v38, 16  ;;  %v6424_v2 = vshll.u32 %v9998_v38, 16  ;;  %v10001_v56 = vpack.c.bf16 %v6244_v41, %v6244_v41  ;;  %v6247_v42 = vmax.f32 %v6227_v63, 0.0 }
 0x422   : > { %v6440_v30 = vrot.slane %v6438_v22, 7  ;;  %v6464_v18 = vshrl.u32 %v10003_v36, 16  ;;  %v6467_v62 = vshll.u32 %v10003_v36, 16  ;;  %v6225_v53 = vadd.f32 %v13948_v17, %v6198_v19 }
 0x423   : > { %v6423_v44 = vrot.slane %v6421_v7, 7  ;;  %v6447_v55 = vshrl.u32 %v10001_v56, 16  ;;  %v6450_v60 = vshll.u32 %v10001_v56, 16  ;;  %v10004_v13 = vpack.c.bf16 %v6247_v42, %v6247_v42 }
 0x424   : > { %v6443_v37 = vor.u32 %v6441_v57, %v6440_v30  ;;  %v6445_v8 = vrot.slane %v6440_v30, 4  ;;  %v6466_v10 = vrot.slane %v6464_v18, 7  ;;  %v6245_v40 = vmax.f32 %v6225_v53, 0.0 }
 0x425   : > { %v6426_v32 = vor.u32 %v6424_v2, %v6423_v44  ;;  %v6428_v15 = vrot.slane %v6423_v44, 4  ;;  %v6449_v26 = vrot.slane %v6447_v55, 7  ;;  %v6472_v34 = vshrl.u32 %v10004_v13, 16 }
 0x426   : > { %v6444_v1 = vsel %vm13975_vm2, %v6436_v43, %v6443_v37  ;;  %v6567_v3 = vsel %vm13581_vm6, %v6445_v8, %v6566_v29  ;;  %v6469_v54 = vor.u32 %v6467_v62, %v6466_v10  ;;  %v10002_v59 = vpack.c.bf16 %v6245_v40, %v6245_v40 }
 0x427   : > { %6565 = vst.msk [vmem:[#allocation3 + $0x58] sm:$0xf] %vm6510_vm11, %v6444_v1  ;;  %6568 = vst [vmem:[#allocation3 + $0x5c] sm:$0x1] %v6567_v3  ;;  %v6427_v17 = vsel %vm13975_vm2, %v6419_v50, %v6426_v32  ;;  %v6560_v61 = vsel %vm13581_vm6, %v6428_v15, %v6559_v58  ;;  %v6452_v9 = vor.u32 %v6450_v60, %v6449_v26  ;;  %v6474_v51 = vrot.slane %v6472_v34, 7 }
 0x428   : > { %6558 = vst.msk [vmem:[#allocation3 + $0x4c] sm:$0xf] %vm6510_vm11, %v6427_v17  ;;  %6561 = vst [vmem:[#allocation3 + $0x50] sm:$0x1] %v6560_v61  ;;  %v6577_v25 = vsel %vm13968_vm1, %v6469_v54, %v6576_v6  ;;  %v6475_v24 = vshll.u32 %v10004_v13, 16  ;;  %v6455_v28 = vshrl.u32 %v10002_v59, 16 }
 0x429   : > { %6578 = vst [vmem:[#allocation3 + $0x6c] sm:$0xf] %v6577_v25  ;;  %v6570_v14 = vsel %vm13968_vm1, %v6452_v9, %v6569_v21  ;;  %v6470_v23 = vrot.slane %v6466_v10, 4  ;;  %v6479_v47 = vrot.slane %v6474_v51, 4  ;;  %v6458_v0 = vshll.u32 %v10002_v59, 16  ;;  %6586 = sbr.rel (%p9754_p0) target bundleno = 1072 (0x430), region = 56 }
 0x42a   : > { %6571 = vst [vmem:[#allocation3 + $0x60] sm:$0xf] %v6570_v14  ;;  %v6477_v11 = vor.u32 %v6475_v24, %v6474_v51  ;;  %v6457_v43 = vrot.slane %v6455_v28, 7  ;;  %v6453_v33 = vrot.slane %v6449_v26, 4  ;;  %v11239_v38 = vmov (!%p9754_p0), 0  }
 0x42b   : > { %v6581_v46 = vsel %vm13581_vm6, %v6479_v47, %v6580_v31  ;;  %6587 = vst.msk [vmem:[#allocation3] sm:$0xf] (!%p9754_p0), %vm6510_vm11, %v11239_v38  ;;  %6588 = vst.msk [vmem:[#allocation3 + $0x4] sm:$0xf] (!%p9754_p0), %vm6510_vm11, %v11239_v38 }
 0x42c   : > { %v6478_v48 = vsel %vm13975_vm2, %v6470_v23, %v6477_v11  ;;  %6582 = vst [vmem:[#allocation3 + $0x74] sm:$0x1] %v6581_v46  ;;  %v6460_v49 = vor.u32 %v6458_v0, %v6457_v43  ;;  %v6462_v16 = vrot.slane %v6457_v43, 4  ;;  %6590 = vst.msk [vmem:[#allocation3 + $0x8] sm:$0x1] (!%p9754_p0), %vm417_vm4, %v11239_v38 }
 0x42d   : > { %6579 = vst.msk [vmem:[#allocation3 + $0x70] sm:$0xf] %vm6510_vm11, %v6478_v48 }
 0x42e   : > { %v6461_v20 = vsel %vm13975_vm2, %v6453_v33, %v6460_v49  ;;  %v6574_v39 = vsel %vm13581_vm6, %v6462_v16, %v6573_v45 }
 0x42f   : > { %6572 = vst.msk [vmem:[#allocation3 + $0x64] sm:$0xf] %vm6510_vm11, %v6461_v20  ;;  %6575 = vst [vmem:[#allocation3 + $0x68] sm:$0x1] %v6574_v39 }
 0x430 PF: > { %p9755_p1 = scmp.ne.s32.totalorder %s11217_s30, 1 }
 0x431   : > { %v11240_v5 = vmov (!%p9755_p1), 0  }
 0x432   : > { %6594 = sbr.rel (%p9755_p1) target bundleno = 1081 (0x439), region = 60  ;;  %6596 = vst.msk [vmem:[#allocation3 + $0x6c] sm:$0xf] (!%p9755_p1), %vm6510_vm11, %v11240_v5  ;;  %6597 = vst.msk [vmem:[#allocation3 + $0x70] sm:$0xf] (!%p9755_p1), %vm6510_vm11, %v11240_v5 }
 0x433   : > { %6599 = vst.msk [vmem:[#allocation3 + $0x74] sm:$0x1] (!%p9755_p1), %vm417_vm4, %v11240_v5 }
 0x439 PF: > { %v11097_v12 = vld [vmem:[%s14925_s5 + $0x10] sm:$0xff]   ;;  %v11098_v27 = vld [vmem:[%s14925_s5 + $0x18] sm:$0xff]   ;;  %vm6861_vm3 = vcmask 261120   ;;  %v14146_v19 = vld [vmem:[%s14925_s5] sm:$0xff]   ;;  %s10005_s25 = sshll.u32 %s11217_s30, 4  ;;  %s9979_s16 = sshll.u32 %s11221_s9, 5 }
 0x43a   : > { %10474 = vmatprep.subr.bf16.mxu1 %v11097_v12  ;;  %v14132_v4 = vld [vmem:[#allocation3] sm:$0xf]  ;;  %v14134_v50 = vld [vmem:[#allocation3 + $0x4] sm:$0xf]  ;;  %v14136_v22 = vld [vmem:[#allocation3 + $0x8] sm:$0x1]  ;;  %s9248_s24 = sadd.s32 %s10005_s25, %s9979_s16 }
 0x43b   : > { %10475 = vmatpush3.bf16.msra.mxu1 %v11097_v12  ;;  %v6629_v41 = vshrl.u32 %v14132_v4, 16  ;;  %v6632_v63 = vshll.u32 %v14132_v4, 16  ;;  %v6638_v57 = vshll.u32 %v14134_v50, 16  ;;  %v6642_v7 = vshrl.u32 %v14134_v50, 16  ;;  %v14148_v29 = vld [vmem:[#allocation3 + $0xc] sm:$0xf] }
 0x43c   : > { %10476 = vmatprep.subr.bf16.mxu1 %v11098_v27  ;;  %v6648_v36 = vshll.u32 %v14136_v22, 16  ;;  %v14150_v18 = vld [vmem:[#allocation3 + $0x10] sm:$0xf]  ;;  %v6621_v62 = vld [vmem:[#allocation3 + $0x14] sm:$0x1]  ;;  %v6653_v53 = vshrl.u32 %v14148_v29, 16 }
 0x43d   : > { %v6631_v30 = vrot.slane %v6629_v41, 4  ;;  %v6634_v2 = vrot.slane %v6632_v63, 5  ;;  %v6640_v56 = vrot.slane %v6638_v57, 5  ;;  %v6644_v42 = vrot.slane %v6642_v7, 4  ;;  %v7157_v60 = vld [vmem:[#allocation3 + $0xc] sm:$0xe] }
 0x43e   : > { %v6650_v44 = vrot.slane %v6648_v36, 5  ;;  %v6656_v58 = vshll.u32 %v14148_v29, 16  ;;  %v6662_v55 = vshll.u32 %v14150_v18, 16  ;;  %v6655_v32 = vrot.slane %v6653_v53, 4  ;;  %v14157_v1 = vld [vmem:[#allocation3 + $0x18] sm:$0xf] }
 0x43f   : > { %10477 = vmatpush3.bf16.msra.mxu1 %v11098_v27  ;;  %v6635_v37 = vor.u32 %v6634_v2, %v6631_v30  ;;  %v6645_v8 = vor.u32 %v6644_v42, %v6640_v56  ;;  %v6666_v15 = vshrl.u32 %v14150_v18, 16  ;;  %v6672_v10 = vshll.u32 %v6621_v62, 16  ;;  %v14160_v9 = vld [vmem:[#allocation3 + $0x1c] sm:$0xf]  ;;  %v14166_v14 = vld [vmem:[#allocation3 + $0x20] sm:$0x1] }
 0x440   : > { %10494 = vmatprep.subr.bf16.mxu1 %v14146_v19  ;;  %v9797_v13 = vrot.slane %v7157_v60, 9  ;;  %v6658_v26 = vrot.slane %v6656_v58, 5  ;;  %v6664_v40 = vrot.slane %v6662_v55, 5  ;;  %v7189_v54 = vrot.slane %v14150_v18, 5  ;;  %v14173_v11 = vld [vmem:[#allocation3 + $0x24] sm:$0xf] }
 0x441   : > { %v6636_v3 = vrot.slane %v6635_v37, 4  ;;  %v6646_v6 = vrot.slane %v6645_v8, 4  ;;  %v6668_v17 = vrot.slane %v6666_v15, 4  ;;  %v6674_v61 = vrot.slane %v6672_v10, 5  ;;  %v14177_v46 = vld [vmem:[#allocation3 + $0x28] sm:$0xf] }
 0x442   : > { %v7192_v21 = vrot.slane %v6621_v62, 5  ;;  %v6659_v59 = vor.u32 %v6658_v26, %v6655_v32  ;;  %v6677_v51 = vshrl.u32 %v14157_v1, 16  ;;  %v14171_v28 = vsel %vm12805_vm9, %v9797_v13, %v7189_v54  ;;  %v14190_v12 = vld [vmem:[#allocation3 + $0x2c] sm:$0x1]  ;;  %v14195_v7 = vld [vmem:[#allocation3 + $0x30] sm:$0xf] }
 0x443   : > { %v6641_v34 = vsel %vm12848_vm14, %v6636_v3, %v6640_v56  ;;  %v6651_v25 = vsel %vm12848_vm14, %v6646_v6, %v6650_v44  ;;  %v6669_v31 = vor.u32 %v6668_v17, %v6664_v40  ;;  %v7191_v23 = vrot.slane %v7189_v54, 4  ;;  %v11100_v42 = vld [vmem:[%s14925_s5 + $0x8] sm:$0xff]   ;;  %v14204_v8 = vld [vmem:[#allocation3 + $0x34] sm:$0xf]  ;;  %s9980_s30 = sshll.u32 %s9248_s24, 7  ;;  %s9251_s9 = sshll.u32 %s14116_s15, 4  ;;  %s14858_s9 = int_to_ptr.vmem [resolvable:$true] %s9251_s9 }
 0x444   : > { %v9760_v24 = vcombine.low %v6641_v34, %v6651_v25  ;;  %v6660_v47 = vrot.slane %v6659_v59, 4  ;;  %v6679_v43 = vrot.slane %v6677_v51, 4  ;;  %v6680_v0 = vshll.u32 %v14157_v1, 16  ;;  %v14211_v15 = vld [vmem:[%s14925_s5 + $0x20] sm:$0xff]   ;;  %v14214_v6 = vld [vmem:[#allocation3 + $0x38] sm:$0x1]  ;;  %s14856_s14 = scalar_lea.hbm %s14928_s8, %s9980_s30 }
 0x445   : > { %v6686_v48 = vshll.u32 %v14160_v9, 16  ;;  %v6670_v45 = vrot.slane %v6669_v31, 4  ;;  %v14182_v33 = vsel %vm12805_vm9, %v7191_v23, %v7192_v21  ;;  %v6690_v49 = vshrl.u32 %v14160_v9, 16  ;;  %v14220_v21 = vld [vmem:[#allocation3 + $0x3c] sm:$0xf]  ;;  %s15145_s17 = sand.u32 1, %s11209_s28  }
 0x446   : > { %10478 = vmatprep.mubr.msk.bf16.mxu1 %vm6861_vm3, %v9760_v24  ;;  %v6696_v16 = vshll.u32 %v14166_v14, 16  ;;  %v6665_v20 = vsel %vm12848_vm14, %v6660_v47, %v6664_v40  ;;  %v9809_v39 = vcombine.low %v14171_v28, %v14182_v33  ;;  %v6682_v38 = vrot.slane %v6680_v0, 5  ;;  %v14222_v34 = vld [vmem:[#allocation3 + $0x40] sm:$0xf]  ;;  %v14230_v0 = vld [vmem:[#allocation3 + $0x48] sm:$0xf] }
 0x447   : > { %v6688_v5 = vrot.slane %v6686_v48, 5  ;;  %v6675_v27 = vsel %vm12848_vm14, %v6670_v45, %v6674_v61  ;;  %v6692_v41 = vrot.slane %v6690_v49, 4  ;;  %v6701_v57 = vshrl.u32 %v14173_v11, 16  ;;  %v11113_v28 = vld [vmem:[#allocation3 + $0xc] sm:$0xff]   ;;  %s14868_s20 = scalar_lea.sflag [#allocation5], %s15145_s17  ;;  %s11139_s21 = scalar_lea.vmem %s14858_s9, 2048 }
 0x448   : > { %v6698_v63 = vrot.slane %v6696_v16, 5  ;;  %v9761_v36 = vcombine.low %v6665_v20, %v6675_v27  ;;  %v6683_v30 = vor.u32 %v6682_v38, %v6679_v43  ;;  %v6704_v2 = vshll.u32 %v14173_v11, 16  ;;  %v14228_v43 = vld [vmem:[#allocation3 + $0x44] sm:$0x1]  ;;  %v7625_v33 = vld [vmem:[#allocation3 + $0xc] sm:$0xf]  ;;  %p11140_p2 = scmp.ne.s32.totalorder %s14858_s9, %s11139_s21 }
 0x449   : > { %v6710_v56 = vshll.u32 %v14177_v46, 16  ;;  %v6693_v44 = vor.u32 %v6692_v41, %v6688_v5  ;;  %v6703_v62 = vrot.slane %v6701_v57, 4  ;;  %v6714_v53 = vshrl.u32 %v14177_v46, 16  ;;  %v14238_v41 = vld [vmem:[#allocation3 + $0x4c] sm:$0xf]  ;;  %s11241_s22 = smov [#allocation4]  }
 0x44a   : > { %v6720_v37 = vshll.u32 %v14190_v12, 16  ;;  %10479 = vmatmul.mubr.msk.bf16.vlgmr.msra.gmra.mrb[28].mxu1 %vm6861_vm3, %v9761_v36  ;;  %v6684_v58 = vrot.slane %v6683_v30, 4  ;;  %v6706_v55 = vrot.slane %v6704_v2, 5  ;;  %v6725_v32 = vshrl.u32 %v14195_v7, 16  ;;  %p11141_p4 = pnand %p11140_p2, %p11340_p3  ;;  %s11143_s25 = sshll.u32 %s11241_s22, 4  ;;  %s11144_s25 = int_to_ptr.vmem [resolvable:$false] %s11143_s25 }
 0x44b   : > { %v6712_v60 = vrot.slane %v6710_v56, 5  ;;  %10495 = vmatpush3.bf16.msra.mxu1 %v14146_v19  ;;  %v6694_v10 = vrot.slane %v6693_v44, 4  ;;  %v6716_v13 = vrot.slane %v6714_v53, 4  ;;  %v6728_v26 = vshll.u32 %v14195_v7, 16  ;;  %s11145_s16 = scalar_lea.vmem %s11144_s25, 4096  ;;  %p11146_p6 = scmp.lt.s32.totalorder %s14858_s9, %s11144_s25 }
 0x44c   : > { %v6722_v3 = vrot.slane %v6720_v37, 5  ;;  %v6689_v40 = vsel %vm12848_vm14, %v6684_v58, %v6688_v5  ;;  %v6707_v17 = vor.u32 %v6706_v55, %v6703_v62  ;;  %v6727_v61 = vrot.slane %v6725_v32, 4  ;;  %10496 = vmatprep.subr.bf16.mxu1 %v11100_v42  ;;  %v14247_v58 = vld [vmem:[#allocation3 + $0x50] sm:$0x1]  ;;  %p11142_p5 = pneg %p11141_p4  ;;  %p11147_p7 = scmp.lt.s32.totalorder %s11145_s16, %s11139_s21 }
 0x44d   : > { %v6734_v54 = vshll.u32 %v14204_v8, 16  ;;  %v6699_v19 = vsel %vm12848_vm14, %v6694_v10, %v6698_v63  ;;  %v6717_v25 = vor.u32 %v6716_v13, %v6712_v60  ;;  %v6730_v59 = vrot.slane %v6728_v26, 5 }
 0x44e   : > { %v6738_v51 = vshrl.u32 %v14204_v8, 16  ;;  %v9762_v24 = vcombine.low %v6689_v40, %v6699_v19  ;;  %v6708_v31 = vrot.slane %v6707_v17, 4  ;;  %v6744_v47 = vshll.u32 %v14214_v6, 16  ;;  %p11148_p9 = por %p11147_p7, %p11146_p6 }
 0x44f   : > { %v6736_v23 = vrot.slane %v6734_v54, 5  ;;  %v6718_v48 = vrot.slane %v6717_v25, 4  ;;  %v6731_v45 = vor.u32 %v6730_v59, %v6727_v61  ;;  %v6749_v16 = vshrl.u32 %v14220_v21, 16  ;;  %10497 = vmatpush3.bf16.msra.mxu1 %v11100_v42 }
 0x450   : > { %v6740_v49 = vrot.slane %v6738_v51, 4  ;;  %10482 = vmatprep.mubr.msk.bf16.mxu1 %vm6861_vm3, %v9762_v24  ;;  %v6713_v20 = vsel %vm12848_vm14, %v6708_v31, %v6712_v60  ;;  %v6746_v38 = vrot.slane %v6744_v47, 5  ;;  %v6752_v5 = vshll.u32 %v14220_v21, 16  ;;  %10514 = vmatprep.subr.bf16.mxu1 %v14211_v15  ;;  %v14258_v51 = vld [vmem:[#allocation3 + $0x58] sm:$0xf]  ;;  %p11149_p10 = pnand %p11148_p9, %p11142_p5 }
 0x451   : > { %v6758_v27 = vshll.u32 %v14222_v34, 16  ;;  %v6723_v63 = vsel %vm12848_vm14, %v6718_v48, %v6722_v3  ;;  %v6732_v57 = vrot.slane %v6731_v45, 4  ;;  %v6751_v30 = vrot.slane %v6749_v16, 4  ;;  %v14253_v3 = vld [vmem:[#allocation3 + $0x54] sm:$0xf] }
 0x452   : > { %v6741_v36 = vor.u32 %v6740_v49, %v6736_v23  ;;  %v9763_v2 = vcombine.low %v6713_v20, %v6723_v63  ;;  %v6754_v56 = vrot.slane %v6752_v5, 5  ;;  %v6762_v44 = vshrl.u32 %v14222_v34, 16  ;;  %v14265_v16 = vld [vmem:[#allocation3 + $0x5c] sm:$0x1] }
 0x453   : > { %v6760_v42 = vrot.slane %v6758_v27, 5  ;;  %v6737_v62 = vsel %vm12848_vm14, %v6732_v57, %v6736_v23  ;;  %v6768_v37 = vshll.u32 %v14228_v43, 16  ;;  %v6773_v55 = vshrl.u32 %v14230_v0, 16 }
 0x454   : > { %v6742_v53 = vrot.slane %v6741_v36, 4  ;;  %10483 = vmatmul.mubr.msk.bf16.gmra.mrb[32].mxu1 %vm6861_vm3, %v9763_v2  ;;  %v6755_v60 = vor.u32 %v6754_v56, %v6751_v30  ;;  %v6764_v32 = vrot.slane %v6762_v44, 4  ;;  %v6776_v10 = vshll.u32 %v14230_v0, 16  ;;  %v7156_v56 = vld [vmem:[#allocation3] sm:$0xe] }
 0x455   : > { %v6782_v13 = vshll.u32 %v14238_v41, 16  ;;  %v6770_v40 = vrot.slane %v6768_v37, 5  ;;  %v6775_v17 = vrot.slane %v6773_v55, 4  ;;  %v6786_v61 = vshrl.u32 %v14238_v41, 16  ;;  %v7158_v37 = vld [vmem:[#allocation3 + $0x18] sm:$0xe] }
 0x456   : > { %v6747_v26 = vsel %vm12848_vm14, %v6742_v53, %v6746_v38  ;;  %v6756_v19 = vrot.slane %v6755_v60, 4  ;;  %v6765_v25 = vor.u32 %v6764_v32, %v6760_v42  ;;  %v6778_v59 = vrot.slane %v6776_v10, 5 }
 0x457   : > { %v9764_v54 = vcombine.low %v6737_v62, %v6747_v26  ;;  %v6784_v24 = vrot.slane %v6782_v13, 5  ;;  %v6788_v31 = vrot.slane %v6786_v61, 4  ;;  %v6792_v23 = vshll.u32 %v14247_v58, 16  ;;  %v7159_v13 = vld [vmem:[#allocation3 + $0x24] sm:$0xe] }
 0x458   : > { %v6797_v47 = vshrl.u32 %v14253_v3, 16  ;;  %v6761_v48 = vsel %vm12848_vm14, %v6756_v19, %v6760_v42  ;;  %v6766_v45 = vrot.slane %v6765_v25, 4  ;;  %v6779_v49 = vor.u32 %v6778_v59, %v6775_v17 }
 0x459   : > { %10486 = vmatprep.mubr.msk.bf16.mxu1 %vm6861_vm3, %v9764_v54  ;;  %v6800_v20 = vshll.u32 %v14253_v3, 16  ;;  %v6789_v38 = vor.u32 %v6788_v31, %v6784_v24  ;;  %v6794_v5 = vrot.slane %v6792_v23, 5  ;;  %v6806_v63 = vshll.u32 %v14258_v51, 16 }
 0x45a   : > { %v6799_v27 = vrot.slane %v6797_v47, 4  ;;  %v6771_v57 = vsel %vm12848_vm14, %v6766_v45, %v6770_v40  ;;  %v6780_v36 = vrot.slane %v6779_v49, 4  ;;  %v6810_v2 = vshrl.u32 %v14258_v51, 16  ;;  %v7161_v45 = vld [vmem:[#allocation3 + $0x3c] sm:$0xe] }
 0x45b   : > { %v6802_v30 = vrot.slane %v6800_v20, 5  ;;  %v9765_v42 = vcombine.low %v6761_v48, %v6771_v57  ;;  %v6790_v44 = vrot.slane %v6789_v38, 4  ;;  %v6808_v62 = vrot.slane %v6806_v63, 5 }
 0x45c   : > { %v6816_v53 = vshll.u32 %v14265_v16, 16  ;;  %v6785_v55 = vsel %vm12848_vm14, %v6780_v36, %v6784_v24  ;;  %v6812_v32 = vrot.slane %v6810_v2, 4  ;;  %v7185_v54 = vrot.slane %v14136_v22, 5  ;;  %v7160_v24 = vld [vmem:[#allocation3 + $0x30] sm:$0xe] }
 0x45d   : > { %v6803_v60 = vor.u32 %v6802_v30, %v6799_v27  ;;  %10487 = vmatmul.mubr.msk.bf16.gmra.mrb[36].mxu1 %vm6861_vm3, %v9765_v42  ;;  %v6795_v10 = vsel %vm12848_vm14, %v6790_v44, %v6794_v5  ;;  %v9778_v19 = vcombine.low %v14132_v4, %v14134_v50  ;;  %v9779_v25 = vcombine.low %v14148_v29, %v14150_v18 }
 0x45e   : > { %v9766_v26 = vcombine.low %v6785_v55, %v6795_v10  ;;  %v6813_v17 = vor.u32 %v6812_v32, %v6808_v62  ;;  %v6818_v61 = vrot.slane %v6816_v53, 5  ;;  %v9796_v59 = vrot.slane %v7156_v56, 9  ;;  %v7163_v53 = vld [vmem:[#allocation3 + $0x54] sm:$0xe] }
 0x45f   : > { %v6804_v40 = vrot.slane %v6803_v60, 4  ;;  %v7182_v47 = vrot.slane %v14134_v50, 5  ;;  %v9798_v48 = vrot.slane %v7158_v37, 9  ;;  %v7196_v22 = vrot.slane %v14160_v9, 5  ;;  %v7162_v50 = vld [vmem:[#allocation3 + $0x48] sm:$0xe] }
 0x460   : > { %10490 = vmatprep.mubr.msk.bf16.mxu1 %vm6861_vm3, %v9766_v26  ;;  %v6814_v23 = vrot.slane %v6813_v17, 4  ;;  %v7199_v49 = vrot.slane %v14166_v14, 5  ;;  %v9799_v4 = vrot.slane %v7159_v13, 9  ;;  %v7203_v20 = vrot.slane %v14177_v46, 5 }
 0x461   : > { %v6809_v31 = vsel %vm12848_vm14, %v6804_v40, %v6808_v62  ;;  %v14294_v18 = vsel %vm12805_vm9, %v9796_v59, %v7182_v47  ;;  %v7184_v38 = vrot.slane %v7182_v47, 4  ;;  %v7206_v5 = vrot.slane %v14190_v12, 5 }
 0x462   : > { %v6819_v29 = vsel %vm12848_vm14, %v6814_v23, %v6818_v61  ;;  %v14299_v63 = vsel %vm12805_vm9, %v9798_v48, %v7196_v22  ;;  %v7198_v14 = vrot.slane %v7196_v22, 4  ;;  %v14303_v57 = vsel %vm12805_vm9, %v9799_v4, %v7203_v20 }
 0x463   : > { %v9767_v27 = vcombine.low %v6809_v31, %v6819_v29  ;;  %v7186_v36 = vsel %vm12805_vm9, %v7184_v38, %v7185_v54  ;;  %v7205_v30 = vrot.slane %v7203_v20, 4  ;;  %v9800_v2 = vrot.slane %v7160_v24, 9  ;;  %v11111_v29 = vld [vmem:[%s14925_s5 + $0x30] sm:$0xff]  }
 0x464   : > { %v7210_v56 = vrot.slane %v14204_v8, 5  ;;  %v9808_v12 = vcombine.low %v14294_v18, %v7186_v36  ;;  %v7200_v42 = vsel %vm12805_vm9, %v7198_v14, %v7199_v49  ;;  %v7213_v44 = vrot.slane %v14214_v6, 5  ;;  %v14398_v14 = vld [vmem:[%s14925_s5 + $0x50] sm:$0xff]  }
 0x465   : > { %10491 = vmatmul.mubr.msk.bf16.gmra.mrb[40].mxu1 %vm6861_vm3, %v9767_v27  ;;  %v9801_v62 = vrot.slane %v7161_v45, 9  ;;  %v9810_v37 = vcombine.low %v14299_v63, %v7200_v42  ;;  %v7207_v55 = vsel %vm12805_vm9, %v7205_v30, %v7206_v5  ;;  %v7217_v13 = vrot.slane %v14222_v34, 5  ;;  %v7628_v5 = vld [vmem:[#allocation3 + $0x18] sm:$0xf] }
 0x466   : > { %10498 = vmatprep.mubr.msk.bf16.mxu1 %vm6861_vm3, %v9778_v19  ;;  %v7211_v60 = vsel %vm12805_vm9, %v9800_v2, %v7210_v56  ;;  %v7212_v32 = vrot.slane %v7210_v56, 4  ;;  %v9811_v10 = vcombine.low %v14303_v57, %v7207_v55  ;;  %v7220_v26 = vrot.slane %v14228_v43, 5  ;;  %v14400_v57 = vld [vmem:[#allocation3 + $0x14] sm:$0x1] }
 0x467   : > { %v9802_v6 = vrot.slane %v7162_v50, 9  ;;  %v7224_v17 = vrot.slane %v14238_v41, 5  ;;  %v7227_v61 = vrot.slane %v14247_v58, 5  ;;  %v9803_v54 = vrot.slane %v7163_v53, 9  ;;  %v11107_v58 = vld [vmem:[%s14925_s5 + $0x28] sm:$0xff]  }
 0x468   : > { %v7214_v40 = vsel %vm12805_vm9, %v7212_v32, %v7213_v44  ;;  %v7218_v59 = vsel %vm12805_vm9, %v9801_v62, %v7217_v13  ;;  %v7219_v24 = vrot.slane %v7217_v13, 4  ;;  %v7231_v31 = vrot.slane %v14258_v51, 5  ;;  %v14392_v50 = vld [vmem:[#allocation3 + $0x1c] sm:$0xf]  ;;  %v11117_v44 = vld [vmem:[#allocation3 + $0x30] sm:$0xff]  }
 0x469   : > { %v9812_v19 = vcombine.low %v7211_v60, %v7214_v40  ;;  %v9780_v23 = vcombine.low %v14157_v1, %v14160_v9  ;;  %v7225_v43 = vsel %vm12805_vm9, %v9802_v6, %v7224_v17  ;;  %v7226_v47 = vrot.slane %v7224_v17, 4  ;;  %v11118_v62 = vld [vmem:[#allocation3 + $0x3c] sm:$0xff]   ;;  %v14409_v13 = vld [vmem:[#allocation3 + $0x28] sm:$0xf] }
 0x46a   : > { %v7234_v48 = vrot.slane %v14265_v16, 5  ;;  %v7221_v45 = vsel %vm12805_vm9, %v7219_v24, %v7220_v26  ;;  %v7232_v22 = vsel %vm12805_vm9, %v9803_v54, %v7231_v31  ;;  %v7233_v49 = vrot.slane %v7231_v31, 4  ;;  %v14411_v26 = vld [vmem:[#allocation3 + $0x20] sm:$0x1] }
 0x46b   : > { %v9813_v4 = vcombine.low %v7218_v59, %v7221_v45  ;;  %v7228_v1 = vsel %vm12805_vm9, %v7226_v47, %v7227_v61  ;;  %v9781_v18 = vcombine.low %v14173_v11, %v14177_v46  ;;  %v9784_v38 = vcombine.low %v14230_v0, %v14238_v41  ;;  %v11112_v46 = vld [vmem:[%s14925_s5 + $0x38] sm:$0xff]   ;;  %v11119_v41 = vld [vmem:[%s14925_s5 + $0x48] sm:$0xff]   ;;  %v7634_v47 = vld [vmem:[#allocation3 + $0x30] sm:$0xf] }
 0x46c   : > { %v9814_v9 = vcombine.low %v7225_v43, %v7228_v1  ;;  %v7235_v16 = vsel %vm12805_vm9, %v7233_v49, %v7234_v48  ;;  %v9785_v11 = vcombine.low %v14253_v3, %v14258_v51  ;;  %v7653_v0 = vshll.u32 %v7625_v33, 16  ;;  %v11120_v48 = vld [vmem:[#allocation3 + $0x48] sm:$0xff]   ;;  %v14423_v1 = vld [vmem:[#allocation3 + $0x34] sm:$0xf] }
 0x46d   : > { %10499 = vmatmul.mubr.msk.bf16.vlgmr.msra.gmra.mrb[28].mxu1 %vm6861_vm3, %v9779_v25  ;;  %v9815_v20 = vcombine.low %v7232_v22, %v7235_v16  ;;  %v9782_v25 = vcombine.low %v14195_v7, %v14204_v8  ;;  %v11114_v7 = vld [vmem:[%s14925_s5 + $0x40] sm:$0xff]   ;;  %v11115_v8 = vld [vmem:[#allocation3 + $0x18] sm:$0xff]   ;;  %v7674_v2 = vshrl.u32 %v7628_v5, 16  ;;  %v7677_v56 = vshll.u32 %v7628_v5, 16  ;;  %v14421_v22 = vld [vmem:[#allocation3 + $0x2c] sm:$0x1] }
 0x46e   : > { %10515 = vmatpush3.bf16.msra.mxu1 %v14211_v15  ;;  %10502 = vmatprep.mubr.msk.bf16.mxu1 %vm6861_vm3, %v9780_v23  ;;  %v9783_v15 = vcombine.low %v14220_v21, %v14222_v34  ;;  %v11116_v21 = vld [vmem:[#allocation3 + $0x24] sm:$0xff]   ;;  %v7650_v34 = vshrl.u32 %v7625_v33, 16  ;;  %v7655_v63 = vrot.slane %v7653_v0, 5  ;;  %v7687_v42 = vshrl.u32 %v14392_v50, 16 }
 0x46f   : > { %10516 = vmatprep.subr.bf16.mxu1 %v11107_v58  ;;  %v7669_v53 = vshll.u32 %v14400_v57, 16  ;;  %v7676_v32 = vrot.slane %v7674_v2, 4  ;;  %v7711_v59 = vshrl.u32 %v14409_v13, 16  ;;  %v7693_v43 = vshll.u32 %v14411_v26, 16  ;;  %v11122_v2 = vld [vmem:[#allocation3 + $0x60] sm:$0xff]  }
 0x470   : > { %v7652_v27 = vrot.slane %v7650_v34, 4  ;;  %v7689_v40 = vrot.slane %v7687_v42, 4  ;;  %v7731_v33 = vshll.u32 %v14423_v1, 16 }
 0x471   : > { %v7671_v54 = vrot.slane %v7669_v53, 5 }
 0x472   : > { %10517 = vmatpush3.bf16.msra.mxu1 %v11107_v58  ;;  %v7656_v55 = vor.u32 %v7655_v63, %v7652_v27  ;;  %v11121_v58 = vld [vmem:[#allocation3 + $0x54] sm:$0xff]   ;;  %v14449_v42 = vrot.slane %v7731_v33, 5 }
 0x473   : > { %10534 = vmatprep.subr.bf16.mxu1 %v11111_v29 }
 0x474   : > { %v7657_v24 = vrot.slane %v7656_v55, 4 }
 0x475   : > { %10503 = vmatmul.mubr.msk.bf16.gmra.mrb[32].mxu1 %vm6861_vm3, %v9781_v18  ;;  %v7725_v18 = vshll.u32 %v7634_v47, 16 }
 0x476   : > { %10506 = vmatprep.mubr.msk.bf16.mxu1 %vm6861_vm3, %v9782_v25  ;;  %v14427_v25 = vld [vmem:[#allocation3 + $0x40] sm:$0xf] }
 0x477   : > { %v7755_v0 = vshll.u32 %v14427_v25, 16  ;;  %v7727_v27 = vrot.slane %v7725_v18, 5 }
 0x479   : > { %v14453_v55 = vrot.slane %v7755_v0, 5  ;;  %v11124_v0 = vld [vmem:[%s14925_s5 + $0x58] sm:$0xff]  }
 0x47d   : > { %10507 = vmatmul.mubr.msk.bf16.gmra.mrb[36].mxu1 %vm6861_vm3, %v9783_v15 }
 0x47e   : > { %10510 = vmatprep.mubr.msk.bf16.mxu1 %vm6861_vm3, %v9784_v38 }
 0x485   : > { %10511 = vmatmul.mubr.msk.bf16.gmra.mrb[40].mxu1 %vm6861_vm3, %v9785_v11 }
 0x486   : > { %10518 = vmatprep.mubr.msk.bf16.mxu1 %vm6861_vm3, %v9808_v12  ;;  %v7683_v12 = vshll.u32 %v14392_v50, 16 }
 0x488   : > { %v14413_v6 = vrot.slane %v7683_v12, 5 }
 0x48a   : > { %v7690_v45 = vor.u32 %v7689_v40, %v14413_v6 }
 0x48d   : > { %10519 = vmatmul.mubr.msk.bf16.vlgmr.msra.gmra.mrb[28].mxu1 %vm6861_vm3, %v9809_v39  ;;  %v14384_v39 = vld [vmem:[#allocation3 + $0x10] sm:$0xf] }
 0x48e   : > { %10535 = vmatpush3.bf16.msra.mxu1 %v11111_v29  ;;  %10522 = vmatprep.mubr.msk.bf16.mxu1 %vm6861_vm3, %v9810_v37  ;;  %v7659_v3 = vshll.u32 %v14384_v39, 16  ;;  %v7663_v51 = vshrl.u32 %v14384_v39, 16  ;;  %v7631_v37 = vld [vmem:[#allocation3 + $0x24] sm:$0xf]  ;;  %v7722_v29 = vshrl.u32 %v7634_v47, 16 }
 0x48f   : > { %10536 = vmatprep.subr.bf16.mxu1 %v11112_v46  ;;  %v7698_v17 = vshrl.u32 %v7631_v37, 16  ;;  %v7701_v61 = vshll.u32 %v7631_v37, 16 }
 0x490   : > { %v14402_v36 = vrot.slane %v7659_v3, 5  ;;  %v7665_v30 = vrot.slane %v7663_v51, 4  ;;  %v7724_v5 = vrot.slane %v7722_v29, 4 }
 0x491   : > { %v7700_v49 = vrot.slane %v7698_v17, 4 }
 0x492   : > { %10537 = vmatpush3.bf16.msra.mxu1 %v11112_v46  ;;  %v7666_v60 = vor.u32 %v7665_v30, %v14402_v36  ;;  %v7662_v15 = vsel %vm12848_vm14, %v7657_v24, %v14402_v36  ;;  %v7695_v46 = vrot.slane %v7693_v43, 5  ;;  %v14445_v30 = vld [vmem:[#allocation3 + $0x38] sm:$0x1]  ;;  %v7728_v40 = vor.u32 %v7727_v27, %v7724_v5 }
 0x493   : > { %10554 = vmatprep.subr.bf16.mxu1 %v11114_v7  ;;  %v7741_v17 = vshll.u32 %v14445_v30, 16  ;;  %v14460_v43 = vld [vmem:[#allocation3 + $0x58] sm:$0xf] }
 0x494   : > { %v7667_v31 = vrot.slane %v7666_v60, 4 }
 0x495   : > { %10523 = vmatmul.mubr.msk.bf16.gmra.mrb[32].mxu1 %vm6861_vm3, %v9811_v10  ;;  %v7679_v10 = vrot.slane %v7677_v56, 5 }
 0x496   : > { %10526 = vmatprep.mubr.msk.bf16.mxu1 %vm6861_vm3, %v9812_v19  ;;  %v7707_v19 = vshll.u32 %v14409_v13, 16  ;;  %v7672_v38 = vsel %vm12848_vm14, %v7667_v31, %v7671_v54 }
 0x497   : > { %v7680_v23 = vor.u32 %v7679_v10, %v7676_v32  ;;  %v9852_v63 = vcombine.low %v7662_v15, %v7672_v38  ;;  %v7640_v32 = vld [vmem:[#allocation3 + $0x48] sm:$0xf]  ;;  %v7803_v15 = vshll.u32 %v14460_v43, 16  ;;  %v7807_v38 = vshrl.u32 %v14460_v43, 16 }
 0x498   : > { %v14425_v16 = vrot.slane %v7707_v19, 5  ;;  %v7643_v19 = vld [vmem:[#allocation3 + $0x54] sm:$0xf]  ;;  %v7770_v31 = vshrl.u32 %v7640_v32, 16 }
 0x499   : > { %v7681_v11 = vrot.slane %v7680_v23, 4  ;;  %v7773_v23 = vshll.u32 %v7640_v32, 16  ;;  %v7794_v29 = vshrl.u32 %v7643_v19, 16  ;;  %v7797_v18 = vshll.u32 %v7643_v19, 16  ;;  %v14503_v19 = vld [vmem:[%s14925_s5 + $0x60] sm:$0xff]  }
 0x49a   : > { %v7805_v27 = vrot.slane %v7803_v15, 5 }
 0x49b   : > { %v7686_v36 = vsel %vm12848_vm14, %v7681_v11, %v14413_v6  ;;  %v7799_v5 = vrot.slane %v7797_v18, 5 }
 0x49d   : > { %10527 = vmatmul.mubr.msk.bf16.gmra.mrb[36].mxu1 %vm6861_vm3, %v9813_v4  ;;  %v7703_v4 = vrot.slane %v7701_v61, 5  ;;  %v14456_v61 = vld [vmem:[#allocation3 + $0x4c] sm:$0xf] }
 0x49e   : > { %10530 = vmatprep.mubr.msk.bf16.mxu1 %vm6861_vm3, %v9814_v9  ;;  %v7637_v9 = vld [vmem:[#allocation3 + $0x3c] sm:$0xf] }
 0x49f   : > { %v7749_v34 = vshll.u32 %v7637_v9, 16  ;;  %v7704_v3 = vor.u32 %v7703_v4, %v7700_v49 }
 0x4a1   : > { %v7751_v37 = vrot.slane %v7749_v34, 5  ;;  %v7705_v10 = vrot.slane %v7704_v3, 4  ;;  %v7646_v3 = vld [vmem:[#allocation3 + $0x60] sm:$0xf] }
 0x4a3   : > { %v7710_v49 = vsel %vm12848_vm14, %v7705_v10, %v14425_v16  ;;  %v7821_v10 = vshll.u32 %v7646_v3, 16 }
 0x4a5   : > { %10531 = vmatmul.mubr.msk.bf16.gmra.mrb[40].mxu1 %vm6861_vm3, %v9815_v20  ;;  %v7713_v20 = vrot.slane %v7711_v59, 4 }
 0x4a6   : > { %10538 = vmatprep.mubr.msk.bf16.mxu1 %vm6861_vm3, %v11113_v28  ;;  %v7717_v28 = vshll.u32 %v14421_v22, 16 }
 0x4a7   : > { %v7714_v51 = vor.u32 %v7713_v20, %v14425_v16  ;;  %v7743_v20 = vrot.slane %v7741_v17, 5 }
 0x4a8   : > { %v7719_v12 = vrot.slane %v7717_v28, 5  ;;  %v7775_v28 = vrot.slane %v7773_v23, 5 }
 0x4a9   : > { %v7715_v6 = vrot.slane %v7714_v51, 4  ;;  %v7796_v51 = vrot.slane %v7794_v29, 4 }
 0x4ab   : > { %v7720_v4 = vsel %vm12848_vm14, %v7715_v6, %v7719_v12  ;;  %v7800_v17 = vor.u32 %v7799_v5, %v7796_v51  ;;  %v8056_v5 = vrot.slane %v14400_v57, 5  ;;  %v8067_v57 = vrot.slane %v14409_v13, 5 }
 0x4ac   : > { %v9854_v16 = vcombine.low %v7710_v49, %v7720_v4 }
 0x4ad   : > { %10539 = vmatmul.mubr.msk.bf16.vlgmr.msra.gmra.mrb[28].mxu1 %vm6861_vm3, %v11115_v8  ;;  %v7735_v8 = vshrl.u32 %v14423_v1, 16  ;;  %v7801_v49 = vrot.slane %v7800_v17, 4 }
 0x4ae   : > { %10555 = vmatpush3.bf16.msra.mxu1 %v11114_v7  ;;  %10542 = vmatprep.mubr.msk.bf16.mxu1 %vm6861_vm3, %v11116_v21  ;;  %v7691_v7 = vrot.slane %v7690_v45, 4  ;;  %v7746_v21 = vshrl.u32 %v7637_v9, 16  ;;  %v7783_v45 = vshrl.u32 %v14456_v61, 16  ;;  %v7729_v9 = vrot.slane %v7728_v40, 4 }
 0x4af   : > { %10556 = vmatprep.subr.bf16.mxu1 %v11119_v41 }
 0x4b0   : > { %v7696_v56 = vsel %vm12848_vm14, %v7691_v7, %v7695_v46  ;;  %v7748_v53 = vrot.slane %v7746_v21, 4  ;;  %v7772_v7 = vrot.slane %v7770_v31, 4  ;;  %v7785_v34 = vrot.slane %v7783_v45, 4 }
 0x4b1   : > { %v9853_v54 = vcombine.low %v7686_v36, %v7696_v56  ;;  %v14479_v36 = vld [vmem:[#allocation3 + $0x64] sm:$0xf] }
 0x4b2   : > { %10557 = vmatpush3.bf16.msra.mxu1 %v11119_v41  ;;  %v7759_v41 = vshrl.u32 %v14427_v25, 16  ;;  %v7752_v47 = vor.u32 %v7751_v37, %v7748_v53  ;;  %v7776_v12 = vor.u32 %v7775_v28, %v7772_v7  ;;  %v7827_v6 = vshll.u32 %v14479_v36, 16 }
 0x4b3   : > { %10574 = vmatprep.subr.bf16.mxu1 %v14398_v14  ;;  %v7831_v40 = vshrl.u32 %v14479_v36, 16  ;;  %v8053_v28 = vrot.slane %v14384_v39, 5 }
 0x4b4   : > { %v7761_v60 = vrot.slane %v7759_v41, 4  ;;  %v7753_v33 = vrot.slane %v7752_v47, 4  ;;  %v14477_v41 = vld [vmem:[#allocation3 + $0x50] sm:$0x1] }
 0x4b5   : > { %10543 = vmatmul.mubr.msk.bf16.gmra.mrb[32].mxu1 %vm6861_vm3, %v11117_v44  ;;  %v7737_v44 = vrot.slane %v7735_v8, 4  ;;  %v7789_v32 = vshll.u32 %v14477_v41, 16  ;;  %v7833_v45 = vrot.slane %v7831_v40, 4  ;;  %v8055_v51 = vrot.slane %v8053_v28, 4 }
 0x4b6   : > { %10546 = vmatprep.mubr.msk.bf16.mxu1 %vm6861_vm3, %v11118_v62  ;;  %v14451_v62 = vld [vmem:[#allocation3 + $0x44] sm:$0x1]  ;;  %v7758_v53 = vsel %vm12848_vm14, %v7753_v33, %v14453_v55  ;;  %v8019_v33 = vld [vmem:[#allocation3 + $0xc] sm:$0xe]  ;;  %v8069_v40 = vrot.slane %v8067_v57, 4 }
 0x4b7   : > { %v7738_v59 = vor.u32 %v7737_v44, %v14449_v42  ;;  %v7765_v24 = vshll.u32 %v14451_v62, 16  ;;  %v14486_v44 = vld [vmem:[#allocation3 + $0x5c] sm:$0x1]  ;;  %v7791_v23 = vrot.slane %v7789_v32, 5 }
 0x4b9   : > { %v7739_v11 = vrot.slane %v7738_v59, 4  ;;  %v7767_v46 = vrot.slane %v7765_v24, 5  ;;  %v7777_v24 = vrot.slane %v7776_v12, 4  ;;  %v8020_v12 = vld [vmem:[#allocation3 + $0x18] sm:$0xe] }
 0x4ba   : > { %v9871_v32 = vrot.slane %v8020_v12, 9  ;;  %v11130_v12 = vld [vmem:[#allocation3 + $0x30] sm:$0xff]  }
 0x4bb   : > { %v7744_v56 = vsel %vm12848_vm14, %v7739_v11, %v7743_v20  ;;  %v14505_v20 = vld [vmem:[#allocation3 + $0x68] sm:$0x1] }
 0x4bc   : > { %v7837_v11 = vshll.u32 %v14505_v20, 16 }
 0x4bd   : > { %10547 = vmatmul.mubr.msk.bf16.gmra.mrb[36].mxu1 %vm6861_vm3, %v11120_v48  ;;  %v7762_v48 = vor.u32 %v7761_v60, %v14453_v55  ;;  %v7813_v55 = vshll.u32 %v14486_v44, 16 }
 0x4be   : > { %10550 = vmatprep.mubr.msk.bf16.mxu1 %vm6861_vm3, %v11121_v58  ;;  %v7779_v58 = vshll.u32 %v14456_v61, 16 }
 0x4bf   : > { %v7763_v8 = vrot.slane %v7762_v48, 4  ;;  %v7823_v48 = vrot.slane %v7821_v10, 5  ;;  %v8063_v10 = vrot.slane %v14411_v26, 5 }
 0x4c0   : > { %v7781_v21 = vrot.slane %v7779_v58, 5  ;;  %v7829_v58 = vrot.slane %v7827_v6, 5 }
 0x4c1   : > { %v7768_v37 = vsel %vm12848_vm14, %v7763_v8, %v7767_v46  ;;  %v7806_v46 = vsel %vm12848_vm14, %v7801_v49, %v7805_v27  ;;  %v11126_v49 = vld [vmem:[%s14925_s5 + $0x68] sm:$0xff]  }
 0x4c2   : > { %v7786_v60 = vor.u32 %v7785_v34, %v7781_v21  ;;  %v7782_v29 = vsel %vm12848_vm14, %v7777_v24, %v7781_v21 }
 0x4c4   : > { %v7787_v31 = vrot.slane %v7786_v60, 4 }
 0x4c5   : > { %10551 = vmatmul.mubr.msk.bf16.gmra.mrb[40].mxu1 %vm6861_vm3, %v11122_v2  ;;  %v7734_v2 = vsel %vm12848_vm14, %v7729_v9, %v14449_v42  ;;  %v7818_v42 = vshrl.u32 %v7646_v3, 16  ;;  %v7815_v9 = vrot.slane %v7813_v55, 5  ;;  %v9870_v3 = vrot.slane %v8019_v33, 9 }
 0x4c6   : > { %10558 = vmatprep.mubr.msk.bf16.mxu1 %vm6861_vm3, %v9852_v63  ;;  %v7809_v63 = vrot.slane %v7807_v38, 4  ;;  %v9855_v59 = vcombine.low %v7734_v2, %v7744_v56  ;;  %v7792_v18 = vsel %vm12848_vm14, %v7787_v31, %v7791_v23  ;;  %v7834_v38 = vor.u32 %v7833_v45, %v7829_v58 }
 0x4c7   : > { %v7820_v47 = vrot.slane %v7818_v42, 4  ;;  %v9857_v8 = vcombine.low %v7782_v29, %v7792_v18  ;;  %v8054_v2 = vsel %vm12805_vm9, %v9870_v3, %v8053_v28  ;;  %v8057_v56 = vsel %vm12805_vm9, %v8055_v51, %v8056_v5  ;;  %v8024_v29 = vld [vmem:[#allocation3 + $0x48] sm:$0xe]  ;;  %v11128_v18 = vld [vmem:[%s14925_s5 + $0x70] sm:$0xff]  }
 0x4c8   : > { %v9882_v60 = vcombine.low %v8054_v2, %v8057_v56  ;;  %v11127_v2 = vld [vmem:[#allocation3 + $0x18] sm:$0xff]   ;;  %v11129_v56 = vld [vmem:[#allocation3 + $0x24] sm:$0xff]  }
 0x4c9   : > { %v7824_v15 = vor.u32 %v7823_v48, %v7820_v47  ;;  %v8077_v48 = vrot.slane %v14445_v30, 5 }
 0x4cb   : > { %v7825_v34 = vrot.slane %v7824_v15, 4  ;;  %v8025_v15 = vld [vmem:[#allocation3 + $0x54] sm:$0xe] }
 0x4cc   : > { %v9876_v28 = vrot.slane %v8025_v15, 9 }
 0x4cd   : > { %10559 = vmatmul.mubr.msk.bf16.vlgmr.msra.gmra.mrb[28].mxu1 %vm6861_vm3, %v9853_v54  ;;  %v7810_v54 = vor.u32 %v7809_v63, %v7805_v27  ;;  %v7830_v27 = vsel %vm12848_vm14, %v7825_v34, %v7829_v58  ;;  %v8060_v63 = vrot.slane %v14392_v50, 5  ;;  %v8070_v50 = vrot.slane %v14421_v22, 5 }
 0x4ce   : > { %10575 = vmatpush3.bf16.msra.mxu1 %v14398_v14  ;;  %10562 = vmatprep.mubr.msk.bf16.mxu1 %vm6861_vm3, %v9854_v16  ;;  %v9856_v14 = vcombine.low %v7758_v53, %v7768_v37  ;;  %v7835_v16 = vrot.slane %v7834_v38, 4  ;;  %v8021_v53 = vld [vmem:[#allocation3 + $0x24] sm:$0xe]  ;;  %v8081_v22 = vrot.slane %v14427_v25, 5  ;;  %v8102_v34 = vrot.slane %v14479_v36, 5 }
 0x4cf   : > { %10576 = vmatprep.subr.bf16.mxu1 %v11124_v0  ;;  %v7811_v4 = vrot.slane %v7810_v54, 4  ;;  %v8062_v42 = vrot.slane %v8060_v63, 4  ;;  %v9872_v6 = vrot.slane %v8021_v53, 9  ;;  %v8061_v17 = vsel %vm12805_vm9, %v9871_v32, %v8060_v63  ;;  %v11133_v53 = vld [vmem:[%s14925_s5 + $0x78] sm:$0xff]  }
 0x4d0   : > { %v8074_v54 = vrot.slane %v14423_v1, 5  ;;  %v8071_v26 = vsel %vm12805_vm9, %v8069_v40, %v8070_v50  ;;  %v8083_v45 = vrot.slane %v8081_v22, 4  ;;  %v8084_v1 = vrot.slane %v14451_v62, 5  ;;  %v14604_v40 = vld [vmem:[%s14925_s5 + $0x80] sm:$0xff]  }
 0x4d1   : > { %v7816_v7 = vsel %vm12848_vm14, %v7811_v4, %v7815_v9  ;;  %v8064_v13 = vsel %vm12805_vm9, %v8062_v42, %v8063_v10  ;;  %v8068_v55 = vsel %vm12805_vm9, %v9872_v6, %v8067_v57  ;;  %v8088_v4 = vrot.slane %v14456_v61, 5  ;;  %v8496_v57 = vld [vmem:[#allocation3 + $0x18] sm:$0xf] }
 0x4d2   : > { %10577 = vmatpush3.bf16.msra.mxu1 %v11124_v0  ;;  %v9858_v21 = vcombine.low %v7806_v46, %v7816_v7  ;;  %v7839_v0 = vrot.slane %v7837_v11, 5  ;;  %v9883_v24 = vcombine.low %v8061_v17, %v8064_v13  ;;  %v9884_v31 = vcombine.low %v8068_v55, %v8071_v26  ;;  %v11131_v55 = vld [vmem:[#allocation3 + $0x3c] sm:$0xff]  }
 0x4d3   : > { %10594 = vmatprep.subr.bf16.mxu1 %v14503_v19  ;;  %v8076_v47 = vrot.slane %v8074_v54, 4  ;;  %v8085_v9 = vsel %vm12805_vm9, %v8083_v45, %v8084_v1  ;;  %v9875_v46 = vrot.slane %v8024_v29, 9  ;;  %v8090_v7 = vrot.slane %v8088_v4, 4  ;;  %v14615_v1 = vld [vmem:[#allocation3 + $0x34] sm:$0xf] }
 0x4d4   : > { %v7840_v39 = vsel %vm12848_vm14, %v7835_v16, %v7839_v0  ;;  %v8091_v61 = vrot.slane %v14477_v41, 5  ;;  %v8104_v5 = vrot.slane %v8102_v34, 4  ;;  %v8521_v32 = vshrl.u32 %v8496_v57, 16 }
 0x4d5   : > { %10563 = vmatmul.mubr.msk.bf16.gmra.mrb[32].mxu1 %vm6861_vm3, %v9855_v59  ;;  %v9859_v37 = vcombine.low %v7830_v27, %v7840_v39  ;;  %v8022_v59 = vld [vmem:[#allocation3 + $0x30] sm:$0xe]  ;;  %v8078_v30 = vsel %vm12805_vm9, %v8076_v47, %v8077_v48  ;;  %v8105_v27 = vrot.slane %v14505_v20, 5  ;;  %v14590_v20 = vld [vmem:[#allocation3 + $0x1c] sm:$0xf]  ;;  %v8524_v42 = vshll.u32 %v8496_v57, 16 }
 0x4d6   : > { %10566 = vmatprep.mubr.msk.bf16.mxu1 %vm6861_vm3, %v9856_v14  ;;  %v8023_v14 = vld [vmem:[#allocation3 + $0x3c] sm:$0xe]  ;;  %v9873_v23 = vrot.slane %v8022_v59, 9  ;;  %v8530_v10 = vshll.u32 %v14590_v20, 16  ;;  %v8534_v6 = vshrl.u32 %v14590_v20, 16  ;;  %v8523_v26 = vrot.slane %v8521_v32, 4 }
 0x4d7   : > { %v9874_v58 = vrot.slane %v8023_v14, 9  ;;  %v8106_v39 = vsel %vm12805_vm9, %v8104_v5, %v8105_v27  ;;  %v8526_v59 = vrot.slane %v8524_v42, 5  ;;  %v8578_v29 = vshll.u32 %v14615_v1, 16 }
 0x4d8   : > { %v8075_v25 = vsel %vm12805_vm9, %v9873_v23, %v8074_v54  ;;  %v8536_v14 = vrot.slane %v8534_v6, 4  ;;  %v14610_v23 = vld [vmem:[#allocation3 + $0x20] sm:$0x1] }
 0x4d9   : > { %v8082_v62 = vsel %vm12805_vm9, %v9874_v58, %v8081_v22  ;;  %v9885_v38 = vcombine.low %v8075_v25, %v8078_v30  ;;  %v14608_v22 = vrot.slane %v8530_v10, 5 }
 0x4da   : > { %v9886_v11 = vcombine.low %v8082_v62, %v8085_v9  ;;  %v8540_v9 = vshll.u32 %v14610_v23, 16 }
 0x4db   : > { %v8537_v62 = vor.u32 %v8536_v14, %v14608_v22 }
 0x4dd   : > { %10567 = vmatmul.mubr.msk.bf16.gmra.mrb[36].mxu1 %vm6861_vm3, %v9857_v8  ;;  %v8098_v8 = vrot.slane %v14486_v44, 5  ;;  %v8026_v44 = vld [vmem:[#allocation3 + $0x60] sm:$0xe] }
 0x4de   : > { %10570 = vmatprep.mubr.msk.bf16.mxu1 %vm6861_vm3, %v9858_v21  ;;  %v8092_v21 = vsel %vm12805_vm9, %v8090_v7, %v8091_v61  ;;  %v9877_v51 = vrot.slane %v8026_v44, 9 }
 0x4e0   : > { %v8103_v36 = vsel %vm12805_vm9, %v9877_v51, %v8102_v34  ;;  %v8508_v34 = vld [vmem:[#allocation3 + $0x48] sm:$0xf] }
 0x4e1   : > { %v9889_v63 = vcombine.low %v8103_v36, %v8106_v39  ;;  %v14633_v36 = vld [vmem:[#allocation3 + $0x38] sm:$0x1] }
 0x4e2   : > { %v8588_v10 = vshll.u32 %v14633_v36, 16 }
 0x4e5   : > { %10571 = vmatmul.mubr.msk.bf16.gmra.mrb[40].mxu1 %vm6861_vm3, %v9859_v37  ;;  %v8499_v37 = vld [vmem:[#allocation3 + $0x24] sm:$0xf] }
 0x4e6   : > { %10578 = vmatprep.mubr.msk.bf16.mxu1 %vm6861_vm3, %v9882_v60  ;;  %v14595_v60 = vld [vmem:[#allocation3 + $0x28] sm:$0xf]  ;;  %v8545_v50 = vshrl.u32 %v8499_v37, 16  ;;  %v8548_v17 = vshll.u32 %v8499_v37, 16 }
 0x4e7   : > { %v8554_v13 = vshll.u32 %v14595_v60, 16  ;;  %v8558_v54 = vshrl.u32 %v14595_v60, 16 }
 0x4e8   : > { %v8547_v47 = vrot.slane %v8545_v50, 4  ;;  %v8550_v48 = vrot.slane %v8548_v17, 5 }
 0x4e9   : > { %v14613_v58 = vrot.slane %v8554_v13, 5  ;;  %v8560_v45 = vrot.slane %v8558_v54, 4  ;;  %v14653_v54 = vld [vmem:[#allocation3 + $0x44] sm:$0x1] }
 0x4eb   : > { %v8561_v15 = vor.u32 %v8560_v45, %v14613_v58 }
 0x4ed   : > { %10579 = vmatmul.mubr.msk.bf16.vlgmr.msra.gmra.mrb[28].mxu1 %vm6861_vm3, %v9883_v24  ;;  %v8502_v24 = vld [vmem:[#allocation3 + $0x30] sm:$0xf]  ;;  %v8562_v5 = vrot.slane %v8561_v15, 4 }
 0x4ee   : > { %10595 = vmatpush3.bf16.msra.mxu1 %v14503_v19  ;;  %10582 = vmatprep.mubr.msk.bf16.mxu1 %vm6861_vm3, %v9884_v31  ;;  %v8095_v19 = vrot.slane %v14460_v43, 5  ;;  %v8089_v43 = vsel %vm12805_vm9, %v9875_v46, %v8088_v4  ;;  %v11132_v31 = vld [vmem:[#allocation3 + $0x48] sm:$0xff]   ;;  %v8569_v25 = vshrl.u32 %v8502_v24, 16  ;;  %v8572_v30 = vshll.u32 %v8502_v24, 16  ;;  %v11134_v46 = vld [vmem:[#allocation3 + $0x54] sm:$0xff]  }
 0x4ef   : > { %10596 = vmatprep.subr.bf16.mxu1 %v11126_v49  ;;  %v9887_v0 = vcombine.low %v8089_v43, %v8092_v21  ;;  %v8527_v4 = vor.u32 %v8526_v59, %v8523_v26  ;;  %v8538_v43 = vrot.slane %v8537_v62, 4  ;;  %v8542_v21 = vrot.slane %v8540_v9, 5  ;;  %v11136_v26 = vld [vmem:[#allocation3 + $0x6c] sm:$0xff]   ;;  %v14662_v9 = vld [vmem:[#allocation3 + $0x58] sm:$0xf] }
 0x4f0   : > { %v8097_v33 = vrot.slane %v8095_v19, 4  ;;  %v8096_v41 = vsel %vm12805_vm9, %v9876_v28, %v8095_v19  ;;  %v8582_v19 = vshrl.u32 %v14615_v1, 16  ;;  %v8571_v7 = vrot.slane %v8569_v25, 4  ;;  %v14627_v28 = vld [vmem:[#allocation3 + $0x40] sm:$0xf] }
 0x4f1   : > { %v8574_v61 = vrot.slane %v8572_v30, 5  ;;  %v8602_v39 = vshll.u32 %v14627_v28, 16  ;;  %v8511_v25 = vld [vmem:[#allocation3 + $0x54] sm:$0xf]  ;;  %v8590_v30 = vrot.slane %v8588_v10, 5  ;;  %v8612_v62 = vshll.u32 %v14653_v54, 16 }
 0x4f2   : > { %10597 = vmatpush3.bf16.msra.mxu1 %v11126_v49  ;;  %v8099_v16 = vsel %vm12805_vm9, %v8097_v33, %v8098_v8  ;;  %v14617_v49 = vld [vmem:[#allocation3 + $0x2c] sm:$0x1]  ;;  %v11135_v33 = vld [vmem:[#allocation3 + $0x60] sm:$0xff]   ;;  %v8528_v8 = vrot.slane %v8527_v4, 4 }
 0x4f3   : > { %10614 = vmatprep.subr.bf16.mxu1 %v11128_v18  ;;  %v9888_v3 = vcombine.low %v8096_v41, %v8099_v16  ;;  %v14629_v41 = vrot.slane %v8578_v29, 5  ;;  %v8584_v16 = vrot.slane %v8582_v19, 4 }
 0x4f4   : > { %v8533_v57 = vsel %vm12848_vm14, %v8528_v8, %v14608_v22  ;;  %v8654_v8 = vshrl.u32 %v14662_v9, 16 }
 0x4f5   : > { %10583 = vmatmul.mubr.msk.bf16.gmra.mrb[32].mxu1 %vm6861_vm3, %v9885_v38  ;;  %v8564_v38 = vshll.u32 %v14617_v49, 16  ;;  %v8585_v42 = vor.u32 %v8584_v16, %v14629_v41  ;;  %v8614_v16 = vrot.slane %v8612_v62, 5 }
 0x4f6   : > { %10586 = vmatprep.mubr.msk.bf16.mxu1 %vm6861_vm3, %v9886_v11  ;;  %v8505_v11 = vld [vmem:[#allocation3 + $0x3c] sm:$0xf] }
 0x4f7   : > { %v8593_v44 = vshrl.u32 %v8505_v11, 16  ;;  %v8566_v27 = vrot.slane %v8564_v38, 5  ;;  %v8641_v38 = vshrl.u32 %v8511_v25, 16 }
 0x4f9   : > { %v8595_v6 = vrot.slane %v8593_v44, 4  ;;  %v8567_v13 = vsel %vm12848_vm14, %v8562_v5, %v8566_v27 }
 0x4fd   : > { %10587 = vmatmul.mubr.msk.bf16.gmra.mrb[36].mxu1 %vm6861_vm3, %v9887_v0  ;;  %v8596_v0 = vshll.u32 %v8505_v11, 16  ;;  %v8514_v11 = vld [vmem:[#allocation3 + $0x60] sm:$0xf] }
 0x4fe   : > { %10590 = vmatprep.mubr.msk.bf16.mxu1 %vm6861_vm3, %v9888_v3  ;;  %v14631_v3 = vld [vmem:[#allocation3 + $0x4c] sm:$0xf]  ;;  %v8665_v44 = vshrl.u32 %v8514_v11, 16 }
 0x4ff   : > { %v8626_v37 = vshll.u32 %v14631_v3, 16  ;;  %v8630_v32 = vshrl.u32 %v14631_v3, 16  ;;  %v8598_v50 = vrot.slane %v8596_v0, 5  ;;  %v8668_v0 = vshll.u32 %v8514_v11, 16 }
 0x500   : > { %v8667_v10 = vrot.slane %v8665_v44, 4 }
 0x501   : > { %v8632_v45 = vrot.slane %v8630_v32, 4  ;;  %v8599_v4 = vor.u32 %v8598_v50, %v8595_v6  ;;  %v11138_v32 = vld [vmem:[%s14925_s5 + $0x88] sm:$0xff]   ;;  %v8670_v6 = vrot.slane %v8668_v0, 5 }
 0x503   : > { %v8671_v62 = vor.u32 %v8670_v6, %v8667_v10  ;;  %v8927_v10 = vrot.slane %v14610_v23, 5  ;;  %v8938_v23 = vrot.slane %v14615_v1, 5 }
 0x505   : > { %10591 = vmatmul.mubr.msk.bf16.gmra.mrb[40].mxu1 %vm6861_vm3, %v9889_v63  ;;  %v8575_v63 = vor.u32 %v8574_v61, %v8571_v7  ;;  %v8644_v61 = vshll.u32 %v8511_v25, 16 }
 0x506   : > { %10598 = vmatprep.mubr.msk.bf16.mxu1 %vm6861_vm3, %v11127_v2  ;;  %v8606_v2 = vshrl.u32 %v14627_v28, 16 }
 0x507   : > { %v8576_v59 = vrot.slane %v8575_v63, 4 }
 0x508   : > { %v8608_v22 = vrot.slane %v8606_v2, 4  ;;  %v8643_v2 = vrot.slane %v8641_v38, 4 }
 0x50d   : > { %10599 = vmatmul.mubr.msk.bf16.vlgmr.msra.gmra.mrb[28].mxu1 %vm6861_vm3, %v11129_v56  ;;  %v8617_v56 = vshrl.u32 %v8508_v34, 16 }
 0x50e   : > { %10615 = vmatpush3.bf16.msra.mxu1 %v11128_v18  ;;  %10602 = vmatprep.mubr.msk.bf16.mxu1 %vm6861_vm3, %v11130_v12  ;;  %v8551_v18 = vor.u32 %v8550_v48, %v8547_v47  ;;  %v8620_v12 = vshll.u32 %v8508_v34, 16  ;;  %v14657_v47 = vld [vmem:[#allocation3 + $0x50] sm:$0x1]  ;;  %v14659_v48 = vrot.slane %v8626_v37, 5  ;;  %v8600_v34 = vrot.slane %v8599_v4, 4 }
 0x50f   : > { %10616 = vmatprep.subr.bf16.mxu1 %v11133_v53  ;;  %v8619_v14 = vrot.slane %v8617_v56, 4  ;;  %v8636_v15 = vshll.u32 %v14657_v47, 16 }
 0x510   : > { %v8552_v51 = vrot.slane %v8551_v18, 4  ;;  %v8622_v24 = vrot.slane %v8620_v12, 5  ;;  %v8633_v7 = vor.u32 %v8632_v45, %v14659_v48  ;;  %v14680_v12 = vld [vmem:[#allocation3 + $0x5c] sm:$0x1] }
 0x511   : > { %v8638_v63 = vrot.slane %v8636_v15, 5 }
 0x512   : > { %10617 = vmatpush3.bf16.msra.mxu1 %v11133_v53  ;;  %v8543_v53 = vsel %vm12848_vm14, %v8538_v43, %v8542_v21  ;;  %v8557_v17 = vsel %vm12848_vm14, %v8552_v51, %v14613_v58  ;;  %v8586_v58 = vrot.slane %v8585_v42, 4  ;;  %v8623_v18 = vor.u32 %v8622_v24, %v8619_v14  ;;  %v8517_v42 = vld [vmem:[#allocation3 + $0x6c] sm:$0xf]  ;;  %v14693_v14 = vld [vmem:[#allocation3 + $0x68] sm:$0x1] }
 0x513   : > { %10634 = vmatprep.subr.bf16.mxu1 %v14604_v40  ;;  %v9927_v29 = vcombine.low %v8557_v17, %v8567_v13  ;;  %v8581_v43 = vsel %vm12848_vm14, %v8576_v59, %v14629_v41  ;;  %v8634_v56 = vrot.slane %v8633_v7, 4  ;;  %v14685_v13 = vld [vmem:[#allocation3 + $0x70] sm:$0xf] }
 0x514   : > { %v8591_v21 = vsel %vm12848_vm14, %v8586_v58, %v8590_v30  ;;  %v8692_v58 = vshll.u32 %v8517_v42, 16  ;;  %v8698_v30 = vshll.u32 %v14685_v13, 16  ;;  %v8702_v4 = vshrl.u32 %v14685_v13, 16 }
 0x515   : > { %10603 = vmatmul.mubr.msk.bf16.gmra.mrb[32].mxu1 %vm6861_vm3, %v11131_v55  ;;  %v14655_v55 = vrot.slane %v8602_v39, 5  ;;  %v8624_v39 = vrot.slane %v8623_v18, 4  ;;  %v9928_v37 = vcombine.low %v8581_v43, %v8591_v21 }
 0x516   : > { %10606 = vmatprep.mubr.msk.bf16.mxu1 %vm6861_vm3, %v11132_v31  ;;  %v9926_v31 = vcombine.low %v8533_v57, %v8543_v53  ;;  %v8646_v57 = vrot.slane %v8644_v61, 5  ;;  %v8656_v53 = vrot.slane %v8654_v8, 4  ;;  %v8694_v7 = vrot.slane %v8692_v58, 5 }
 0x517   : > { %v8609_v19 = vor.u32 %v8608_v22, %v14655_v55  ;;  %v8660_v22 = vshll.u32 %v14680_v12, 16  ;;  %v8629_v24 = vsel %vm12848_vm14, %v8624_v39, %v14659_v48  ;;  %v8684_v48 = vshll.u32 %v14693_v14, 16 }
 0x518   : > { %v8647_v45 = vor.u32 %v8646_v57, %v8643_v2  ;;  %v8700_v61 = vrot.slane %v8698_v30, 5  ;;  %v8672_v8 = vrot.slane %v8671_v62, 4  ;;  %v8890_v2 = vld [vmem:[#allocation3 + $0x18] sm:$0xe]  ;;  %v8940_v58 = vrot.slane %v8938_v23, 4 }
 0x519   : > { %v8610_v27 = vrot.slane %v8609_v19, 4  ;;  %v8662_v11 = vrot.slane %v8660_v22, 5  ;;  %v8686_v21 = vrot.slane %v8684_v48, 5  ;;  %v8892_v22 = vld [vmem:[#allocation3 + $0x30] sm:$0xe] }
 0x51a   : > { %v8648_v15 = vrot.slane %v8647_v45, 4  ;;  %v9946_v52 = vrot.slane %v8892_v22, 9  ;;  %v8894_v48 = vld [vmem:[#allocation3 + $0x48] sm:$0xe] }
 0x51b   : > { %v8615_v59 = vsel %vm12848_vm14, %v8610_v27, %v8614_v16 }
 0x51c   : > { %v8939_v62 = vsel %vm12805_vm9, %v9946_v52, %v8938_v23 }
 0x51d   : > { %10607 = vmatmul.mubr.msk.bf16.gmra.mrb[36].mxu1 %vm6861_vm3, %v11134_v46  ;;  %v14666_v46 = vld [vmem:[#allocation3 + $0x64] sm:$0xf] }
 0x51e   : > { %10610 = vmatprep.mubr.msk.bf16.mxu1 %vm6861_vm3, %v11135_v33  ;;  %v8650_v33 = vshll.u32 %v14662_v9, 16  ;;  %v8674_v51 = vshll.u32 %v14666_v46, 16  ;;  %v8678_v5 = vshrl.u32 %v14666_v46, 16 }
 0x520   : > { %v8652_v41 = vrot.slane %v8650_v33, 5  ;;  %v8676_v50 = vrot.slane %v8674_v51, 5  ;;  %v8680_v17 = vrot.slane %v8678_v5, 4  ;;  %v8704_v33 = vrot.slane %v8702_v4, 4 }
 0x521   : > { %v8945_v4 = vrot.slane %v14627_v28, 5  ;;  %v8955_v28 = vrot.slane %v14657_v47, 5  ;;  %v8966_v47 = vrot.slane %v14666_v46, 5 }
 0x522   : > { %v8657_v25 = vor.u32 %v8656_v53, %v8652_v41  ;;  %v8653_v16 = vsel %vm12848_vm14, %v8648_v15, %v8652_v41  ;;  %v8705_v51 = vor.u32 %v8704_v33, %v8700_v61  ;;  %v8677_v27 = vsel %vm12848_vm14, %v8672_v8, %v8676_v50 }
 0x523   : > { %v8959_v33 = vrot.slane %v14662_v9, 5  ;;  %v8969_v9 = vrot.slane %v14693_v14, 5 }
 0x524   : > { %v8658_v38 = vrot.slane %v8657_v25, 4  ;;  %v8706_v53 = vrot.slane %v8705_v51, 4 }
 0x525   : > { %10611 = vmatmul.mubr.msk.bf16.gmra.mrb[40].mxu1 %vm6861_vm3, %v11136_v26  ;;  %v8605_v26 = vsel %vm12848_vm14, %v8600_v34, %v14655_v55  ;;  %v8689_v55 = vshrl.u32 %v8517_v42, 16  ;;  %v14706_v34 = vld [vmem:[#allocation3 + $0x74] sm:$0x1]  ;;  %v8961_v51 = vrot.slane %v8959_v33, 4 }
 0x526   : > { %10618 = vmatprep.mubr.msk.bf16.mxu1 %vm6861_vm3, %v9926_v31  ;;  %v8639_v31 = vsel %vm12848_vm14, %v8634_v56, %v8638_v63  ;;  %v9929_v19 = vcombine.low %v8605_v26, %v8615_v59  ;;  %v8663_v44 = vsel %vm12848_vm14, %v8658_v38, %v8662_v11  ;;  %v8708_v5 = vshll.u32 %v14706_v34, 16  ;;  %v8891_v59 = vld [vmem:[#allocation3 + $0x24] sm:$0xe] }
 0x527   : > { %v9930_v18 = vcombine.low %v8629_v24, %v8639_v31  ;;  %v8924_v63 = vrot.slane %v14590_v20, 5  ;;  %v9931_v56 = vcombine.low %v8653_v16, %v8663_v44  ;;  %v9945_v45 = vrot.slane %v8891_v59, 9 }
 0x528   : > { %v8947_v38 = vrot.slane %v8945_v4, 4  ;;  %v8948_v11 = vrot.slane %v14653_v54, 5 }
 0x529   : > { %v8926_v42 = vrot.slane %v8924_v63, 4 }
 0x52b   : > { %v8928_v26 = vsel %vm12805_vm9, %v8926_v42, %v8927_v10 }
 0x52d   : > { %10619 = vmatmul.mubr.msk.bf16.vlgmr.msra.gmra.mrb[28].mxu1 %vm6861_vm3, %v9927_v29  ;;  %v8681_v29 = vor.u32 %v8680_v17, %v8676_v50  ;;  %v8931_v50 = vrot.slane %v14595_v60, 5  ;;  %v8941_v60 = vrot.slane %v14633_v36, 5  ;;  %v8952_v36 = vrot.slane %v14631_v3, 5 }
 0x52e   : > { %10635 = vmatpush3.bf16.msra.mxu1 %v14604_v40  ;;  %10622 = vmatprep.mubr.msk.bf16.mxu1 %vm6861_vm3, %v9928_v37  ;;  %v8691_v40 = vrot.slane %v8689_v55, 4  ;;  %v8710_v37 = vrot.slane %v8708_v5, 5  ;;  %v8934_v55 = vrot.slane %v14617_v49, 5  ;;  %v8949_v3 = vsel %vm12805_vm9, %v8947_v38, %v8948_v11 }
 0x52f   : > { %10636 = vmatprep.subr.bf16.mxu1 %v11138_v32  ;;  %v8682_v43 = vrot.slane %v8681_v29, 4  ;;  %v8933_v25 = vrot.slane %v8931_v50, 4  ;;  %v8932_v30 = vsel %vm12805_vm9, %v9945_v45, %v8931_v50  ;;  %v8942_v49 = vsel %vm12805_vm9, %v8940_v58, %v8941_v60  ;;  %v8893_v29 = vld [vmem:[#allocation3 + $0x3c] sm:$0xe] }
 0x530   : > { %v8695_v0 = vor.u32 %v8694_v7, %v8691_v40  ;;  %v8711_v20 = vsel %vm12848_vm14, %v8706_v53, %v8710_v37  ;;  %v9947_v15 = vrot.slane %v8893_v29, 9  ;;  %v9948_v40 = vrot.slane %v8894_v48, 9 }
 0x531   : > { %v8687_v39 = vsel %vm12848_vm14, %v8682_v43, %v8686_v21  ;;  %v8935_v1 = vsel %vm12805_vm9, %v8933_v25, %v8934_v55  ;;  %v8954_v7 = vrot.slane %v8952_v36, 4  ;;  %v8895_v43 = vld [vmem:[#allocation3 + $0x54] sm:$0xe]  ;;  %v8896_v21 = vld [vmem:[#allocation3 + $0x60] sm:$0xe]  ;;  %v8962_v5 = vrot.slane %v14680_v12, 5 }
 0x532   : > { %10637 = vmatpush3.bf16.msra.mxu1 %v11138_v32  ;;  %v9932_v57 = vcombine.low %v8677_v27, %v8687_v39  ;;  %v8696_v41 = vrot.slane %v8695_v0, 4  ;;  %v9944_v32 = vrot.slane %v8890_v2, 9  ;;  %v8953_v8 = vsel %vm12805_vm9, %v9948_v40, %v8952_v36 }
 0x533   : > { %v8956_v54 = vsel %vm12805_vm9, %v8954_v7, %v8955_v28  ;;  %v9949_v0 = vrot.slane %v8895_v43, 9  ;;  %v9950_v27 = vrot.slane %v8896_v21, 9  ;;  %v8968_v39 = vrot.slane %v8966_v47, 4 }
 0x534   : > { %v8701_v6 = vsel %vm12848_vm14, %v8696_v41, %v8700_v61  ;;  %v8925_v17 = vsel %vm12805_vm9, %v9944_v32, %v8924_v63  ;;  %v8946_v61 = vsel %vm12805_vm9, %v9947_v15, %v8945_v4  ;;  %v9960_v44 = vcombine.low %v8953_v8, %v8956_v54 }
 0x535   : > { %10623 = vmatmul.mubr.msk.bf16.gmra.mrb[32].mxu1 %vm6861_vm3, %v9929_v19  ;;  %v9933_v24 = vcombine.low %v8701_v6, %v8711_v20  ;;  %v9956_v31 = vcombine.low %v8925_v17, %v8928_v26  ;;  %v9957_v19 = vcombine.low %v8932_v30, %v8935_v1  ;;  %v9959_v16 = vcombine.low %v8946_v61, %v8949_v3  ;;  %v14785_v6 = vld [vmem:[%s14926_s6] ss:$0 sm:$0xff] }
 0x536   : > { %10626 = vmatprep.mubr.msk.bf16.mxu1 %vm6861_vm3, %v9930_v18  ;;  %v9958_v18 = vcombine.low %v8939_v62, %v8942_v49  ;;  %v8960_v63 = vsel %vm12805_vm9, %v9949_v0, %v8959_v33  ;;  %v8963_v46 = vsel %vm12805_vm9, %v8961_v51, %v8962_v5  ;;  %v8973_v2 = vrot.slane %v14685_v13, 5  ;;  %v14790_v20 = vld [vmem:[%s14927_s7] ss:$0 sm:$0xff] }
 0x537   : > { %v8970_v12 = vsel %vm12805_vm9, %v8968_v39, %v8969_v9  ;;  %v9961_v14 = vcombine.low %v8960_v63, %v8963_v46  ;;  %v8976_v32 = vrot.slane %v14706_v34, 5 }
 0x538   : > { %v8975_v37 = vrot.slane %v8973_v2, 4 }
 0x53a   : > { %v8977_v42 = vsel %vm12805_vm9, %v8975_v37, %v8976_v32 }
 0x53d   : > { %10627 = vmatmul.mubr.msk.bf16.gmra.mrb[36].mxu1 %vm6861_vm3, %v9931_v56  ;;  %v8967_v56 = vsel %vm12805_vm9, %v9950_v27, %v8966_v47 }
 0x53e   : > { %10630 = vmatprep.mubr.msk.bf16.mxu1 %vm6861_vm3, %v9932_v57  ;;  %v8897_v57 = vld [vmem:[#allocation3 + $0x6c] sm:$0xe]  ;;  %v9962_v41 = vcombine.low %v8967_v56, %v8970_v12 }
 0x53f   : > { %v9951_v53 = vrot.slane %v8897_v57, 9 }
 0x541   : > { %v8974_v13 = vsel %vm12805_vm9, %v9951_v53, %v8973_v2 }
 0x542   : > { %v9963_v10 = vcombine.low %v8974_v13, %v8977_v42 }
 0x545   : > { %10631 = vmatmul.mubr.msk.bf16.gmra.mrb[40].mxu1 %vm6861_vm3, %v9933_v24 }
 0x546   : > { %10638 = vmatprep.mubr.msk.bf16.mxu1 %vm6861_vm3, %v9956_v31 }
 0x54d   : > { %10639 = vmatmul.mubr.msk.bf16.vlgmr.msra.gmra.mrb[28].mxu1 %vm6861_vm3, %v9957_v19 }
 0x54e   : > { %10642 = vmatprep.mubr.msk.bf16.mxu1 %vm6861_vm3, %v9958_v18 }
 0x555   : > { %10643 = vmatmul.mubr.msk.bf16.gmra.mrb[32].mxu1 %vm6861_vm3, %v9959_v16 }
 0x556   : > { %10646 = vmatprep.mubr.msk.bf16.mxu1 %vm6861_vm3, %v9960_v44 }
 0x55d   : > { %10647 = vmatmul.mubr.msk.bf16.gmra.mrb[36].mxu1 %vm6861_vm3, %v9961_v14 }
 0x55e   : > { %10650 = vmatprep.mubr.msk.bf16.mxu1 %vm6861_vm3, %v9962_v41 }
 0x565   : > { %10651 = vmatmul.mubr.msk.bf16.gmra.mrb[40].mxu1 %vm6861_vm3, %v9963_v10 }
 0x620   : > { %v10640_v34 = vpop.f32.mrb[28].mxu1 }
 0x621   : > { %v9165_v50 = vmul.f32 %v10640_v34, %v14785_v6  ;;  %v9077_v35 = vpop.f32.mrb[29].mxu1 }
 0x622   : > { %v9163_v17 = vmul.f32 %v14785_v6, %v9077_v35  ;;  %v10641_v26 = vpop.f32.mrb[30].mxu1 }
 0x623   : > { %v9188_v59 = vadd.f32 %v14790_v20, %v9165_v50  ;;  %v9166_v23 = vmul.f32 %v10641_v26, %v14785_v6  ;;  %v9080_v22 = vpop.f32.mrb[31].mxu1 }
 0x624   : > { %v9186_v24 = vadd.f32 %v14790_v20, %v9163_v17  ;;  %v9164_v31 = vmul.f32 %v14785_v6, %v9080_v22 }
 0x625   : > { %v9204_v45 = vmax.f32 %v9188_v59, 0.0  ;;  %v9189_v25 = vadd.f32 %v14790_v20, %v9166_v23 }
 0x626   : > { %v9202_v55 = vmax.f32 %v9186_v24, 0.0  ;;  %v9187_v52 = vadd.f32 %v14790_v20, %v9164_v31 }
 0x627   : > { %9220 = vst.msk [vmem:[%s14116_s15 + $0x10] sm:$0xff] %vm6861_vm3, %v9204_v45  ;;  %v9205_v58 = vmax.f32 %v9189_v25, 0.0 }
 0x628   : > { %9218 = vst.msk [vmem:[%s14116_s15] sm:$0xff] %vm6861_vm3, %v9202_v55  ;;  %v9203_v60 = vmax.f32 %v9187_v52, 0.0  ;;  %v10644_v30 = vpop.f32.mrb[32].mxu1 }
 0x629   : > { %9221 = vst.msk [vmem:[%s14116_s15 + $0x18] sm:$0xff] %vm6861_vm3, %v9205_v58  ;;  %v9169_v1 = vmul.f32 %v10644_v30, %v14785_v6  ;;  %v9093_v4 = vpop.f32.mrb[33].mxu1 }
 0x62a   : > { %9219 = vst.msk [vmem:[%s14116_s15 + $0x8] sm:$0xff] %vm6861_vm3, %v9203_v60  ;;  %v9167_v62 = vmul.f32 %v14785_v6, %v9093_v4  ;;  %v10645_v49 = vpop.f32.mrb[34].mxu1 }
 0x62b   : > { %v9192_v29 = vadd.f32 %v14790_v20, %v9169_v1  ;;  %v9170_v36 = vmul.f32 %v10645_v49, %v14785_v6  ;;  %v9096_v48 = vpop.f32.mrb[35].mxu1 }
 0x62c   : > { %v9190_v19 = vadd.f32 %v14790_v20, %v9167_v62  ;;  %v9168_v18 = vmul.f32 %v14785_v6, %v9096_v48 }
 0x62d   : > { %v9208_v15 = vmax.f32 %v9192_v29, 0.0  ;;  %v9193_v38 = vadd.f32 %v14790_v20, %v9170_v36 }
 0x62e   : > { %v9206_v11 = vmax.f32 %v9190_v19, 0.0  ;;  %v9191_v40 = vadd.f32 %v14790_v20, %v9168_v18 }
 0x62f   : > { %9224 = vst.msk [vmem:[%s14116_s15 + $0x30] sm:$0xff] %vm6861_vm3, %v9208_v15  ;;  %v9209_v7 = vmax.f32 %v9193_v38, 0.0 }
 0x630   : > { %9222 = vst.msk [vmem:[%s14116_s15 + $0x20] sm:$0xff] %vm6861_vm3, %v9206_v11  ;;  %v9207_v28 = vmax.f32 %v9191_v40, 0.0  ;;  %v10648_v61 = vpop.f32.mrb[36].mxu1 }
 0x631   : > { %9225 = vst.msk [vmem:[%s14116_s15 + $0x38] sm:$0xff] %vm6861_vm3, %v9209_v7  ;;  %v9173_v3 = vmul.f32 %v10648_v61, %v14785_v6  ;;  %v9109_v33 = vpop.f32.mrb[37].mxu1 }
 0x632   : > { %9223 = vst.msk [vmem:[%s14116_s15 + $0x28] sm:$0xff] %vm6861_vm3, %v9207_v28  ;;  %v9171_v8 = vmul.f32 %v14785_v6, %v9109_v33  ;;  %v10649_v54 = vpop.f32.mrb[38].mxu1 }
 0x633   : > { %v9196_v43 = vadd.f32 %v14790_v20, %v9173_v3  ;;  %v9174_v47 = vmul.f32 %v10649_v54, %v14785_v6  ;;  %v9112_v21 = vpop.f32.mrb[39].mxu1 }
 0x634   : > { %v9194_v16 = vadd.f32 %v14790_v20, %v9171_v8  ;;  %v9172_v44 = vmul.f32 %v14785_v6, %v9112_v21 }
 0x635   : > { %v9212_v0 = vmax.f32 %v9196_v43, 0.0  ;;  %v9197_v51 = vadd.f32 %v14790_v20, %v9174_v47 }
 0x636   : > { %v9210_v5 = vmax.f32 %v9194_v16, 0.0  ;;  %v9195_v27 = vadd.f32 %v14790_v20, %v9172_v44 }
 0x637   : > { %9228 = vst.msk [vmem:[%s14116_s15 + $0x50] sm:$0xff] %vm6861_vm3, %v9212_v0  ;;  %v9213_v39 = vmax.f32 %v9197_v51, 0.0 }
 0x638   : > { %9226 = vst.msk [vmem:[%s14116_s15 + $0x40] sm:$0xff] %vm6861_vm3, %v9210_v5  ;;  %v9211_v9 = vmax.f32 %v9195_v27, 0.0  ;;  %v10652_v63 = vpop.f32.mrb[40].mxu1 }
 0x639   : > { %9229 = vst.msk [vmem:[%s14116_s15 + $0x58] sm:$0xff] %vm6861_vm3, %v9213_v39  ;;  %v9177_v46 = vmul.f32 %v10652_v63, %v14785_v6  ;;  %v9125_v2 = vpop.f32.mrb[41].mxu1 }
 0x63a   : > { %9227 = vst.msk [vmem:[%s14116_s15 + $0x48] sm:$0xff] %vm6861_vm3, %v9211_v9  ;;  %v9175_v56 = vmul.f32 %v14785_v6, %v9125_v2  ;;  %v10653_v12 = vpop.f32.mrb[42].mxu1 }
 0x63b   : > { %v9200_v57 = vadd.f32 %v14790_v20, %v9177_v46  ;;  %v9178_v14 = vmul.f32 %v10653_v12, %v14785_v6  ;;  %v9128_v41 = vpop.f32.mrb[43].mxu1 }
 0x63c   : > { %v9198_v53 = vadd.f32 %v14790_v20, %v9175_v56  ;;  %v9176_v37 = vmul.f32 %v14785_v6, %v9128_v41 }
 0x63d   : > { %v9216_v32 = vmax.f32 %v9200_v57, 0.0  ;;  %v9201_v13 = vadd.f32 %v14790_v20, %v9178_v14 }
 0x63e   : > { %v9214_v42 = vmax.f32 %v9198_v53, 0.0  ;;  %v9199_v10 = vadd.f32 %v14790_v20, %v9176_v37 }
 0x63f   : > { %9232 = vst.msk [vmem:[%s14116_s15 + $0x70] sm:$0xff] %vm6861_vm3, %v9216_v32  ;;  %v9217_v34 = vmax.f32 %v9201_v13, 0.0 }
 0x640   : > { %9230 = vst.msk [vmem:[%s14116_s15 + $0x60] sm:$0xff] %vm6861_vm3, %v9214_v42  ;;  %v9215_v6 = vmax.f32 %v9199_v10, 0.0 }
 0x641   : > { %9233 = vst.msk [vmem:[%s14116_s15 + $0x78] sm:$0xff] %vm6861_vm3, %v9217_v34 }
 0x642   : > { %9231 = vst.msk [vmem:[%s14116_s15 + $0x68] sm:$0xff] %vm6861_vm3, %v9215_v6 }
 0x643   : > { %11152 = shalt.err (!%p11149_p10)
}
 0x644   : > { %s11153_s15 = scalar_lea.hbm %s14856_s14, 2048  ;;  %s11157_s26 = scalar_lea.hbm %s14928_s8, 8192 }
 0x645   : > { %p11154_p11 = scmp.ne.s32.totalorder %s14856_s14, %s11153_s15  ;;  %p11158_p0 = scmp.lt.u32.totalorder %s14856_s14, %s14928_s8 }
 0x646   : > { %p11159_p1 = scmp.lt.u32.totalorder %s11157_s26, %s11153_s15  ;;  %p11161_p4 = scmp.lt.u32.totalorder %s11153_s15, %s14856_s14 }
 0x647   : > { %p11155_p12 = pnand %p11154_p11, %p11340_p3 }
 0x648   : > { %p11160_p2 = por %p11159_p1, %p11158_p0 }
 0x649   : > { %p11156_p13 = pneg %p11155_p12 }
 0x64a   : > { %p11162_p5 = por %p11161_p4, %p11160_p2 }
 0x64c   : > { %p11163_p6 = pnand %p11162_p5, %p11156_p13 }
 0x64e   : > { %11166 = shalt.err (!%p11163_p6)
}
 0x64f   : > { %s11242_s21 = smov 128   ;;  %s11243_s22 = smov 8  }
 0x650   : > { %10942 = dma.vmem_to_hbm [thread:$0]  (%p11340_p3), %s14858_s9, 2048, %s14856_s14, %s14868_s20, %s11242_s21, %s11242_s21, %s11243_s22  }
 0x651 PF: > { %p10948_p7 = scmp.ge.s32.totalorder %s11233_s12, 2  ;;  %s9266_s25 = sand.u32 1, %s11205_s27  }
 0x652   : > { %s9267_s16 = scalar_lea.sflag [#allocation5], %s9266_s25 }
 0x653   : > { %p10945_p9 = pnand %p10948_p7, %p11349_p8 }
 0x655   : > { %11200 = dma.done.wait (!%p10945_p9), %s9267_s16, 2048  }
 0x656   : > { %11202 = vsyncadd (!%p10945_p9), %s9267_s16, 4294965248  ;;  %s21_s12 = sadd.s32 1, %s11233_s12   ;;  %s15146_s18 = sld [smem:[#allocation7_spill]] }
 0x657   : > { %p18_p10 = scmp.ge.s32.totalorder %s21_s12, 6   ;;  %s15147_s14 = sld [smem:[#allocation8_spill]] }
 0x658   : > { %s15148_s27 = smov %s11209_s28  ;;  %s15149_s28 = smov %s11213_s29 }
 0x659   : > { %s15150_s29 = smov %s11358_s23  ;;  %s15151_s30 = smov %s11225_s10 }
 0x65a   : > { %s15152_s9 = smov %s11229_s11  ;;  %20 = sbr.rel (!%p18_p10) target bundleno = 5 (0x5), region = 119 }
 0x65c   : > { %s15153_s10 = smov %s15146_s18 }
 0x65d   : > { %s15154_s11 = smov %s15147_s14 }
 0x661   :  { %9272 = vsyncpa [#allocation5], 1 }
 0x662   :  { %9274 = vsyncpa [#allocation5 + $0x1], 1 }

</bundles_post_ra>
